<compile_context>
chip_gen: v7x
topology: tpu7x:2x2x1
jax: 0.10.0
libtpu: 0.0.40
codegen_flags: <defaults>
</compile_context>

<pallas_src>
import jax
import jax.numpy as jnp
from jax.experimental import pallas as pl
from jax.experimental.pallas import tpu as pltpu

EPS = 1e-5
K, S, P = 4, 2, 1      # conv kernel / stride / padding
TN = 256               # Cout tile width (multiple of 128)


# --------------------------- static conv geometry --------------------------- #

def _kept_positions(h, w):
    """Kernel positions (kh, kw) whose im2col column is NOT structurally zero
    for conv(K=4, S=2, P=1) on an (h, w) input, plus the output spatial size.
    A column is nonzero iff some output row samples a real (non-padding) input
    row AND some output col samples a real input col.  For the final 2x2->1x1
    layer this prunes 12 of the 16 positions (exact)."""
    ho = (h + 2 * P - K) // S + 1
    wo = (w + 2 * P - K) // S + 1
    kept = []
    for i in range(K):
        row_real = any(P <= i + S * oh < h + P for oh in range(ho))
        for j in range(K):
            col_real = any(P <= j + S * ow < w + P for ow in range(wo))
            if row_real and col_real:
                kept.append((i, j))
    return kept, ho, wo


# ----------------------------- Pallas kernels ------------------------------ #

def _conv_relu_kernel(p_ref, w_ref, b_ref, o_ref):
    # p_ref: (M, Ktot) f32   w_ref: (Ktot, TN) bf16   b_ref: (1, TN) f32
    p = p_ref[...].astype(jnp.bfloat16)                      # VPU cast, free vs DMA
    conv = jnp.dot(p, w_ref[...], preferred_element_type=jnp.float32)
    o_ref[...] = jnp.maximum(conv + b_ref[...], 0.0)


def _conv_bn_relu_kernel(p_ref, w_ref, g_ref, be_ref, o_ref):
    # Fused conv (as matmul, bf16 in / f32 acc) + BatchNorm (training-mode batch
    # stats over the M = N*Ho*Wo axis, biased variance) + ReLU.  BN stats are
    # per-channel, so tiling Cout is exact.  Conv bias is omitted: it is
    # cancelled exactly by the mean subtraction.
    p = p_ref[...].astype(jnp.bfloat16)
    conv = jnp.dot(p, w_ref[...], preferred_element_type=jnp.float32)
    mean = jnp.mean(conv, axis=0, keepdims=True)
    centered = conv - mean
    var = jnp.mean(centered * centered, axis=0, keepdims=True)
    o_ref[...] = jnp.maximum(
        centered * jax.lax.rsqrt(var + EPS) * g_ref[...] + be_ref[...], 0.0)


def _pallas_layer(kernel, patches, w_flat, *chan_args):
    """Run one layer, tiled over Cout. patches: (M, Ktot) f32; w_flat:
    (Ktot, Cout) bf16; chan_args: per-channel (1, Cout) f32 arrays."""
    m, ktot = patches.shape
    cout = w_flat.shape[1]
    tn = cout if cout <= TN else TN
    assert cout % tn == 0, (cout, tn)
    n_tiles = cout // tn

    in_specs = [
        pl.BlockSpec((m, ktot), lambda j: (0, 0)),     # patches resident across tiles
        pl.BlockSpec((ktot, tn), lambda j: (0, j)),    # streamed (double-buffered) weight tile
    ] + [pl.BlockSpec((1, tn), lambda j: (0, j)) for _ in chan_args]

    return pl.pallas_call(
        kernel,
        out_shape=jax.ShapeDtypeStruct((m, cout), jnp.float32),
        grid=(n_tiles,),
        in_specs=in_specs,
        out_specs=pl.BlockSpec((m, tn), lambda j: (0, j)),
        compiler_params=pltpu.CompilerParams(
            dimension_semantics=("parallel",),         # megacore-shard Cout tiles on v7x
            vmem_limit_bytes=32 << 20),                # safe on v5e/v6e (128 MiB) and v7x (64 MiB)
    )(patches, w_flat, *chan_args)


# ------------------------------- JAX glue ---------------------------------- #

def _im2col(x_nhwc):
    """x: (N, H, W, C) -> patches (N*Ho*Wo, n_kept*C) in (kept-position, cin)
    order, skipping kernel positions whose column is structurally zero."""
    n, h, w, c = x_nhwc.shape
    kept, ho, wo = _kept_positions(h, w)
    xp = jnp.pad(x_nhwc, ((0, 0), (P, P), (P, P), (0, 0)))
    cols = [xp[:, i:i + S * (ho - 1) + 1:S, j:j + S * (wo - 1) + 1:S, :]
            for (i, j) in kept]
    patches = jnp.stack(cols, axis=3)                 # (N, Ho, Wo, n_kept, C)
    return patches.reshape(n * ho * wo, len(kept) * c), (n, ho, wo)


def conv_block(x_nhwc, w_flat, bias=None, gamma=None, beta=None):
    """One [conv2d(4,2,1) (+ BN) + ReLU] block. w_flat is (n_kept*Cin, Cout) bf16."""
    cout = w_flat.shape[1]
    patches, (n, ho, wo) = _im2col(x_nhwc)
    assert patches.shape[1] == w_flat.shape[0], (patches.shape, w_flat.shape)
    if gamma is None:
        out = _pallas_layer(_conv_relu_kernel, patches, w_flat,
                            bias.reshape(1, cout))
    else:
        out = _pallas_layer(_conv_bn_relu_kernel, patches, w_flat,
                            gamma.reshape(1, cout), beta.reshape(1, cout))
    return out.reshape(n, ho, wo, cout)


def init_params(key, in_channels=1, input_hw=(16, 16)):
    """Deterministic init mirroring PyTorch Conv2d default (uniform +/- 1/sqrt(fan_in)).
    Weights are pre-transposed / pre-flattened / pruned / cast to bf16 ONCE here."""
    chans = [(in_channels, 128), (128, 256), (256, 512), (512, 1024)]
    h, w = input_hw
    params = []
    for li, (cin, cout) in enumerate(chans):
        kept, ho, wo = _kept_positions(h, w)
        key, kw_key, kb_key = jax.random.split(key, 3)
        fan_in = cin * K * K
        bound = 1.0 / (fan_in ** 0.5)
        wgt = jax.random.uniform(kw_key, (cout, cin, K, K), jnp.float32, -bound, bound)
        # (Cout, Cin, kH, kW) -> (kH, kW, Cin, Cout); keep only non-zero im2col
        # positions (matches the (kept-position, cin) flattening of _im2col),
        # then flatten and cast to bf16 (halves weight HBM traffic, f32 acc).
        w_t = jnp.transpose(wgt, (2, 3, 1, 0))
        w_sel = jnp.stack([w_t[i, j] for (i, j) in kept], axis=0)   # (n_kept, Cin, Cout)
        w_flat = w_sel.reshape(len(kept) * cin, cout).astype(jnp.bfloat16)
        if li == 0:
            b = jax.random.uniform(kb_key, (cout,), jnp.float32, -bound, bound)
            params.append({"w": w_flat, "b": b})
        else:
            # Conv bias before training-mode BN is mathematically cancelled by
            # the mean subtraction, so it is dropped entirely (exact no-op).
            params.append({"w": w_flat,
                           "gamma": jnp.ones((cout,), jnp.float32),
                           "beta": jnp.zeros((cout,), jnp.float32)})
        h, w = ho, wo
    return params


@jax.jit
def g_encode_forward(x_nchw, params):
    # TODO(synk): BatchNorm running-stat tracking (momentum update) is a training
    # side effect and is not reproduced; normalization uses batch stats exactly
    # as nn.BatchNorm2d does in its default (training) forward.
    # TODO(synk): cross-call prefetch of the layer-2/3 weight slabs (semaphore +
    # VMEM-ref futures) or full 4-layer fusion would hide the remaining DMA
    # behind the early layers; left as follow-up.
    h = jnp.transpose(x_nchw, (0, 2, 3, 1))                    # NCHW -> NHWC
    p0 = params[0]
    h = conv_block(h, p0["w"], bias=p0["b"])                   # conv + relu
    for p in params[1:]:
        h = conv_block(h, p["w"], gamma=p["gamma"], beta=p["beta"])  # conv+bn+relu
    return jnp.transpose(h, (0, 3, 1, 2))                      # NHWC -> NCHW


if __name__ == "__main__":
    key = jax.random.PRNGKey(0)
    kx, kp = jax.random.split(key)
    # G_encode(out_channels=1): input has 1 channel; 16x16 -> four stride-2 convs -> 1x1.
    x = jax.random.normal(kx, (2, 1, 16, 16), jnp.float32)
    params = init_params(kp, in_channels=1, input_hw=(16, 16))

    out = g_encode_forward(x, params)
    out = jax.block_until_ready(out)
    assert out.shape == (2, 1024, 1, 1), out.shape
    assert out.dtype == jnp.float32
    print("KERNEL_OK")
</pallas_src>

<mosaic_0001>
module attributes {stable_mosaic.version = 11 : i64} {
  func.func @_conv_relu_kernel(%arg0: i32, %arg1: memref<128x16xf32, #tpu.memory_space<vmem>>, %arg2: memref<16x128xbf16, #tpu.memory_space<vmem>>, %arg3: memref<1x128xf32, #tpu.memory_space<vmem>>, %arg4: memref<128x128xf32, #tpu.memory_space<vmem>>) attributes {dimension_semantics = [#tpu.dimension_semantics<parallel>], iteration_bounds = array<i64: 1>, scalar_prefetch = 0 : i64, scratch_operands = 0 : i64, tpu.core_type = #tpu.core_type<tc>, window_params = [{pipeline_mode = #tpu.pipeline_mode<synchronous>, transform_indices = @transform_0, window_bounds = array<i64: 128, 16>}, {transform_indices = @transform_1, window_bounds = array<i64: 16, 128>}, {transform_indices = @transform_2, window_bounds = array<i64: 1, 128>}, {transform_indices = @transform_3, window_bounds = array<i64: 128, 128>}]} {
    %c0 = arith.constant 0 : index
    %c0_0 = arith.constant 0 : index
    %0 = vector.load %arg1[%c0, %c0_0] : memref<128x16xf32, #tpu.memory_space<vmem>>, vector<128x16xf32>
    %1 = arith.truncf %0 : vector<128x16xf32> to vector<128x16xbf16>
    %c0_1 = arith.constant 0 : index
    %c0_2 = arith.constant 0 : index
    %2 = vector.load %arg2[%c0_1, %c0_2] : memref<16x128xbf16, #tpu.memory_space<vmem>>, vector<16x128xbf16>
    %cst = arith.constant dense<0.000000e+00> : vector<128x128xf32>
    %3 = tpu.matmul %1, %2, %cst {dimension_numbers = #tpu.dot_dimension_numbers<[1], [0], [0], [1], [0, 0, 1, 1], [], []>} : vector<128x16xbf16>, vector<16x128xbf16>, vector<128x128xf32> -> vector<128x128xf32>
    %c0_3 = arith.constant 0 : index
    %c0_4 = arith.constant 0 : index
    %4 = vector.load %arg3[%c0_3, %c0_4] : memref<1x128xf32, #tpu.memory_space<vmem>>, vector<1x128xf32>
    %5 = vector.broadcast %4 : vector<1x128xf32> to vector<128x128xf32>
    %6 = arith.addf %3, %5 : vector<128x128xf32>
    %cst_5 = arith.constant 0.000000e+00 : f32
    %7 = vector.broadcast %cst_5 : f32 to vector<128x128xf32>
    %8 = arith.maximumf %6, %7 : vector<128x128xf32>
    %c0_6 = arith.constant 0 : index
    %c0_7 = arith.constant 0 : index
    %9 = vector.load %arg4[%c0_6, %c0_7] : memref<128x128xf32, #tpu.memory_space<vmem>>, vector<128x128xf32>
    tpu.vector_store %arg4[%c0_6, %c0_7], %8 {strides = array<i32>} : memref<128x128xf32, #tpu.memory_space<vmem>>, vector<128x128xf32>,
    return
  }
  func.func @transform_0(%arg0: i32) -> (i32, i32) {
    %c0_i32 = arith.constant 0 : i32
    %c0_i32_0 = arith.constant 0 : i32
    %c0_i32_1 = arith.constant 0 : i32
    return %c0_i32, %c0_i32_0 : i32, i32
  }
  func.func @transform_1(%arg0: i32) -> (i32, i32) {
    %c0_i32 = arith.constant 0 : i32
    %c0_i32_0 = arith.constant 0 : i32
    return %c0_i32, %arg0 : i32, i32
  }
  func.func @transform_2(%arg0: i32) -> (i32, i32) {
    %c0_i32 = arith.constant 0 : i32
    %c0_i32_0 = arith.constant 0 : i32
    return %c0_i32, %arg0 : i32, i32
  }
  func.func @transform_3(%arg0: i32) -> (i32, i32) {
    %c0_i32 = arith.constant 0 : i32
    %c0_i32_0 = arith.constant 0 : i32
    return %c0_i32, %arg0 : i32, i32
  }
}

module attributes {stable_mosaic.version = 11 : i64} {
  func.func @_conv_bn_relu_kernel(%arg0: i32, %arg1: memref<32x2048xf32, #tpu.memory_space<vmem>>, %arg2: memref<2048x256xbf16, #tpu.memory_space<vmem>>, %arg3: memref<1x256xf32, #tpu.memory_space<vmem>>, %arg4: memref<1x256xf32, #tpu.memory_space<vmem>>, %arg5: memref<32x256xf32, #tpu.memory_space<vmem>>) attributes {dimension_semantics = [#tpu.dimension_semantics<parallel>], iteration_bounds = array<i64: 1>, scalar_prefetch = 0 : i64, scratch_operands = 0 : i64, tpu.core_type = #tpu.core_type<tc>, window_params = [{pipeline_mode = #tpu.pipeline_mode<synchronous>, transform_indices = @transform_0, window_bounds = array<i64: 32, 2048>}, {transform_indices = @transform_1, window_bounds = array<i64: 2048, 256>}, {transform_indices = @transform_2, window_bounds = array<i64: 1, 256>}, {transform_indices = @transform_3, window_bounds = array<i64: 1, 256>}, {transform_indices = @transform_4, window_bounds = array<i64: 32, 256>}]} {
    %c0 = arith.constant 0 : index
    %c0_0 = arith.constant 0 : index
    %0 = vector.load %arg1[%c0, %c0_0] : memref<32x2048xf32, #tpu.memory_space<vmem>>, vector<32x2048xf32>
    %1 = arith.truncf %0 : vector<32x2048xf32> to vector<32x2048xbf16>
    %c0_1 = arith.constant 0 : index
    %c0_2 = arith.constant 0 : index
    %2 = vector.load %arg2[%c0_1, %c0_2] : memref<2048x256xbf16, #tpu.memory_space<vmem>>, vector<2048x256xbf16>
    %cst = arith.constant dense<0.000000e+00> : vector<32x256xf32>
    %3 = tpu.matmul %1, %2, %cst {dimension_numbers = #tpu.dot_dimension_numbers<[1], [0], [0], [1], [0, 0, 1, 1], [], []>} : vector<32x2048xbf16>, vector<2048x256xbf16>, vector<32x256xf32> -> vector<32x256xf32>
    %cst_3 = arith.constant dense<0.000000e+00> : vector<256xf32>
    %4 = vector.multi_reduction <add>, %3, %cst_3 [0] : vector<32x256xf32> to vector<256xf32>
    %5 = vector.shape_cast %4 : vector<256xf32> to vector<1x256xf32>
    %cst_4 = arith.constant 3.200000e+01 : f32
    %6 = vector.broadcast %cst_4 : f32 to vector<1x256xf32>
    %7 = arith.divf %5, %6 : vector<1x256xf32>
    %8 = vector.broadcast %7 : vector<1x256xf32> to vector<32x256xf32>
    %9 = arith.subf %3, %8 : vector<32x256xf32>
    %10 = arith.mulf %9, %9 : vector<32x256xf32>
    %cst_5 = arith.constant dense<0.000000e+00> : vector<256xf32>
    %11 = vector.multi_reduction <add>, %10, %cst_5 [0] : vector<32x256xf32> to vector<256xf32>
    %12 = vector.shape_cast %11 : vector<256xf32> to vector<1x256xf32>
    %cst_6 = arith.constant 3.200000e+01 : f32
    %13 = vector.broadcast %cst_6 : f32 to vector<1x256xf32>
    %14 = arith.divf %12, %13 : vector<1x256xf32>
    %cst_7 = arith.constant 9.99999974E-6 : f32
    %15 = vector.broadcast %cst_7 : f32 to vector<1x256xf32>
    %16 = arith.addf %14, %15 : vector<1x256xf32>
    %17 = math.rsqrt %16 : vector<1x256xf32>
    %18 = vector.broadcast %17 : vector<1x256xf32> to vector<32x256xf32>
    %19 = arith.mulf %9, %18 : vector<32x256xf32>
    %c0_8 = arith.constant 0 : index
    %c0_9 = arith.constant 0 : index
    %20 = vector.load %arg3[%c0_8, %c0_9] : memref<1x256xf32, #tpu.memory_space<vmem>>, vector<1x256xf32>
    %21 = vector.broadcast %20 : vector<1x256xf32> to vector<32x256xf32>
    %22 = arith.mulf %19, %21 : vector<32x256xf32>
    %c0_10 = arith.constant 0 : index
    %c0_11 = arith.constant 0 : index
    %23 = vector.load %arg4[%c0_10, %c0_11] : memref<1x256xf32, #tpu.memory_space<vmem>>, vector<1x256xf32>
    %24 = vector.broadcast %23 : vector<1x256xf32> to vector<32x256xf32>
    %25 = arith.addf %22, %24 : vector<32x256xf32>
    %cst_12 = arith.constant 0.000000e+00 : f32
    %26 = vector.broadcast %cst_12 : f32 to vector<32x256xf32>
    %27 = arith.maximumf %25, %26 : vector<32x256xf32>
    %c0_13 = arith.constant 0 : index
    %c0_14 = arith.constant 0 : index
    %28 = vector.load %arg5[%c0_13, %c0_14] : memref<32x256xf32, #tpu.memory_space<vmem>>, vector<32x256xf32>
    tpu.vector_store %arg5[%c0_13, %c0_14], %27 {strides = array<i32>} : memref<32x256xf32, #tpu.memory_space<vmem>>, vector<32x256xf32>,
    return
  }
  func.func @transform_0(%arg0: i32) -> (i32, i32) {
    %c0_i32 = arith.constant 0 : i32
    %c0_i32_0 = arith.constant 0 : i32
    %c0_i32_1 = arith.constant 0 : i32
    return %c0_i32, %c0_i32_0 : i32, i32
  }
  func.func @transform_1(%arg0: i32) -> (i32, i32) {
    %c0_i32 = arith.constant 0 : i32
    %c0_i32_0 = arith.constant 0 : i32
    return %c0_i32, %arg0 : i32, i32
  }
  func.func @transform_2(%arg0: i32) -> (i32, i32) {
    %c0_i32 = arith.constant 0 : i32
    %c0_i32_0 = arith.constant 0 : i32
    return %c0_i32, %arg0 : i32, i32
  }
  func.func @transform_3(%arg0: i32) -> (i32, i32) {
    %c0_i32 = arith.constant 0 : i32
    %c0_i32_0 = arith.constant 0 : i32
    return %c0_i32, %arg0 : i32, i32
  }
  func.func @transform_4(%arg0: i32) -> (i32, i32) {
    %c0_i32 = arith.constant 0 : i32
    %c0_i32_0 = arith.constant 0 : i32
    return %c0_i32, %arg0 : i32, i32
  }
}

module attributes {stable_mosaic.version = 11 : i64} {
  func.func @_conv_bn_relu_kernel(%arg0: i32, %arg1: memref<8x4096xf32, #tpu.memory_space<vmem>>, %arg2: memref<4096x256xbf16, #tpu.memory_space<vmem>>, %arg3: memref<1x256xf32, #tpu.memory_space<vmem>>, %arg4: memref<1x256xf32, #tpu.memory_space<vmem>>, %arg5: memref<8x256xf32, #tpu.memory_space<vmem>>) attributes {dimension_semantics = [#tpu.dimension_semantics<parallel>], iteration_bounds = array<i64: 2>, scalar_prefetch = 0 : i64, scratch_operands = 0 : i64, tpu.core_type = #tpu.core_type<tc>, window_params = [{pipeline_mode = #tpu.pipeline_mode<synchronous>, transform_indices = @transform_0, window_bounds = array<i64: 8, 4096>}, {transform_indices = @transform_1, window_bounds = array<i64: 4096, 256>}, {transform_indices = @transform_2, window_bounds = array<i64: 1, 256>}, {transform_indices = @transform_3, window_bounds = array<i64: 1, 256>}, {transform_indices = @transform_4, window_bounds = array<i64: 8, 256>}]} {
    %c0 = arith.constant 0 : index
    %c0_0 = arith.constant 0 : index
    %0 = vector.load %arg1[%c0, %c0_0] : memref<8x4096xf32, #tpu.memory_space<vmem>>, vector<8x4096xf32>
    %1 = arith.truncf %0 : vector<8x4096xf32> to vector<8x4096xbf16>
    %c0_1 = arith.constant 0 : index
    %c0_2 = arith.constant 0 : index
    %2 = vector.load %arg2[%c0_1, %c0_2] : memref<4096x256xbf16, #tpu.memory_space<vmem>>, vector<4096x256xbf16>
    %cst = arith.constant dense<0.000000e+00> : vector<8x256xf32>
    %3 = tpu.matmul %1, %2, %cst {dimension_numbers = #tpu.dot_dimension_numbers<[1], [0], [0], [1], [0, 0, 1, 1], [], []>} : vector<8x4096xbf16>, vector<4096x256xbf16>, vector<8x256xf32> -> vector<8x256xf32>
    %cst_3 = arith.constant dense<0.000000e+00> : vector<256xf32>
    %4 = vector.multi_reduction <add>, %3, %cst_3 [0] : vector<8x256xf32> to vector<256xf32>
    %5 = vector.shape_cast %4 : vector<256xf32> to vector<1x256xf32>
    %cst_4 = arith.constant 8.000000e+00 : f32
    %6 = vector.broadcast %cst_4 : f32 to vector<1x256xf32>
    %7 = arith.divf %5, %6 : vector<1x256xf32>
    %8 = vector.broadcast %7 : vector<1x256xf32> to vector<8x256xf32>
    %9 = arith.subf %3, %8 : vector<8x256xf32>
    %10 = arith.mulf %9, %9 : vector<8x256xf32>
    %cst_5 = arith.constant dense<0.000000e+00> : vector<256xf32>
    %11 = vector.multi_reduction <add>, %10, %cst_5 [0] : vector<8x256xf32> to vector<256xf32>
    %12 = vector.shape_cast %11 : vector<256xf32> to vector<1x256xf32>
    %cst_6 = arith.constant 8.000000e+00 : f32
    %13 = vector.broadcast %cst_6 : f32 to vector<1x256xf32>
    %14 = arith.divf %12, %13 : vector<1x256xf32>
    %cst_7 = arith.constant 9.99999974E-6 : f32
    %15 = vector.broadcast %cst_7 : f32 to vector<1x256xf32>
    %16 = arith.addf %14, %15 : vector<1x256xf32>
    %17 = math.rsqrt %16 : vector<1x256xf32>
    %18 = vector.broadcast %17 : vector<1x256xf32> to vector<8x256xf32>
    %19 = arith.mulf %9, %18 : vector<8x256xf32>
    %c0_8 = arith.constant 0 : index
    %c0_9 = arith.constant 0 : index
    %20 = vector.load %arg3[%c0_8, %c0_9] : memref<1x256xf32, #tpu.memory_space<vmem>>, vector<1x256xf32>
    %21 = vector.broadcast %20 : vector<1x256xf32> to vector<8x256xf32>
    %22 = arith.mulf %19, %21 : vector<8x256xf32>
    %c0_10 = arith.constant 0 : index
    %c0_11 = arith.constant 0 : index
    %23 = vector.load %arg4[%c0_10, %c0_11] : memref<1x256xf32, #tpu.memory_space<vmem>>, vector<1x256xf32>
    %24 = vector.broadcast %23 : vector<1x256xf32> to vector<8x256xf32>
    %25 = arith.addf %22, %24 : vector<8x256xf32>
    %cst_12 = arith.constant 0.000000e+00 : f32
    %26 = vector.broadcast %cst_12 : f32 to vector<8x256xf32>
    %27 = arith.maximumf %25, %26 : vector<8x256xf32>
    %c0_13 = arith.constant 0 : index
    %c0_14 = arith.constant 0 : index
    %28 = vector.load %arg5[%c0_13, %c0_14] : memref<8x256xf32, #tpu.memory_space<vmem>>, vector<8x256xf32>
    tpu.vector_store %arg5[%c0_13, %c0_14], %27 {strides = array<i32>} : memref<8x256xf32, #tpu.memory_space<vmem>>, vector<8x256xf32>,
    return
  }
  func.func @transform_0(%arg0: i32) -> (i32, i32) {
    %c0_i32 = arith.constant 0 : i32
    %c0_i32_0 = arith.constant 0 : i32
    %c0_i32_1 = arith.constant 0 : i32
    return %c0_i32, %c0_i32_0 : i32, i32
  }
  func.func @transform_1(%arg0: i32) -> (i32, i32) {
    %c0_i32 = arith.constant 0 : i32
    %c0_i32_0 = arith.constant 0 : i32
    return %c0_i32, %arg0 : i32, i32
  }
  func.func @transform_2(%arg0: i32) -> (i32, i32) {
    %c0_i32 = arith.constant 0 : i32
    %c0_i32_0 = arith.constant 0 : i32
    return %c0_i32, %arg0 : i32, i32
  }
  func.func @transform_3(%arg0: i32) -> (i32, i32) {
    %c0_i32 = arith.constant 0 : i32
    %c0_i32_0 = arith.constant 0 : i32
    return %c0_i32, %arg0 : i32, i32
  }
  func.func @transform_4(%arg0: i32) -> (i32, i32) {
    %c0_i32 = arith.constant 0 : i32
    %c0_i32_0 = arith.constant 0 : i32
    return %c0_i32, %arg0 : i32, i32
  }
}

module attributes {stable_mosaic.version = 11 : i64} {
  func.func @_conv_bn_relu_kernel(%arg0: i32, %arg1: memref<2x2048xf32, #tpu.memory_space<vmem>>, %arg2: memref<2048x256xbf16, #tpu.memory_space<vmem>>, %arg3: memref<1x256xf32, #tpu.memory_space<vmem>>, %arg4: memref<1x256xf32, #tpu.memory_space<vmem>>, %arg5: memref<2x256xf32, #tpu.memory_space<vmem>>) attributes {dimension_semantics = [#tpu.dimension_semantics<parallel>], iteration_bounds = array<i64: 4>, scalar_prefetch = 0 : i64, scratch_operands = 0 : i64, tpu.core_type = #tpu.core_type<tc>, window_params = [{pipeline_mode = #tpu.pipeline_mode<synchronous>, transform_indices = @transform_0, window_bounds = array<i64: 2, 2048>}, {transform_indices = @transform_1, window_bounds = array<i64: 2048, 256>}, {transform_indices = @transform_2, window_bounds = array<i64: 1, 256>}, {transform_indices = @transform_3, window_bounds = array<i64: 1, 256>}, {transform_indices = @transform_4, window_bounds = array<i64: 2, 256>}]} {
    %c0 = arith.constant 0 : index
    %c0_0 = arith.constant 0 : index
    %0 = vector.load %arg1[%c0, %c0_0] : memref<2x2048xf32, #tpu.memory_space<vmem>>, vector<2x2048xf32>
    %1 = arith.truncf %0 : vector<2x2048xf32> to vector<2x2048xbf16>
    %c0_1 = arith.constant 0 : index
    %c0_2 = arith.constant 0 : index
    %2 = vector.load %arg2[%c0_1, %c0_2] : memref<2048x256xbf16, #tpu.memory_space<vmem>>, vector<2048x256xbf16>
    %cst = arith.constant dense<0.000000e+00> : vector<2x256xf32>
    %3 = tpu.matmul %1, %2, %cst {dimension_numbers = #tpu.dot_dimension_numbers<[1], [0], [0], [1], [0, 0, 1, 1], [], []>} : vector<2x2048xbf16>, vector<2048x256xbf16>, vector<2x256xf32> -> vector<2x256xf32>
    %cst_3 = arith.constant dense<0.000000e+00> : vector<256xf32>
    %4 = vector.multi_reduction <add>, %3, %cst_3 [0] : vector<2x256xf32> to vector<256xf32>
    %5 = vector.shape_cast %4 : vector<256xf32> to vector<1x256xf32>
    %cst_4 = arith.constant 2.000000e+00 : f32
    %6 = vector.broadcast %cst_4 : f32 to vector<1x256xf32>
    %7 = arith.divf %5, %6 : vector<1x256xf32>
    %8 = vector.broadcast %7 : vector<1x256xf32> to vector<2x256xf32>
    %9 = arith.subf %3, %8 : vector<2x256xf32>
    %10 = arith.mulf %9, %9 : vector<2x256xf32>
    %cst_5 = arith.constant dense<0.000000e+00> : vector<256xf32>
    %11 = vector.multi_reduction <add>, %10, %cst_5 [0] : vector<2x256xf32> to vector<256xf32>
    %12 = vector.shape_cast %11 : vector<256xf32> to vector<1x256xf32>
    %cst_6 = arith.constant 2.000000e+00 : f32
    %13 = vector.broadcast %cst_6 : f32 to vector<1x256xf32>
    %14 = arith.divf %12, %13 : vector<1x256xf32>
    %cst_7 = arith.constant 9.99999974E-6 : f32
    %15 = vector.broadcast %cst_7 : f32 to vector<1x256xf32>
    %16 = arith.addf %14, %15 : vector<1x256xf32>
    %17 = math.rsqrt %16 : vector<1x256xf32>
    %18 = vector.broadcast %17 : vector<1x256xf32> to vector<2x256xf32>
    %19 = arith.mulf %9, %18 : vector<2x256xf32>
    %c0_8 = arith.constant 0 : index
    %c0_9 = arith.constant 0 : index
    %20 = vector.load %arg3[%c0_8, %c0_9] : memref<1x256xf32, #tpu.memory_space<vmem>>, vector<1x256xf32>
    %21 = vector.broadcast %20 : vector<1x256xf32> to vector<2x256xf32>
    %22 = arith.mulf %19, %21 : vector<2x256xf32>
    %c0_10 = arith.constant 0 : index
    %c0_11 = arith.constant 0 : index
    %23 = vector.load %arg4[%c0_10, %c0_11] : memref<1x256xf32, #tpu.memory_space<vmem>>, vector<1x256xf32>
    %24 = vector.broadcast %23 : vector<1x256xf32> to vector<2x256xf32>
    %25 = arith.addf %22, %24 : vector<2x256xf32>
    %cst_12 = arith.constant 0.000000e+00 : f32
    %26 = vector.broadcast %cst_12 : f32 to vector<2x256xf32>
    %27 = arith.maximumf %25, %26 : vector<2x256xf32>
    %c0_13 = arith.constant 0 : index
    %c0_14 = arith.constant 0 : index
    %28 = vector.load %arg5[%c0_13, %c0_14] : memref<2x256xf32, #tpu.memory_space<vmem>>, vector<2x256xf32>
    tpu.vector_store %arg5[%c0_13, %c0_14], %27 {strides = array<i32>} : memref<2x256xf32, #tpu.memory_space<vmem>>, vector<2x256xf32>,
    return
  }
  func.func @transform_0(%arg0: i32) -> (i32, i32) {
    %c0_i32 = arith.constant 0 : i32
    %c0_i32_0 = arith.constant 0 : i32
    %c0_i32_1 = arith.constant 0 : i32
    return %c0_i32, %c0_i32_0 : i32, i32
  }
  func.func @transform_1(%arg0: i32) -> (i32, i32) {
    %c0_i32 = arith.constant 0 : i32
    %c0_i32_0 = arith.constant 0 : i32
    return %c0_i32, %arg0 : i32, i32
  }
  func.func @transform_2(%arg0: i32) -> (i32, i32) {
    %c0_i32 = arith.constant 0 : i32
    %c0_i32_0 = arith.constant 0 : i32
    return %c0_i32, %arg0 : i32, i32
  }
  func.func @transform_3(%arg0: i32) -> (i32, i32) {
    %c0_i32 = arith.constant 0 : i32
    %c0_i32_0 = arith.constant 0 : i32
    return %c0_i32, %arg0 : i32, i32
  }
  func.func @transform_4(%arg0: i32) -> (i32, i32) {
    %c0_i32 = arith.constant 0 : i32
    %c0_i32_0 = arith.constant 0 : i32
    return %c0_i32, %arg0 : i32, i32
  }
}

</mosaic_0001>

<bundles_post_ra>
// kernel: g_encode_forward.4
= control target key start
LH: loop header
LB: loop body
LE: loop exit
PB: predicated region body
PF: predicated region fallthrough
CT: control target
= control target key end

     0   :  { %8 = vsyncpa [#allocation3], 0  ;;  %s484_s0 = inlined_call_operand.vmem [shape: f32[128,16], index: 0, kind: input, shape index: {}]   ;;  %s485_s1 = inlined_call_operand.hbm [shape: bf16[16,128], index: 1, kind: input, shape index: {}]   ;;  %s486_s2 = inlined_call_operand.hbm [shape: f32[1,128], index: 2, kind: input, shape index: {}]   ;;  %s487_s3 = inlined_call_operand.vmem [shape: f32[128,128], index: 3, kind: output, shape index: {}]  }
   0x1   :  { %9 = vsyncpa [#allocation5], 0  ;;  %s332_s12 = smov [#allocation2]   ;;  %s284_s16 = scalar_lea.hbm %s485_s1, 128 }
   0x2   :  { %s17_s13 = sshll.u32 %s332_s12, 4  ;;  %p285_p0 = scmp.ne.s32.totalorder %s485_s1, %s284_s16  ;;  %s18_s13 = int_to_ptr.vmem [resolvable:$true] %s17_s13 }
   0x3   :  { %p288_p1 = scmp.lt.u32.totalorder %s284_s16, %s485_s1 }
   0x5   :  { %p290_p2 = pnand %p288_p1, %p285_p0 }
   0x7   :  { %293 = shalt.err (!%p290_p2)
}
   0x8   :  { %s294_s21 = scalar_lea.vmem %s18_s13, 128  ;;  %p299_p4 = scmp.lt.s32.totalorder %s18_s13, %s18_s13 }
   0x9   :  { %p295_p3 = scmp.ne.s32.totalorder %s18_s13, %s294_s21  ;;  %p300_p5 = scmp.lt.s32.totalorder %s294_s21, %s294_s21 }
   0xb   :  { %p301_p6 = por %p300_p5, %p299_p4 }
   0xd   :  { %p302_p7 = pnand %p301_p6, %p295_p3 }
   0xf   :  { %305 = shalt.err (!%p302_p7)
}
  0x10   :  { %s333_s22 = smov 64   ;;  %s334_s23 = smov 4  }
  0x11   :  { %23 = dma.hbm_to_vmem [thread:$0]  %s485_s1, 128, %s18_s13, [#allocation3], %s333_s22, %s333_s22, %s334_s23  }
  0x12   :  { %s335_s26 = smov [#allocation4]   ;;  %s306_s30 = scalar_lea.hbm %s486_s2, 16 }
  0x13   :  { %s30_s27 = sshll.u32 %s335_s26, 4  ;;  %p307_p8 = scmp.ne.s32.totalorder %s486_s2, %s306_s30  ;;  %s31_s27 = int_to_ptr.vmem [resolvable:$true] %s30_s27 }
  0x14   :  { %p310_p9 = scmp.lt.u32.totalorder %s306_s30, %s486_s2 }
  0x16   :  { %p312_p10 = pnand %p310_p9, %p307_p8 }
  0x18   :  { %315 = shalt.err (!%p312_p10)
}
  0x19   :  { %s316_s8 = scalar_lea.vmem %s31_s27, 16  ;;  %s320_s1 = scalar_lea.vmem %s31_s27, 32 }
  0x1a   :  { %p317_p11 = scmp.ne.s32.totalorder %s31_s27, %s316_s8  ;;  %p321_p12 = scmp.lt.s32.totalorder %s31_s27, %s31_s27 }
  0x1b   :  { %p322_p13 = scmp.lt.s32.totalorder %s320_s1, %s316_s8 }
  0x1d   :  { %p323_p0 = por %p322_p13, %p321_p12 }
  0x1f   :  { %p324_p1 = pnand %p323_p0, %p317_p11 }
  0x21   :  { %327 = shalt.err (!%p324_p1)
}
  0x22   :  { %33 = dma.hbm_to_vmem [thread:$0]  %s486_s2, 16, %s31_s27, [#allocation5]  }
  0x23   :  { %328 = dma.done.wait [#allocation3], 128  }
  0x24   :  { %329 = vsyncadd [#allocation3], 4294967168 }
  0x25   :  { %330 = dma.done.wait [#allocation5], 16  }
  0x26   :  { %331 = vsyncadd [#allocation5], 4294967280  ;;  %v283_v0 = vld [vmem:[#allocation2] sm:$0xff]   ;;  %v42_v2 = vld [vmem:[%s484_s0 + $0x8] sm:$0xff]  ;;  %vm80_vm0 = vcmask 130048  }
  0x27   :  { %v41_v1 = vld [vmem:[%s484_s0] sm:$0xff]  ;;  %259 = vmatprep.subr.bf16.mxu0 %v283_v0  ;;  %277 = vmatprep.subr.bf16.mxu1 %v283_v0  ;;  %v50_v5 = vld [vmem:[%s484_s0 + $0x48] sm:$0xff]  ;;  %v43_v6 = vld [vmem:[%s484_s0 + $0x10] sm:$0xff] }
  0x28   :  { %v49_v3 = vld [vmem:[%s484_s0 + $0x40] sm:$0xff]  ;;  %v57_v4 = vpack.c.bf16 %v42_v2, %v41_v1  ;;  %v44_v7 = vld [vmem:[%s484_s0 + $0x18] sm:$0xff]  ;;  %260 = vmatpush3.bf16.msra.mxu0 %v283_v0  ;;  %278 = vmatpush3.bf16.msra.mxu1 %v283_v0  ;;  %v51_v10 = vld [vmem:[%s484_s0 + $0x50] sm:$0xff] }
  0x29   :  { %v61_v8 = vpack.c.bf16 %v50_v5, %v49_v3  ;;  %v58_v9 = vpack.c.bf16 %v44_v7, %v43_v6  ;;  %v52_v11 = vld [vmem:[%s484_s0 + $0x58] sm:$0xff]  ;;  %v45_v12 = vld [vmem:[%s484_s0 + $0x20] sm:$0xff]  ;;  %v46_v14 = vld [vmem:[%s484_s0 + $0x28] sm:$0xff] }
  0x2a   :  { %261 = vmatprep.mubr.msk.bf16.mxu0 %vm80_vm0, %v57_v4  ;;  %v62_v13 = vpack.c.bf16 %v52_v11, %v51_v10  ;;  %v53_v15 = vld [vmem:[%s484_s0 + $0x60] sm:$0xff]  ;;  %v54_v16 = vld [vmem:[%s484_s0 + $0x68] sm:$0xff]  ;;  %v59_v17 = vpack.c.bf16 %v46_v14, %v45_v12  ;;  %v47_v19 = vld [vmem:[%s484_s0 + $0x30] sm:$0xff] }
  0x2b   :  { %269 = vmatprep.mubr.msk.bf16.mxu1 %vm80_vm0, %v61_v8  ;;  %v63_v18 = vpack.c.bf16 %v54_v16, %v53_v15  ;;  %262 = vmatmul.mubr.msk.bf16.vlgmr.msra.gmra.mrb[0].mxu0 %vm80_vm0, %v58_v9  ;;  %v48_v20 = vld [vmem:[%s484_s0 + $0x38] sm:$0xff]  ;;  %v55_v21 = vld [vmem:[%s484_s0 + $0x70] sm:$0xff]  ;;  %v240_v25 = vld [vmem:[#allocation4] ss:$0 sm:$0xff] }
  0x2c   :  { %270 = vmatmul.mubr.msk.bf16.vlgmr.msra.gmra.mrb[0].mxu1 %vm80_vm0, %v62_v13  ;;  %265 = vmatprep.mubr.msk.bf16.mxu0 %vm80_vm0, %v59_v17  ;;  %v56_v22 = vld [vmem:[%s484_s0 + $0x78] sm:$0xff]  ;;  %v60_v23 = vpack.c.bf16 %v48_v20, %v47_v19 }
  0x2d   :  { %273 = vmatprep.mubr.msk.bf16.mxu1 %vm80_vm0, %v63_v18  ;;  %v64_v24 = vpack.c.bf16 %v56_v22, %v55_v21 }
  0x33   :  { %266 = vmatmul.mubr.msk.bf16.gmra.mrb[4].mxu0 %vm80_vm0, %v60_v23 }
  0x34   :  { %274 = vmatmul.mubr.msk.bf16.gmra.mrb[4].mxu1 %vm80_vm0, %v64_v24 }
  0xfe   :  { %v263_v26 = vpop.f32.mrb[0].mxu0 }
  0xff   :  { %v271_v27 = vpop.f32.mrb[0].mxu1  ;;  %v148_v28 = vadd.f32 %v263_v26, %v240_v25  ;;  %v139_v30 = vpop.f32.mrb[1].mxu0 }
 0x100   :  { %v180_v29 = vadd.f32 %v271_v27, %v240_v25  ;;  %v171_v31 = vpop.f32.mrb[1].mxu1  ;;  %v140_v32 = vadd.f32 %v240_v25, %v139_v30  ;;  %v264_v34 = vpop.f32.mrb[2].mxu0 }
 0x101   :  { %v172_v33 = vadd.f32 %v240_v25, %v171_v31  ;;  %v272_v35 = vpop.f32.mrb[2].mxu1  ;;  %v204_v36 = vmax.f32 %v148_v28, 0.0  ;;  %v151_v38 = vadd.f32 %v264_v34, %v240_v25  ;;  %v142_v40 = vpop.f32.mrb[3].mxu0 }
 0x102   :  { %v212_v37 = vmax.f32 %v180_v29, 0.0  ;;  %v183_v39 = vadd.f32 %v272_v35, %v240_v25  ;;  %v174_v41 = vpop.f32.mrb[3].mxu1  ;;  %v202_v42 = vmax.f32 %v140_v32, 0.0  ;;  %v143_v44 = vadd.f32 %v240_v25, %v142_v40 }
 0x103   :  { %v210_v43 = vmax.f32 %v172_v33, 0.0  ;;  %v175_v45 = vadd.f32 %v240_v25, %v174_v41  ;;  %220 = vst [vmem:[%s487_s3 + $0x10] sm:$0xff] %v204_v36  ;;  %v205_v46 = vmax.f32 %v151_v38, 0.0 }
 0x104   :  { %228 = vst [vmem:[%s487_s3 + $0x50] sm:$0xff] %v212_v37  ;;  %v213_v47 = vmax.f32 %v183_v39, 0.0  ;;  %218 = vst [vmem:[%s487_s3] sm:$0xff] %v202_v42  ;;  %v203_v48 = vmax.f32 %v143_v44, 0.0 }
 0x105   :  { %226 = vst [vmem:[%s487_s3 + $0x40] sm:$0xff] %v210_v43  ;;  %v211_v49 = vmax.f32 %v175_v45, 0.0  ;;  %221 = vst [vmem:[%s487_s3 + $0x18] sm:$0xff] %v205_v46 }
 0x106   :  { %229 = vst [vmem:[%s487_s3 + $0x58] sm:$0xff] %v213_v47  ;;  %219 = vst [vmem:[%s487_s3 + $0x8] sm:$0xff] %v203_v48  ;;  %v267_v50 = vpop.f32.mrb[4].mxu0 }
 0x107   :  { %227 = vst [vmem:[%s487_s3 + $0x48] sm:$0xff] %v211_v49  ;;  %v275_v51 = vpop.f32.mrb[4].mxu1  ;;  %v164_v52 = vadd.f32 %v267_v50, %v240_v25  ;;  %v155_v54 = vpop.f32.mrb[5].mxu0 }
 0x108   :  { %v196_v53 = vadd.f32 %v275_v51, %v240_v25  ;;  %v187_v55 = vpop.f32.mrb[5].mxu1  ;;  %v156_v56 = vadd.f32 %v240_v25, %v155_v54  ;;  %v268_v58 = vpop.f32.mrb[6].mxu0 }
 0x109   :  { %v188_v57 = vadd.f32 %v240_v25, %v187_v55  ;;  %v276_v59 = vpop.f32.mrb[6].mxu1  ;;  %v208_v60 = vmax.f32 %v164_v52, 0.0  ;;  %v167_v62 = vadd.f32 %v268_v58, %v240_v25  ;;  %v158_v0 = vpop.f32.mrb[7].mxu0 }
 0x10a   :  { %v216_v61 = vmax.f32 %v196_v53, 0.0  ;;  %v199_v63 = vadd.f32 %v276_v59, %v240_v25  ;;  %v190_v1 = vpop.f32.mrb[7].mxu1  ;;  %v206_v2 = vmax.f32 %v156_v56, 0.0  ;;  %v159_v4 = vadd.f32 %v240_v25, %v158_v0 }
 0x10b   :  { %v214_v3 = vmax.f32 %v188_v57, 0.0  ;;  %v191_v5 = vadd.f32 %v240_v25, %v190_v1  ;;  %224 = vst [vmem:[%s487_s3 + $0x30] sm:$0xff] %v208_v60  ;;  %v209_v6 = vmax.f32 %v167_v62, 0.0 }
 0x10c   :  { %232 = vst [vmem:[%s487_s3 + $0x70] sm:$0xff] %v216_v61  ;;  %v217_v7 = vmax.f32 %v199_v63, 0.0  ;;  %222 = vst [vmem:[%s487_s3 + $0x20] sm:$0xff] %v206_v2  ;;  %v207_v8 = vmax.f32 %v159_v4, 0.0 }
 0x10d   :  { %230 = vst [vmem:[%s487_s3 + $0x60] sm:$0xff] %v214_v3  ;;  %v215_v9 = vmax.f32 %v191_v5, 0.0  ;;  %225 = vst [vmem:[%s487_s3 + $0x38] sm:$0xff] %v209_v6 }
 0x10e   :  { %233 = vst [vmem:[%s487_s3 + $0x78] sm:$0xff] %v217_v7  ;;  %223 = vst [vmem:[%s487_s3 + $0x28] sm:$0xff] %v207_v8 }
 0x10f   :  { %231 = vst [vmem:[%s487_s3 + $0x68] sm:$0xff] %v215_v9 }
 0x110   :  { %238 = vsyncpa [#allocation3], 1 }
 0x111   :  { %239 = vsyncpa [#allocation5], 1 }

// kernel: g_encode_forward.5
= control target key start
LH: loop header
LB: loop body
LE: loop exit
PB: predicated region body
PF: predicated region fallthrough
CT: control target
= control target key end

     0   :  { %9 = vsyncpa [#allocation3], 0  ;;  %s3305_s0 = inlined_call_operand.vmem [shape: f32[32,2048], index: 0, kind: input, shape index: {}]   ;;  %s3306_s1 = inlined_call_operand.hbm [shape: bf16[2048,256], index: 1, kind: input, shape index: {}]   ;;  %s3307_s2 = inlined_call_operand.hbm [shape: f32[1,256], index: 2, kind: input, shape index: {}]   ;;  %s3308_s3 = inlined_call_operand.hbm [shape: f32[1,256], index: 3, kind: input, shape index: {}]   ;;  %s3309_s4 = inlined_call_operand.vmem [shape: f32[32,256], index: 4, kind: output, shape index: {}]  }
   0x1   :  { %10 = vsyncpa [#allocation5], 0  ;;  %s3016_s15 = smov [#allocation4]   ;;  %s3017_s17 = smov [#allocation2]  }
   0x2   :  { %s31_s16 = sshll.u32 %s3016_s15, 4  ;;  %s18_s18 = sshll.u32 %s3017_s17, 4  ;;  %s32_s16 = int_to_ptr.vmem [resolvable:$true] %s31_s16  ;;  %s3046_s18 = int_to_ptr.vmem [resolvable:$true] %s18_s18 }
   0x3   :  { %s2946_s21 = scalar_lea.hbm %s3307_s2, 32 }
   0x4   :  { %p2947_p0 = scmp.ne.s32.totalorder %s3307_s2, %s2946_s21  ;;  %p2950_p1 = scmp.lt.u32.totalorder %s2946_s21, %s3307_s2 }
   0x6   :  { %p2952_p2 = pnand %p2950_p1, %p2947_p0 }
   0x8   :  { %2955 = shalt.err (!%p2952_p2)
}
   0x9   :  { %s2956_s26 = scalar_lea.vmem %s32_s16, 32  ;;  %p2961_p4 = scmp.lt.s32.totalorder %s32_s16, %s32_s16 }
   0xa   :  { %p2957_p3 = scmp.ne.s32.totalorder %s32_s16, %s2956_s26  ;;  %p2962_p5 = scmp.lt.s32.totalorder %s2956_s26, %s2956_s26 }
   0xc   :  { %p2963_p6 = por %p2962_p5, %p2961_p4 }
   0xe   :  { %p2964_p7 = pnand %p2963_p6, %p2957_p3 }
  0x10   :  { %2967 = shalt.err (!%p2964_p7)
}
  0x11   :  { %34 = dma.hbm_to_vmem [thread:$0]  %s3307_s2, 32, %s32_s16, [#allocation5]  }
  0x12   :  { %s2968_s5 = scalar_lea.hbm %s3306_s1, 32768 }
  0x13   :  { %p2969_p8 = scmp.ne.s32.totalorder %s3306_s1, %s2968_s5  ;;  %p2972_p9 = scmp.lt.u32.totalorder %s2968_s5, %s3306_s1 }
  0x15   :  { %p2974_p10 = pnand %p2972_p9, %p2969_p8 }
  0x17   :  { %2977 = shalt.err (!%p2974_p10)
}
  0x18   :  { %s2978_s10 = scalar_lea.vmem %s3046_s18, 32768  ;;  %p2983_p12 = scmp.lt.s32.totalorder %s3046_s18, %s3046_s18 }
  0x19   :  { %p2979_p11 = scmp.ne.s32.totalorder %s3046_s18, %s2978_s10  ;;  %p2984_p13 = scmp.lt.s32.totalorder %s2978_s10, %s2978_s10 }
  0x1b   :  { %p2985_p0 = por %p2984_p13, %p2983_p12 }
  0x1d   :  { %p2986_p1 = pnand %p2985_p0, %p2979_p11 }
  0x1f   :  { %2989 = shalt.err (!%p2986_p1)
}
  0x20   :  { %s3018_s2 = smov 128   ;;  %s3019_s11 = smov 8  }
  0x21   :  { %24 = dma.hbm_to_vmem [thread:$0]  %s3306_s1, 32768, %s3046_s18, [#allocation3], %s3018_s2, %s3018_s2, %s3019_s11  }
  0x22   :  { %s3020_s14 = smov [#allocation6]   ;;  %s2990_s19 = scalar_lea.hbm %s3308_s3, 32 }
  0x23   :  { %s41_s15 = sshll.u32 %s3020_s14, 4  ;;  %p2991_p2 = scmp.ne.s32.totalorder %s3308_s3, %s2990_s19  ;;  %s42_s15 = int_to_ptr.vmem [resolvable:$true] %s41_s15 }
  0x24   :  { %p2994_p3 = scmp.lt.u32.totalorder %s2990_s19, %s3308_s3 }
  0x26   :  { %p2996_p4 = pnand %p2994_p3, %p2991_p2 }
  0x28   :  { %2999 = shalt.err (!%p2996_p4)
}
  0x29   :  { %s3000_s24 = scalar_lea.vmem %s42_s15, 32  ;;  %p3005_p6 = scmp.lt.s32.totalorder %s42_s15, %s42_s15 }
  0x2a   :  { %p3001_p5 = scmp.ne.s32.totalorder %s42_s15, %s3000_s24  ;;  %p3006_p7 = scmp.lt.s32.totalorder %s3000_s24, %s3000_s24 }
  0x2c   :  { %p3007_p8 = por %p3006_p7, %p3005_p6 }
  0x2e   :  { %p3008_p9 = pnand %p3007_p8, %p3001_p5 }
  0x30   :  { %3011 = shalt.err (!%p3008_p9)
}
  0x31   :  { %44 = dma.hbm_to_vmem [thread:$0]  %s3308_s3, 32, %s42_s15, [#allocation5]  }
  0x32   :  { %3012 = dma.done.wait [#allocation3], 32768  }
  0x33   :  { %3013 = vsyncadd [#allocation3], 4294934528 }
  0x34   :  { %3014 = dma.done.wait [#allocation5], 64  }
  0x35   :  { %3015 = vsyncadd [#allocation5], 4294967232  ;;  %v2558_v0 = vld [vmem:[#allocation2 + $0x4] ss:$8 sps:$4 sm:$0xff]   ;;  %v2562_v2 = vld [vmem:[#allocation2] ss:$8 sps:$4 sm:$0xff]  }
  0x36   :  { %v2560_v1 = vld [vmem:[#allocation2 + $0x404] ss:$8 sps:$4 sm:$0xff]   ;;  %1686 = vmatprep.subr.bf16.mxu1 %v2558_v0  ;;  %v2563_v3 = vld [vmem:[#allocation2 + $0x400] ss:$8 sps:$4 sm:$0xff]   ;;  %v2564_v4 = vld [vmem:[#allocation2 + $0x14] ss:$8 sps:$4 sm:$0xff]  }
  0x37   :  { %1898 = vmatprep.subr.bf16.mxu0 %v2560_v1  ;;  %1687 = vmatpush1.bf16.msra.mxu1 %v2562_v2  ;;  %v2566_v5 = vld [vmem:[#allocation2 + $0x414] ss:$8 sps:$4 sm:$0xff]   ;;  %v2568_v6 = vld [vmem:[#allocation2 + $0x10] ss:$8 sps:$4 sm:$0xff]   ;;  %v2570_v8 = vld [vmem:[#allocation2 + $0x24] ss:$8 sps:$4 sm:$0xff]  }
  0x38   :  { %1899 = vmatpush1.bf16.msra.mxu0 %v2563_v3  ;;  %1688 = vmatprep.subr.bf16.mxu1 %v2564_v4  ;;  %v2569_v7 = vld [vmem:[#allocation2 + $0x410] ss:$8 sps:$4 sm:$0xff]   ;;  %v2572_v9 = vld [vmem:[#allocation2 + $0x424] ss:$8 sps:$4 sm:$0xff]   ;;  %v2574_v10 = vld [vmem:[#allocation2 + $0x20] ss:$8 sps:$4 sm:$0xff]  }
  0x39   :  { %1900 = vmatprep.subr.bf16.mxu0 %v2566_v5  ;;  %v2575_v11 = vld [vmem:[#allocation2 + $0x420] ss:$8 sps:$4 sm:$0xff]   ;;  %v2576_v12 = vld [vmem:[#allocation2 + $0x34] ss:$8 sps:$4 sm:$0xff]   ;;  %v2580_v14 = vld [vmem:[#allocation2 + $0x30] ss:$8 sps:$4 sm:$0xff]  }
  0x3a   :  { %v2578_v13 = vld [vmem:[#allocation2 + $0x434] ss:$8 sps:$4 sm:$0xff]   ;;  %v2581_v15 = vld [vmem:[#allocation2 + $0x430] ss:$8 sps:$4 sm:$0xff]   ;;  %v2582_v16 = vld [vmem:[#allocation2 + $0x44] ss:$8 sps:$4 sm:$0xff]  }
  0x3b   :  { %1689 = vmatpush1.bf16.msra.mxu1 %v2568_v6  ;;  %v2584_v17 = vld [vmem:[#allocation2 + $0x444] ss:$8 sps:$4 sm:$0xff]   ;;  %v2586_v18 = vld [vmem:[#allocation2 + $0x40] ss:$8 sps:$4 sm:$0xff]   ;;  %v2588_v20 = vld [vmem:[#allocation2 + $0x54] ss:$8 sps:$4 sm:$0xff]  }
  0x3c   :  { %1901 = vmatpush1.bf16.msra.mxu0 %v2569_v7  ;;  %1690 = vmatprep.subr.bf16.mxu1 %v2570_v8  ;;  %v2587_v19 = vld [vmem:[#allocation2 + $0x440] ss:$8 sps:$4 sm:$0xff]   ;;  %v2590_v21 = vld [vmem:[#allocation2 + $0x454] ss:$8 sps:$4 sm:$0xff]   ;;  %v2592_v22 = vld [vmem:[#allocation2 + $0x50] ss:$8 sps:$4 sm:$0xff]  }
  0x3d   :  { %1902 = vmatprep.subr.bf16.mxu0 %v2572_v9  ;;  %v2593_v23 = vld [vmem:[#allocation2 + $0x450] ss:$8 sps:$4 sm:$0xff]   ;;  %v2594_v24 = vld [vmem:[#allocation2 + $0x64] ss:$8 sps:$4 sm:$0xff]   ;;  %v2598_v26 = vld [vmem:[#allocation2 + $0x60] ss:$8 sps:$4 sm:$0xff]  }
  0x3e   :  { %v2596_v25 = vld [vmem:[#allocation2 + $0x464] ss:$8 sps:$4 sm:$0xff]   ;;  %v2599_v27 = vld [vmem:[#allocation2 + $0x460] ss:$8 sps:$4 sm:$0xff]   ;;  %v2600_v28 = vld [vmem:[#allocation2 + $0x74] ss:$8 sps:$4 sm:$0xff]  }
  0x3f   :  { %1691 = vmatpush1.bf16.msra.mxu1 %v2574_v10  ;;  %v2602_v29 = vld [vmem:[#allocation2 + $0x474] ss:$8 sps:$4 sm:$0xff]   ;;  %v2604_v30 = vld [vmem:[#allocation2 + $0x70] ss:$8 sps:$4 sm:$0xff]   ;;  %v2606_v32 = vld [vmem:[#allocation2 + $0x84] ss:$8 sps:$4 sm:$0xff]  }
  0x40   :  { %1903 = vmatpush1.bf16.msra.mxu0 %v2575_v11  ;;  %1692 = vmatprep.subr.bf16.mxu1 %v2576_v12  ;;  %v2605_v31 = vld [vmem:[#allocation2 + $0x470] ss:$8 sps:$4 sm:$0xff]   ;;  %v2608_v33 = vld [vmem:[#allocation2 + $0x484] ss:$8 sps:$4 sm:$0xff]   ;;  %v2610_v34 = vld [vmem:[#allocation2 + $0x80] ss:$8 sps:$4 sm:$0xff]  }
  0x41   :  { %1904 = vmatprep.subr.bf16.mxu0 %v2578_v13  ;;  %v2611_v35 = vld [vmem:[#allocation2 + $0x480] ss:$8 sps:$4 sm:$0xff]   ;;  %v2612_v36 = vld [vmem:[#allocation2 + $0x94] ss:$8 sps:$4 sm:$0xff]   ;;  %v2616_v38 = vld [vmem:[#allocation2 + $0x90] ss:$8 sps:$4 sm:$0xff]  }
  0x42   :  { %v2614_v37 = vld [vmem:[#allocation2 + $0x494] ss:$8 sps:$4 sm:$0xff]   ;;  %v2617_v39 = vld [vmem:[#allocation2 + $0x490] ss:$8 sps:$4 sm:$0xff]   ;;  %v2618_v40 = vld [vmem:[#allocation2 + $0xa4] ss:$8 sps:$4 sm:$0xff]  }
  0x43   :  { %1693 = vmatpush1.bf16.msra.mxu1 %v2580_v14  ;;  %v2620_v41 = vld [vmem:[#allocation2 + $0x4a4] ss:$8 sps:$4 sm:$0xff]   ;;  %v2622_v42 = vld [vmem:[#allocation2 + $0xa0] ss:$8 sps:$4 sm:$0xff]   ;;  %v2624_v44 = vld [vmem:[#allocation2 + $0xb4] ss:$8 sps:$4 sm:$0xff]  }
  0x44   :  { %1905 = vmatpush1.bf16.msra.mxu0 %v2581_v15  ;;  %1694 = vmatprep.subr.bf16.mxu1 %v2582_v16  ;;  %v2623_v43 = vld [vmem:[#allocation2 + $0x4a0] ss:$8 sps:$4 sm:$0xff]   ;;  %v2626_v45 = vld [vmem:[#allocation2 + $0x4b4] ss:$8 sps:$4 sm:$0xff]   ;;  %v2628_v46 = vld [vmem:[#allocation2 + $0xb0] ss:$8 sps:$4 sm:$0xff]  }
  0x45   :  { %1906 = vmatprep.subr.bf16.mxu0 %v2584_v17  ;;  %v2629_v47 = vld [vmem:[#allocation2 + $0x4b0] ss:$8 sps:$4 sm:$0xff]   ;;  %v55_v48 = vld [vmem:[%s3305_s0 + $0x8] sm:$0xff]  ;;  %v2636_v58 = vld [vmem:[#allocation2 + $0xd4] ss:$8 sps:$4 sm:$0xff]  }
  0x46   :  { %v71_v49 = vld [vmem:[%s3305_s0 + $0x88] sm:$0xff]  ;;  %v2638_v59 = vld [vmem:[#allocation2 + $0x4d4] ss:$8 sps:$4 sm:$0xff]   ;;  %v2640_v60 = vld [vmem:[#allocation2 + $0xd0] ss:$8 sps:$4 sm:$0xff]  }
  0x47   :  { %1695 = vmatpush1.bf16.msra.mxu1 %v2586_v18  ;;  %v2630_v50 = vld [vmem:[#allocation2 + $0xc4] ss:$8 sps:$4 sm:$0xff]   ;;  %v119_v52 = vpack.c.bf16 %v71_v49, %v55_v48  ;;  %v2634_v56 = vld [vmem:[#allocation2 + $0xc0] ss:$8 sps:$4 sm:$0xff]   ;;  %v2641_v61 = vld [vmem:[#allocation2 + $0x4d0] ss:$8 sps:$4 sm:$0xff]  }
  0x48   :  { %1907 = vmatpush1.bf16.msra.mxu0 %v2587_v19  ;;  %1696 = vmatprep.subr.bf16.mxu1 %v2588_v20  ;;  %v2632_v51 = vld [vmem:[#allocation2 + $0x4c4] ss:$8 sps:$4 sm:$0xff]   ;;  %v2635_v57 = vld [vmem:[#allocation2 + $0x4c0] ss:$8 sps:$4 sm:$0xff]   ;;  %v2648_v2 = vld [vmem:[#allocation2 + $0xf4] ss:$8 sps:$4 sm:$0xff]  }
  0x49   :  { %1908 = vmatprep.subr.bf16.mxu0 %v2590_v21  ;;  %v63_v53 = vld [vmem:[%s3305_s0 + $0x48] sm:$0xff]  ;;  %1718 = vmatprep.mubr.bf16.mxu1 %v119_v52  ;;  %v2650_v3 = vld [vmem:[#allocation2 + $0x4f4] ss:$8 sps:$4 sm:$0xff]   ;;  %v2652_v4 = vld [vmem:[#allocation2 + $0xf0] ss:$8 sps:$4 sm:$0xff]  }
  0x4a   :  { %v79_v54 = vld [vmem:[%s3305_s0 + $0xc8] sm:$0xff]  ;;  %v2653_v5 = vld [vmem:[#allocation2 + $0x4f0] ss:$8 sps:$4 sm:$0xff]   ;;  %v54_v6 = vld [vmem:[%s3305_s0] sm:$0xff] }
  0x4b   :  { %1697 = vmatpush1.bf16.msra.mxu1 %v2592_v22  ;;  %v127_v55 = vpack.c.bf16 %v79_v54, %v63_v53  ;;  %v2642_v62 = vld [vmem:[#allocation2 + $0xe4] ss:$8 sps:$4 sm:$0xff]   ;;  %v2646_v0 = vld [vmem:[#allocation2 + $0xe0] ss:$8 sps:$4 sm:$0xff]   ;;  %v2662_v16 = vld [vmem:[#allocation2 + $0x114] ss:$8 sps:$4 sm:$0xff]  }
  0x4c   :  { %1909 = vmatpush1.bf16.msra.mxu0 %v2593_v23  ;;  %1698 = vmatprep.subr.bf16.mxu1 %v2594_v24  ;;  %v2644_v63 = vld [vmem:[#allocation2 + $0x4e4] ss:$8 sps:$4 sm:$0xff]   ;;  %v2647_v1 = vld [vmem:[#allocation2 + $0x4e0] ss:$8 sps:$4 sm:$0xff]   ;;  %v2665_v17 = vld [vmem:[#allocation2 + $0x514] ss:$8 sps:$4 sm:$0xff]  }
  0x4d   :  { %1910 = vmatprep.subr.bf16.mxu0 %v2596_v25  ;;  %1930 = vmatprep.mubr.bf16.mxu0 %v127_v55  ;;  %v2656_v7 = vld [vmem:[#allocation2 + $0x104] ss:$8 sps:$4 sm:$0xff]   ;;  %v2654_v12 = vld [vmem:[#allocation2 + $0x100] ss:$8 sps:$4 sm:$0xff]   ;;  %v2660_v18 = vld [vmem:[#allocation2 + $0x110] ss:$8 sps:$4 sm:$0xff]  }
  0x4e   :  { %v70_v8 = vld [vmem:[%s3305_s0 + $0x80] sm:$0xff]  ;;  %v2663_v19 = vld [vmem:[#allocation2 + $0x510] ss:$8 sps:$4 sm:$0xff]   ;;  %v2674_v24 = vld [vmem:[#allocation2 + $0x134] ss:$8 sps:$4 sm:$0xff]  }
  0x4f   :  { %1699 = vmatpush1.bf16.msra.mxu1 %v2598_v26  ;;  %v62_v9 = vld [vmem:[%s3305_s0 + $0x40] sm:$0xff]  ;;  %v118_v14 = vpack.c.bf16 %v70_v8, %v54_v6  ;;  %v2677_v25 = vld [vmem:[#allocation2 + $0x534] ss:$8 sps:$4 sm:$0xff]   ;;  %v2672_v26 = vld [vmem:[#allocation2 + $0x130] ss:$8 sps:$4 sm:$0xff]  }
  0x50   :  { %1911 = vmatpush1.bf16.msra.mxu0 %v2599_v27  ;;  %1700 = vmatprep.subr.bf16.mxu1 %v2600_v28  ;;  %v78_v10 = vld [vmem:[%s3305_s0 + $0xc0] sm:$0xff]  ;;  %v2675_v27 = vld [vmem:[#allocation2 + $0x530] ss:$8 sps:$4 sm:$0xff]   ;;  %v2701_v53 = vld [vmem:[#allocation2 + $0x574] ss:$8 sps:$4 sm:$0xff]  }
  0x51   :  { %1912 = vmatprep.subr.bf16.mxu0 %v2602_v29  ;;  %v2659_v11 = vld [vmem:[#allocation2 + $0x504] ss:$8 sps:$4 sm:$0xff]   ;;  %v2657_v13 = vld [vmem:[#allocation2 + $0x500] ss:$8 sps:$4 sm:$0xff]   ;;  %v126_v15 = vpack.c.bf16 %v78_v10, %v62_v9  ;;  %v2696_v54 = vld [vmem:[#allocation2 + $0x170] ss:$8 sps:$4 sm:$0xff]  }
  0x52   :  { %v2668_v20 = vld [vmem:[#allocation2 + $0x124] ss:$8 sps:$4 sm:$0xff]   ;;  %v2666_v22 = vld [vmem:[#allocation2 + $0x120] ss:$8 sps:$4 sm:$0xff]   ;;  %v2699_v55 = vld [vmem:[#allocation2 + $0x570] ss:$8 sps:$4 sm:$0xff]  }
  0x53   :  { %1701 = vmatpush1.bf16.msra.mxu1 %v2604_v30  ;;  %v2671_v21 = vld [vmem:[#allocation2 + $0x524] ss:$8 sps:$4 sm:$0xff]   ;;  %v2669_v23 = vld [vmem:[#allocation2 + $0x520] ss:$8 sps:$4 sm:$0xff]   ;;  %v2722_v10 = vld [vmem:[#allocation2 + $0x1b4] ss:$8 sps:$4 sm:$0xff]  }
  0x54   :  { %1913 = vmatpush1.bf16.msra.mxu0 %v2605_v31  ;;  %1702 = vmatprep.subr.bf16.mxu1 %v2606_v32  ;;  %v2680_v28 = vld [vmem:[#allocation2 + $0x144] ss:$8 sps:$4 sm:$0xff]   ;;  %v2678_v30 = vld [vmem:[#allocation2 + $0x140] ss:$8 sps:$4 sm:$0xff]   ;;  %v2686_v32 = vld [vmem:[#allocation2 + $0x154] ss:$8 sps:$4 sm:$0xff]  }
  0x55   :  { %1914 = vmatprep.subr.bf16.mxu0 %v2608_v33  ;;  %v2683_v29 = vld [vmem:[#allocation2 + $0x544] ss:$8 sps:$4 sm:$0xff]   ;;  %v2681_v31 = vld [vmem:[#allocation2 + $0x540] ss:$8 sps:$4 sm:$0xff]   ;;  %v2689_v33 = vld [vmem:[#allocation2 + $0x554] ss:$8 sps:$4 sm:$0xff]  }
  0x56   :  { %v94_v48 = vld [vmem:[%s3305_s0 + $0x140] sm:$0xff] }
  0x57   :  { %1703 = vmatpush1.bf16.msra.mxu1 %v2610_v34  ;;  %v2684_v34 = vld [vmem:[#allocation2 + $0x150] ss:$8 sps:$4 sm:$0xff]   ;;  %v110_v49 = vld [vmem:[%s3305_s0 + $0x1c0] sm:$0xff] }
  0x58   :  { %1915 = vmatpush1.bf16.msra.mxu0 %v2611_v35  ;;  %1704 = vmatprep.subr.bf16.mxu1 %v2612_v36  ;;  %v2687_v35 = vld [vmem:[#allocation2 + $0x550] ss:$8 sps:$4 sm:$0xff]   ;;  %v87_v36 = vld [vmem:[%s3305_s0 + $0x108] sm:$0xff]  ;;  %v142_v52 = vpack.c.bf16 %v110_v49, %v94_v48 }
  0x59   :  { %1916 = vmatprep.subr.bf16.mxu0 %v2614_v37  ;;  %v103_v37 = vld [vmem:[%s3305_s0 + $0x188] sm:$0xff]  ;;  %v97_v49 = vld [vmem:[%s3305_s0 + $0x158] sm:$0xff] }
  0x5a   :  { %v2716_v6 = vld [vmem:[#allocation2 + $0x1a4] ss:$8 sps:$4 sm:$0xff]   ;;  %v2714_v8 = vld [vmem:[#allocation2 + $0x1a0] ss:$8 sps:$4 sm:$0xff]  }
  0x5b   :  { %1705 = vmatpush1.bf16.msra.mxu1 %v2616_v38  ;;  %v2692_v38 = vld [vmem:[#allocation2 + $0x164] ss:$8 sps:$4 sm:$0xff]   ;;  %v2717_v9 = vld [vmem:[#allocation2 + $0x5a0] ss:$8 sps:$4 sm:$0xff]  }
  0x5c   :  { %1917 = vmatpush1.bf16.msra.mxu0 %v2617_v39  ;;  %1706 = vmatprep.subr.bf16.mxu1 %v2618_v40  ;;  %v2695_v39 = vld [vmem:[#allocation2 + $0x564] ss:$8 sps:$4 sm:$0xff]   ;;  %v135_v40 = vpack.c.bf16 %v103_v37, %v87_v36  ;;  %v2750_v36 = vld [vmem:[#allocation2 + $0x200] ss:$8 sps:$4 sm:$0xff]  }
  0x5d   :  { %1918 = vmatprep.subr.bf16.mxu0 %v2620_v41  ;;  %v95_v41 = vld [vmem:[%s3305_s0 + $0x148] sm:$0xff] }
  0x5e   :  { %v2753_v37 = vld [vmem:[#allocation2 + $0x600] ss:$8 sps:$4 sm:$0xff]  }
  0x5f   :  { %1707 = vmatpush1.bf16.msra.mxu1 %v2622_v42  ;;  %v111_v42 = vld [vmem:[%s3305_s0 + $0x1c8] sm:$0xff] }
  0x60   :  { %1919 = vmatpush1.bf16.msra.mxu0 %v2623_v43  ;;  %1708 = vmatprep.subr.bf16.mxu1 %v2624_v44  ;;  %v2690_v43 = vld [vmem:[#allocation2 + $0x160] ss:$8 sps:$4 sm:$0xff]  }
  0x61   :  { %1920 = vmatprep.subr.bf16.mxu0 %v2626_v45  ;;  %v2693_v44 = vld [vmem:[#allocation2 + $0x560] ss:$8 sps:$4 sm:$0xff]   ;;  %v143_v45 = vpack.c.bf16 %v111_v42, %v95_v41  ;;  %v2761_v41 = vld [vmem:[#allocation2 + $0x614] ss:$8 sps:$4 sm:$0xff]   ;;  %v2756_v42 = vld [vmem:[#allocation2 + $0x210] ss:$8 sps:$4 sm:$0xff]  }
  0x63   :  { %1709 = vmatpush1.bf16.msra.mxu1 %v2628_v46  ;;  %v86_v46 = vld [vmem:[%s3305_s0 + $0x100] sm:$0xff] }
  0x64   :  { %1921 = vmatpush1.bf16.msra.mxu0 %v2629_v47  ;;  %1710 = vmatprep.subr.bf16.mxu1 %v2630_v50  ;;  %v102_v47 = vld [vmem:[%s3305_s0 + $0x180] sm:$0xff]  ;;  %v2698_v50 = vld [vmem:[#allocation2 + $0x174] ss:$8 sps:$4 sm:$0xff]  }
  0x65   :  { %1922 = vmatprep.subr.bf16.mxu0 %v2632_v51  ;;  %v134_v51 = vpack.c.bf16 %v102_v47, %v86_v46  ;;  %v2764_v46 = vld [vmem:[#allocation2 + $0x224] ss:$8 sps:$4 sm:$0xff]  }
  0x66   :  { %v2767_v47 = vld [vmem:[#allocation2 + $0x624] ss:$8 sps:$4 sm:$0xff]  }
  0x67   :  { %1711 = vmatpush1.bf16.msra.mxu1 %v2634_v56  ;;  %v57_v56 = vld [vmem:[%s3305_s0 + $0x18] sm:$0xff] }
  0x68   :  { %1923 = vmatpush1.bf16.msra.mxu0 %v2635_v57  ;;  %1712 = vmatprep.subr.bf16.mxu1 %v2636_v58  ;;  %v73_v57 = vld [vmem:[%s3305_s0 + $0x98] sm:$0xff]  ;;  %v2704_v58 = vld [vmem:[#allocation2 + $0x184] ss:$8 sps:$4 sm:$0xff]  }
  0x69   :  { %1924 = vmatprep.subr.bf16.mxu0 %v2638_v59  ;;  %v2707_v59 = vld [vmem:[#allocation2 + $0x584] ss:$8 sps:$4 sm:$0xff]  }
  0x6b   :  { %1713 = vmatpush1.bf16.msra.mxu1 %v2640_v60  ;;  %v121_v60 = vpack.c.bf16 %v73_v57, %v57_v56  ;;  %v96_v56 = vld [vmem:[%s3305_s0 + $0x150] sm:$0xff] }
  0x6c   :  { %1925 = vmatpush1.bf16.msra.mxu0 %v2641_v61  ;;  %1714 = vmatprep.subr.bf16.mxu1 %v2642_v62  ;;  %v65_v61 = vld [vmem:[%s3305_s0 + $0x58] sm:$0xff]  ;;  %v112_v57 = vld [vmem:[%s3305_s0 + $0x1d0] sm:$0xff] }
  0x6d   :  { %1926 = vmatprep.subr.bf16.mxu0 %v2644_v63  ;;  %v81_v62 = vld [vmem:[%s3305_s0 + $0xd8] sm:$0xff] }
  0x6e   :  { %v129_v63 = vpack.c.bf16 %v81_v62, %v65_v61  ;;  %v2773_v61 = vld [vmem:[#allocation2 + $0x634] ss:$8 sps:$4 sm:$0xff]   ;;  %v2768_v62 = vld [vmem:[#allocation2 + $0x230] ss:$8 sps:$4 sm:$0xff]  }
  0x6f   :  { %1715 = vmatpush1.bf16.msra.mxu1 %v2646_v0  ;;  %v2702_v0 = vld [vmem:[#allocation2 + $0x180] ss:$8 sps:$4 sm:$0xff]  }
  0x70   :  { %1927 = vmatpush1.bf16.msra.mxu0 %v2647_v1  ;;  %1716 = vmatprep.subr.bf16.mxu1 %v2648_v2  ;;  %v2705_v1 = vld [vmem:[#allocation2 + $0x580] ss:$8 sps:$4 sm:$0xff]   ;;  %v2710_v2 = vld [vmem:[#allocation2 + $0x194] ss:$8 sps:$4 sm:$0xff]  }
  0x71   :  { %1928 = vmatprep.subr.bf16.mxu0 %v2650_v3  ;;  %v2713_v3 = vld [vmem:[#allocation2 + $0x594] ss:$8 sps:$4 sm:$0xff]  }
  0x73   :  { %1717 = vmatpush1.bf16.msra.mxu1 %v2652_v4  ;;  %v2708_v4 = vld [vmem:[#allocation2 + $0x190] ss:$8 sps:$4 sm:$0xff]  }
  0x74   :  { %1929 = vmatpush1.bf16.msra.mxu0 %v2653_v5  ;;  %1739 = vmatprep.subr.bf16.mxu1 %v2656_v7  ;;  %v2711_v5 = vld [vmem:[#allocation2 + $0x590] ss:$8 sps:$4 sm:$0xff]   ;;  %v2719_v7 = vld [vmem:[#allocation2 + $0x5a4] ss:$8 sps:$4 sm:$0xff]  }
  0x75   :  { %1951 = vmatprep.subr.bf16.mxu0 %v2659_v11  ;;  %v2725_v11 = vld [vmem:[#allocation2 + $0x5b4] ss:$8 sps:$4 sm:$0xff]  }
  0x76   :  { %1719 = vmatmul.mubr.bf16.vlgmr.msra.gmra.mrb[0].mxu1 %v118_v14  ;;  %v2728_v14 = vld [vmem:[#allocation2 + $0x1c4] ss:$8 sps:$4 sm:$0xff]  }
  0x77   :  { %1931 = vmatmul.mubr.bf16.vlgmr.msra.gmra.mrb[0].mxu0 %v126_v15  ;;  %1740 = vmatpush1.bf16.msra.mxu1 %v2654_v12  ;;  %v2720_v12 = vld [vmem:[#allocation2 + $0x1b0] ss:$8 sps:$4 sm:$0xff]   ;;  %v2731_v15 = vld [vmem:[#allocation2 + $0x5c4] ss:$8 sps:$4 sm:$0xff]  }
  0x78   :  { %1952 = vmatpush1.bf16.msra.mxu0 %v2657_v13  ;;  %1741 = vmatprep.subr.bf16.mxu1 %v2662_v16  ;;  %v2723_v13 = vld [vmem:[#allocation2 + $0x5b0] ss:$8 sps:$4 sm:$0xff]   ;;  %v2726_v16 = vld [vmem:[#allocation2 + $0x1c0] ss:$8 sps:$4 sm:$0xff]  }
  0x79   :  { %1953 = vmatprep.subr.bf16.mxu0 %v2665_v17  ;;  %1728 = vmatprep.mubr.bf16.mxu1 %v135_v40  ;;  %v2729_v17 = vld [vmem:[#allocation2 + $0x5c0] ss:$8 sps:$4 sm:$0xff]   ;;  %v2758_v40 = vld [vmem:[#allocation2 + $0x214] ss:$8 sps:$4 sm:$0xff]  }
  0x7a   :  { %1940 = vmatprep.mubr.bf16.mxu0 %v143_v45  ;;  %v105_v45 = vld [vmem:[%s3305_s0 + $0x198] sm:$0xff] }
  0x7b   :  { %1742 = vmatpush1.bf16.msra.mxu1 %v2660_v18  ;;  %v2734_v18 = vld [vmem:[#allocation2 + $0x1d4] ss:$8 sps:$4 sm:$0xff]  }
  0x7c   :  { %1954 = vmatpush1.bf16.msra.mxu0 %v2663_v19  ;;  %1743 = vmatprep.subr.bf16.mxu1 %v2668_v20  ;;  %v2737_v19 = vld [vmem:[#allocation2 + $0x5d4] ss:$8 sps:$4 sm:$0xff]   ;;  %v2732_v20 = vld [vmem:[#allocation2 + $0x1d0] ss:$8 sps:$4 sm:$0xff]  }
  0x7d   :  { %1955 = vmatprep.subr.bf16.mxu0 %v2671_v21  ;;  %v2735_v21 = vld [vmem:[#allocation2 + $0x5d0] ss:$8 sps:$4 sm:$0xff]  }
  0x7e   :  { %1729 = vmatmul.mubr.bf16.gmra.mrb[4].mxu1 %v134_v51  ;;  %v2762_v51 = vld [vmem:[#allocation2 + $0x220] ss:$8 sps:$4 sm:$0xff]  }
  0x7f   :  { %1744 = vmatpush1.bf16.msra.mxu1 %v2666_v22  ;;  %1941 = vmatmul.mubr.bf16.gmra.mrb[4].mxu0 %v142_v52  ;;  %v2740_v22 = vld [vmem:[#allocation2 + $0x1e4] ss:$8 sps:$4 sm:$0xff]   ;;  %v2765_v52 = vld [vmem:[#allocation2 + $0x620] ss:$8 sps:$4 sm:$0xff]  }
  0x80   :  { %1956 = vmatpush1.bf16.msra.mxu0 %v2669_v23  ;;  %1745 = vmatprep.subr.bf16.mxu1 %v2674_v24  ;;  %v2743_v23 = vld [vmem:[#allocation2 + $0x5e4] ss:$8 sps:$4 sm:$0xff]   ;;  %v2738_v24 = vld [vmem:[#allocation2 + $0x1e0] ss:$8 sps:$4 sm:$0xff]  }
  0x81   :  { %1957 = vmatprep.subr.bf16.mxu0 %v2677_v25  ;;  %1771 = vmatprep.mubr.bf16.mxu1 %v121_v60  ;;  %v2741_v25 = vld [vmem:[#allocation2 + $0x5e0] ss:$8 sps:$4 sm:$0xff]   ;;  %v144_v60 = vpack.c.bf16 %v112_v57, %v96_v56 }
  0x82   :  { %1983 = vmatprep.mubr.bf16.mxu0 %v129_v63  ;;  %v2771_v63 = vld [vmem:[#allocation2 + $0x630] ss:$8 sps:$4 sm:$0xff]   ;;  %v66_v56 = vld [vmem:[%s3305_s0 + $0x60] sm:$0xff] }
  0x83   :  { %1746 = vmatpush1.bf16.msra.mxu1 %v2672_v26  ;;  %v2746_v26 = vld [vmem:[#allocation2 + $0x1f4] ss:$8 sps:$4 sm:$0xff]   ;;  %v82_v57 = vld [vmem:[%s3305_s0 + $0xe0] sm:$0xff] }
  0x84   :  { %1958 = vmatpush1.bf16.msra.mxu0 %v2675_v27  ;;  %1747 = vmatprep.subr.bf16.mxu1 %v2680_v28  ;;  %v2749_v27 = vld [vmem:[#allocation2 + $0x5f4] ss:$8 sps:$4 sm:$0xff]   ;;  %v2744_v28 = vld [vmem:[#allocation2 + $0x1f0] ss:$8 sps:$4 sm:$0xff]  }
  0x85   :  { %1959 = vmatprep.subr.bf16.mxu0 %v2683_v29  ;;  %v2747_v29 = vld [vmem:[#allocation2 + $0x5f0] ss:$8 sps:$4 sm:$0xff]  }
  0x87   :  { %1748 = vmatpush1.bf16.msra.mxu1 %v2678_v30  ;;  %v56_v30 = vld [vmem:[%s3305_s0 + $0x10] sm:$0xff] }
  0x88   :  { %1960 = vmatpush1.bf16.msra.mxu0 %v2681_v31  ;;  %1749 = vmatprep.subr.bf16.mxu1 %v2686_v32  ;;  %v2752_v31 = vld [vmem:[#allocation2 + $0x204] ss:$8 sps:$4 sm:$0xff]   ;;  %v72_v32 = vld [vmem:[%s3305_s0 + $0x90] sm:$0xff] }
  0x89   :  { %1961 = vmatprep.subr.bf16.mxu0 %v2689_v33  ;;  %v64_v33 = vld [vmem:[%s3305_s0 + $0x50] sm:$0xff] }
  0x8b   :  { %1750 = vmatpush1.bf16.msra.mxu1 %v2684_v34  ;;  %v80_v34 = vld [vmem:[%s3305_s0 + $0xd0] sm:$0xff] }
  0x8c   :  { %1962 = vmatpush1.bf16.msra.mxu0 %v2687_v35  ;;  %1751 = vmatprep.subr.bf16.mxu1 %v2692_v38  ;;  %v2755_v35 = vld [vmem:[#allocation2 + $0x604] ss:$8 sps:$4 sm:$0xff]   ;;  %v120_v38 = vpack.c.bf16 %v72_v32, %v56_v30  ;;  %v2810_v32 = vld [vmem:[#allocation2 + $0x2a0] ss:$8 sps:$4 sm:$0xff]  }
  0x8d   :  { %1963 = vmatprep.subr.bf16.mxu0 %v2695_v39  ;;  %v128_v39 = vpack.c.bf16 %v80_v34, %v64_v33  ;;  %v2812_v30 = vld [vmem:[#allocation2 + $0x2a4] ss:$8 sps:$4 sm:$0xff]   ;;  %v2813_v33 = vld [vmem:[#allocation2 + $0x6a0] ss:$8 sps:$4 sm:$0xff]   ;;  %v2818_v34 = vld [vmem:[#allocation2 + $0x2b4] ss:$8 sps:$4 sm:$0xff]  }
  0x8f   :  { %1752 = vmatpush1.bf16.msra.mxu1 %v2690_v43  ;;  %v2759_v43 = vld [vmem:[#allocation2 + $0x610] ss:$8 sps:$4 sm:$0xff]  }
  0x90   :  { %1964 = vmatpush1.bf16.msra.mxu0 %v2693_v44  ;;  %1753 = vmatprep.subr.bf16.mxu1 %v2698_v50  ;;  %v89_v44 = vld [vmem:[%s3305_s0 + $0x118] sm:$0xff] }
  0x91   :  { %1965 = vmatprep.subr.bf16.mxu0 %v2701_v53  ;;  %v137_v48 = vpack.c.bf16 %v105_v45, %v89_v44  ;;  %v113_v50 = vld [vmem:[%s3305_s0 + $0x1d8] sm:$0xff] }
  0x92   :  { %v145_v53 = vpack.c.bf16 %v113_v50, %v97_v49  ;;  %v2828_v44 = vld [vmem:[#allocation2 + $0x2d0] ss:$8 sps:$4 sm:$0xff]   ;;  %v2837_v49 = vld [vmem:[#allocation2 + $0x6e0] ss:$8 sps:$4 sm:$0xff]   ;;  %v2842_v50 = vld [vmem:[#allocation2 + $0x2f4] ss:$8 sps:$4 sm:$0xff]  }
  0x93   :  { %1754 = vmatpush1.bf16.msra.mxu1 %v2696_v54  ;;  %v88_v54 = vld [vmem:[%s3305_s0 + $0x110] sm:$0xff] }
  0x94   :  { %1966 = vmatpush1.bf16.msra.mxu0 %v2699_v55  ;;  %1755 = vmatprep.subr.bf16.mxu1 %v2704_v58  ;;  %v104_v55 = vld [vmem:[%s3305_s0 + $0x190] sm:$0xff] }
  0x95   :  { %1967 = vmatprep.subr.bf16.mxu0 %v2707_v59  ;;  %v2770_v58 = vld [vmem:[#allocation2 + $0x234] ss:$8 sps:$4 sm:$0xff]   ;;  %v136_v59 = vpack.c.bf16 %v104_v55, %v88_v54  ;;  %v2831_v45 = vld [vmem:[#allocation2 + $0x6d0] ss:$8 sps:$4 sm:$0xff]   ;;  %v58_v54 = vld [vmem:[%s3305_s0 + $0x20] sm:$0xff] }
  0x96   :  { %v74_v55 = vld [vmem:[%s3305_s0 + $0xa0] sm:$0xff] }
  0x97   :  { %1756 = vmatpush1.bf16.msra.mxu1 %v2702_v0  ;;  %v59_v0 = vld [vmem:[%s3305_s0 + $0x28] sm:$0xff] }
  0x98   :  { %1968 = vmatpush1.bf16.msra.mxu0 %v2705_v1  ;;  %1757 = vmatprep.subr.bf16.mxu1 %v2710_v2  ;;  %v75_v1 = vld [vmem:[%s3305_s0 + $0xa8] sm:$0xff] }
  0x99   :  { %1969 = vmatprep.subr.bf16.mxu0 %v2713_v3  ;;  %v2776_v2 = vld [vmem:[#allocation2 + $0x244] ss:$8 sps:$4 sm:$0xff]  }
  0x9a   :  { %v2779_v3 = vld [vmem:[#allocation2 + $0x644] ss:$8 sps:$4 sm:$0xff]  }
  0x9b   :  { %1758 = vmatpush1.bf16.msra.mxu1 %v2708_v4  ;;  %v123_v4 = vpack.c.bf16 %v75_v1, %v59_v0  ;;  %v99_v0 = vld [vmem:[%s3305_s0 + $0x168] sm:$0xff] }
  0x9c   :  { %1970 = vmatpush1.bf16.msra.mxu0 %v2711_v5  ;;  %1759 = vmatprep.subr.bf16.mxu1 %v2716_v6  ;;  %v67_v5 = vld [vmem:[%s3305_s0 + $0x68] sm:$0xff] }
  0x9d   :  { %1971 = vmatprep.subr.bf16.mxu0 %v2719_v7  ;;  %v83_v6 = vld [vmem:[%s3305_s0 + $0xe8] sm:$0xff] }
  0x9e   :  { %v131_v7 = vpack.c.bf16 %v83_v6, %v67_v5  ;;  %v115_v1 = vld [vmem:[%s3305_s0 + $0x1e8] sm:$0xff]  ;;  %v2857_v5 = vld [vmem:[#allocation2 + $0x714] ss:$8 sps:$4 sm:$0xff]  }
  0x9f   :  { %1760 = vmatpush1.bf16.msra.mxu1 %v2714_v8  ;;  %v2774_v8 = vld [vmem:[#allocation2 + $0x240] ss:$8 sps:$4 sm:$0xff]  }
  0xa0   :  { %1972 = vmatpush1.bf16.msra.mxu0 %v2717_v9  ;;  %1761 = vmatprep.subr.bf16.mxu1 %v2722_v10  ;;  %v2777_v9 = vld [vmem:[#allocation2 + $0x640] ss:$8 sps:$4 sm:$0xff]   ;;  %v2782_v10 = vld [vmem:[#allocation2 + $0x254] ss:$8 sps:$4 sm:$0xff]  }
  0xa1   :  { %1973 = vmatprep.subr.bf16.mxu0 %v2725_v11  ;;  %v2785_v11 = vld [vmem:[#allocation2 + $0x654] ss:$8 sps:$4 sm:$0xff]  }
  0xa3   :  { %1762 = vmatpush1.bf16.msra.mxu1 %v2720_v12  ;;  %v2780_v12 = vld [vmem:[#allocation2 + $0x250] ss:$8 sps:$4 sm:$0xff]  }
  0xa4   :  { %1974 = vmatpush1.bf16.msra.mxu0 %v2723_v13  ;;  %1763 = vmatprep.subr.bf16.mxu1 %v2728_v14  ;;  %v2783_v13 = vld [vmem:[#allocation2 + $0x650] ss:$8 sps:$4 sm:$0xff]   ;;  %v2788_v14 = vld [vmem:[#allocation2 + $0x264] ss:$8 sps:$4 sm:$0xff]  }
  0xa5   :  { %1975 = vmatprep.subr.bf16.mxu0 %v2731_v15  ;;  %v2791_v15 = vld [vmem:[#allocation2 + $0x664] ss:$8 sps:$4 sm:$0xff]  }
  0xa7   :  { %1764 = vmatpush1.bf16.msra.mxu1 %v2726_v16  ;;  %v2786_v16 = vld [vmem:[#allocation2 + $0x260] ss:$8 sps:$4 sm:$0xff]  }
  0xa8   :  { %1976 = vmatpush1.bf16.msra.mxu0 %v2729_v17  ;;  %1765 = vmatprep.subr.bf16.mxu1 %v2734_v18  ;;  %v2789_v17 = vld [vmem:[#allocation2 + $0x660] ss:$8 sps:$4 sm:$0xff]   ;;  %v2794_v18 = vld [vmem:[#allocation2 + $0x274] ss:$8 sps:$4 sm:$0xff]  }
  0xa9   :  { %1977 = vmatprep.subr.bf16.mxu0 %v2737_v19  ;;  %v2797_v19 = vld [vmem:[#allocation2 + $0x674] ss:$8 sps:$4 sm:$0xff]  }
  0xab   :  { %1766 = vmatpush1.bf16.msra.mxu1 %v2732_v20  ;;  %v2792_v20 = vld [vmem:[#allocation2 + $0x270] ss:$8 sps:$4 sm:$0xff]  }
  0xac   :  { %1978 = vmatpush1.bf16.msra.mxu0 %v2735_v21  ;;  %1767 = vmatprep.subr.bf16.mxu1 %v2740_v22  ;;  %v2795_v21 = vld [vmem:[#allocation2 + $0x670] ss:$8 sps:$4 sm:$0xff]   ;;  %v2800_v22 = vld [vmem:[#allocation2 + $0x284] ss:$8 sps:$4 sm:$0xff]  }
  0xad   :  { %1979 = vmatprep.subr.bf16.mxu0 %v2743_v23  ;;  %v2803_v23 = vld [vmem:[#allocation2 + $0x684] ss:$8 sps:$4 sm:$0xff]  }
  0xaf   :  { %1768 = vmatpush1.bf16.msra.mxu1 %v2738_v24  ;;  %v2798_v24 = vld [vmem:[#allocation2 + $0x280] ss:$8 sps:$4 sm:$0xff]  }
  0xb0   :  { %1980 = vmatpush1.bf16.msra.mxu0 %v2741_v25  ;;  %1769 = vmatprep.subr.bf16.mxu1 %v2746_v26  ;;  %v2801_v25 = vld [vmem:[#allocation2 + $0x680] ss:$8 sps:$4 sm:$0xff]   ;;  %v2806_v26 = vld [vmem:[#allocation2 + $0x294] ss:$8 sps:$4 sm:$0xff]  }
  0xb1   :  { %1981 = vmatprep.subr.bf16.mxu0 %v2749_v27  ;;  %v2809_v27 = vld [vmem:[#allocation2 + $0x694] ss:$8 sps:$4 sm:$0xff]  }
  0xb3   :  { %1770 = vmatpush1.bf16.msra.mxu1 %v2744_v28  ;;  %v2804_v28 = vld [vmem:[#allocation2 + $0x290] ss:$8 sps:$4 sm:$0xff]  }
  0xb4   :  { %1982 = vmatpush1.bf16.msra.mxu0 %v2747_v29  ;;  %1792 = vmatprep.subr.bf16.mxu1 %v2752_v31  ;;  %v2807_v29 = vld [vmem:[#allocation2 + $0x690] ss:$8 sps:$4 sm:$0xff]   ;;  %v2815_v31 = vld [vmem:[#allocation2 + $0x6a4] ss:$8 sps:$4 sm:$0xff]  }
  0xb5   :  { %2004 = vmatprep.subr.bf16.mxu0 %v2755_v35  ;;  %v2821_v35 = vld [vmem:[#allocation2 + $0x6b4] ss:$8 sps:$4 sm:$0xff]  }
  0xb6   :  { %1772 = vmatmul.mubr.bf16.vlgmr.msra.gmra.mrb[0].mxu1 %v120_v38  ;;  %v2824_v38 = vld [vmem:[#allocation2 + $0x2c4] ss:$8 sps:$4 sm:$0xff]  }
  0xb7   :  { %1984 = vmatmul.mubr.bf16.vlgmr.msra.gmra.mrb[0].mxu0 %v128_v39  ;;  %1793 = vmatpush1.bf16.msra.mxu1 %v2750_v36  ;;  %v2816_v36 = vld [vmem:[#allocation2 + $0x2b0] ss:$8 sps:$4 sm:$0xff]   ;;  %v2827_v39 = vld [vmem:[#allocation2 + $0x6c4] ss:$8 sps:$4 sm:$0xff]  }
  0xb8   :  { %2005 = vmatpush1.bf16.msra.mxu0 %v2753_v37  ;;  %1794 = vmatprep.subr.bf16.mxu1 %v2758_v40  ;;  %v2819_v37 = vld [vmem:[#allocation2 + $0x6b0] ss:$8 sps:$4 sm:$0xff]   ;;  %v2822_v40 = vld [vmem:[#allocation2 + $0x2c0] ss:$8 sps:$4 sm:$0xff]  }
  0xb9   :  { %2006 = vmatprep.subr.bf16.mxu0 %v2761_v41  ;;  %1781 = vmatprep.mubr.bf16.mxu1 %v137_v48  ;;  %v2825_v41 = vld [vmem:[#allocation2 + $0x6c0] ss:$8 sps:$4 sm:$0xff]  }
  0xba   :  { %1993 = vmatprep.mubr.bf16.mxu0 %v145_v53  ;;  %v2834_v48 = vld [vmem:[#allocation2 + $0x2e0] ss:$8 sps:$4 sm:$0xff]   ;;  %v2843_v53 = vld [vmem:[#allocation2 + $0x6f0] ss:$8 sps:$4 sm:$0xff]  }
  0xbb   :  { %1795 = vmatpush1.bf16.msra.mxu1 %v2756_v42  ;;  %v2830_v42 = vld [vmem:[#allocation2 + $0x2d4] ss:$8 sps:$4 sm:$0xff]  }
  0xbc   :  { %2007 = vmatpush1.bf16.msra.mxu0 %v2759_v43  ;;  %1796 = vmatprep.subr.bf16.mxu1 %v2764_v46  ;;  %v2833_v43 = vld [vmem:[#allocation2 + $0x6d4] ss:$8 sps:$4 sm:$0xff]   ;;  %v2836_v46 = vld [vmem:[#allocation2 + $0x2e4] ss:$8 sps:$4 sm:$0xff]  }
  0xbd   :  { %2008 = vmatprep.subr.bf16.mxu0 %v2767_v47  ;;  %v2839_v47 = vld [vmem:[#allocation2 + $0x6e4] ss:$8 sps:$4 sm:$0xff]  }
  0xbe   :  { %1782 = vmatmul.mubr.bf16.gmra.mrb[4].mxu1 %v136_v59  ;;  %v2851_v59 = vld [vmem:[#allocation2 + $0x704] ss:$8 sps:$4 sm:$0xff]  }
  0xbf   :  { %1994 = vmatmul.mubr.bf16.gmra.mrb[4].mxu0 %v144_v60  ;;  %1797 = vmatpush1.bf16.msra.mxu1 %v2762_v51  ;;  %v2845_v51 = vld [vmem:[#allocation2 + $0x6f4] ss:$8 sps:$4 sm:$0xff]   ;;  %v91_v60 = vld [vmem:[%s3305_s0 + $0x128] sm:$0xff] }
  0xc0   :  { %2009 = vmatpush1.bf16.msra.mxu0 %v2765_v52  ;;  %1798 = vmatprep.subr.bf16.mxu1 %v2770_v58  ;;  %v2840_v52 = vld [vmem:[#allocation2 + $0x2f0] ss:$8 sps:$4 sm:$0xff]   ;;  %v2848_v58 = vld [vmem:[#allocation2 + $0x304] ss:$8 sps:$4 sm:$0xff]  }
  0xc1   :  { %2010 = vmatprep.subr.bf16.mxu0 %v2773_v61  ;;  %1824 = vmatprep.mubr.bf16.mxu1 %v123_v4  ;;  %v122_v61 = vpack.c.bf16 %v74_v55, %v58_v54  ;;  %v2854_v4 = vld [vmem:[#allocation2 + $0x314] ss:$8 sps:$4 sm:$0xff]   ;;  %v2908_v54 = vld [vmem:[#allocation2 + $0x3a4] ss:$8 sps:$4 sm:$0xff]  }
  0xc2   :  { %2036 = vmatprep.mubr.bf16.mxu0 %v131_v7  ;;  %v147_v7 = vpack.c.bf16 %v115_v1, %v99_v0  ;;  %v2911_v55 = vld [vmem:[#allocation2 + $0x7a4] ss:$8 sps:$4 sm:$0xff]   ;;  %v2918_v0 = vld [vmem:[#allocation2 + $0x3c0] ss:$8 sps:$4 sm:$0xff]  }
  0xc3   :  { %1799 = vmatpush1.bf16.msra.mxu1 %v2768_v62  ;;  %v130_v62 = vpack.c.bf16 %v82_v57, %v66_v56  ;;  %v2906_v56 = vld [vmem:[#allocation2 + $0x3a0] ss:$8 sps:$4 sm:$0xff]  }
  0xc4   :  { %2011 = vmatpush1.bf16.msra.mxu0 %v2771_v63  ;;  %1800 = vmatprep.subr.bf16.mxu1 %v2776_v2  ;;  %v107_v63 = vld [vmem:[%s3305_s0 + $0x1a8] sm:$0xff] }
  0xc5   :  { %2012 = vmatprep.subr.bf16.mxu0 %v2779_v3  ;;  %v2846_v2 = vld [vmem:[#allocation2 + $0x300] ss:$8 sps:$4 sm:$0xff]   ;;  %v139_v6 = vpack.c.bf16 %v107_v63, %v91_v60  ;;  %v2912_v60 = vld [vmem:[#allocation2 + $0x3b0] ss:$8 sps:$4 sm:$0xff]   ;;  %v2923_v63 = vld [vmem:[#allocation2 + $0x7c4] ss:$8 sps:$4 sm:$0xff]  }
  0xc6   :  { %v2849_v3 = vld [vmem:[#allocation2 + $0x700] ss:$8 sps:$4 sm:$0xff]  }
  0xc7   :  { %1801 = vmatpush1.bf16.msra.mxu1 %v2774_v8  ;;  %v2852_v8 = vld [vmem:[#allocation2 + $0x310] ss:$8 sps:$4 sm:$0xff]   ;;  %v2909_v57 = vld [vmem:[#allocation2 + $0x7a0] ss:$8 sps:$4 sm:$0xff]  }
  0xc8   :  { %2013 = vmatpush1.bf16.msra.mxu0 %v2777_v9  ;;  %1802 = vmatprep.subr.bf16.mxu1 %v2782_v10  ;;  %v2855_v9 = vld [vmem:[#allocation2 + $0x710] ss:$8 sps:$4 sm:$0xff]   ;;  %v90_v10 = vld [vmem:[%s3305_s0 + $0x120] sm:$0xff] }
  0xc9   :  { %2014 = vmatprep.subr.bf16.mxu0 %v2785_v11  ;;  %v106_v11 = vld [vmem:[%s3305_s0 + $0x1a0] sm:$0xff] }
  0xca   :  { %v2921_v1 = vld [vmem:[#allocation2 + $0x7c0] ss:$8 sps:$4 sm:$0xff]  }
  0xcb   :  { %1803 = vmatpush1.bf16.msra.mxu1 %v2780_v12  ;;  %v98_v12 = vld [vmem:[%s3305_s0 + $0x160] sm:$0xff] }
  0xcc   :  { %2015 = vmatpush1.bf16.msra.mxu0 %v2783_v13  ;;  %1804 = vmatprep.subr.bf16.mxu1 %v2788_v14  ;;  %v114_v13 = vld [vmem:[%s3305_s0 + $0x1e0] sm:$0xff] }
  0xcd   :  { %2016 = vmatprep.subr.bf16.mxu0 %v2791_v15  ;;  %v2860_v14 = vld [vmem:[#allocation2 + $0x324] ss:$8 sps:$4 sm:$0xff]  }
  0xce   :  { %v2863_v15 = vld [vmem:[#allocation2 + $0x724] ss:$8 sps:$4 sm:$0xff]  }
  0xcf   :  { %1805 = vmatpush1.bf16.msra.mxu1 %v2786_v16  ;;  %v61_v16 = vld [vmem:[%s3305_s0 + $0x38] sm:$0xff] }
  0xd0   :  { %2017 = vmatpush1.bf16.msra.mxu0 %v2789_v17  ;;  %1806 = vmatprep.subr.bf16.mxu1 %v2794_v18  ;;  %v138_v17 = vpack.c.bf16 %v106_v11, %v90_v10  ;;  %v146_v18 = vpack.c.bf16 %v114_v13, %v98_v12  ;;  %v2938_v10 = vld [vmem:[#allocation2 + $0x3f4] ss:$8 sps:$4 sm:$0xff]   ;;  %v2936_v12 = vld [vmem:[#allocation2 + $0x3f0] ss:$8 sps:$4 sm:$0xff]  }
  0xd1   :  { %2018 = vmatprep.subr.bf16.mxu0 %v2797_v19  ;;  %v77_v19 = vld [vmem:[%s3305_s0 + $0xb8] sm:$0xff] }
  0xd2   :  { %v2941_v11 = vld [vmem:[#allocation2 + $0x7f4] ss:$8 sps:$4 sm:$0xff]   ;;  %v2939_v13 = vld [vmem:[#allocation2 + $0x7f0] ss:$8 sps:$4 sm:$0xff]  }
  0xd3   :  { %1807 = vmatpush1.bf16.msra.mxu1 %v2792_v20  ;;  %v69_v20 = vld [vmem:[%s3305_s0 + $0x78] sm:$0xff] }
  0xd4   :  { %2019 = vmatpush1.bf16.msra.mxu0 %v2795_v21  ;;  %1808 = vmatprep.subr.bf16.mxu1 %v2800_v22  ;;  %v85_v21 = vld [vmem:[%s3305_s0 + $0xf8] sm:$0xff]  ;;  %v2858_v22 = vld [vmem:[#allocation2 + $0x320] ss:$8 sps:$4 sm:$0xff]  }
  0xd5   :  { %2020 = vmatprep.subr.bf16.mxu0 %v2803_v23  ;;  %v2861_v23 = vld [vmem:[#allocation2 + $0x720] ss:$8 sps:$4 sm:$0xff]  }
  0xd7   :  { %1809 = vmatpush1.bf16.msra.mxu1 %v2798_v24  ;;  %v2866_v24 = vld [vmem:[#allocation2 + $0x334] ss:$8 sps:$4 sm:$0xff]  }
  0xd8   :  { %2021 = vmatpush1.bf16.msra.mxu0 %v2801_v25  ;;  %1810 = vmatprep.subr.bf16.mxu1 %v2806_v26  ;;  %v2869_v25 = vld [vmem:[#allocation2 + $0x734] ss:$8 sps:$4 sm:$0xff]   ;;  %v125_v26 = vpack.c.bf16 %v77_v19, %v61_v16 }
  0xd9   :  { %2022 = vmatprep.subr.bf16.mxu0 %v2809_v27  ;;  %v133_v27 = vpack.c.bf16 %v85_v21, %v69_v20  ;;  %v68_v16 = vld [vmem:[%s3305_s0 + $0x70] sm:$0xff]  ;;  %v109_v19 = vld [vmem:[%s3305_s0 + $0x1b8] sm:$0xff] }
  0xda   :  { %v101_v20 = vld [vmem:[%s3305_s0 + $0x178] sm:$0xff] }
  0xdb   :  { %1811 = vmatpush1.bf16.msra.mxu1 %v2804_v28  ;;  %v2864_v28 = vld [vmem:[#allocation2 + $0x330] ss:$8 sps:$4 sm:$0xff]  }
  0xdc   :  { %2023 = vmatpush1.bf16.msra.mxu0 %v2807_v29  ;;  %1812 = vmatprep.subr.bf16.mxu1 %v2812_v30  ;;  %v2867_v29 = vld [vmem:[#allocation2 + $0x730] ss:$8 sps:$4 sm:$0xff]   ;;  %v2872_v30 = vld [vmem:[#allocation2 + $0x344] ss:$8 sps:$4 sm:$0xff]  }
  0xdd   :  { %2024 = vmatprep.subr.bf16.mxu0 %v2815_v31  ;;  %v2875_v31 = vld [vmem:[#allocation2 + $0x744] ss:$8 sps:$4 sm:$0xff]   ;;  %v117_v21 = vld [vmem:[%s3305_s0 + $0x1f8] sm:$0xff] }
  0xdf   :  { %1813 = vmatpush1.bf16.msra.mxu1 %v2810_v32  ;;  %v2870_v32 = vld [vmem:[#allocation2 + $0x340] ss:$8 sps:$4 sm:$0xff]  }
  0xe0   :  { %2025 = vmatpush1.bf16.msra.mxu0 %v2813_v33  ;;  %1814 = vmatprep.subr.bf16.mxu1 %v2818_v34  ;;  %v2873_v33 = vld [vmem:[#allocation2 + $0x740] ss:$8 sps:$4 sm:$0xff]   ;;  %v2878_v34 = vld [vmem:[#allocation2 + $0x354] ss:$8 sps:$4 sm:$0xff]  }
  0xe1   :  { %2026 = vmatprep.subr.bf16.mxu0 %v2821_v35  ;;  %v2881_v35 = vld [vmem:[#allocation2 + $0x754] ss:$8 sps:$4 sm:$0xff]  }
  0xe3   :  { %1815 = vmatpush1.bf16.msra.mxu1 %v2816_v36  ;;  %v2876_v36 = vld [vmem:[#allocation2 + $0x350] ss:$8 sps:$4 sm:$0xff]  }
  0xe4   :  { %2027 = vmatpush1.bf16.msra.mxu0 %v2819_v37  ;;  %1816 = vmatprep.subr.bf16.mxu1 %v2824_v38  ;;  %v2879_v37 = vld [vmem:[#allocation2 + $0x750] ss:$8 sps:$4 sm:$0xff]   ;;  %v2884_v38 = vld [vmem:[#allocation2 + $0x364] ss:$8 sps:$4 sm:$0xff]  }
  0xe5   :  { %2028 = vmatprep.subr.bf16.mxu0 %v2827_v39  ;;  %v2887_v39 = vld [vmem:[#allocation2 + $0x764] ss:$8 sps:$4 sm:$0xff]  }
  0xe7   :  { %1817 = vmatpush1.bf16.msra.mxu1 %v2822_v40  ;;  %v2882_v40 = vld [vmem:[#allocation2 + $0x360] ss:$8 sps:$4 sm:$0xff]  }
  0xe8   :  { %2029 = vmatpush1.bf16.msra.mxu0 %v2825_v41  ;;  %1818 = vmatprep.subr.bf16.mxu1 %v2830_v42  ;;  %v2885_v41 = vld [vmem:[#allocation2 + $0x760] ss:$8 sps:$4 sm:$0xff]   ;;  %v2890_v42 = vld [vmem:[#allocation2 + $0x374] ss:$8 sps:$4 sm:$0xff]  }
  0xe9   :  { %2030 = vmatprep.subr.bf16.mxu0 %v2833_v43  ;;  %v2893_v43 = vld [vmem:[#allocation2 + $0x774] ss:$8 sps:$4 sm:$0xff]  }
  0xeb   :  { %1819 = vmatpush1.bf16.msra.mxu1 %v2828_v44  ;;  %v2888_v44 = vld [vmem:[#allocation2 + $0x370] ss:$8 sps:$4 sm:$0xff]  }
  0xec   :  { %2031 = vmatpush1.bf16.msra.mxu0 %v2831_v45  ;;  %1820 = vmatprep.subr.bf16.mxu1 %v2836_v46  ;;  %v2891_v45 = vld [vmem:[#allocation2 + $0x770] ss:$8 sps:$4 sm:$0xff]   ;;  %v2896_v46 = vld [vmem:[#allocation2 + $0x384] ss:$8 sps:$4 sm:$0xff]  }
  0xed   :  { %2032 = vmatprep.subr.bf16.mxu0 %v2839_v47  ;;  %v2899_v47 = vld [vmem:[#allocation2 + $0x784] ss:$8 sps:$4 sm:$0xff]  }
  0xef   :  { %1821 = vmatpush1.bf16.msra.mxu1 %v2834_v48  ;;  %v2894_v48 = vld [vmem:[#allocation2 + $0x380] ss:$8 sps:$4 sm:$0xff]  }
  0xf0   :  { %2033 = vmatpush1.bf16.msra.mxu0 %v2837_v49  ;;  %1822 = vmatprep.subr.bf16.mxu1 %v2842_v50  ;;  %v2897_v49 = vld [vmem:[#allocation2 + $0x780] ss:$8 sps:$4 sm:$0xff]   ;;  %v2902_v50 = vld [vmem:[#allocation2 + $0x394] ss:$8 sps:$4 sm:$0xff]  }
  0xf1   :  { %2034 = vmatprep.subr.bf16.mxu0 %v2845_v51  ;;  %v2905_v51 = vld [vmem:[#allocation2 + $0x794] ss:$8 sps:$4 sm:$0xff]  }
  0xf3   :  { %1823 = vmatpush1.bf16.msra.mxu1 %v2840_v52  ;;  %v2900_v52 = vld [vmem:[#allocation2 + $0x390] ss:$8 sps:$4 sm:$0xff]  }
  0xf4   :  { %2035 = vmatpush1.bf16.msra.mxu0 %v2843_v53  ;;  %1845 = vmatprep.subr.bf16.mxu1 %v2848_v58  ;;  %v2903_v53 = vld [vmem:[#allocation2 + $0x790] ss:$8 sps:$4 sm:$0xff]   ;;  %v2914_v58 = vld [vmem:[#allocation2 + $0x3b4] ss:$8 sps:$4 sm:$0xff]  }
  0xf5   :  { %2057 = vmatprep.subr.bf16.mxu0 %v2851_v59  ;;  %v2917_v59 = vld [vmem:[#allocation2 + $0x7b4] ss:$8 sps:$4 sm:$0xff]  }
  0xf6   :  { %1825 = vmatmul.mubr.bf16.vlgmr.msra.gmra.mrb[0].mxu1 %v122_v61  ;;  %v2915_v61 = vld [vmem:[#allocation2 + $0x7b0] ss:$8 sps:$4 sm:$0xff]  }
  0xf7   :  { %2037 = vmatmul.mubr.bf16.vlgmr.msra.gmra.mrb[0].mxu0 %v130_v62  ;;  %1846 = vmatpush1.bf16.msra.mxu1 %v2846_v2  ;;  %v2920_v62 = vld [vmem:[#allocation2 + $0x3c4] ss:$8 sps:$4 sm:$0xff]   ;;  %v2926_v2 = vld [vmem:[#allocation2 + $0x3d4] ss:$8 sps:$4 sm:$0xff]  }
  0xf8   :  { %2058 = vmatpush1.bf16.msra.mxu0 %v2849_v3  ;;  %1847 = vmatprep.subr.bf16.mxu1 %v2854_v4  ;;  %v2929_v3 = vld [vmem:[#allocation2 + $0x7d4] ss:$8 sps:$4 sm:$0xff]   ;;  %v2924_v4 = vld [vmem:[#allocation2 + $0x3d0] ss:$8 sps:$4 sm:$0xff]  }
  0xf9   :  { %2059 = vmatprep.subr.bf16.mxu0 %v2857_v5  ;;  %1834 = vmatprep.mubr.bf16.mxu1 %v139_v6  ;;  %v2927_v5 = vld [vmem:[#allocation2 + $0x7d0] ss:$8 sps:$4 sm:$0xff]   ;;  %v2932_v6 = vld [vmem:[#allocation2 + $0x3e4] ss:$8 sps:$4 sm:$0xff]  }
  0xfa   :  { %2046 = vmatprep.mubr.bf16.mxu0 %v147_v7  ;;  %v2935_v7 = vld [vmem:[#allocation2 + $0x7e4] ss:$8 sps:$4 sm:$0xff]  }
  0xfb   :  { %1848 = vmatpush1.bf16.msra.mxu1 %v2852_v8  ;;  %v2930_v8 = vld [vmem:[#allocation2 + $0x3e0] ss:$8 sps:$4 sm:$0xff]  }
  0xfc   :  { %2060 = vmatpush1.bf16.msra.mxu0 %v2855_v9  ;;  %1849 = vmatprep.subr.bf16.mxu1 %v2860_v14  ;;  %v2933_v9 = vld [vmem:[#allocation2 + $0x7e0] ss:$8 sps:$4 sm:$0xff]   ;;  %v60_v14 = vld [vmem:[%s3305_s0 + $0x30] sm:$0xff] }
  0xfd   :  { %2061 = vmatprep.subr.bf16.mxu0 %v2863_v15  ;;  %v76_v15 = vld [vmem:[%s3305_s0 + $0xb0] sm:$0xff] }
  0xfe   :  { %1835 = vmatmul.mubr.bf16.gmra.mrb[4].mxu1 %v138_v17  ;;  %v84_v17 = vld [vmem:[%s3305_s0 + $0xf0] sm:$0xff] }
  0xff   :  { %2047 = vmatmul.mubr.bf16.gmra.mrb[4].mxu0 %v146_v18  ;;  %1850 = vmatpush1.bf16.msra.mxu1 %v2858_v22  ;;  %v93_v18 = vld [vmem:[%s3305_s0 + $0x138] sm:$0xff]  ;;  %v124_v22 = vpack.c.bf16 %v76_v15, %v60_v14 }
 0x100   :  { %2062 = vmatpush1.bf16.msra.mxu0 %v2861_v23  ;;  %1851 = vmatprep.subr.bf16.mxu1 %v2866_v24  ;;  %v132_v23 = vpack.c.bf16 %v84_v17, %v68_v16  ;;  %v141_v24 = vpack.c.bf16 %v109_v19, %v93_v18 }
 0x101   :  { %2063 = vmatprep.subr.bf16.mxu0 %v2869_v25  ;;  %1877 = vmatprep.mubr.bf16.mxu1 %v125_v26  ;;  %v149_v25 = vpack.c.bf16 %v117_v21, %v101_v20  ;;  %v92_v26 = vld [vmem:[%s3305_s0 + $0x130] sm:$0xff] }
 0x102   :  { %2089 = vmatprep.mubr.bf16.mxu0 %v133_v27  ;;  %v108_v27 = vld [vmem:[%s3305_s0 + $0x1b0] sm:$0xff] }
 0x103   :  { %1852 = vmatpush1.bf16.msra.mxu1 %v2864_v28  ;;  %v100_v28 = vld [vmem:[%s3305_s0 + $0x170] sm:$0xff] }
 0x104   :  { %2064 = vmatpush1.bf16.msra.mxu0 %v2867_v29  ;;  %1853 = vmatprep.subr.bf16.mxu1 %v2872_v30  ;;  %v116_v29 = vld [vmem:[%s3305_s0 + $0x1f0] sm:$0xff]  ;;  %v140_v30 = vpack.c.bf16 %v108_v27, %v92_v26 }
 0x105   :  { %2065 = vmatprep.subr.bf16.mxu0 %v2875_v31  ;;  %v148_v31 = vpack.c.bf16 %v116_v29, %v100_v28 }
 0x107   :  { %1854 = vmatpush1.bf16.msra.mxu1 %v2870_v32 }
 0x108   :  { %2066 = vmatpush1.bf16.msra.mxu0 %v2873_v33  ;;  %1855 = vmatprep.subr.bf16.mxu1 %v2878_v34 }
 0x109   :  { %2067 = vmatprep.subr.bf16.mxu0 %v2881_v35 }
 0x10b   :  { %1856 = vmatpush1.bf16.msra.mxu1 %v2876_v36 }
 0x10c   :  { %2068 = vmatpush1.bf16.msra.mxu0 %v2879_v37  ;;  %1857 = vmatprep.subr.bf16.mxu1 %v2884_v38 }
 0x10d   :  { %2069 = vmatprep.subr.bf16.mxu0 %v2887_v39 }
 0x10f   :  { %1858 = vmatpush1.bf16.msra.mxu1 %v2882_v40 }
 0x110   :  { %2070 = vmatpush1.bf16.msra.mxu0 %v2885_v41  ;;  %1859 = vmatprep.subr.bf16.mxu1 %v2890_v42 }
 0x111   :  { %2071 = vmatprep.subr.bf16.mxu0 %v2893_v43 }
 0x113   :  { %1860 = vmatpush1.bf16.msra.mxu1 %v2888_v44 }
 0x114   :  { %2072 = vmatpush1.bf16.msra.mxu0 %v2891_v45  ;;  %1861 = vmatprep.subr.bf16.mxu1 %v2896_v46 }
 0x115   :  { %2073 = vmatprep.subr.bf16.mxu0 %v2899_v47 }
 0x117   :  { %1862 = vmatpush1.bf16.msra.mxu1 %v2894_v48 }
 0x118   :  { %2074 = vmatpush1.bf16.msra.mxu0 %v2897_v49  ;;  %1863 = vmatprep.subr.bf16.mxu1 %v2902_v50 }
 0x119   :  { %2075 = vmatprep.subr.bf16.mxu0 %v2905_v51 }
 0x11b   :  { %1864 = vmatpush1.bf16.msra.mxu1 %v2900_v52 }
 0x11c   :  { %2076 = vmatpush1.bf16.msra.mxu0 %v2903_v53  ;;  %1865 = vmatprep.subr.bf16.mxu1 %v2908_v54 }
 0x11d   :  { %2077 = vmatprep.subr.bf16.mxu0 %v2911_v55 }
 0x11f   :  { %1866 = vmatpush1.bf16.msra.mxu1 %v2906_v56 }
 0x120   :  { %2078 = vmatpush1.bf16.msra.mxu0 %v2909_v57  ;;  %1867 = vmatprep.subr.bf16.mxu1 %v2914_v58 }
 0x121   :  { %2079 = vmatprep.subr.bf16.mxu0 %v2917_v59 }
 0x123   :  { %1868 = vmatpush1.bf16.msra.mxu1 %v2912_v60 }
 0x124   :  { %2080 = vmatpush1.bf16.msra.mxu0 %v2915_v61  ;;  %1869 = vmatprep.subr.bf16.mxu1 %v2920_v62 }
 0x125   :  { %2081 = vmatprep.subr.bf16.mxu0 %v2923_v63 }
 0x127   :  { %1870 = vmatpush1.bf16.msra.mxu1 %v2918_v0 }
 0x128   :  { %2082 = vmatpush1.bf16.msra.mxu0 %v2921_v1  ;;  %1871 = vmatprep.subr.bf16.mxu1 %v2926_v2 }
 0x129   :  { %2083 = vmatprep.subr.bf16.mxu0 %v2929_v3 }
 0x12b   :  { %1872 = vmatpush1.bf16.msra.mxu1 %v2924_v4 }
 0x12c   :  { %2084 = vmatpush1.bf16.msra.mxu0 %v2927_v5  ;;  %1873 = vmatprep.subr.bf16.mxu1 %v2932_v6 }
 0x12d   :  { %2085 = vmatprep.subr.bf16.mxu0 %v2935_v7 }
 0x12f   :  { %1874 = vmatpush1.bf16.msra.mxu1 %v2930_v8 }
 0x130   :  { %2086 = vmatpush1.bf16.msra.mxu0 %v2933_v9  ;;  %1875 = vmatprep.subr.bf16.mxu1 %v2938_v10 }
 0x131   :  { %2087 = vmatprep.subr.bf16.mxu0 %v2941_v11 }
 0x133   :  { %1876 = vmatpush1.bf16.msra.mxu1 %v2936_v12 }
 0x134   :  { %2088 = vmatpush1.bf16.msra.mxu0 %v2939_v13 }
 0x136   :  { %1878 = vmatmul.mubr.bf16.vlgmr.msra.gmra.mrb[0].mxu1 %v124_v22 }
 0x137   :  { %2090 = vmatmul.mubr.bf16.vlgmr.msra.gmra.mrb[0].mxu0 %v132_v23  ;;  %1887 = vmatprep.mubr.bf16.mxu1 %v141_v24 }
 0x138   :  { %2099 = vmatprep.mubr.bf16.mxu0 %v149_v25 }
 0x13e   :  { %1888 = vmatmul.mubr.bf16.gmra.mrb[4].mxu1 %v140_v30 }
 0x13f   :  { %2100 = vmatmul.mubr.bf16.gmra.mrb[4].mxu0 %v148_v31 }
 0x209   :  { %v1879_v32 = vpop.f32.mrb[0].mxu1 }
 0x20a   :  { %v2091_v33 = vpop.f32.mrb[0].mxu0  ;;  %v1881_v35 = vpop.f32.mrb[1].mxu1 }
 0x20b   :  { %v2497_v34 = vadd.f32 %v2091_v33, %v1879_v32  ;;  %v2093_v36 = vpop.f32.mrb[1].mxu0  ;;  %v1883_v38 = vpop.f32.mrb[2].mxu1 }
 0x20c   :  { %v2498_v37 = vadd.f32 %v2093_v36, %v1881_v35  ;;  %v2095_v39 = vpop.f32.mrb[2].mxu0  ;;  %v1885_v41 = vpop.f32.mrb[3].mxu1 }
 0x20d   :  { %v2499_v40 = vadd.f32 %v2095_v39, %v1883_v38  ;;  %v2097_v42 = vpop.f32.mrb[3].mxu0 }
 0x20e   :  { %v2500_v43 = vadd.f32 %v2097_v42, %v1885_v41 }
 0x20f   :  { %v2110_v44 = vadd.f32 %v2499_v40, %v2497_v34 }
 0x210   :  { %v2119_v45 = vadd.f32 %v2500_v43, %v2498_v37 }
 0x211   :  { %v1889_v46 = vpop.f32.mrb[4].mxu1 }
 0x212   :  { %v2101_v47 = vpop.f32.mrb[4].mxu0  ;;  %v1891_v49 = vpop.f32.mrb[5].mxu1 }
 0x213   :  { %v2501_v48 = vadd.f32 %v2101_v47, %v1889_v46  ;;  %v2103_v50 = vpop.f32.mrb[5].mxu0  ;;  %v1893_v52 = vpop.f32.mrb[6].mxu1  ;;  %v2181_v47 = vlaneseq }
 0x214   :  { %v2502_v51 = vadd.f32 %v2103_v50, %v1891_v49  ;;  %v2105_v53 = vpop.f32.mrb[6].mxu0  ;;  %v1895_v56 = vpop.f32.mrb[7].mxu1 }
 0x215   :  { %v2111_v54 = vadd.f32 %v2501_v48, %v2110_v44  ;;  %v2503_v55 = vadd.f32 %v2105_v53, %v1893_v52  ;;  %v2107_v57 = vpop.f32.mrb[7].mxu0  ;;  %v2179_v53 = vld [vmem:[#allocation4] sm:$0x3] }
 0x216   :  { %v2120_v58 = vadd.f32 %v2502_v51, %v2119_v45  ;;  %v2504_v59 = vadd.f32 %v2107_v57, %v1895_v56 }
 0x217   :  { %v2112_v60 = vadd.f32 %v2503_v55, %v2111_v54 }
 0x218   :  { %v2121_v61 = vadd.f32 %v2504_v59, %v2120_v58 }
 0x219   :  { %v2113_v62 = vrot.slane %v2112_v60, 4 }
 0x21a   :  { %v2122_v63 = vrot.slane %v2121_v61, 4 }
 0x21b   :  { %v2114_v0 = vadd.f32 %v2113_v62, %v2112_v60 }
 0x21c   :  { %v2123_v1 = vadd.f32 %v2122_v63, %v2121_v61 }
 0x21d   :  { %v2115_v2 = vrot.slane %v2114_v0, 2 }
 0x21e   :  { %v2124_v3 = vrot.slane %v2123_v1, 2 }
 0x21f   :  { %v2116_v4 = vadd.f32 %v2115_v2, %v2114_v0 }
 0x220   :  { %v2125_v5 = vadd.f32 %v2124_v3, %v2123_v1 }
 0x221   :  { %v2117_v6 = vrot.slane %v2116_v4, 1 }
 0x222   :  { %v2126_v7 = vrot.slane %v2125_v5, 1 }
 0x223   :  { %v2118_v8 = vadd.f32 %v2117_v6, %v2116_v4 }
 0x224   :  { %v2127_v9 = vadd.f32 %v2126_v7, %v2125_v5 }
 0x225   :  { %v2129_v10 = vmul.f32 0.03125, %v2118_v8 }
 0x226   :  { %v2130_v11 = vmul.f32 0.03125, %v2127_v9 }
 0x227   :  { %v2131_v12 = vsub.f32 %v2497_v34, %v2129_v10  ;;  %v2133_v13 = vsub.f32 %v2499_v40, %v2129_v10  ;;  %v2135_v14 = vsub.f32 %v2501_v48, %v2129_v10  ;;  %v2137_v15 = vsub.f32 %v2503_v55, %v2129_v10  ;;  %v2199_v55 = vld [vmem:[#allocation6] sm:$0x3] }
 0x228   :  { %v2132_v16 = vsub.f32 %v2498_v37, %v2130_v11  ;;  %v2134_v17 = vsub.f32 %v2500_v43, %v2130_v11  ;;  %v2136_v18 = vsub.f32 %v2502_v51, %v2130_v11  ;;  %v2138_v19 = vsub.f32 %v2504_v59, %v2130_v11 }
 0x229   :  { %v2139_v20 = vmul.f32 %v2131_v12, %v2131_v12  ;;  %v2141_v21 = vmul.f32 %v2133_v13, %v2133_v13  ;;  %v2143_v24 = vmul.f32 %v2135_v14, %v2135_v14  ;;  %v2145_v28 = vmul.f32 %v2137_v15, %v2137_v15 }
 0x22a   :  { %v2140_v22 = vmul.f32 %v2132_v16, %v2132_v16  ;;  %v2142_v23 = vmul.f32 %v2134_v17, %v2134_v17  ;;  %v2144_v26 = vmul.f32 %v2136_v18, %v2136_v18  ;;  %v2146_v30 = vmul.f32 %v2138_v19, %v2138_v19 }
 0x22b   :  { %v2147_v25 = vadd.f32 %v2141_v21, %v2139_v20  ;;  %v2182_v51 = vshrl.u32 %v2181_v47, 7 }
 0x22c   :  { %v2156_v27 = vadd.f32 %v2142_v23, %v2140_v22 }
 0x22d   :  { %v2148_v29 = vadd.f32 %v2147_v25, %v2143_v24  ;;  %v2183_v52 = vsub.s32 0, %v2182_v51  ;;  %v2187_v54 = vsub.s32 1, %v2182_v51 }
 0x22e   :  { %v2157_v31 = vadd.f32 %v2156_v27, %v2144_v26 }
 0x22f   :  { %v2149_v32 = vadd.f32 %v2148_v29, %v2145_v28  ;;  %v2184_v56 = vrot.slane %v2179_v53, %v2183_v52  ;;  %v2204_v58 = vrot.slane %v2199_v55, %v2183_v52  ;;  %v2188_v59 = vrot.slane %v2179_v53, %v2187_v54 }
 0x230   :  { %v2158_v33 = vadd.f32 %v2157_v31, %v2146_v30  ;;  %v2208_v60 = vrot.slane %v2199_v55, %v2187_v54 }
 0x231   :  { %v2150_v34 = vrot.slane %v2149_v32, 4 }
 0x232   :  { %v2159_v35 = vrot.slane %v2158_v33, 4 }
 0x233   :  { %v2151_v36 = vadd.f32 %v2150_v34, %v2149_v32 }
 0x234   :  { %v2160_v37 = vadd.f32 %v2159_v35, %v2158_v33 }
 0x235   :  { %v2152_v38 = vrot.slane %v2151_v36, 2 }
 0x236   :  { %v2161_v39 = vrot.slane %v2160_v37, 2 }
 0x237   :  { %v2153_v40 = vadd.f32 %v2152_v38, %v2151_v36 }
 0x238   :  { %v2162_v41 = vadd.f32 %v2161_v39, %v2160_v37 }
 0x239   :  { %v2154_v42 = vrot.slane %v2153_v40, 1 }
 0x23a   :  { %v2163_v43 = vrot.slane %v2162_v41, 1 }
 0x23b   :  { %v2155_v44 = vadd.f32 %v2154_v42, %v2153_v40 }
 0x23c   :  { %v2164_v45 = vadd.f32 %v2163_v43, %v2162_v41 }
 0x23d   :  { %v2165_v46 = vmul.f32 0.03125, %v2155_v44 }
 0x23e   :  { %v2166_v48 = vmul.f32 0.03125, %v2164_v45 }
 0x23f   :  { %v2167_v49 = vadd.f32 1e-05, %v2165_v46 }
 0x240   :  { %v2168_v50 = vadd.f32 1e-05, %v2166_v48 }
 0x241   :  { %2942 = vrsqrt.f32 %v2167_v49 }
 0x242   :  { %2944 = vrsqrt.f32 %v2168_v50 }
 0x24b   :  { %v2943_v57 = vpop.eup %2942 }
 0x24c   :  { %v2945_v61 = vpop.eup %2944  ;;  %v2171_v62 = vmul.f32 %v2943_v57, %v2131_v12  ;;  %v2173_v63 = vmul.f32 %v2943_v57, %v2133_v13  ;;  %v2175_v0 = vmul.f32 %v2943_v57, %v2135_v14  ;;  %v2177_v1 = vmul.f32 %v2943_v57, %v2137_v15 }
 0x24d   :  { %v2172_v2 = vmul.f32 %v2945_v61, %v2132_v16  ;;  %v2174_v3 = vmul.f32 %v2945_v61, %v2134_v17  ;;  %v2176_v4 = vmul.f32 %v2945_v61, %v2136_v18  ;;  %v2178_v5 = vmul.f32 %v2945_v61, %v2138_v19 }
 0x24e   :  { %v2191_v6 = vmul.f32 %v2184_v56, %v2171_v62  ;;  %v2193_v7 = vmul.f32 %v2184_v56, %v2173_v63  ;;  %v2195_v8 = vmul.f32 %v2184_v56, %v2175_v0  ;;  %v2197_v9 = vmul.f32 %v2184_v56, %v2177_v1 }
 0x24f   :  { %v2192_v10 = vmul.f32 %v2188_v59, %v2172_v2  ;;  %v2194_v11 = vmul.f32 %v2188_v59, %v2174_v3  ;;  %v2196_v20 = vmul.f32 %v2188_v59, %v2176_v4  ;;  %v2198_v21 = vmul.f32 %v2188_v59, %v2178_v5 }
 0x250   :  { %v2211_v22 = vadd.f32 %v2204_v58, %v2191_v6  ;;  %v2213_v23 = vadd.f32 %v2204_v58, %v2193_v7  ;;  %v2215_v24 = vadd.f32 %v2204_v58, %v2195_v8  ;;  %v2217_v25 = vadd.f32 %v2204_v58, %v2197_v9 }
 0x251   :  { %v2212_v12 = vadd.f32 %v2208_v60, %v2192_v10  ;;  %v2214_v13 = vadd.f32 %v2208_v60, %v2194_v11  ;;  %v2216_v14 = vadd.f32 %v2208_v60, %v2196_v20  ;;  %v2218_v15 = vadd.f32 %v2208_v60, %v2198_v21 }
 0x252   :  { %v2219_v16 = vmax.f32 %v2211_v22, 0.0  ;;  %v2221_v17 = vmax.f32 %v2213_v23, 0.0  ;;  %v2223_v18 = vmax.f32 %v2215_v24, 0.0  ;;  %v2225_v19 = vmax.f32 %v2217_v25, 0.0 }
 0x253   :  { %v2220_v26 = vmax.f32 %v2212_v12, 0.0  ;;  %v2222_v27 = vmax.f32 %v2214_v13, 0.0  ;;  %v2224_v28 = vmax.f32 %v2216_v14, 0.0  ;;  %v2226_v29 = vmax.f32 %v2218_v15, 0.0 }
 0x254   :  { %2227 = vst [vmem:[%s3309_s4] sm:$0xff] %v2219_v16  ;;  %2229 = vst [vmem:[%s3309_s4 + $0x10] sm:$0xff] %v2221_v17 }
 0x255   :  { %2231 = vst [vmem:[%s3309_s4 + $0x20] sm:$0xff] %v2223_v18  ;;  %2233 = vst [vmem:[%s3309_s4 + $0x30] sm:$0xff] %v2225_v19 }
 0x256   :  { %2228 = vst [vmem:[%s3309_s4 + $0x8] sm:$0xff] %v2220_v26  ;;  %2230 = vst [vmem:[%s3309_s4 + $0x18] sm:$0xff] %v2222_v27 }
 0x257   :  { %2232 = vst [vmem:[%s3309_s4 + $0x28] sm:$0xff] %v2224_v28  ;;  %2234 = vst [vmem:[%s3309_s4 + $0x38] sm:$0xff] %v2226_v29 }
 0x258   :  { %2239 = vsyncpa [#allocation3], 1 }
 0x259   :  { %2240 = vsyncpa [#allocation5], 1 }

// kernel: g_encode_forward.7
= control target key start
LH: loop header
LB: loop body
LE: loop exit
PB: predicated region body
PF: predicated region fallthrough
CT: control target
= control target key end

     0   :  { %s4197_s15 = smov 0   ;;  %s4199_s16 = smov 0   ;;  %s5128_s0 = inlined_call_operand.vmem [shape: f32[2,2048], index: 0, kind: input, shape index: {}]   ;;  %s5129_s1 = inlined_call_operand.vmem [shape: bf16[2048,1024], index: 1, kind: input, shape index: {}]   ;;  %s5130_s2 = inlined_call_operand.vmem [shape: f32[1,1024], index: 2, kind: input, shape index: {}]   ;;  %s5131_s3 = inlined_call_operand.vmem [shape: f32[1,1024], index: 3, kind: input, shape index: {}]   ;;  %s5132_s4 = inlined_call_operand.vmem [shape: f32[2,1024], index: 4, kind: output, shape index: {}]  }
   0x1   :  { %s4201_s17 = smov 0  }
   0x2 LB: > { %s3431_s18 = sadd.s32 4294967295, %s4169_s17   ;;  %s4214_s19 = sadd.s32 1, %s4169_s17   ;;  %s4169_s17 = sphi %s4201_s17, %s5135_s17   ;;  %s4165_s16 = sphi %s4199_s16, %s5134_s16   ;;  %s4161_s15 = sphi %s4197_s15, %s5133_s15  }
   0x3   : > { %s39_s20 = ssub.s32 %s4169_s17, %s4214_s19  ;;  %s42_s21 = sadd.s32 1, %s4165_s16 }
   0x4   : > { %p40_p0 = scmp.eq.s32.totalorder %s39_s20, 0  ;;  %p49_p1 = scmp.ne.s32.totalorder %s4165_s16, %s4161_s15 }
   0x5   : > { %p50_p2 = scmp.eq.s32.totalorder %s4169_s17, 0  ;;  %p3434_p4 = scmp.ge.s32.totalorder %s4169_s17, 4 }
   0x6   : > { %s4223_s22 = scalar_select %p40_p0, %s4165_s16, %s42_s21  }
   0x7   : > { %p51_p3 = por %p50_p2, %p49_p1  ;;  %156 = sbr.rel (%p3434_p4) target bundleno = 274 (0x112), region = 20 }
   0xe   : > { %159 = sbr.rel (!%p51_p3) target bundleno = 274 (0x112), region = 24  ;;  %s161_s23 = sand.u32 (%p51_p3), 1, %s4165_s16  }
   0xf   : > { %s3703_s24 = sshll.u32 (%p51_p3), %s4169_s17, 3  ;;  %s3435_s25 = sshll.u32 (%p51_p3), %s161_s23, 11 }
  0x10   : > { %s4231_s28 = scalar_lea.vmem (%p51_p3), %s5129_s1, %s3703_s24  ;;  %s4236_s29 = scalar_lea.vmem (%p51_p3), [#allocation2], %s3435_s25 }
  0x11   : > { %v704_v0 = vld [vmem:[%s4231_s28] sm:$0xff] (%p51_p3) }
  0x12   : > { %v706_v1 = vld [vmem:[%s4231_s28 + $0x20] sm:$0xff] (%p51_p3)  ;;  %705 = vst [vmem:[%s4236_s29] sm:$0xff] (%p51_p3), %v704_v0 }
  0x13   : > { %v708_v2 = vld [vmem:[%s4231_s28 + $0x40] sm:$0xff] (%p51_p3)  ;;  %707 = vst [vmem:[%s4236_s29 + $0x8] sm:$0xff] (%p51_p3), %v706_v1 }
  0x14   : > { %709 = vst [vmem:[%s4236_s29 + $0x10] sm:$0xff] (%p51_p3), %v708_v2  ;;  %v710_v3 = vld [vmem:[%s4231_s28 + $0x60] sm:$0xff] (%p51_p3) }
  0x15   : > { %v712_v4 = vld [vmem:[%s4231_s28 + $0x80] sm:$0xff]  ;;  %711 = vst [vmem:[%s4236_s29 + $0x18] sm:$0xff] %v710_v3 }
  0x16   : > { %v714_v5 = vld [vmem:[%s4231_s28 + $0xa0] sm:$0xff]  ;;  %713 = vst [vmem:[%s4236_s29 + $0x20] sm:$0xff] %v712_v4 }
  0x17   : > { %715 = vst [vmem:[%s4236_s29 + $0x28] sm:$0xff] %v714_v5  ;;  %v716_v6 = vld [vmem:[%s4231_s28 + $0xc0] sm:$0xff] }
  0x18   : > { %v718_v7 = vld [vmem:[%s4231_s28 + $0xe0] sm:$0xff]  ;;  %717 = vst [vmem:[%s4236_s29 + $0x30] sm:$0xff] %v716_v6 }
  0x19   : > { %v720_v8 = vld [vmem:[%s4231_s28 + $0x100] sm:$0xff]  ;;  %719 = vst [vmem:[%s4236_s29 + $0x38] sm:$0xff] %v718_v7 }
  0x1a   : > { %721 = vst [vmem:[%s4236_s29 + $0x40] sm:$0xff] %v720_v8  ;;  %v722_v9 = vld [vmem:[%s4231_s28 + $0x120] sm:$0xff] }
  0x1b   : > { %v724_v10 = vld [vmem:[%s4231_s28 + $0x140] sm:$0xff]  ;;  %723 = vst [vmem:[%s4236_s29 + $0x48] sm:$0xff] %v722_v9 }
  0x1c   : > { %v726_v11 = vld [vmem:[%s4231_s28 + $0x160] sm:$0xff]  ;;  %725 = vst [vmem:[%s4236_s29 + $0x50] sm:$0xff] %v724_v10 }
  0x1d   : > { %727 = vst [vmem:[%s4236_s29 + $0x58] sm:$0xff] %v726_v11  ;;  %v728_v12 = vld [vmem:[%s4231_s28 + $0x180] sm:$0xff] }
  0x1e   : > { %v730_v13 = vld [vmem:[%s4231_s28 + $0x1a0] sm:$0xff]  ;;  %729 = vst [vmem:[%s4236_s29 + $0x60] sm:$0xff] %v728_v12 }
  0x1f   : > { %v732_v14 = vld [vmem:[%s4231_s28 + $0x1c0] sm:$0xff]  ;;  %731 = vst [vmem:[%s4236_s29 + $0x68] sm:$0xff] %v730_v13 }
  0x20   : > { %733 = vst [vmem:[%s4236_s29 + $0x70] sm:$0xff] %v732_v14  ;;  %v734_v15 = vld [vmem:[%s4231_s28 + $0x1e0] sm:$0xff] }
  0x21   : > { %v736_v16 = vld [vmem:[%s4231_s28 + $0x200] sm:$0xff]  ;;  %735 = vst [vmem:[%s4236_s29 + $0x78] sm:$0xff] %v734_v15 }
  0x22   : > { %v738_v17 = vld [vmem:[%s4231_s28 + $0x220] sm:$0xff]  ;;  %737 = vst [vmem:[%s4236_s29 + $0x80] sm:$0xff] %v736_v16 }
  0x23   : > { %739 = vst [vmem:[%s4236_s29 + $0x88] sm:$0xff] %v738_v17  ;;  %v740_v18 = vld [vmem:[%s4231_s28 + $0x240] sm:$0xff] }
  0x24   : > { %v742_v19 = vld [vmem:[%s4231_s28 + $0x260] sm:$0xff]  ;;  %741 = vst [vmem:[%s4236_s29 + $0x90] sm:$0xff] %v740_v18 }
  0x25   : > { %v744_v20 = vld [vmem:[%s4231_s28 + $0x280] sm:$0xff]  ;;  %743 = vst [vmem:[%s4236_s29 + $0x98] sm:$0xff] %v742_v19 }
  0x26   : > { %745 = vst [vmem:[%s4236_s29 + $0xa0] sm:$0xff] %v744_v20  ;;  %v746_v21 = vld [vmem:[%s4231_s28 + $0x2a0] sm:$0xff] }
  0x27   : > { %v748_v22 = vld [vmem:[%s4231_s28 + $0x2c0] sm:$0xff]  ;;  %747 = vst [vmem:[%s4236_s29 + $0xa8] sm:$0xff] %v746_v21 }
  0x28   : > { %v750_v23 = vld [vmem:[%s4231_s28 + $0x2e0] sm:$0xff]  ;;  %749 = vst [vmem:[%s4236_s29 + $0xb0] sm:$0xff] %v748_v22 }
  0x29   : > { %751 = vst [vmem:[%s4236_s29 + $0xb8] sm:$0xff] %v750_v23  ;;  %v752_v24 = vld [vmem:[%s4231_s28 + $0x300] sm:$0xff] }
  0x2a   : > { %v754_v25 = vld [vmem:[%s4231_s28 + $0x320] sm:$0xff]  ;;  %753 = vst [vmem:[%s4236_s29 + $0xc0] sm:$0xff] %v752_v24 }
  0x2b   : > { %v756_v26 = vld [vmem:[%s4231_s28 + $0x340] sm:$0xff]  ;;  %755 = vst [vmem:[%s4236_s29 + $0xc8] sm:$0xff] %v754_v25 }
  0x2c   : > { %757 = vst [vmem:[%s4236_s29 + $0xd0] sm:$0xff] %v756_v26  ;;  %v758_v27 = vld [vmem:[%s4231_s28 + $0x360] sm:$0xff] }
  0x2d   : > { %v760_v28 = vld [vmem:[%s4231_s28 + $0x380] sm:$0xff]  ;;  %759 = vst [vmem:[%s4236_s29 + $0xd8] sm:$0xff] %v758_v27 }
  0x2e   : > { %v762_v29 = vld [vmem:[%s4231_s28 + $0x3a0] sm:$0xff]  ;;  %761 = vst [vmem:[%s4236_s29 + $0xe0] sm:$0xff] %v760_v28 }
  0x2f   : > { %763 = vst [vmem:[%s4236_s29 + $0xe8] sm:$0xff] %v762_v29  ;;  %v764_v30 = vld [vmem:[%s4231_s28 + $0x3c0] sm:$0xff] }
  0x30   : > { %v766_v31 = vld [vmem:[%s4231_s28 + $0x3e0] sm:$0xff]  ;;  %765 = vst [vmem:[%s4236_s29 + $0xf0] sm:$0xff] %v764_v30 }
  0x31   : > { %v768_v32 = vld [vmem:[%s4231_s28 + $0x400] sm:$0xff]  ;;  %767 = vst [vmem:[%s4236_s29 + $0xf8] sm:$0xff] %v766_v31 }
  0x32   : > { %769 = vst [vmem:[%s4236_s29 + $0x100] sm:$0xff] %v768_v32  ;;  %v770_v33 = vld [vmem:[%s4231_s28 + $0x420] sm:$0xff] }
  0x33   : > { %v772_v34 = vld [vmem:[%s4231_s28 + $0x440] sm:$0xff]  ;;  %771 = vst [vmem:[%s4236_s29 + $0x108] sm:$0xff] %v770_v33 }
  0x34   : > { %v774_v35 = vld [vmem:[%s4231_s28 + $0x460] sm:$0xff]  ;;  %773 = vst [vmem:[%s4236_s29 + $0x110] sm:$0xff] %v772_v34 }
  0x35   : > { %775 = vst [vmem:[%s4236_s29 + $0x118] sm:$0xff] %v774_v35  ;;  %v776_v36 = vld [vmem:[%s4231_s28 + $0x480] sm:$0xff] }
  0x36   : > { %v778_v37 = vld [vmem:[%s4231_s28 + $0x4a0] sm:$0xff]  ;;  %777 = vst [vmem:[%s4236_s29 + $0x120] sm:$0xff] %v776_v36 }
  0x37   : > { %v780_v38 = vld [vmem:[%s4231_s28 + $0x4c0] sm:$0xff]  ;;  %779 = vst [vmem:[%s4236_s29 + $0x128] sm:$0xff] %v778_v37 }
  0x38   : > { %781 = vst [vmem:[%s4236_s29 + $0x130] sm:$0xff] %v780_v38  ;;  %v782_v39 = vld [vmem:[%s4231_s28 + $0x4e0] sm:$0xff] }
  0x39   : > { %v784_v40 = vld [vmem:[%s4231_s28 + $0x500] sm:$0xff]  ;;  %783 = vst [vmem:[%s4236_s29 + $0x138] sm:$0xff] %v782_v39 }
  0x3a   : > { %v786_v41 = vld [vmem:[%s4231_s28 + $0x520] sm:$0xff]  ;;  %785 = vst [vmem:[%s4236_s29 + $0x140] sm:$0xff] %v784_v40 }
  0x3b   : > { %787 = vst [vmem:[%s4236_s29 + $0x148] sm:$0xff] %v786_v41  ;;  %v788_v42 = vld [vmem:[%s4231_s28 + $0x540] sm:$0xff] }
  0x3c   : > { %v790_v43 = vld [vmem:[%s4231_s28 + $0x560] sm:$0xff]  ;;  %789 = vst [vmem:[%s4236_s29 + $0x150] sm:$0xff] %v788_v42 }
  0x3d   : > { %v792_v44 = vld [vmem:[%s4231_s28 + $0x580] sm:$0xff]  ;;  %791 = vst [vmem:[%s4236_s29 + $0x158] sm:$0xff] %v790_v43 }
  0x3e   : > { %793 = vst [vmem:[%s4236_s29 + $0x160] sm:$0xff] %v792_v44  ;;  %v794_v45 = vld [vmem:[%s4231_s28 + $0x5a0] sm:$0xff] }
  0x3f   : > { %v796_v46 = vld [vmem:[%s4231_s28 + $0x5c0] sm:$0xff]  ;;  %795 = vst [vmem:[%s4236_s29 + $0x168] sm:$0xff] %v794_v45 }
  0x40   : > { %v798_v47 = vld [vmem:[%s4231_s28 + $0x5e0] sm:$0xff]  ;;  %797 = vst [vmem:[%s4236_s29 + $0x170] sm:$0xff] %v796_v46 }
  0x41   : > { %799 = vst [vmem:[%s4236_s29 + $0x178] sm:$0xff] %v798_v47  ;;  %v800_v48 = vld [vmem:[%s4231_s28 + $0x600] sm:$0xff] }
  0x42   : > { %v802_v49 = vld [vmem:[%s4231_s28 + $0x620] sm:$0xff]  ;;  %801 = vst [vmem:[%s4236_s29 + $0x180] sm:$0xff] %v800_v48 }
  0x43   : > { %v804_v50 = vld [vmem:[%s4231_s28 + $0x640] sm:$0xff]  ;;  %803 = vst [vmem:[%s4236_s29 + $0x188] sm:$0xff] %v802_v49 }
  0x44   : > { %805 = vst [vmem:[%s4236_s29 + $0x190] sm:$0xff] %v804_v50  ;;  %v806_v51 = vld [vmem:[%s4231_s28 + $0x660] sm:$0xff] }
  0x45   : > { %v808_v52 = vld [vmem:[%s4231_s28 + $0x680] sm:$0xff]  ;;  %807 = vst [vmem:[%s4236_s29 + $0x198] sm:$0xff] %v806_v51 }
  0x46   : > { %v810_v53 = vld [vmem:[%s4231_s28 + $0x6a0] sm:$0xff]  ;;  %809 = vst [vmem:[%s4236_s29 + $0x1a0] sm:$0xff] %v808_v52 }
  0x47   : > { %811 = vst [vmem:[%s4236_s29 + $0x1a8] sm:$0xff] %v810_v53  ;;  %v812_v54 = vld [vmem:[%s4231_s28 + $0x6c0] sm:$0xff] }
  0x48   : > { %v814_v55 = vld [vmem:[%s4231_s28 + $0x6e0] sm:$0xff]  ;;  %813 = vst [vmem:[%s4236_s29 + $0x1b0] sm:$0xff] %v812_v54 }
  0x49   : > { %v816_v56 = vld [vmem:[%s4231_s28 + $0x700] sm:$0xff]  ;;  %815 = vst [vmem:[%s4236_s29 + $0x1b8] sm:$0xff] %v814_v55 }
  0x4a   : > { %817 = vst [vmem:[%s4236_s29 + $0x1c0] sm:$0xff] %v816_v56  ;;  %v818_v57 = vld [vmem:[%s4231_s28 + $0x720] sm:$0xff] }
  0x4b   : > { %v820_v58 = vld [vmem:[%s4231_s28 + $0x740] sm:$0xff]  ;;  %819 = vst [vmem:[%s4236_s29 + $0x1c8] sm:$0xff] %v818_v57 }
  0x4c   : > { %v822_v59 = vld [vmem:[%s4231_s28 + $0x760] sm:$0xff]  ;;  %821 = vst [vmem:[%s4236_s29 + $0x1d0] sm:$0xff] %v820_v58 }
  0x4d   : > { %823 = vst [vmem:[%s4236_s29 + $0x1d8] sm:$0xff] %v822_v59  ;;  %v824_v60 = vld [vmem:[%s4231_s28 + $0x780] sm:$0xff] }
  0x4e   : > { %v826_v61 = vld [vmem:[%s4231_s28 + $0x7a0] sm:$0xff]  ;;  %825 = vst [vmem:[%s4236_s29 + $0x1e0] sm:$0xff] %v824_v60 }
  0x4f   : > { %v828_v62 = vld [vmem:[%s4231_s28 + $0x7c0] sm:$0xff]  ;;  %827 = vst [vmem:[%s4236_s29 + $0x1e8] sm:$0xff] %v826_v61 }
  0x50   : > { %829 = vst [vmem:[%s4236_s29 + $0x1f0] sm:$0xff] %v828_v62  ;;  %v830_v63 = vld [vmem:[%s4231_s28 + $0x7e0] sm:$0xff] }
  0x51   : > { %v832_v0 = vld [vmem:[%s4231_s28 + $0x800] sm:$0xff]  ;;  %831 = vst [vmem:[%s4236_s29 + $0x1f8] sm:$0xff] %v830_v63 }
  0x52   : > { %v834_v1 = vld [vmem:[%s4231_s28 + $0x820] sm:$0xff]  ;;  %833 = vst [vmem:[%s4236_s29 + $0x200] sm:$0xff] %v832_v0 }
  0x53   : > { %835 = vst [vmem:[%s4236_s29 + $0x208] sm:$0xff] %v834_v1  ;;  %v836_v2 = vld [vmem:[%s4231_s28 + $0x840] sm:$0xff] }
  0x54   : > { %v838_v3 = vld [vmem:[%s4231_s28 + $0x860] sm:$0xff]  ;;  %837 = vst [vmem:[%s4236_s29 + $0x210] sm:$0xff] %v836_v2 }
  0x55   : > { %v840_v4 = vld [vmem:[%s4231_s28 + $0x880] sm:$0xff]  ;;  %839 = vst [vmem:[%s4236_s29 + $0x218] sm:$0xff] %v838_v3 }
  0x56   : > { %841 = vst [vmem:[%s4236_s29 + $0x220] sm:$0xff] %v840_v4  ;;  %v842_v5 = vld [vmem:[%s4231_s28 + $0x8a0] sm:$0xff] }
  0x57   : > { %v844_v6 = vld [vmem:[%s4231_s28 + $0x8c0] sm:$0xff]  ;;  %843 = vst [vmem:[%s4236_s29 + $0x228] sm:$0xff] %v842_v5 }
  0x58   : > { %v846_v7 = vld [vmem:[%s4231_s28 + $0x8e0] sm:$0xff]  ;;  %845 = vst [vmem:[%s4236_s29 + $0x230] sm:$0xff] %v844_v6 }
  0x59   : > { %847 = vst [vmem:[%s4236_s29 + $0x238] sm:$0xff] %v846_v7  ;;  %v848_v8 = vld [vmem:[%s4231_s28 + $0x900] sm:$0xff] }
  0x5a   : > { %v850_v9 = vld [vmem:[%s4231_s28 + $0x920] sm:$0xff]  ;;  %849 = vst [vmem:[%s4236_s29 + $0x240] sm:$0xff] %v848_v8 }
  0x5b   : > { %v852_v10 = vld [vmem:[%s4231_s28 + $0x940] sm:$0xff]  ;;  %851 = vst [vmem:[%s4236_s29 + $0x248] sm:$0xff] %v850_v9 }
  0x5c   : > { %853 = vst [vmem:[%s4236_s29 + $0x250] sm:$0xff] %v852_v10  ;;  %v854_v11 = vld [vmem:[%s4231_s28 + $0x960] sm:$0xff] }
  0x5d   : > { %v856_v12 = vld [vmem:[%s4231_s28 + $0x980] sm:$0xff]  ;;  %855 = vst [vmem:[%s4236_s29 + $0x258] sm:$0xff] %v854_v11 }
  0x5e   : > { %v858_v13 = vld [vmem:[%s4231_s28 + $0x9a0] sm:$0xff]  ;;  %857 = vst [vmem:[%s4236_s29 + $0x260] sm:$0xff] %v856_v12 }
  0x5f   : > { %859 = vst [vmem:[%s4236_s29 + $0x268] sm:$0xff] %v858_v13  ;;  %v860_v14 = vld [vmem:[%s4231_s28 + $0x9c0] sm:$0xff] }
  0x60   : > { %v862_v15 = vld [vmem:[%s4231_s28 + $0x9e0] sm:$0xff]  ;;  %861 = vst [vmem:[%s4236_s29 + $0x270] sm:$0xff] %v860_v14 }
  0x61   : > { %v864_v16 = vld [vmem:[%s4231_s28 + $0xa00] sm:$0xff]  ;;  %863 = vst [vmem:[%s4236_s29 + $0x278] sm:$0xff] %v862_v15 }
  0x62   : > { %865 = vst [vmem:[%s4236_s29 + $0x280] sm:$0xff] %v864_v16  ;;  %v866_v17 = vld [vmem:[%s4231_s28 + $0xa20] sm:$0xff] }
  0x63   : > { %v868_v18 = vld [vmem:[%s4231_s28 + $0xa40] sm:$0xff]  ;;  %867 = vst [vmem:[%s4236_s29 + $0x288] sm:$0xff] %v866_v17 }
  0x64   : > { %v870_v19 = vld [vmem:[%s4231_s28 + $0xa60] sm:$0xff]  ;;  %869 = vst [vmem:[%s4236_s29 + $0x290] sm:$0xff] %v868_v18 }
  0x65   : > { %871 = vst [vmem:[%s4236_s29 + $0x298] sm:$0xff] %v870_v19  ;;  %v872_v20 = vld [vmem:[%s4231_s28 + $0xa80] sm:$0xff] }
  0x66   : > { %v874_v21 = vld [vmem:[%s4231_s28 + $0xaa0] sm:$0xff]  ;;  %873 = vst [vmem:[%s4236_s29 + $0x2a0] sm:$0xff] %v872_v20 }
  0x67   : > { %v876_v22 = vld [vmem:[%s4231_s28 + $0xac0] sm:$0xff]  ;;  %875 = vst [vmem:[%s4236_s29 + $0x2a8] sm:$0xff] %v874_v21 }
  0x68   : > { %877 = vst [vmem:[%s4236_s29 + $0x2b0] sm:$0xff] %v876_v22  ;;  %v878_v23 = vld [vmem:[%s4231_s28 + $0xae0] sm:$0xff] }
  0x69   : > { %v880_v24 = vld [vmem:[%s4231_s28 + $0xb00] sm:$0xff]  ;;  %879 = vst [vmem:[%s4236_s29 + $0x2b8] sm:$0xff] %v878_v23 }
  0x6a   : > { %v882_v25 = vld [vmem:[%s4231_s28 + $0xb20] sm:$0xff]  ;;  %881 = vst [vmem:[%s4236_s29 + $0x2c0] sm:$0xff] %v880_v24 }
  0x6b   : > { %883 = vst [vmem:[%s4236_s29 + $0x2c8] sm:$0xff] %v882_v25  ;;  %v884_v26 = vld [vmem:[%s4231_s28 + $0xb40] sm:$0xff] }
  0x6c   : > { %v886_v27 = vld [vmem:[%s4231_s28 + $0xb60] sm:$0xff]  ;;  %885 = vst [vmem:[%s4236_s29 + $0x2d0] sm:$0xff] %v884_v26 }
  0x6d   : > { %v888_v28 = vld [vmem:[%s4231_s28 + $0xb80] sm:$0xff]  ;;  %887 = vst [vmem:[%s4236_s29 + $0x2d8] sm:$0xff] %v886_v27 }
  0x6e   : > { %889 = vst [vmem:[%s4236_s29 + $0x2e0] sm:$0xff] %v888_v28  ;;  %v890_v29 = vld [vmem:[%s4231_s28 + $0xba0] sm:$0xff] }
  0x6f   : > { %v892_v30 = vld [vmem:[%s4231_s28 + $0xbc0] sm:$0xff]  ;;  %891 = vst [vmem:[%s4236_s29 + $0x2e8] sm:$0xff] %v890_v29 }
  0x70   : > { %v894_v31 = vld [vmem:[%s4231_s28 + $0xbe0] sm:$0xff]  ;;  %893 = vst [vmem:[%s4236_s29 + $0x2f0] sm:$0xff] %v892_v30 }
  0x71   : > { %895 = vst [vmem:[%s4236_s29 + $0x2f8] sm:$0xff] %v894_v31  ;;  %v896_v32 = vld [vmem:[%s4231_s28 + $0xc00] sm:$0xff] }
  0x72   : > { %v898_v33 = vld [vmem:[%s4231_s28 + $0xc20] sm:$0xff]  ;;  %897 = vst [vmem:[%s4236_s29 + $0x300] sm:$0xff] %v896_v32 }
  0x73   : > { %v900_v34 = vld [vmem:[%s4231_s28 + $0xc40] sm:$0xff]  ;;  %899 = vst [vmem:[%s4236_s29 + $0x308] sm:$0xff] %v898_v33 }
  0x74   : > { %901 = vst [vmem:[%s4236_s29 + $0x310] sm:$0xff] %v900_v34  ;;  %v902_v35 = vld [vmem:[%s4231_s28 + $0xc60] sm:$0xff] }
  0x75   : > { %v904_v36 = vld [vmem:[%s4231_s28 + $0xc80] sm:$0xff]  ;;  %903 = vst [vmem:[%s4236_s29 + $0x318] sm:$0xff] %v902_v35 }
  0x76   : > { %v906_v37 = vld [vmem:[%s4231_s28 + $0xca0] sm:$0xff]  ;;  %905 = vst [vmem:[%s4236_s29 + $0x320] sm:$0xff] %v904_v36 }
  0x77   : > { %907 = vst [vmem:[%s4236_s29 + $0x328] sm:$0xff] %v906_v37  ;;  %v908_v38 = vld [vmem:[%s4231_s28 + $0xcc0] sm:$0xff] }
  0x78   : > { %v910_v39 = vld [vmem:[%s4231_s28 + $0xce0] sm:$0xff]  ;;  %909 = vst [vmem:[%s4236_s29 + $0x330] sm:$0xff] %v908_v38 }
  0x79   : > { %v912_v40 = vld [vmem:[%s4231_s28 + $0xd00] sm:$0xff]  ;;  %911 = vst [vmem:[%s4236_s29 + $0x338] sm:$0xff] %v910_v39 }
  0x7a   : > { %913 = vst [vmem:[%s4236_s29 + $0x340] sm:$0xff] %v912_v40  ;;  %v914_v41 = vld [vmem:[%s4231_s28 + $0xd20] sm:$0xff] }
  0x7b   : > { %v916_v42 = vld [vmem:[%s4231_s28 + $0xd40] sm:$0xff]  ;;  %915 = vst [vmem:[%s4236_s29 + $0x348] sm:$0xff] %v914_v41 }
  0x7c   : > { %v918_v43 = vld [vmem:[%s4231_s28 + $0xd60] sm:$0xff]  ;;  %917 = vst [vmem:[%s4236_s29 + $0x350] sm:$0xff] %v916_v42 }
  0x7d   : > { %919 = vst [vmem:[%s4236_s29 + $0x358] sm:$0xff] %v918_v43  ;;  %v920_v44 = vld [vmem:[%s4231_s28 + $0xd80] sm:$0xff] }
  0x7e   : > { %v922_v45 = vld [vmem:[%s4231_s28 + $0xda0] sm:$0xff]  ;;  %921 = vst [vmem:[%s4236_s29 + $0x360] sm:$0xff] %v920_v44 }
  0x7f   : > { %v924_v46 = vld [vmem:[%s4231_s28 + $0xdc0] sm:$0xff]  ;;  %923 = vst [vmem:[%s4236_s29 + $0x368] sm:$0xff] %v922_v45 }
  0x80   : > { %925 = vst [vmem:[%s4236_s29 + $0x370] sm:$0xff] %v924_v46  ;;  %v926_v47 = vld [vmem:[%s4231_s28 + $0xde0] sm:$0xff] }
  0x81   : > { %v928_v48 = vld [vmem:[%s4231_s28 + $0xe00] sm:$0xff]  ;;  %927 = vst [vmem:[%s4236_s29 + $0x378] sm:$0xff] %v926_v47 }
  0x82   : > { %v930_v49 = vld [vmem:[%s4231_s28 + $0xe20] sm:$0xff]  ;;  %929 = vst [vmem:[%s4236_s29 + $0x380] sm:$0xff] %v928_v48 }
  0x83   : > { %931 = vst [vmem:[%s4236_s29 + $0x388] sm:$0xff] %v930_v49  ;;  %v932_v50 = vld [vmem:[%s4231_s28 + $0xe40] sm:$0xff] }
  0x84   : > { %v934_v51 = vld [vmem:[%s4231_s28 + $0xe60] sm:$0xff]  ;;  %933 = vst [vmem:[%s4236_s29 + $0x390] sm:$0xff] %v932_v50 }
  0x85   : > { %v936_v52 = vld [vmem:[%s4231_s28 + $0xe80] sm:$0xff]  ;;  %935 = vst [vmem:[%s4236_s29 + $0x398] sm:$0xff] %v934_v51 }
  0x86   : > { %937 = vst [vmem:[%s4236_s29 + $0x3a0] sm:$0xff] %v936_v52  ;;  %v938_v53 = vld [vmem:[%s4231_s28 + $0xea0] sm:$0xff] }
  0x87   : > { %v940_v54 = vld [vmem:[%s4231_s28 + $0xec0] sm:$0xff]  ;;  %939 = vst [vmem:[%s4236_s29 + $0x3a8] sm:$0xff] %v938_v53 }
  0x88   : > { %v942_v55 = vld [vmem:[%s4231_s28 + $0xee0] sm:$0xff]  ;;  %941 = vst [vmem:[%s4236_s29 + $0x3b0] sm:$0xff] %v940_v54 }
  0x89   : > { %943 = vst [vmem:[%s4236_s29 + $0x3b8] sm:$0xff] %v942_v55  ;;  %v944_v56 = vld [vmem:[%s4231_s28 + $0xf00] sm:$0xff] }
  0x8a   : > { %v946_v57 = vld [vmem:[%s4231_s28 + $0xf20] sm:$0xff]  ;;  %945 = vst [vmem:[%s4236_s29 + $0x3c0] sm:$0xff] %v944_v56 }
  0x8b   : > { %v948_v58 = vld [vmem:[%s4231_s28 + $0xf40] sm:$0xff]  ;;  %947 = vst [vmem:[%s4236_s29 + $0x3c8] sm:$0xff] %v946_v57 }
  0x8c   : > { %949 = vst [vmem:[%s4236_s29 + $0x3d0] sm:$0xff] %v948_v58  ;;  %v950_v59 = vld [vmem:[%s4231_s28 + $0xf60] sm:$0xff] }
  0x8d   : > { %v952_v60 = vld [vmem:[%s4231_s28 + $0xf80] sm:$0xff]  ;;  %951 = vst [vmem:[%s4236_s29 + $0x3d8] sm:$0xff] %v950_v59 }
  0x8e   : > { %v954_v61 = vld [vmem:[%s4231_s28 + $0xfa0] sm:$0xff]  ;;  %953 = vst [vmem:[%s4236_s29 + $0x3e0] sm:$0xff] %v952_v60 }
  0x8f   : > { %955 = vst [vmem:[%s4236_s29 + $0x3e8] sm:$0xff] %v954_v61  ;;  %v956_v62 = vld [vmem:[%s4231_s28 + $0xfc0] sm:$0xff] }
  0x90   : > { %v958_v63 = vld [vmem:[%s4231_s28 + $0xfe0] sm:$0xff]  ;;  %957 = vst [vmem:[%s4236_s29 + $0x3f0] sm:$0xff] %v956_v62 }
  0x91   : > { %v960_v0 = vld [vmem:[%s4231_s28 + $0x1000] sm:$0xff]  ;;  %959 = vst [vmem:[%s4236_s29 + $0x3f8] sm:$0xff] %v958_v63 }
  0x92   : > { %961 = vst [vmem:[%s4236_s29 + $0x400] sm:$0xff] %v960_v0  ;;  %v962_v1 = vld [vmem:[%s4231_s28 + $0x1020] sm:$0xff] }
  0x93   : > { %v964_v2 = vld [vmem:[%s4231_s28 + $0x1040] sm:$0xff]  ;;  %963 = vst [vmem:[%s4236_s29 + $0x408] sm:$0xff] %v962_v1 }
  0x94   : > { %v966_v3 = vld [vmem:[%s4231_s28 + $0x1060] sm:$0xff]  ;;  %965 = vst [vmem:[%s4236_s29 + $0x410] sm:$0xff] %v964_v2 }
  0x95   : > { %967 = vst [vmem:[%s4236_s29 + $0x418] sm:$0xff] %v966_v3  ;;  %v968_v4 = vld [vmem:[%s4231_s28 + $0x1080] sm:$0xff] }
  0x96   : > { %v970_v5 = vld [vmem:[%s4231_s28 + $0x10a0] sm:$0xff]  ;;  %969 = vst [vmem:[%s4236_s29 + $0x420] sm:$0xff] %v968_v4 }
  0x97   : > { %v972_v6 = vld [vmem:[%s4231_s28 + $0x10c0] sm:$0xff]  ;;  %971 = vst [vmem:[%s4236_s29 + $0x428] sm:$0xff] %v970_v5 }
  0x98   : > { %973 = vst [vmem:[%s4236_s29 + $0x430] sm:$0xff] %v972_v6  ;;  %v974_v7 = vld [vmem:[%s4231_s28 + $0x10e0] sm:$0xff] }
  0x99   : > { %v976_v8 = vld [vmem:[%s4231_s28 + $0x1100] sm:$0xff]  ;;  %975 = vst [vmem:[%s4236_s29 + $0x438] sm:$0xff] %v974_v7 }
  0x9a   : > { %v978_v9 = vld [vmem:[%s4231_s28 + $0x1120] sm:$0xff]  ;;  %977 = vst [vmem:[%s4236_s29 + $0x440] sm:$0xff] %v976_v8 }
  0x9b   : > { %979 = vst [vmem:[%s4236_s29 + $0x448] sm:$0xff] %v978_v9  ;;  %v980_v10 = vld [vmem:[%s4231_s28 + $0x1140] sm:$0xff] }
  0x9c   : > { %v982_v11 = vld [vmem:[%s4231_s28 + $0x1160] sm:$0xff]  ;;  %981 = vst [vmem:[%s4236_s29 + $0x450] sm:$0xff] %v980_v10 }
  0x9d   : > { %v984_v12 = vld [vmem:[%s4231_s28 + $0x1180] sm:$0xff]  ;;  %983 = vst [vmem:[%s4236_s29 + $0x458] sm:$0xff] %v982_v11 }
  0x9e   : > { %985 = vst [vmem:[%s4236_s29 + $0x460] sm:$0xff] %v984_v12  ;;  %v986_v13 = vld [vmem:[%s4231_s28 + $0x11a0] sm:$0xff] }
  0x9f   : > { %v988_v14 = vld [vmem:[%s4231_s28 + $0x11c0] sm:$0xff]  ;;  %987 = vst [vmem:[%s4236_s29 + $0x468] sm:$0xff] %v986_v13 }
  0xa0   : > { %v990_v15 = vld [vmem:[%s4231_s28 + $0x11e0] sm:$0xff]  ;;  %989 = vst [vmem:[%s4236_s29 + $0x470] sm:$0xff] %v988_v14 }
  0xa1   : > { %991 = vst [vmem:[%s4236_s29 + $0x478] sm:$0xff] %v990_v15  ;;  %v992_v16 = vld [vmem:[%s4231_s28 + $0x1200] sm:$0xff] }
  0xa2   : > { %v994_v17 = vld [vmem:[%s4231_s28 + $0x1220] sm:$0xff]  ;;  %993 = vst [vmem:[%s4236_s29 + $0x480] sm:$0xff] %v992_v16 }
  0xa3   : > { %v996_v18 = vld [vmem:[%s4231_s28 + $0x1240] sm:$0xff]  ;;  %995 = vst [vmem:[%s4236_s29 + $0x488] sm:$0xff] %v994_v17 }
  0xa4   : > { %997 = vst [vmem:[%s4236_s29 + $0x490] sm:$0xff] %v996_v18  ;;  %v998_v19 = vld [vmem:[%s4231_s28 + $0x1260] sm:$0xff] }
  0xa5   : > { %v1000_v20 = vld [vmem:[%s4231_s28 + $0x1280] sm:$0xff]  ;;  %999 = vst [vmem:[%s4236_s29 + $0x498] sm:$0xff] %v998_v19 }
  0xa6   : > { %v1002_v21 = vld [vmem:[%s4231_s28 + $0x12a0] sm:$0xff]  ;;  %1001 = vst [vmem:[%s4236_s29 + $0x4a0] sm:$0xff] %v1000_v20 }
  0xa7   : > { %1003 = vst [vmem:[%s4236_s29 + $0x4a8] sm:$0xff] %v1002_v21  ;;  %v1004_v22 = vld [vmem:[%s4231_s28 + $0x12c0] sm:$0xff] }
  0xa8   : > { %v1006_v23 = vld [vmem:[%s4231_s28 + $0x12e0] sm:$0xff]  ;;  %1005 = vst [vmem:[%s4236_s29 + $0x4b0] sm:$0xff] %v1004_v22 }
  0xa9   : > { %v1008_v24 = vld [vmem:[%s4231_s28 + $0x1300] sm:$0xff]  ;;  %1007 = vst [vmem:[%s4236_s29 + $0x4b8] sm:$0xff] %v1006_v23 }
  0xaa   : > { %1009 = vst [vmem:[%s4236_s29 + $0x4c0] sm:$0xff] %v1008_v24  ;;  %v1010_v25 = vld [vmem:[%s4231_s28 + $0x1320] sm:$0xff] }
  0xab   : > { %v1012_v26 = vld [vmem:[%s4231_s28 + $0x1340] sm:$0xff]  ;;  %1011 = vst [vmem:[%s4236_s29 + $0x4c8] sm:$0xff] %v1010_v25 }
  0xac   : > { %v1014_v27 = vld [vmem:[%s4231_s28 + $0x1360] sm:$0xff]  ;;  %1013 = vst [vmem:[%s4236_s29 + $0x4d0] sm:$0xff] %v1012_v26 }
  0xad   : > { %1015 = vst [vmem:[%s4236_s29 + $0x4d8] sm:$0xff] %v1014_v27  ;;  %v1016_v28 = vld [vmem:[%s4231_s28 + $0x1380] sm:$0xff] }
  0xae   : > { %v1018_v29 = vld [vmem:[%s4231_s28 + $0x13a0] sm:$0xff]  ;;  %1017 = vst [vmem:[%s4236_s29 + $0x4e0] sm:$0xff] %v1016_v28 }
  0xaf   : > { %v1020_v30 = vld [vmem:[%s4231_s28 + $0x13c0] sm:$0xff]  ;;  %1019 = vst [vmem:[%s4236_s29 + $0x4e8] sm:$0xff] %v1018_v29 }
  0xb0   : > { %1021 = vst [vmem:[%s4236_s29 + $0x4f0] sm:$0xff] %v1020_v30  ;;  %v1022_v31 = vld [vmem:[%s4231_s28 + $0x13e0] sm:$0xff] }
  0xb1   : > { %v1024_v32 = vld [vmem:[%s4231_s28 + $0x1400] sm:$0xff]  ;;  %1023 = vst [vmem:[%s4236_s29 + $0x4f8] sm:$0xff] %v1022_v31 }
  0xb2   : > { %v1026_v33 = vld [vmem:[%s4231_s28 + $0x1420] sm:$0xff]  ;;  %1025 = vst [vmem:[%s4236_s29 + $0x500] sm:$0xff] %v1024_v32 }
  0xb3   : > { %1027 = vst [vmem:[%s4236_s29 + $0x508] sm:$0xff] %v1026_v33  ;;  %v1028_v34 = vld [vmem:[%s4231_s28 + $0x1440] sm:$0xff] }
  0xb4   : > { %v1030_v35 = vld [vmem:[%s4231_s28 + $0x1460] sm:$0xff]  ;;  %1029 = vst [vmem:[%s4236_s29 + $0x510] sm:$0xff] %v1028_v34 }
  0xb5   : > { %v1032_v36 = vld [vmem:[%s4231_s28 + $0x1480] sm:$0xff]  ;;  %1031 = vst [vmem:[%s4236_s29 + $0x518] sm:$0xff] %v1030_v35 }
  0xb6   : > { %1033 = vst [vmem:[%s4236_s29 + $0x520] sm:$0xff] %v1032_v36  ;;  %v1034_v37 = vld [vmem:[%s4231_s28 + $0x14a0] sm:$0xff] }
  0xb7   : > { %v1036_v38 = vld [vmem:[%s4231_s28 + $0x14c0] sm:$0xff]  ;;  %1035 = vst [vmem:[%s4236_s29 + $0x528] sm:$0xff] %v1034_v37 }
  0xb8   : > { %v1038_v39 = vld [vmem:[%s4231_s28 + $0x14e0] sm:$0xff]  ;;  %1037 = vst [vmem:[%s4236_s29 + $0x530] sm:$0xff] %v1036_v38 }
  0xb9   : > { %1039 = vst [vmem:[%s4236_s29 + $0x538] sm:$0xff] %v1038_v39  ;;  %v1040_v40 = vld [vmem:[%s4231_s28 + $0x1500] sm:$0xff] }
  0xba   : > { %v1042_v41 = vld [vmem:[%s4231_s28 + $0x1520] sm:$0xff]  ;;  %1041 = vst [vmem:[%s4236_s29 + $0x540] sm:$0xff] %v1040_v40 }
  0xbb   : > { %v1044_v42 = vld [vmem:[%s4231_s28 + $0x1540] sm:$0xff]  ;;  %1043 = vst [vmem:[%s4236_s29 + $0x548] sm:$0xff] %v1042_v41 }
  0xbc   : > { %1045 = vst [vmem:[%s4236_s29 + $0x550] sm:$0xff] %v1044_v42  ;;  %v1046_v43 = vld [vmem:[%s4231_s28 + $0x1560] sm:$0xff] }
  0xbd   : > { %v1048_v44 = vld [vmem:[%s4231_s28 + $0x1580] sm:$0xff]  ;;  %1047 = vst [vmem:[%s4236_s29 + $0x558] sm:$0xff] %v1046_v43 }
  0xbe   : > { %v1050_v45 = vld [vmem:[%s4231_s28 + $0x15a0] sm:$0xff]  ;;  %1049 = vst [vmem:[%s4236_s29 + $0x560] sm:$0xff] %v1048_v44 }
  0xbf   : > { %1051 = vst [vmem:[%s4236_s29 + $0x568] sm:$0xff] %v1050_v45  ;;  %v1052_v46 = vld [vmem:[%s4231_s28 + $0x15c0] sm:$0xff] }
  0xc0   : > { %v1054_v47 = vld [vmem:[%s4231_s28 + $0x15e0] sm:$0xff]  ;;  %1053 = vst [vmem:[%s4236_s29 + $0x570] sm:$0xff] %v1052_v46 }
  0xc1   : > { %v1056_v48 = vld [vmem:[%s4231_s28 + $0x1600] sm:$0xff]  ;;  %1055 = vst [vmem:[%s4236_s29 + $0x578] sm:$0xff] %v1054_v47 }
  0xc2   : > { %1057 = vst [vmem:[%s4236_s29 + $0x580] sm:$0xff] %v1056_v48  ;;  %v1058_v49 = vld [vmem:[%s4231_s28 + $0x1620] sm:$0xff] }
  0xc3   : > { %v1060_v50 = vld [vmem:[%s4231_s28 + $0x1640] sm:$0xff]  ;;  %1059 = vst [vmem:[%s4236_s29 + $0x588] sm:$0xff] %v1058_v49 }
  0xc4   : > { %v1062_v51 = vld [vmem:[%s4231_s28 + $0x1660] sm:$0xff]  ;;  %1061 = vst [vmem:[%s4236_s29 + $0x590] sm:$0xff] %v1060_v50 }
  0xc5   : > { %1063 = vst [vmem:[%s4236_s29 + $0x598] sm:$0xff] %v1062_v51  ;;  %v1064_v52 = vld [vmem:[%s4231_s28 + $0x1680] sm:$0xff] }
  0xc6   : > { %v1066_v53 = vld [vmem:[%s4231_s28 + $0x16a0] sm:$0xff]  ;;  %1065 = vst [vmem:[%s4236_s29 + $0x5a0] sm:$0xff] %v1064_v52 }
  0xc7   : > { %v1068_v54 = vld [vmem:[%s4231_s28 + $0x16c0] sm:$0xff]  ;;  %1067 = vst [vmem:[%s4236_s29 + $0x5a8] sm:$0xff] %v1066_v53 }
  0xc8   : > { %1069 = vst [vmem:[%s4236_s29 + $0x5b0] sm:$0xff] %v1068_v54  ;;  %v1070_v55 = vld [vmem:[%s4231_s28 + $0x16e0] sm:$0xff] }
  0xc9   : > { %v1072_v56 = vld [vmem:[%s4231_s28 + $0x1700] sm:$0xff]  ;;  %1071 = vst [vmem:[%s4236_s29 + $0x5b8] sm:$0xff] %v1070_v55 }
  0xca   : > { %v1074_v57 = vld [vmem:[%s4231_s28 + $0x1720] sm:$0xff]  ;;  %1073 = vst [vmem:[%s4236_s29 + $0x5c0] sm:$0xff] %v1072_v56 }
  0xcb   : > { %1075 = vst [vmem:[%s4236_s29 + $0x5c8] sm:$0xff] %v1074_v57  ;;  %v1076_v58 = vld [vmem:[%s4231_s28 + $0x1740] sm:$0xff] }
  0xcc   : > { %v1078_v59 = vld [vmem:[%s4231_s28 + $0x1760] sm:$0xff]  ;;  %1077 = vst [vmem:[%s4236_s29 + $0x5d0] sm:$0xff] %v1076_v58 }
  0xcd   : > { %v1080_v60 = vld [vmem:[%s4231_s28 + $0x1780] sm:$0xff]  ;;  %1079 = vst [vmem:[%s4236_s29 + $0x5d8] sm:$0xff] %v1078_v59 }
  0xce   : > { %1081 = vst [vmem:[%s4236_s29 + $0x5e0] sm:$0xff] %v1080_v60  ;;  %v1082_v61 = vld [vmem:[%s4231_s28 + $0x17a0] sm:$0xff] }
  0xcf   : > { %v1084_v62 = vld [vmem:[%s4231_s28 + $0x17c0] sm:$0xff]  ;;  %1083 = vst [vmem:[%s4236_s29 + $0x5e8] sm:$0xff] %v1082_v61 }
  0xd0   : > { %v1086_v63 = vld [vmem:[%s4231_s28 + $0x17e0] sm:$0xff]  ;;  %1085 = vst [vmem:[%s4236_s29 + $0x5f0] sm:$0xff] %v1084_v62 }
  0xd1   : > { %1087 = vst [vmem:[%s4236_s29 + $0x5f8] sm:$0xff] %v1086_v63  ;;  %v1088_v0 = vld [vmem:[%s4231_s28 + $0x1800] sm:$0xff] }
  0xd2   : > { %v1090_v1 = vld [vmem:[%s4231_s28 + $0x1820] sm:$0xff]  ;;  %1089 = vst [vmem:[%s4236_s29 + $0x600] sm:$0xff] %v1088_v0 }
  0xd3   : > { %v1092_v2 = vld [vmem:[%s4231_s28 + $0x1840] sm:$0xff]  ;;  %1091 = vst [vmem:[%s4236_s29 + $0x608] sm:$0xff] %v1090_v1 }
  0xd4   : > { %1093 = vst [vmem:[%s4236_s29 + $0x610] sm:$0xff] %v1092_v2  ;;  %v1094_v3 = vld [vmem:[%s4231_s28 + $0x1860] sm:$0xff] }
  0xd5   : > { %v1096_v4 = vld [vmem:[%s4231_s28 + $0x1880] sm:$0xff]  ;;  %1095 = vst [vmem:[%s4236_s29 + $0x618] sm:$0xff] %v1094_v3 }
  0xd6   : > { %v1098_v5 = vld [vmem:[%s4231_s28 + $0x18a0] sm:$0xff]  ;;  %1097 = vst [vmem:[%s4236_s29 + $0x620] sm:$0xff] %v1096_v4 }
  0xd7   : > { %1099 = vst [vmem:[%s4236_s29 + $0x628] sm:$0xff] %v1098_v5  ;;  %v1100_v6 = vld [vmem:[%s4231_s28 + $0x18c0] sm:$0xff] }
  0xd8   : > { %v1102_v7 = vld [vmem:[%s4231_s28 + $0x18e0] sm:$0xff]  ;;  %1101 = vst [vmem:[%s4236_s29 + $0x630] sm:$0xff] %v1100_v6 }
  0xd9   : > { %v1104_v8 = vld [vmem:[%s4231_s28 + $0x1900] sm:$0xff]  ;;  %1103 = vst [vmem:[%s4236_s29 + $0x638] sm:$0xff] %v1102_v7 }
  0xda   : > { %1105 = vst [vmem:[%s4236_s29 + $0x640] sm:$0xff] %v1104_v8  ;;  %v1106_v9 = vld [vmem:[%s4231_s28 + $0x1920] sm:$0xff] }
  0xdb   : > { %v1108_v10 = vld [vmem:[%s4231_s28 + $0x1940] sm:$0xff]  ;;  %1107 = vst [vmem:[%s4236_s29 + $0x648] sm:$0xff] %v1106_v9 }
  0xdc   : > { %v1110_v11 = vld [vmem:[%s4231_s28 + $0x1960] sm:$0xff]  ;;  %1109 = vst [vmem:[%s4236_s29 + $0x650] sm:$0xff] %v1108_v10 }
  0xdd   : > { %1111 = vst [vmem:[%s4236_s29 + $0x658] sm:$0xff] %v1110_v11  ;;  %v1112_v12 = vld [vmem:[%s4231_s28 + $0x1980] sm:$0xff] }
  0xde   : > { %v1114_v13 = vld [vmem:[%s4231_s28 + $0x19a0] sm:$0xff]  ;;  %1113 = vst [vmem:[%s4236_s29 + $0x660] sm:$0xff] %v1112_v12 }
  0xdf   : > { %v1116_v14 = vld [vmem:[%s4231_s28 + $0x19c0] sm:$0xff]  ;;  %1115 = vst [vmem:[%s4236_s29 + $0x668] sm:$0xff] %v1114_v13 }
  0xe0   : > { %1117 = vst [vmem:[%s4236_s29 + $0x670] sm:$0xff] %v1116_v14  ;;  %v1118_v15 = vld [vmem:[%s4231_s28 + $0x19e0] sm:$0xff] }
  0xe1   : > { %v1120_v16 = vld [vmem:[%s4231_s28 + $0x1a00] sm:$0xff]  ;;  %1119 = vst [vmem:[%s4236_s29 + $0x678] sm:$0xff] %v1118_v15 }
  0xe2   : > { %v1122_v17 = vld [vmem:[%s4231_s28 + $0x1a20] sm:$0xff]  ;;  %1121 = vst [vmem:[%s4236_s29 + $0x680] sm:$0xff] %v1120_v16 }
  0xe3   : > { %1123 = vst [vmem:[%s4236_s29 + $0x688] sm:$0xff] %v1122_v17  ;;  %v1124_v18 = vld [vmem:[%s4231_s28 + $0x1a40] sm:$0xff] }
  0xe4   : > { %v1126_v19 = vld [vmem:[%s4231_s28 + $0x1a60] sm:$0xff]  ;;  %1125 = vst [vmem:[%s4236_s29 + $0x690] sm:$0xff] %v1124_v18 }
  0xe5   : > { %v1128_v20 = vld [vmem:[%s4231_s28 + $0x1a80] sm:$0xff]  ;;  %1127 = vst [vmem:[%s4236_s29 + $0x698] sm:$0xff] %v1126_v19 }
  0xe6   : > { %1129 = vst [vmem:[%s4236_s29 + $0x6a0] sm:$0xff] %v1128_v20  ;;  %v1130_v21 = vld [vmem:[%s4231_s28 + $0x1aa0] sm:$0xff] }
  0xe7   : > { %v1132_v22 = vld [vmem:[%s4231_s28 + $0x1ac0] sm:$0xff]  ;;  %1131 = vst [vmem:[%s4236_s29 + $0x6a8] sm:$0xff] %v1130_v21 }
  0xe8   : > { %v1134_v23 = vld [vmem:[%s4231_s28 + $0x1ae0] sm:$0xff]  ;;  %1133 = vst [vmem:[%s4236_s29 + $0x6b0] sm:$0xff] %v1132_v22 }
  0xe9   : > { %1135 = vst [vmem:[%s4236_s29 + $0x6b8] sm:$0xff] %v1134_v23  ;;  %v1136_v24 = vld [vmem:[%s4231_s28 + $0x1b00] sm:$0xff] }
  0xea   : > { %v1138_v25 = vld [vmem:[%s4231_s28 + $0x1b20] sm:$0xff]  ;;  %1137 = vst [vmem:[%s4236_s29 + $0x6c0] sm:$0xff] %v1136_v24 }
  0xeb   : > { %v1140_v26 = vld [vmem:[%s4231_s28 + $0x1b40] sm:$0xff]  ;;  %1139 = vst [vmem:[%s4236_s29 + $0x6c8] sm:$0xff] %v1138_v25 }
  0xec   : > { %1141 = vst [vmem:[%s4236_s29 + $0x6d0] sm:$0xff] %v1140_v26  ;;  %v1142_v27 = vld [vmem:[%s4231_s28 + $0x1b60] sm:$0xff] }
  0xed   : > { %v1144_v28 = vld [vmem:[%s4231_s28 + $0x1b80] sm:$0xff]  ;;  %1143 = vst [vmem:[%s4236_s29 + $0x6d8] sm:$0xff] %v1142_v27 }
  0xee   : > { %v1146_v29 = vld [vmem:[%s4231_s28 + $0x1ba0] sm:$0xff]  ;;  %1145 = vst [vmem:[%s4236_s29 + $0x6e0] sm:$0xff] %v1144_v28 }
  0xef   : > { %1147 = vst [vmem:[%s4236_s29 + $0x6e8] sm:$0xff] %v1146_v29  ;;  %v1148_v30 = vld [vmem:[%s4231_s28 + $0x1bc0] sm:$0xff] }
  0xf0   : > { %v1150_v31 = vld [vmem:[%s4231_s28 + $0x1be0] sm:$0xff]  ;;  %1149 = vst [vmem:[%s4236_s29 + $0x6f0] sm:$0xff] %v1148_v30 }
  0xf1   : > { %v1152_v32 = vld [vmem:[%s4231_s28 + $0x1c00] sm:$0xff]  ;;  %1151 = vst [vmem:[%s4236_s29 + $0x6f8] sm:$0xff] %v1150_v31 }
  0xf2   : > { %1153 = vst [vmem:[%s4236_s29 + $0x700] sm:$0xff] %v1152_v32  ;;  %v1154_v33 = vld [vmem:[%s4231_s28 + $0x1c20] sm:$0xff] }
  0xf3   : > { %v1156_v34 = vld [vmem:[%s4231_s28 + $0x1c40] sm:$0xff]  ;;  %1155 = vst [vmem:[%s4236_s29 + $0x708] sm:$0xff] %v1154_v33 }
  0xf4   : > { %v1158_v35 = vld [vmem:[%s4231_s28 + $0x1c60] sm:$0xff]  ;;  %1157 = vst [vmem:[%s4236_s29 + $0x710] sm:$0xff] %v1156_v34 }
  0xf5   : > { %1159 = vst [vmem:[%s4236_s29 + $0x718] sm:$0xff] %v1158_v35  ;;  %v1160_v36 = vld [vmem:[%s4231_s28 + $0x1c80] sm:$0xff] }
  0xf6   : > { %v1162_v37 = vld [vmem:[%s4231_s28 + $0x1ca0] sm:$0xff]  ;;  %1161 = vst [vmem:[%s4236_s29 + $0x720] sm:$0xff] %v1160_v36 }
  0xf7   : > { %v1164_v38 = vld [vmem:[%s4231_s28 + $0x1cc0] sm:$0xff]  ;;  %1163 = vst [vmem:[%s4236_s29 + $0x728] sm:$0xff] %v1162_v37 }
  0xf8   : > { %1165 = vst [vmem:[%s4236_s29 + $0x730] sm:$0xff] %v1164_v38  ;;  %v1166_v39 = vld [vmem:[%s4231_s28 + $0x1ce0] sm:$0xff] }
  0xf9   : > { %v1168_v40 = vld [vmem:[%s4231_s28 + $0x1d00] sm:$0xff]  ;;  %1167 = vst [vmem:[%s4236_s29 + $0x738] sm:$0xff] %v1166_v39 }
  0xfa   : > { %v1170_v41 = vld [vmem:[%s4231_s28 + $0x1d20] sm:$0xff]  ;;  %1169 = vst [vmem:[%s4236_s29 + $0x740] sm:$0xff] %v1168_v40 }
  0xfb   : > { %1171 = vst [vmem:[%s4236_s29 + $0x748] sm:$0xff] %v1170_v41  ;;  %v1172_v42 = vld [vmem:[%s4231_s28 + $0x1d40] sm:$0xff] }
  0xfc   : > { %v1174_v43 = vld [vmem:[%s4231_s28 + $0x1d60] sm:$0xff]  ;;  %1173 = vst [vmem:[%s4236_s29 + $0x750] sm:$0xff] %v1172_v42 }
  0xfd   : > { %v1176_v44 = vld [vmem:[%s4231_s28 + $0x1d80] sm:$0xff]  ;;  %1175 = vst [vmem:[%s4236_s29 + $0x758] sm:$0xff] %v1174_v43 }
  0xfe   : > { %1177 = vst [vmem:[%s4236_s29 + $0x760] sm:$0xff] %v1176_v44  ;;  %v1178_v45 = vld [vmem:[%s4231_s28 + $0x1da0] sm:$0xff] }
  0xff   : > { %v1180_v46 = vld [vmem:[%s4231_s28 + $0x1dc0] sm:$0xff]  ;;  %1179 = vst [vmem:[%s4236_s29 + $0x768] sm:$0xff] %v1178_v45 }
 0x100   : > { %v1182_v47 = vld [vmem:[%s4231_s28 + $0x1de0] sm:$0xff]  ;;  %1181 = vst [vmem:[%s4236_s29 + $0x770] sm:$0xff] %v1180_v46 }
 0x101   : > { %1183 = vst [vmem:[%s4236_s29 + $0x778] sm:$0xff] %v1182_v47  ;;  %v1184_v48 = vld [vmem:[%s4231_s28 + $0x1e00] sm:$0xff] }
 0x102   : > { %v1186_v49 = vld [vmem:[%s4231_s28 + $0x1e20] sm:$0xff]  ;;  %1185 = vst [vmem:[%s4236_s29 + $0x780] sm:$0xff] %v1184_v48 }
 0x103   : > { %v1188_v50 = vld [vmem:[%s4231_s28 + $0x1e40] sm:$0xff]  ;;  %1187 = vst [vmem:[%s4236_s29 + $0x788] sm:$0xff] %v1186_v49 }
 0x104   : > { %1189 = vst [vmem:[%s4236_s29 + $0x790] sm:$0xff] %v1188_v50  ;;  %v1190_v51 = vld [vmem:[%s4231_s28 + $0x1e60] sm:$0xff] }
 0x105   : > { %v1192_v52 = vld [vmem:[%s4231_s28 + $0x1e80] sm:$0xff]  ;;  %1191 = vst [vmem:[%s4236_s29 + $0x798] sm:$0xff] %v1190_v51 }
 0x106   : > { %v1194_v53 = vld [vmem:[%s4231_s28 + $0x1ea0] sm:$0xff]  ;;  %1193 = vst [vmem:[%s4236_s29 + $0x7a0] sm:$0xff] %v1192_v52 }
 0x107   : > { %1195 = vst [vmem:[%s4236_s29 + $0x7a8] sm:$0xff] %v1194_v53  ;;  %v1196_v54 = vld [vmem:[%s4231_s28 + $0x1ec0] sm:$0xff] }
 0x108   : > { %v1198_v55 = vld [vmem:[%s4231_s28 + $0x1ee0] sm:$0xff]  ;;  %1197 = vst [vmem:[%s4236_s29 + $0x7b0] sm:$0xff] %v1196_v54 }
 0x109   : > { %v1200_v56 = vld [vmem:[%s4231_s28 + $0x1f00] sm:$0xff]  ;;  %1199 = vst [vmem:[%s4236_s29 + $0x7b8] sm:$0xff] %v1198_v55 }
 0x10a   : > { %1201 = vst [vmem:[%s4236_s29 + $0x7c0] sm:$0xff] %v1200_v56  ;;  %v1202_v57 = vld [vmem:[%s4231_s28 + $0x1f20] sm:$0xff] }
 0x10b   : > { %v1204_v58 = vld [vmem:[%s4231_s28 + $0x1f40] sm:$0xff]  ;;  %1203 = vst [vmem:[%s4236_s29 + $0x7c8] sm:$0xff] %v1202_v57 }
 0x10c   : > { %v1206_v59 = vld [vmem:[%s4231_s28 + $0x1f60] sm:$0xff]  ;;  %1205 = vst [vmem:[%s4236_s29 + $0x7d0] sm:$0xff] %v1204_v58 }
 0x10d   : > { %1207 = vst [vmem:[%s4236_s29 + $0x7d8] sm:$0xff] %v1206_v59  ;;  %v1208_v60 = vld [vmem:[%s4231_s28 + $0x1f80] sm:$0xff] }
 0x10e   : > { %v1210_v61 = vld [vmem:[%s4231_s28 + $0x1fa0] sm:$0xff]  ;;  %1209 = vst [vmem:[%s4236_s29 + $0x7e0] sm:$0xff] %v1208_v60 }
 0x10f   : > { %v1212_v62 = vld [vmem:[%s4231_s28 + $0x1fc0] sm:$0xff]  ;;  %1211 = vst [vmem:[%s4236_s29 + $0x7e8] sm:$0xff] %v1210_v61 }
 0x110   : > { %1213 = vst [vmem:[%s4236_s29 + $0x7f0] sm:$0xff] %v1212_v62  ;;  %v1214_v63 = vld [vmem:[%s4231_s28 + $0x1fe0] sm:$0xff] }
 0x111   : > { %1215 = vst [vmem:[%s4236_s29 + $0x7f8] sm:$0xff] %v1214_v63 }
 0x112 PF: > { %p3438_p5 = scmp.ge.s32.totalorder %s4169_s17, 1  ;;  %p1236_p6 = scmp.lt.s32.totalorder %s4169_s17, 5 }
 0x114   : > { %p1237_p7 = pnand %p3438_p5, %p1236_p6 }
 0x115   : > { %s1243_s30 = sand.u32 (!%p1237_p7), 1, %s4161_s15   ;;  %v1305_v0 = vlaneseq (!%p1237_p7)  ;;  %v4171_v1 = vmov (!%p1237_p7), 1983009808   ;;  %v4753_v3 = vld [vmem:[%s5128_s0] sm:$0xff] (!%p1237_p7)  ;;  %v4760_v5 = vld [vmem:[%s5128_s0 + $0x10] sm:$0xff] (!%p1237_p7)  ;;  %vm3265_vm0 = vcmask (!%p1237_p7), 1041408  }
 0x116   : > { %1240 = sbr.rel (%p1237_p7) target bundleno = 811 (0x32b), region = 70  ;;  %s3439_s5 = sshll.u32 (!%p1237_p7), %s1243_s30, 11  ;;  %v1303_v2 = vunpack.c.l.s4 (!%p1237_p7), %v4171_v1 }
 0x117   : > { %v4755_v4 = vshrl.u32 (!%p1237_p7), %v1305_v0, 7  ;;  %s4762_s10 = scalar_lea.vmem (!%p1237_p7), [#allocation2], %s3439_s5  ;;  %s3440_s15 = sshll.u32 (!%p1237_p7), %s3431_s18, 1 }
 0x118   : > { %v3755_v6 = vld [vmem:[%s4762_s10 + $0x4] ss:$8 sps:$4 sm:$0xff] (!%p1237_p7)   ;;  %v1304_v7 = vunpack.c.0.s8 (!%p1237_p7), %v1303_v2  ;;  %v3759_v9 = vld [vmem:[%s4762_s10] ss:$8 sps:$4 sm:$0xff] (!%p1237_p7)   ;;  %v3761_v12 = vld [vmem:[%s4762_s10 + $0x14] ss:$8 sps:$4 sm:$0xff] (!%p1237_p7)  }
 0x119   : > { %v3757_v8 = vld [vmem:[%s4762_s10 + $0x404] ss:$8 sps:$4 sm:$0xff] (!%p1237_p7)   ;;  %2937 = vmatprep.subr.bf16.mxu1 (!%p1237_p7), %v3755_v6  ;;  %v3760_v10 = vld [vmem:[%s4762_s10 + $0x400] ss:$8 sps:$4 sm:$0xff] (!%p1237_p7)   ;;  %v3763_v13 = vld [vmem:[%s4762_s10 + $0x414] ss:$8 sps:$4 sm:$0xff] (!%p1237_p7)  }
 0x11a   : > { %v4769_v11 = vsub.s32 (!%p1237_p7), %v1304_v7, %v4755_v4  ;;  %3101 = vmatprep.subr.bf16.mxu0 (!%p1237_p7), %v3757_v8  ;;  %2938 = vmatpush1.bf16.msra.mxu1 (!%p1237_p7), %v3759_v9  ;;  %v3765_v14 = vld [vmem:[%s4762_s10 + $0x10] ss:$8 sps:$4 sm:$0xff] (!%p1237_p7)   ;;  %v3767_v18 = vld [vmem:[%s4762_s10 + $0x24] ss:$8 sps:$4 sm:$0xff] (!%p1237_p7)   ;;  %v3771_v22 = vld [vmem:[%s4762_s10 + $0x20] ss:$8 sps:$4 sm:$0xff] (!%p1237_p7)  }
 0x11b   : > { %3102 = vmatpush1.bf16.msra.mxu0 (!%p1237_p7), %v3760_v10  ;;  %2939 = vmatprep.subr.bf16.mxu1 (!%p1237_p7), %v3761_v12  ;;  %v3766_v17 = vld [vmem:[%s4762_s10 + $0x410] ss:$8 sps:$4 sm:$0xff] (!%p1237_p7)   ;;  %v3769_v21 = vld [vmem:[%s4762_s10 + $0x424] ss:$8 sps:$4 sm:$0xff] (!%p1237_p7)   ;;  %v3772_v23 = vld [vmem:[%s4762_s10 + $0x420] ss:$8 sps:$4 sm:$0xff] (!%p1237_p7)   ;;  %v1301_v12 = vcombine.high (!%p1237_p7), %v4753_v3, %v4753_v3 }
 0x11c   : > { %v4776_v15 = vrot.slane (!%p1237_p7), %v4753_v3, %v4769_v11  ;;  %v4780_v16 = vrot.slane (!%p1237_p7), %v4760_v5, %v4769_v11  ;;  %3103 = vmatprep.subr.bf16.mxu0 (!%p1237_p7), %v3763_v13  ;;  %v3773_v24 = vld [vmem:[%s4762_s10 + $0x34] ss:$8 sps:$4 sm:$0xff] (!%p1237_p7)   ;;  %v3777_v28 = vld [vmem:[%s4762_s10 + $0x30] ss:$8 sps:$4 sm:$0xff] (!%p1237_p7)   ;;  %v3779_v30 = vld [vmem:[%s4762_s10 + $0x44] ss:$8 sps:$4 sm:$0xff] (!%p1237_p7)   ;;  %v1335_v13 = vcombine.high (!%p1237_p7), %v4760_v5, %v4760_v5 }
 0x11d   : > { %v3775_v27 = vld [vmem:[%s4762_s10 + $0x434] ss:$8 sps:$4 sm:$0xff]   ;;  %v3778_v29 = vld [vmem:[%s4762_s10 + $0x430] ss:$8 sps:$4 sm:$0xff]   ;;  %v3781_v31 = vld [vmem:[%s4762_s10 + $0x444] ss:$8 sps:$4 sm:$0xff]  }
 0x11e   : > { %v1316_v19 = vcombine.high %v4776_v15, %v4776_v15  ;;  %v1350_v20 = vcombine.high %v4780_v16, %v4780_v16  ;;  %2940 = vmatpush1.bf16.msra.mxu1 %v3765_v14  ;;  %v3783_v32 = vld [vmem:[%s4762_s10 + $0x40] ss:$8 sps:$4 sm:$0xff]   ;;  %v3785_v34 = vld [vmem:[%s4762_s10 + $0x54] ss:$8 sps:$4 sm:$0xff]   ;;  %v3789_v36 = vld [vmem:[%s4762_s10 + $0x50] ss:$8 sps:$4 sm:$0xff]   ;;  %v4849_v3 = vrot.slane %v1335_v13, %v4769_v11 }
 0x11f   : > { %3104 = vmatpush1.bf16.msra.mxu0 %v3766_v17  ;;  %2941 = vmatprep.subr.bf16.mxu1 %v3767_v18  ;;  %v3784_v33 = vld [vmem:[%s4762_s10 + $0x440] ss:$8 sps:$4 sm:$0xff]   ;;  %v3787_v35 = vld [vmem:[%s4762_s10 + $0x454] ss:$8 sps:$4 sm:$0xff]   ;;  %v3790_v37 = vld [vmem:[%s4762_s10 + $0x450] ss:$8 sps:$4 sm:$0xff]  }
 0x120   : > { %v1386_v25 = vpack.c.bf16 %v1316_v19, %v1316_v19  ;;  %v1394_v26 = vpack.c.bf16 %v1350_v20, %v1350_v20  ;;  %3105 = vmatprep.subr.bf16.mxu0 %v3769_v21  ;;  %v3791_v38 = vld [vmem:[%s4762_s10 + $0x64] ss:$8 sps:$4 sm:$0xff]   ;;  %v3795_v40 = vld [vmem:[%s4762_s10 + $0x60] ss:$8 sps:$4 sm:$0xff]   ;;  %v3797_v42 = vld [vmem:[%s4762_s10 + $0x74] ss:$8 sps:$4 sm:$0xff]   ;;  %v4846_v20 = vrot.slane %v1301_v12, %v4769_v11 }
 0x121   : > { %v3793_v39 = vld [vmem:[%s4762_s10 + $0x464] ss:$8 sps:$4 sm:$0xff]   ;;  %v3796_v41 = vld [vmem:[%s4762_s10 + $0x460] ss:$8 sps:$4 sm:$0xff]   ;;  %v3799_v43 = vld [vmem:[%s4762_s10 + $0x474] ss:$8 sps:$4 sm:$0xff]  }
 0x122   : > { %2969 = vmatprep.mubr.bf16.mxu1 %v1386_v25  ;;  %3133 = vmatprep.mubr.bf16.mxu0 %v1394_v26  ;;  %v3801_v44 = vld [vmem:[%s4762_s10 + $0x70] ss:$8 sps:$4 sm:$0xff]   ;;  %v3803_v46 = vld [vmem:[%s4762_s10 + $0x84] ss:$8 sps:$4 sm:$0xff]   ;;  %v3807_v48 = vld [vmem:[%s4762_s10 + $0x80] ss:$8 sps:$4 sm:$0xff]   ;;  %v1351_v25 = vcombine.high %v4849_v3, %v4849_v3 }
 0x123   : > { %2942 = vmatpush1.bf16.msra.mxu1 %v3771_v22  ;;  %3106 = vmatpush1.bf16.msra.mxu0 %v3772_v23  ;;  %v3802_v45 = vld [vmem:[%s4762_s10 + $0x470] ss:$8 sps:$4 sm:$0xff]   ;;  %v3805_v47 = vld [vmem:[%s4762_s10 + $0x484] ss:$8 sps:$4 sm:$0xff]   ;;  %v3808_v49 = vld [vmem:[%s4762_s10 + $0x480] ss:$8 sps:$4 sm:$0xff]  }
 0x124   : > { %2943 = vmatprep.subr.bf16.mxu1 %v3773_v24  ;;  %3107 = vmatprep.subr.bf16.mxu0 %v3775_v27  ;;  %v3809_v50 = vld [vmem:[%s4762_s10 + $0x94] ss:$8 sps:$4 sm:$0xff]   ;;  %v3813_v52 = vld [vmem:[%s4762_s10 + $0x90] ss:$8 sps:$4 sm:$0xff]   ;;  %v3815_v54 = vld [vmem:[%s4762_s10 + $0xa4] ss:$8 sps:$4 sm:$0xff]   ;;  %v1317_v24 = vcombine.high %v4846_v20, %v4846_v20 }
 0x125   : > { %v3811_v51 = vld [vmem:[%s4762_s10 + $0x494] ss:$8 sps:$4 sm:$0xff]   ;;  %v3814_v53 = vld [vmem:[%s4762_s10 + $0x490] ss:$8 sps:$4 sm:$0xff]   ;;  %v3817_v55 = vld [vmem:[%s4762_s10 + $0x4a4] ss:$8 sps:$4 sm:$0xff]  }
 0x126   : > { %v3819_v56 = vld [vmem:[%s4762_s10 + $0xa0] ss:$8 sps:$4 sm:$0xff]   ;;  %v3821_v58 = vld [vmem:[%s4762_s10 + $0xb4] ss:$8 sps:$4 sm:$0xff]   ;;  %v3825_v60 = vld [vmem:[%s4762_s10 + $0xb0] ss:$8 sps:$4 sm:$0xff]  }
 0x127   : > { %2944 = vmatpush1.bf16.msra.mxu1 %v3777_v28  ;;  %3108 = vmatpush1.bf16.msra.mxu0 %v3778_v29  ;;  %v3820_v57 = vld [vmem:[%s4762_s10 + $0x4a0] ss:$8 sps:$4 sm:$0xff]   ;;  %v3823_v59 = vld [vmem:[%s4762_s10 + $0x4b4] ss:$8 sps:$4 sm:$0xff]   ;;  %v3826_v61 = vld [vmem:[%s4762_s10 + $0x4b0] ss:$8 sps:$4 sm:$0xff]   ;;  %v1385_v28 = vpack.c.bf16 %v4776_v15, %v4776_v15  ;;  %v1393_v29 = vpack.c.bf16 %v4780_v16, %v4780_v16 }
 0x128   : > { %2945 = vmatprep.subr.bf16.mxu1 %v3779_v30  ;;  %3109 = vmatprep.subr.bf16.mxu0 %v3781_v31  ;;  %v3827_v62 = vld [vmem:[%s4762_s10 + $0xc4] ss:$8 sps:$4 sm:$0xff]   ;;  %v3831_v0 = vld [vmem:[%s4762_s10 + $0xc0] ss:$8 sps:$4 sm:$0xff]   ;;  %v3833_v2 = vld [vmem:[%s4762_s10 + $0xd4] ss:$8 sps:$4 sm:$0xff]  }
 0x129   : > { %v3829_v63 = vld [vmem:[%s4762_s10 + $0x4c4] ss:$8 sps:$4 sm:$0xff]   ;;  %v3832_v1 = vld [vmem:[%s4762_s10 + $0x4c0] ss:$8 sps:$4 sm:$0xff]   ;;  %v3835_v6 = vld [vmem:[%s4762_s10 + $0x4d4] ss:$8 sps:$4 sm:$0xff]  }
 0x12a   : > { %v3837_v7 = vld [vmem:[%s4762_s10 + $0xd0] ss:$8 sps:$4 sm:$0xff]   ;;  %v3839_v9 = vld [vmem:[%s4762_s10 + $0xe4] ss:$8 sps:$4 sm:$0xff]   ;;  %v3843_v14 = vld [vmem:[%s4762_s10 + $0xe0] ss:$8 sps:$4 sm:$0xff]  }
 0x12b   : > { %2946 = vmatpush1.bf16.msra.mxu1 %v3783_v32  ;;  %3110 = vmatpush1.bf16.msra.mxu0 %v3784_v33  ;;  %v3838_v8 = vld [vmem:[%s4762_s10 + $0x4d0] ss:$8 sps:$4 sm:$0xff]   ;;  %v3841_v10 = vld [vmem:[%s4762_s10 + $0x4e4] ss:$8 sps:$4 sm:$0xff]   ;;  %v3844_v17 = vld [vmem:[%s4762_s10 + $0x4e0] ss:$8 sps:$4 sm:$0xff]   ;;  %v1388_v32 = vpack.c.bf16 %v1317_v24, %v1317_v24  ;;  %v1396_v33 = vpack.c.bf16 %v1351_v25, %v1351_v25 }
 0x12c   : > { %2947 = vmatprep.subr.bf16.mxu1 %v3785_v34  ;;  %3111 = vmatprep.subr.bf16.mxu0 %v3787_v35  ;;  %v3845_v18 = vld [vmem:[%s4762_s10 + $0xf4] ss:$8 sps:$4 sm:$0xff]   ;;  %v3849_v21 = vld [vmem:[%s4762_s10 + $0xf0] ss:$8 sps:$4 sm:$0xff]   ;;  %v3854_v22 = vld [vmem:[%s4762_s10 + $0x104] ss:$8 sps:$4 sm:$0xff]  }
 0x12d   : > { %v3847_v19 = vld [vmem:[%s4762_s10 + $0x4f4] ss:$8 sps:$4 sm:$0xff]   ;;  %v3850_v5 = vld [vmem:[%s4762_s10 + $0x4f0] ss:$8 sps:$4 sm:$0xff]   ;;  %v3858_v23 = vld [vmem:[%s4762_s10 + $0x504] ss:$8 sps:$4 sm:$0xff]  }
 0x12e   : > { %v3852_v26 = vld [vmem:[%s4762_s10 + $0x100] ss:$8 sps:$4 sm:$0xff]   ;;  %v3861_v30 = vld [vmem:[%s4762_s10 + $0x114] ss:$8 sps:$4 sm:$0xff]   ;;  %v3859_v34 = vld [vmem:[%s4762_s10 + $0x110] ss:$8 sps:$4 sm:$0xff]  }
 0x12f   : > { %2948 = vmatpush1.bf16.msra.mxu1 %v3789_v36  ;;  %3112 = vmatpush1.bf16.msra.mxu0 %v3790_v37  ;;  %v3856_v27 = vld [vmem:[%s4762_s10 + $0x500] ss:$8 sps:$4 sm:$0xff]   ;;  %v3864_v31 = vld [vmem:[%s4762_s10 + $0x514] ss:$8 sps:$4 sm:$0xff]   ;;  %v3862_v15 = vld [vmem:[%s4762_s10 + $0x510] ss:$8 sps:$4 sm:$0xff]  }
 0x130   : > { %2949 = vmatprep.subr.bf16.mxu1 %v3791_v38  ;;  %3113 = vmatprep.subr.bf16.mxu0 %v3793_v39  ;;  %v3867_v16 = vld [vmem:[%s4762_s10 + $0x124] ss:$8 sps:$4 sm:$0xff]   ;;  %v3865_v36 = vld [vmem:[%s4762_s10 + $0x120] ss:$8 sps:$4 sm:$0xff]   ;;  %v3873_v38 = vld [vmem:[%s4762_s10 + $0x134] ss:$8 sps:$4 sm:$0xff]  }
 0x131   : > { %v3870_v35 = vld [vmem:[%s4762_s10 + $0x524] ss:$8 sps:$4 sm:$0xff]   ;;  %v3868_v37 = vld [vmem:[%s4762_s10 + $0x520] ss:$8 sps:$4 sm:$0xff]   ;;  %v3876_v39 = vld [vmem:[%s4762_s10 + $0x534] ss:$8 sps:$4 sm:$0xff]  }
 0x132   : > { %v3919_v12 = vld [vmem:[%s4762_s10 + $0x1b0] ss:$8 sps:$4 sm:$0xff]   ;;  %v3939_v24 = vld [vmem:[%s4762_s10 + $0x1e4] ss:$8 sps:$4 sm:$0xff]   ;;  %p1278_p8 = scmp.lt.s32.totalorder %s3440_s15, 7 }
 0x133   : > { %2950 = vmatpush1.bf16.msra.mxu1 %v3795_v40  ;;  %3114 = vmatpush1.bf16.msra.mxu0 %v3796_v41  ;;  %v3871_v40 = vld [vmem:[%s4762_s10 + $0x130] ss:$8 sps:$4 sm:$0xff]   ;;  %v3942_v25 = vld [vmem:[%s4762_s10 + $0x5e4] ss:$8 sps:$4 sm:$0xff]  }
 0x134   : > { %2951 = vmatprep.subr.bf16.mxu1 %v3797_v42  ;;  %3115 = vmatprep.subr.bf16.mxu0 %v3799_v43  ;;  %v3874_v41 = vld [vmem:[%s4762_s10 + $0x530] ss:$8 sps:$4 sm:$0xff]   ;;  %v3879_v42 = vld [vmem:[%s4762_s10 + $0x144] ss:$8 sps:$4 sm:$0xff]   ;;  %s5137_s15 = smov (!%p1278_p8, %s3440_s15), 7 }
 0x135   : > { %v3882_v43 = vld [vmem:[%s4762_s10 + $0x544] ss:$8 sps:$4 sm:$0xff]   ;;  %v3922_v13 = vld [vmem:[%s4762_s10 + $0x5b0] ss:$8 sps:$4 sm:$0xff]   ;;  %s1280_s23 = scalar_lea.vmem %s5130_s2, %s5137_s15  ;;  %s1285_s17 = scalar_lea.vmem %s5131_s3, %s5137_s15 }
 0x136   : > { %s3443_s18 = sshll.u32 %s5137_s15, 1 }
 0x137   : > { %2952 = vmatpush1.bf16.msra.mxu1 %v3801_v44  ;;  %3116 = vmatpush1.bf16.msra.mxu0 %v3802_v45  ;;  %v3877_v44 = vld [vmem:[%s4762_s10 + $0x140] ss:$8 sps:$4 sm:$0xff]   ;;  %s1291_s28 = scalar_lea.vmem %s5132_s4, %s3443_s18 }
 0x138   : > { %2953 = vmatprep.subr.bf16.mxu1 %v3803_v46  ;;  %3117 = vmatprep.subr.bf16.mxu0 %v3805_v47  ;;  %v3880_v45 = vld [vmem:[%s4762_s10 + $0x540] ss:$8 sps:$4 sm:$0xff]   ;;  %v3885_v46 = vld [vmem:[%s4762_s10 + $0x154] ss:$8 sps:$4 sm:$0xff]  }
 0x139   : > { %v3888_v47 = vld [vmem:[%s4762_s10 + $0x554] ss:$8 sps:$4 sm:$0xff]  }
 0x13b   : > { %2954 = vmatpush1.bf16.msra.mxu1 %v3807_v48  ;;  %3118 = vmatpush1.bf16.msra.mxu0 %v3808_v49  ;;  %v3883_v48 = vld [vmem:[%s4762_s10 + $0x150] ss:$8 sps:$4 sm:$0xff]  }
 0x13c   : > { %2955 = vmatprep.subr.bf16.mxu1 %v3809_v50  ;;  %3119 = vmatprep.subr.bf16.mxu0 %v3811_v51  ;;  %v3886_v49 = vld [vmem:[%s4762_s10 + $0x550] ss:$8 sps:$4 sm:$0xff]   ;;  %v3891_v50 = vld [vmem:[%s4762_s10 + $0x164] ss:$8 sps:$4 sm:$0xff]  }
 0x13d   : > { %v3894_v51 = vld [vmem:[%s4762_s10 + $0x564] ss:$8 sps:$4 sm:$0xff]  }
 0x13f   : > { %2956 = vmatpush1.bf16.msra.mxu1 %v3813_v52  ;;  %3120 = vmatpush1.bf16.msra.mxu0 %v3814_v53  ;;  %v3889_v52 = vld [vmem:[%s4762_s10 + $0x160] ss:$8 sps:$4 sm:$0xff]  }
 0x140   : > { %2957 = vmatprep.subr.bf16.mxu1 %v3815_v54  ;;  %3121 = vmatprep.subr.bf16.mxu0 %v3817_v55  ;;  %v3892_v53 = vld [vmem:[%s4762_s10 + $0x560] ss:$8 sps:$4 sm:$0xff]   ;;  %v3897_v54 = vld [vmem:[%s4762_s10 + $0x174] ss:$8 sps:$4 sm:$0xff]  }
 0x141   : > { %v3900_v55 = vld [vmem:[%s4762_s10 + $0x574] ss:$8 sps:$4 sm:$0xff]  }
 0x143   : > { %2958 = vmatpush1.bf16.msra.mxu1 %v3819_v56  ;;  %3122 = vmatpush1.bf16.msra.mxu0 %v3820_v57  ;;  %v3895_v56 = vld [vmem:[%s4762_s10 + $0x170] ss:$8 sps:$4 sm:$0xff]  }
 0x144   : > { %2959 = vmatprep.subr.bf16.mxu1 %v3821_v58  ;;  %3123 = vmatprep.subr.bf16.mxu0 %v3823_v59  ;;  %v3898_v57 = vld [vmem:[%s4762_s10 + $0x570] ss:$8 sps:$4 sm:$0xff]   ;;  %v3903_v58 = vld [vmem:[%s4762_s10 + $0x184] ss:$8 sps:$4 sm:$0xff]  }
 0x145   : > { %v3906_v59 = vld [vmem:[%s4762_s10 + $0x584] ss:$8 sps:$4 sm:$0xff]  }
 0x147   : > { %2960 = vmatpush1.bf16.msra.mxu1 %v3825_v60  ;;  %3124 = vmatpush1.bf16.msra.mxu0 %v3826_v61  ;;  %v3901_v60 = vld [vmem:[%s4762_s10 + $0x180] ss:$8 sps:$4 sm:$0xff]  }
 0x148   : > { %2961 = vmatprep.subr.bf16.mxu1 %v3827_v62  ;;  %3125 = vmatprep.subr.bf16.mxu0 %v3829_v63  ;;  %v3904_v61 = vld [vmem:[%s4762_s10 + $0x580] ss:$8 sps:$4 sm:$0xff]   ;;  %v3909_v62 = vld [vmem:[%s4762_s10 + $0x194] ss:$8 sps:$4 sm:$0xff]  }
 0x149   : > { %v3912_v63 = vld [vmem:[%s4762_s10 + $0x594] ss:$8 sps:$4 sm:$0xff]  }
 0x14b   : > { %2962 = vmatpush1.bf16.msra.mxu1 %v3831_v0  ;;  %3126 = vmatpush1.bf16.msra.mxu0 %v3832_v1  ;;  %v3907_v0 = vld [vmem:[%s4762_s10 + $0x190] ss:$8 sps:$4 sm:$0xff]  }
 0x14c   : > { %2963 = vmatprep.subr.bf16.mxu1 %v3833_v2  ;;  %3127 = vmatprep.subr.bf16.mxu0 %v3835_v6  ;;  %v3910_v1 = vld [vmem:[%s4762_s10 + $0x590] ss:$8 sps:$4 sm:$0xff]   ;;  %v3915_v2 = vld [vmem:[%s4762_s10 + $0x1a4] ss:$8 sps:$4 sm:$0xff]  }
 0x14d   : > { %v3918_v6 = vld [vmem:[%s4762_s10 + $0x5a4] ss:$8 sps:$4 sm:$0xff]  }
 0x14f   : > { %2964 = vmatpush1.bf16.msra.mxu1 %v3837_v7  ;;  %3128 = vmatpush1.bf16.msra.mxu0 %v3838_v8  ;;  %v3913_v7 = vld [vmem:[%s4762_s10 + $0x1a0] ss:$8 sps:$4 sm:$0xff]  }
 0x150   : > { %2965 = vmatprep.subr.bf16.mxu1 %v3839_v9  ;;  %3129 = vmatprep.subr.bf16.mxu0 %v3841_v10  ;;  %v3916_v8 = vld [vmem:[%s4762_s10 + $0x5a0] ss:$8 sps:$4 sm:$0xff]   ;;  %v3921_v9 = vld [vmem:[%s4762_s10 + $0x1b4] ss:$8 sps:$4 sm:$0xff]  }
 0x151   : > { %v3924_v10 = vld [vmem:[%s4762_s10 + $0x5b4] ss:$8 sps:$4 sm:$0xff]  }
 0x153   : > { %2966 = vmatpush1.bf16.msra.mxu1 %v3843_v14  ;;  %3130 = vmatpush1.bf16.msra.mxu0 %v3844_v17  ;;  %v3927_v14 = vld [vmem:[%s4762_s10 + $0x1c4] ss:$8 sps:$4 sm:$0xff]  }
 0x154   : > { %2967 = vmatprep.subr.bf16.mxu1 %v3845_v18  ;;  %3131 = vmatprep.subr.bf16.mxu0 %v3847_v19  ;;  %v3930_v17 = vld [vmem:[%s4762_s10 + $0x5c4] ss:$8 sps:$4 sm:$0xff]   ;;  %v3925_v18 = vld [vmem:[%s4762_s10 + $0x1c0] ss:$8 sps:$4 sm:$0xff]  }
 0x155   : > { %v3928_v19 = vld [vmem:[%s4762_s10 + $0x5c0] ss:$8 sps:$4 sm:$0xff]  }
 0x157   : > { %2968 = vmatpush1.bf16.msra.mxu1 %v3849_v21  ;;  %3132 = vmatpush1.bf16.msra.mxu0 %v3850_v5  ;;  %v3933_v21 = vld [vmem:[%s4762_s10 + $0x1d4] ss:$8 sps:$4 sm:$0xff]  }
 0x158   : > { %2978 = vmatprep.subr.bf16.mxu1 %v3854_v22  ;;  %3142 = vmatprep.subr.bf16.mxu0 %v3858_v23  ;;  %v3936_v5 = vld [vmem:[%s4762_s10 + $0x5d4] ss:$8 sps:$4 sm:$0xff]   ;;  %v3931_v22 = vld [vmem:[%s4762_s10 + $0x1d0] ss:$8 sps:$4 sm:$0xff]  }
 0x159   : > { %v3934_v23 = vld [vmem:[%s4762_s10 + $0x5d0] ss:$8 sps:$4 sm:$0xff]  }
 0x15a   : > { %2970 = vmatmul.mubr.bf16.vlgmr.msra.gmra.mrb[0].mxu1 %v1385_v28  ;;  %3134 = vmatmul.mubr.bf16.vlgmr.msra.gmra.mrb[0].mxu0 %v1393_v29  ;;  %v3945_v28 = vld [vmem:[%s4762_s10 + $0x1f4] ss:$8 sps:$4 sm:$0xff]  }
 0x15b   : > { %2979 = vmatpush1.bf16.msra.mxu1 %v3852_v26  ;;  %3143 = vmatpush1.bf16.msra.mxu0 %v3856_v27  ;;  %v3937_v26 = vld [vmem:[%s4762_s10 + $0x1e0] ss:$8 sps:$4 sm:$0xff]   ;;  %v3948_v29 = vld [vmem:[%s4762_s10 + $0x5f4] ss:$8 sps:$4 sm:$0xff]  }
 0x15c   : > { %2980 = vmatprep.subr.bf16.mxu1 %v3861_v30  ;;  %3144 = vmatprep.subr.bf16.mxu0 %v3864_v31  ;;  %v3940_v27 = vld [vmem:[%s4762_s10 + $0x5e0] ss:$8 sps:$4 sm:$0xff]   ;;  %v3943_v30 = vld [vmem:[%s4762_s10 + $0x1f0] ss:$8 sps:$4 sm:$0xff]  }
 0x15d   : > { %3010 = vmatprep.mubr.bf16.mxu1 %v1388_v32  ;;  %3174 = vmatprep.mubr.bf16.mxu0 %v1396_v33  ;;  %v3946_v31 = vld [vmem:[%s4762_s10 + $0x5f0] ss:$8 sps:$4 sm:$0xff]   ;;  %v3951_v32 = vld [vmem:[%s4762_s10 + $0x204] ss:$8 sps:$4 sm:$0xff]  }
 0x15e   : > { %v3954_v33 = vld [vmem:[%s4762_s10 + $0x604] ss:$8 sps:$4 sm:$0xff]  }
 0x15f   : > { %2981 = vmatpush1.bf16.msra.mxu1 %v3859_v34  ;;  %3145 = vmatpush1.bf16.msra.mxu0 %v3862_v15  ;;  %v3949_v34 = vld [vmem:[%s4762_s10 + $0x200] ss:$8 sps:$4 sm:$0xff]  }
 0x160   : > { %2982 = vmatprep.subr.bf16.mxu1 %v3867_v16  ;;  %3146 = vmatprep.subr.bf16.mxu0 %v3870_v35  ;;  %v3952_v15 = vld [vmem:[%s4762_s10 + $0x600] ss:$8 sps:$4 sm:$0xff]   ;;  %v1387_v16 = vpack.c.bf16 %v4846_v20, %v4846_v20  ;;  %v1395_v35 = vpack.c.bf16 %v4849_v3, %v4849_v3  ;;  %v4947_v3 = vld [vmem:[%s5128_s0 + $0x18] sm:$0xff] }
 0x163   : > { %2983 = vmatpush1.bf16.msra.mxu1 %v3865_v36  ;;  %3147 = vmatpush1.bf16.msra.mxu0 %v3868_v37  ;;  %v4936_v36 = vld [vmem:[%s5128_s0 + $0x8] sm:$0xff]  ;;  %v3957_v37 = vld [vmem:[%s4762_s10 + $0x214] ss:$8 sps:$4 sm:$0xff]  }
 0x164   : > { %2984 = vmatprep.subr.bf16.mxu1 %v3873_v38  ;;  %3148 = vmatprep.subr.bf16.mxu0 %v3876_v39  ;;  %v3960_v38 = vld [vmem:[%s4762_s10 + $0x614] ss:$8 sps:$4 sm:$0xff]   ;;  %v4942_v20 = vrot.slane %v4936_v36, %v4769_v11  ;;  %v4951_v39 = vrot.slane %v4947_v3, %v4769_v11 }
 0x167   : > { %2985 = vmatpush1.bf16.msra.mxu1 %v3871_v40  ;;  %3149 = vmatpush1.bf16.msra.mxu0 %v3874_v41  ;;  %v1333_v40 = vcombine.high %v4942_v20, %v4942_v20  ;;  %v3955_v41 = vld [vmem:[%s4762_s10 + $0x210] ss:$8 sps:$4 sm:$0xff]  }
 0x168   : > { %2986 = vmatprep.subr.bf16.mxu1 %v3879_v42  ;;  %3150 = vmatprep.subr.bf16.mxu0 %v3882_v43  ;;  %v3958_v42 = vld [vmem:[%s4762_s10 + $0x610] ss:$8 sps:$4 sm:$0xff]   ;;  %v1367_v43 = vcombine.high %v4951_v39, %v4951_v39 }
 0x16b   : > { %2987 = vmatpush1.bf16.msra.mxu1 %v3877_v44  ;;  %3151 = vmatpush1.bf16.msra.mxu0 %v3880_v45  ;;  %v3963_v44 = vld [vmem:[%s4762_s10 + $0x224] ss:$8 sps:$4 sm:$0xff]  }
 0x16c   : > { %2988 = vmatprep.subr.bf16.mxu1 %v3885_v46  ;;  %3152 = vmatprep.subr.bf16.mxu0 %v3888_v47  ;;  %v3966_v45 = vld [vmem:[%s4762_s10 + $0x624] ss:$8 sps:$4 sm:$0xff]   ;;  %v1390_v46 = vpack.c.bf16 %v1333_v40, %v1333_v40  ;;  %v1398_v47 = vpack.c.bf16 %v1367_v43, %v1367_v43  ;;  %v4033_v40 = vld [vmem:[%s4762_s10 + $0x2e0] ss:$8 sps:$4 sm:$0xff]   ;;  %v4044_v43 = vld [vmem:[%s4762_s10 + $0x6f4] ss:$8 sps:$4 sm:$0xff]  }
 0x16f   : > { %2989 = vmatpush1.bf16.msra.mxu1 %v3883_v48  ;;  %3153 = vmatpush1.bf16.msra.mxu0 %v3886_v49  ;;  %v3961_v48 = vld [vmem:[%s4762_s10 + $0x220] ss:$8 sps:$4 sm:$0xff]  }
 0x170   : > { %2990 = vmatprep.subr.bf16.mxu1 %v3891_v50  ;;  %3154 = vmatprep.subr.bf16.mxu0 %v3894_v51  ;;  %v3964_v49 = vld [vmem:[%s4762_s10 + $0x620] ss:$8 sps:$4 sm:$0xff]   ;;  %v3969_v50 = vld [vmem:[%s4762_s10 + $0x234] ss:$8 sps:$4 sm:$0xff]  }
 0x171   : > { %v3972_v51 = vld [vmem:[%s4762_s10 + $0x634] ss:$8 sps:$4 sm:$0xff]  }
 0x173   : > { %2991 = vmatpush1.bf16.msra.mxu1 %v3889_v52  ;;  %3155 = vmatpush1.bf16.msra.mxu0 %v3892_v53  ;;  %v3967_v52 = vld [vmem:[%s4762_s10 + $0x230] ss:$8 sps:$4 sm:$0xff]  }
 0x174   : > { %2992 = vmatprep.subr.bf16.mxu1 %v3897_v54  ;;  %3156 = vmatprep.subr.bf16.mxu0 %v3900_v55  ;;  %v3970_v53 = vld [vmem:[%s4762_s10 + $0x630] ss:$8 sps:$4 sm:$0xff]   ;;  %v3975_v54 = vld [vmem:[%s4762_s10 + $0x244] ss:$8 sps:$4 sm:$0xff]  }
 0x175   : > { %v3978_v55 = vld [vmem:[%s4762_s10 + $0x644] ss:$8 sps:$4 sm:$0xff]  }
 0x177   : > { %2993 = vmatpush1.bf16.msra.mxu1 %v3895_v56  ;;  %3157 = vmatpush1.bf16.msra.mxu0 %v3898_v57  ;;  %v3973_v56 = vld [vmem:[%s4762_s10 + $0x240] ss:$8 sps:$4 sm:$0xff]  }
 0x178   : > { %2994 = vmatprep.subr.bf16.mxu1 %v3903_v58  ;;  %3158 = vmatprep.subr.bf16.mxu0 %v3906_v59  ;;  %v3976_v57 = vld [vmem:[%s4762_s10 + $0x640] ss:$8 sps:$4 sm:$0xff]   ;;  %v3981_v58 = vld [vmem:[%s4762_s10 + $0x254] ss:$8 sps:$4 sm:$0xff]  }
 0x179   : > { %v3984_v59 = vld [vmem:[%s4762_s10 + $0x654] ss:$8 sps:$4 sm:$0xff]  }
 0x17b   : > { %2995 = vmatpush1.bf16.msra.mxu1 %v3901_v60  ;;  %3159 = vmatpush1.bf16.msra.mxu0 %v3904_v61  ;;  %v3979_v60 = vld [vmem:[%s4762_s10 + $0x250] ss:$8 sps:$4 sm:$0xff]  }
 0x17c   : > { %2996 = vmatprep.subr.bf16.mxu1 %v3909_v62  ;;  %3160 = vmatprep.subr.bf16.mxu0 %v3912_v63  ;;  %v3982_v61 = vld [vmem:[%s4762_s10 + $0x650] ss:$8 sps:$4 sm:$0xff]   ;;  %v3987_v62 = vld [vmem:[%s4762_s10 + $0x264] ss:$8 sps:$4 sm:$0xff]  }
 0x17d   : > { %v3990_v63 = vld [vmem:[%s4762_s10 + $0x664] ss:$8 sps:$4 sm:$0xff]  }
 0x17f   : > { %2997 = vmatpush1.bf16.msra.mxu1 %v3907_v0  ;;  %3161 = vmatpush1.bf16.msra.mxu0 %v3910_v1  ;;  %v3985_v0 = vld [vmem:[%s4762_s10 + $0x260] ss:$8 sps:$4 sm:$0xff]  }
 0x180   : > { %2998 = vmatprep.subr.bf16.mxu1 %v3915_v2  ;;  %3162 = vmatprep.subr.bf16.mxu0 %v3918_v6  ;;  %v3988_v1 = vld [vmem:[%s4762_s10 + $0x660] ss:$8 sps:$4 sm:$0xff]   ;;  %v3993_v2 = vld [vmem:[%s4762_s10 + $0x274] ss:$8 sps:$4 sm:$0xff]  }
 0x181   : > { %v3996_v6 = vld [vmem:[%s4762_s10 + $0x674] ss:$8 sps:$4 sm:$0xff]  }
 0x183   : > { %2999 = vmatpush1.bf16.msra.mxu1 %v3913_v7  ;;  %3163 = vmatpush1.bf16.msra.mxu0 %v3916_v8  ;;  %v3991_v7 = vld [vmem:[%s4762_s10 + $0x270] ss:$8 sps:$4 sm:$0xff]  }
 0x184   : > { %3000 = vmatprep.subr.bf16.mxu1 %v3921_v9  ;;  %3164 = vmatprep.subr.bf16.mxu0 %v3924_v10  ;;  %v3994_v8 = vld [vmem:[%s4762_s10 + $0x670] ss:$8 sps:$4 sm:$0xff]   ;;  %v3999_v9 = vld [vmem:[%s4762_s10 + $0x284] ss:$8 sps:$4 sm:$0xff]  }
 0x185   : > { %v4002_v10 = vld [vmem:[%s4762_s10 + $0x684] ss:$8 sps:$4 sm:$0xff]  }
 0x187   : > { %3001 = vmatpush1.bf16.msra.mxu1 %v3919_v12  ;;  %3165 = vmatpush1.bf16.msra.mxu0 %v3922_v13  ;;  %v3997_v12 = vld [vmem:[%s4762_s10 + $0x280] ss:$8 sps:$4 sm:$0xff]  }
 0x188   : > { %3002 = vmatprep.subr.bf16.mxu1 %v3927_v14  ;;  %3166 = vmatprep.subr.bf16.mxu0 %v3930_v17  ;;  %v4000_v13 = vld [vmem:[%s4762_s10 + $0x680] ss:$8 sps:$4 sm:$0xff]   ;;  %v4005_v14 = vld [vmem:[%s4762_s10 + $0x294] ss:$8 sps:$4 sm:$0xff]  }
 0x189   : > { %v4008_v17 = vld [vmem:[%s4762_s10 + $0x694] ss:$8 sps:$4 sm:$0xff]  }
 0x18b   : > { %3003 = vmatpush1.bf16.msra.mxu1 %v3925_v18  ;;  %3167 = vmatpush1.bf16.msra.mxu0 %v3928_v19  ;;  %v4003_v18 = vld [vmem:[%s4762_s10 + $0x290] ss:$8 sps:$4 sm:$0xff]  }
 0x18c   : > { %3004 = vmatprep.subr.bf16.mxu1 %v3933_v21  ;;  %3168 = vmatprep.subr.bf16.mxu0 %v3936_v5  ;;  %v4006_v19 = vld [vmem:[%s4762_s10 + $0x690] ss:$8 sps:$4 sm:$0xff]   ;;  %v4011_v21 = vld [vmem:[%s4762_s10 + $0x2a4] ss:$8 sps:$4 sm:$0xff]  }
 0x18d   : > { %v4014_v5 = vld [vmem:[%s4762_s10 + $0x6a4] ss:$8 sps:$4 sm:$0xff]  }
 0x18f   : > { %3005 = vmatpush1.bf16.msra.mxu1 %v3931_v22  ;;  %3169 = vmatpush1.bf16.msra.mxu0 %v3934_v23  ;;  %v4009_v22 = vld [vmem:[%s4762_s10 + $0x2a0] ss:$8 sps:$4 sm:$0xff]  }
 0x190   : > { %3006 = vmatprep.subr.bf16.mxu1 %v3939_v24  ;;  %3170 = vmatprep.subr.bf16.mxu0 %v3942_v25  ;;  %v4012_v23 = vld [vmem:[%s4762_s10 + $0x6a0] ss:$8 sps:$4 sm:$0xff]   ;;  %v4017_v24 = vld [vmem:[%s4762_s10 + $0x2b4] ss:$8 sps:$4 sm:$0xff]  }
 0x191   : > { %v4020_v25 = vld [vmem:[%s4762_s10 + $0x6b4] ss:$8 sps:$4 sm:$0xff]  }
 0x193   : > { %3007 = vmatpush1.bf16.msra.mxu1 %v3937_v26  ;;  %3171 = vmatpush1.bf16.msra.mxu0 %v3940_v27  ;;  %v4015_v26 = vld [vmem:[%s4762_s10 + $0x2b0] ss:$8 sps:$4 sm:$0xff]  }
 0x194   : > { %3008 = vmatprep.subr.bf16.mxu1 %v3945_v28  ;;  %3172 = vmatprep.subr.bf16.mxu0 %v3948_v29  ;;  %v4018_v27 = vld [vmem:[%s4762_s10 + $0x6b0] ss:$8 sps:$4 sm:$0xff]   ;;  %v4023_v28 = vld [vmem:[%s4762_s10 + $0x2c4] ss:$8 sps:$4 sm:$0xff]  }
 0x195   : > { %v4026_v29 = vld [vmem:[%s4762_s10 + $0x6c4] ss:$8 sps:$4 sm:$0xff]  }
 0x197   : > { %3009 = vmatpush1.bf16.msra.mxu1 %v3943_v30  ;;  %3173 = vmatpush1.bf16.msra.mxu0 %v3946_v31  ;;  %v4021_v30 = vld [vmem:[%s4762_s10 + $0x2c0] ss:$8 sps:$4 sm:$0xff]  }
 0x198   : > { %3019 = vmatprep.subr.bf16.mxu1 %v3951_v32  ;;  %3183 = vmatprep.subr.bf16.mxu0 %v3954_v33  ;;  %v4024_v31 = vld [vmem:[%s4762_s10 + $0x6c0] ss:$8 sps:$4 sm:$0xff]   ;;  %v4029_v32 = vld [vmem:[%s4762_s10 + $0x2d4] ss:$8 sps:$4 sm:$0xff]  }
 0x199   : > { %v4032_v33 = vld [vmem:[%s4762_s10 + $0x6d4] ss:$8 sps:$4 sm:$0xff]  }
 0x19a   : > { %3011 = vmatmul.mubr.bf16.vlgmr.msra.gmra.mrb[0].mxu1 %v1387_v16  ;;  %3175 = vmatmul.mubr.bf16.vlgmr.msra.gmra.mrb[0].mxu0 %v1395_v35  ;;  %v4035_v16 = vld [vmem:[%s4762_s10 + $0x2e4] ss:$8 sps:$4 sm:$0xff]  }
 0x19b   : > { %3020 = vmatpush1.bf16.msra.mxu1 %v3949_v34  ;;  %3184 = vmatpush1.bf16.msra.mxu0 %v3952_v15  ;;  %v4027_v34 = vld [vmem:[%s4762_s10 + $0x2d0] ss:$8 sps:$4 sm:$0xff]   ;;  %v4038_v35 = vld [vmem:[%s4762_s10 + $0x6e4] ss:$8 sps:$4 sm:$0xff]  }
 0x19c   : > { %3021 = vmatprep.subr.bf16.mxu1 %v3957_v37  ;;  %3185 = vmatprep.subr.bf16.mxu0 %v3960_v38  ;;  %v4030_v15 = vld [vmem:[%s4762_s10 + $0x6d0] ss:$8 sps:$4 sm:$0xff]   ;;  %v1318_v37 = vcombine.high %v4936_v36, %v4936_v36  ;;  %v1352_v38 = vcombine.high %v4947_v3, %v4947_v3 }
 0x19d   : > { %3051 = vmatprep.mubr.bf16.mxu1 %v1390_v46  ;;  %3215 = vmatprep.mubr.bf16.mxu0 %v1398_v47  ;;  %v4039_v36 = vld [vmem:[%s4762_s10 + $0x2f0] ss:$8 sps:$4 sm:$0xff]   ;;  %v4047_v46 = vld [vmem:[%s4762_s10 + $0x304] ss:$8 sps:$4 sm:$0xff]  }
 0x19e   : > { %v4042_v3 = vld [vmem:[%s4762_s10 + $0x6f0] ss:$8 sps:$4 sm:$0xff]   ;;  %v4050_v47 = vld [vmem:[%s4762_s10 + $0x704] ss:$8 sps:$4 sm:$0xff]  }
 0x19f   : > { %3022 = vmatpush1.bf16.msra.mxu1 %v3955_v41  ;;  %3186 = vmatpush1.bf16.msra.mxu0 %v3958_v42  ;;  %v4036_v41 = vld [vmem:[%s4762_s10 + $0x6e0] ss:$8 sps:$4 sm:$0xff]   ;;  %v4041_v42 = vld [vmem:[%s4762_s10 + $0x2f4] ss:$8 sps:$4 sm:$0xff]  }
 0x1a0   : > { %3023 = vmatprep.subr.bf16.mxu1 %v3963_v44  ;;  %3187 = vmatprep.subr.bf16.mxu0 %v3966_v45  ;;  %v5018_v44 = vrot.slane %v1318_v37, %v4769_v11  ;;  %v5021_v45 = vrot.slane %v1352_v38, %v4769_v11  ;;  %v1389_v11 = vpack.c.bf16 %v4942_v20, %v4942_v20  ;;  %v4051_v20 = vld [vmem:[%s4762_s10 + $0x310] ss:$8 sps:$4 sm:$0xff]   ;;  %v4119_v38 = vld [vmem:[%s4762_s10 + $0x3c4] ss:$8 sps:$4 sm:$0xff]  }
 0x1a1   : > { %v4114_v37 = vld [vmem:[%s4762_s10 + $0x7b0] ss:$8 sps:$4 sm:$0xff]  }
 0x1a3   : > { %3024 = vmatpush1.bf16.msra.mxu1 %v3961_v48  ;;  %3188 = vmatpush1.bf16.msra.mxu0 %v3964_v49  ;;  %v1334_v48 = vcombine.high %v5018_v44, %v5018_v44  ;;  %v1368_v49 = vcombine.high %v5021_v45, %v5021_v45 }
 0x1a4   : > { %3025 = vmatprep.subr.bf16.mxu1 %v3969_v50  ;;  %3189 = vmatprep.subr.bf16.mxu0 %v3972_v51  ;;  %v1397_v50 = vpack.c.bf16 %v4951_v39, %v4951_v39  ;;  %v4045_v51 = vld [vmem:[%s4762_s10 + $0x300] ss:$8 sps:$4 sm:$0xff]   ;;  %v4054_v39 = vld [vmem:[%s4762_s10 + $0x710] ss:$8 sps:$4 sm:$0xff]  }
 0x1a7   : > { %3026 = vmatpush1.bf16.msra.mxu1 %v3967_v52  ;;  %3190 = vmatpush1.bf16.msra.mxu0 %v3970_v53  ;;  %v4048_v52 = vld [vmem:[%s4762_s10 + $0x700] ss:$8 sps:$4 sm:$0xff]   ;;  %v4053_v53 = vld [vmem:[%s4762_s10 + $0x314] ss:$8 sps:$4 sm:$0xff]  }
 0x1a8   : > { %3027 = vmatprep.subr.bf16.mxu1 %v3975_v54  ;;  %3191 = vmatprep.subr.bf16.mxu0 %v3978_v55  ;;  %v4056_v54 = vld [vmem:[%s4762_s10 + $0x714] ss:$8 sps:$4 sm:$0xff]   ;;  %v1392_v55 = vpack.c.bf16 %v1334_v48, %v1334_v48  ;;  %v4134_v48 = vld [vmem:[%s4762_s10 + $0x7e4] ss:$8 sps:$4 sm:$0xff]  }
 0x1ab   : > { %3028 = vmatpush1.bf16.msra.mxu1 %v3973_v56  ;;  %3192 = vmatpush1.bf16.msra.mxu0 %v3976_v57  ;;  %v1400_v56 = vpack.c.bf16 %v1368_v49, %v1368_v49  ;;  %v4059_v57 = vld [vmem:[%s4762_s10 + $0x324] ss:$8 sps:$4 sm:$0xff]   ;;  %v4129_v49 = vld [vmem:[%s4762_s10 + $0x3e0] ss:$8 sps:$4 sm:$0xff]  }
 0x1ac   : > { %3029 = vmatprep.subr.bf16.mxu1 %v3981_v58  ;;  %3193 = vmatprep.subr.bf16.mxu0 %v3984_v59  ;;  %v4062_v58 = vld [vmem:[%s4762_s10 + $0x724] ss:$8 sps:$4 sm:$0xff]   ;;  %v4057_v59 = vld [vmem:[%s4762_s10 + $0x320] ss:$8 sps:$4 sm:$0xff]  }
 0x1af   : > { %3030 = vmatpush1.bf16.msra.mxu1 %v3979_v60  ;;  %3194 = vmatpush1.bf16.msra.mxu0 %v3982_v61  ;;  %v4060_v60 = vld [vmem:[%s4762_s10 + $0x720] ss:$8 sps:$4 sm:$0xff]   ;;  %v4065_v61 = vld [vmem:[%s4762_s10 + $0x334] ss:$8 sps:$4 sm:$0xff]  }
 0x1b0   : > { %3031 = vmatprep.subr.bf16.mxu1 %v3987_v62  ;;  %3195 = vmatprep.subr.bf16.mxu0 %v3990_v63  ;;  %v4068_v62 = vld [vmem:[%s4762_s10 + $0x734] ss:$8 sps:$4 sm:$0xff]   ;;  %v4063_v63 = vld [vmem:[%s4762_s10 + $0x330] ss:$8 sps:$4 sm:$0xff]  }
 0x1b3   : > { %3032 = vmatpush1.bf16.msra.mxu1 %v3985_v0  ;;  %3196 = vmatpush1.bf16.msra.mxu0 %v3988_v1  ;;  %v4066_v0 = vld [vmem:[%s4762_s10 + $0x730] ss:$8 sps:$4 sm:$0xff]   ;;  %v4071_v1 = vld [vmem:[%s4762_s10 + $0x344] ss:$8 sps:$4 sm:$0xff]  }
 0x1b4   : > { %3033 = vmatprep.subr.bf16.mxu1 %v3993_v2  ;;  %3197 = vmatprep.subr.bf16.mxu0 %v3996_v6  ;;  %v4074_v2 = vld [vmem:[%s4762_s10 + $0x744] ss:$8 sps:$4 sm:$0xff]   ;;  %v4069_v6 = vld [vmem:[%s4762_s10 + $0x340] ss:$8 sps:$4 sm:$0xff]  }
 0x1b7   : > { %3034 = vmatpush1.bf16.msra.mxu1 %v3991_v7  ;;  %3198 = vmatpush1.bf16.msra.mxu0 %v3994_v8  ;;  %v4072_v7 = vld [vmem:[%s4762_s10 + $0x740] ss:$8 sps:$4 sm:$0xff]   ;;  %v4077_v8 = vld [vmem:[%s4762_s10 + $0x354] ss:$8 sps:$4 sm:$0xff]  }
 0x1b8   : > { %3035 = vmatprep.subr.bf16.mxu1 %v3999_v9  ;;  %3199 = vmatprep.subr.bf16.mxu0 %v4002_v10  ;;  %v4080_v9 = vld [vmem:[%s4762_s10 + $0x754] ss:$8 sps:$4 sm:$0xff]   ;;  %v4075_v10 = vld [vmem:[%s4762_s10 + $0x350] ss:$8 sps:$4 sm:$0xff]  }
 0x1bb   : > { %3036 = vmatpush1.bf16.msra.mxu1 %v3997_v12  ;;  %3200 = vmatpush1.bf16.msra.mxu0 %v4000_v13  ;;  %v4078_v12 = vld [vmem:[%s4762_s10 + $0x750] ss:$8 sps:$4 sm:$0xff]   ;;  %v4083_v13 = vld [vmem:[%s4762_s10 + $0x364] ss:$8 sps:$4 sm:$0xff]  }
 0x1bc   : > { %3037 = vmatprep.subr.bf16.mxu1 %v4005_v14  ;;  %3201 = vmatprep.subr.bf16.mxu0 %v4008_v17  ;;  %v4086_v14 = vld [vmem:[%s4762_s10 + $0x764] ss:$8 sps:$4 sm:$0xff]   ;;  %v4081_v17 = vld [vmem:[%s4762_s10 + $0x360] ss:$8 sps:$4 sm:$0xff]  }
 0x1bf   : > { %3038 = vmatpush1.bf16.msra.mxu1 %v4003_v18  ;;  %3202 = vmatpush1.bf16.msra.mxu0 %v4006_v19  ;;  %v4084_v18 = vld [vmem:[%s4762_s10 + $0x760] ss:$8 sps:$4 sm:$0xff]   ;;  %v4089_v19 = vld [vmem:[%s4762_s10 + $0x374] ss:$8 sps:$4 sm:$0xff]  }
 0x1c0   : > { %3039 = vmatprep.subr.bf16.mxu1 %v4011_v21  ;;  %3203 = vmatprep.subr.bf16.mxu0 %v4014_v5  ;;  %v4092_v21 = vld [vmem:[%s4762_s10 + $0x774] ss:$8 sps:$4 sm:$0xff]   ;;  %v4087_v5 = vld [vmem:[%s4762_s10 + $0x370] ss:$8 sps:$4 sm:$0xff]  }
 0x1c3   : > { %3040 = vmatpush1.bf16.msra.mxu1 %v4009_v22  ;;  %3204 = vmatpush1.bf16.msra.mxu0 %v4012_v23  ;;  %v4090_v22 = vld [vmem:[%s4762_s10 + $0x770] ss:$8 sps:$4 sm:$0xff]   ;;  %v4095_v23 = vld [vmem:[%s4762_s10 + $0x384] ss:$8 sps:$4 sm:$0xff]  }
 0x1c4   : > { %3041 = vmatprep.subr.bf16.mxu1 %v4017_v24  ;;  %3205 = vmatprep.subr.bf16.mxu0 %v4020_v25  ;;  %v4098_v24 = vld [vmem:[%s4762_s10 + $0x784] ss:$8 sps:$4 sm:$0xff]   ;;  %v4093_v25 = vld [vmem:[%s4762_s10 + $0x380] ss:$8 sps:$4 sm:$0xff]  }
 0x1c7   : > { %3042 = vmatpush1.bf16.msra.mxu1 %v4015_v26  ;;  %3206 = vmatpush1.bf16.msra.mxu0 %v4018_v27  ;;  %v4096_v26 = vld [vmem:[%s4762_s10 + $0x780] ss:$8 sps:$4 sm:$0xff]   ;;  %v4101_v27 = vld [vmem:[%s4762_s10 + $0x394] ss:$8 sps:$4 sm:$0xff]  }
 0x1c8   : > { %3043 = vmatprep.subr.bf16.mxu1 %v4023_v28  ;;  %3207 = vmatprep.subr.bf16.mxu0 %v4026_v29  ;;  %v4104_v28 = vld [vmem:[%s4762_s10 + $0x794] ss:$8 sps:$4 sm:$0xff]   ;;  %v4099_v29 = vld [vmem:[%s4762_s10 + $0x390] ss:$8 sps:$4 sm:$0xff]  }
 0x1cb   : > { %3044 = vmatpush1.bf16.msra.mxu1 %v4021_v30  ;;  %3208 = vmatpush1.bf16.msra.mxu0 %v4024_v31  ;;  %v4102_v30 = vld [vmem:[%s4762_s10 + $0x790] ss:$8 sps:$4 sm:$0xff]   ;;  %v4107_v31 = vld [vmem:[%s4762_s10 + $0x3a4] ss:$8 sps:$4 sm:$0xff]  }
 0x1cc   : > { %3045 = vmatprep.subr.bf16.mxu1 %v4029_v32  ;;  %3209 = vmatprep.subr.bf16.mxu0 %v4032_v33  ;;  %v4110_v32 = vld [vmem:[%s4762_s10 + $0x7a4] ss:$8 sps:$4 sm:$0xff]   ;;  %v4105_v33 = vld [vmem:[%s4762_s10 + $0x3a0] ss:$8 sps:$4 sm:$0xff]  }
 0x1cf   : > { %3046 = vmatpush1.bf16.msra.mxu1 %v4027_v34  ;;  %3210 = vmatpush1.bf16.msra.mxu0 %v4030_v15  ;;  %v4108_v34 = vld [vmem:[%s4762_s10 + $0x7a0] ss:$8 sps:$4 sm:$0xff]   ;;  %v4113_v15 = vld [vmem:[%s4762_s10 + $0x3b4] ss:$8 sps:$4 sm:$0xff]  }
 0x1d0   : > { %3047 = vmatprep.subr.bf16.mxu1 %v4035_v16  ;;  %3211 = vmatprep.subr.bf16.mxu0 %v4038_v35  ;;  %v4116_v16 = vld [vmem:[%s4762_s10 + $0x7b4] ss:$8 sps:$4 sm:$0xff]   ;;  %v4111_v35 = vld [vmem:[%s4762_s10 + $0x3b0] ss:$8 sps:$4 sm:$0xff]  }
 0x1d3   : > { %3048 = vmatpush1.bf16.msra.mxu1 %v4033_v40  ;;  %3212 = vmatpush1.bf16.msra.mxu0 %v4036_v41  ;;  %v4122_v40 = vld [vmem:[%s4762_s10 + $0x7c4] ss:$8 sps:$4 sm:$0xff]   ;;  %v4117_v41 = vld [vmem:[%s4762_s10 + $0x3c0] ss:$8 sps:$4 sm:$0xff]  }
 0x1d4   : > { %3049 = vmatprep.subr.bf16.mxu1 %v4041_v42  ;;  %3213 = vmatprep.subr.bf16.mxu0 %v4044_v43  ;;  %v4120_v42 = vld [vmem:[%s4762_s10 + $0x7c0] ss:$8 sps:$4 sm:$0xff]   ;;  %v4125_v43 = vld [vmem:[%s4762_s10 + $0x3d4] ss:$8 sps:$4 sm:$0xff]  }
 0x1d7   : > { %3050 = vmatpush1.bf16.msra.mxu1 %v4039_v36  ;;  %3214 = vmatpush1.bf16.msra.mxu0 %v4042_v3  ;;  %v4128_v36 = vld [vmem:[%s4762_s10 + $0x7d4] ss:$8 sps:$4 sm:$0xff]   ;;  %v4123_v3 = vld [vmem:[%s4762_s10 + $0x3d0] ss:$8 sps:$4 sm:$0xff]  }
 0x1d8   : > { %3060 = vmatprep.subr.bf16.mxu1 %v4047_v46  ;;  %3224 = vmatprep.subr.bf16.mxu0 %v4050_v47  ;;  %v4126_v46 = vld [vmem:[%s4762_s10 + $0x7d0] ss:$8 sps:$4 sm:$0xff]   ;;  %v4131_v47 = vld [vmem:[%s4762_s10 + $0x3e4] ss:$8 sps:$4 sm:$0xff]  }
 0x1da   : > { %3052 = vmatmul.mubr.bf16.vlgmr.msra.gmra.mrb[0].mxu1 %v1389_v11  ;;  %3216 = vmatmul.mubr.bf16.vlgmr.msra.gmra.mrb[0].mxu0 %v1397_v50  ;;  %v4132_v11 = vld [vmem:[%s4762_s10 + $0x7e0] ss:$8 sps:$4 sm:$0xff]   ;;  %v4137_v50 = vld [vmem:[%s4762_s10 + $0x3f4] ss:$8 sps:$4 sm:$0xff]  }
 0x1db   : > { %3061 = vmatpush1.bf16.msra.mxu1 %v4045_v51  ;;  %3225 = vmatpush1.bf16.msra.mxu0 %v4048_v52  ;;  %v4140_v51 = vld [vmem:[%s4762_s10 + $0x7f4] ss:$8 sps:$4 sm:$0xff]   ;;  %v4135_v52 = vld [vmem:[%s4762_s10 + $0x3f0] ss:$8 sps:$4 sm:$0xff]  }
 0x1dc   : > { %3062 = vmatprep.subr.bf16.mxu1 %v4053_v53  ;;  %3226 = vmatprep.subr.bf16.mxu0 %v4056_v54  ;;  %v4138_v53 = vld [vmem:[%s4762_s10 + $0x7f0] ss:$8 sps:$4 sm:$0xff]   ;;  %v1391_v54 = vpack.c.bf16 %v5018_v44, %v5018_v44 }
 0x1dd   : > { %3092 = vmatprep.mubr.bf16.mxu1 %v1392_v55  ;;  %3256 = vmatprep.mubr.bf16.mxu0 %v1400_v56  ;;  %v1399_v55 = vpack.c.bf16 %v5021_v45, %v5021_v45 }
 0x1df   : > { %3063 = vmatpush1.bf16.msra.mxu1 %v4051_v20  ;;  %3227 = vmatpush1.bf16.msra.mxu0 %v4054_v39 }
 0x1e0   : > { %3064 = vmatprep.subr.bf16.mxu1 %v4059_v57  ;;  %3228 = vmatprep.subr.bf16.mxu0 %v4062_v58 }
 0x1e3   : > { %3065 = vmatpush1.bf16.msra.mxu1 %v4057_v59  ;;  %3229 = vmatpush1.bf16.msra.mxu0 %v4060_v60 }
 0x1e4   : > { %3066 = vmatprep.subr.bf16.mxu1 %v4065_v61  ;;  %3230 = vmatprep.subr.bf16.mxu0 %v4068_v62 }
 0x1e7   : > { %3067 = vmatpush1.bf16.msra.mxu1 %v4063_v63  ;;  %3231 = vmatpush1.bf16.msra.mxu0 %v4066_v0 }
 0x1e8   : > { %3068 = vmatprep.subr.bf16.mxu1 %v4071_v1  ;;  %3232 = vmatprep.subr.bf16.mxu0 %v4074_v2 }
 0x1eb   : > { %3069 = vmatpush1.bf16.msra.mxu1 %v4069_v6  ;;  %3233 = vmatpush1.bf16.msra.mxu0 %v4072_v7 }
 0x1ec   : > { %3070 = vmatprep.subr.bf16.mxu1 %v4077_v8  ;;  %3234 = vmatprep.subr.bf16.mxu0 %v4080_v9 }
 0x1ef   : > { %3071 = vmatpush1.bf16.msra.mxu1 %v4075_v10  ;;  %3235 = vmatpush1.bf16.msra.mxu0 %v4078_v12 }
 0x1f0   : > { %3072 = vmatprep.subr.bf16.mxu1 %v4083_v13  ;;  %3236 = vmatprep.subr.bf16.mxu0 %v4086_v14 }
 0x1f3   : > { %3073 = vmatpush1.bf16.msra.mxu1 %v4081_v17  ;;  %3237 = vmatpush1.bf16.msra.mxu0 %v4084_v18 }
 0x1f4   : > { %3074 = vmatprep.subr.bf16.mxu1 %v4089_v19  ;;  %3238 = vmatprep.subr.bf16.mxu0 %v4092_v21 }
 0x1f7   : > { %3075 = vmatpush1.bf16.msra.mxu1 %v4087_v5  ;;  %3239 = vmatpush1.bf16.msra.mxu0 %v4090_v22 }
 0x1f8   : > { %3076 = vmatprep.subr.bf16.mxu1 %v4095_v23  ;;  %3240 = vmatprep.subr.bf16.mxu0 %v4098_v24 }
 0x1fb   : > { %3077 = vmatpush1.bf16.msra.mxu1 %v4093_v25  ;;  %3241 = vmatpush1.bf16.msra.mxu0 %v4096_v26 }
 0x1fc   : > { %3078 = vmatprep.subr.bf16.mxu1 %v4101_v27  ;;  %3242 = vmatprep.subr.bf16.mxu0 %v4104_v28 }
 0x1ff   : > { %3079 = vmatpush1.bf16.msra.mxu1 %v4099_v29  ;;  %3243 = vmatpush1.bf16.msra.mxu0 %v4102_v30 }
 0x200   : > { %3080 = vmatprep.subr.bf16.mxu1 %v4107_v31  ;;  %3244 = vmatprep.subr.bf16.mxu0 %v4110_v32 }
 0x203   : > { %3081 = vmatpush1.bf16.msra.mxu1 %v4105_v33  ;;  %3245 = vmatpush1.bf16.msra.mxu0 %v4108_v34 }
 0x204   : > { %3082 = vmatprep.subr.bf16.mxu1 %v4113_v15  ;;  %3246 = vmatprep.subr.bf16.mxu0 %v4116_v16 }
 0x207   : > { %3083 = vmatpush1.bf16.msra.mxu1 %v4111_v35  ;;  %3247 = vmatpush1.bf16.msra.mxu0 %v4114_v37 }
 0x208   : > { %3084 = vmatprep.subr.bf16.mxu1 %v4119_v38  ;;  %3248 = vmatprep.subr.bf16.mxu0 %v4122_v40 }
 0x20b   : > { %3085 = vmatpush1.bf16.msra.mxu1 %v4117_v41  ;;  %3249 = vmatpush1.bf16.msra.mxu0 %v4120_v42  ;;  %v3313_v42 = vsub.s32 0, %v4755_v4 }
 0x20c   : > { %3086 = vmatprep.subr.bf16.mxu1 %v4125_v43  ;;  %3250 = vmatprep.subr.bf16.mxu0 %v4128_v36  ;;  %v3309_v43 = vld [vmem:[%s1280_s23] sm:$0x3]  ;;  %v3317_v36 = vsub.s32 1, %v4755_v4 }
 0x20f   : > { %3087 = vmatpush1.bf16.msra.mxu1 %v4123_v3  ;;  %3251 = vmatpush1.bf16.msra.mxu0 %v4126_v46  ;;  %v3323_v3 = vld [vmem:[%s1285_s17] sm:$0x3]  ;;  %v3314_v46 = vrot.slane %v3309_v43, %v3313_v42 }
 0x210   : > { %3088 = vmatprep.subr.bf16.mxu1 %v4131_v47  ;;  %3252 = vmatprep.subr.bf16.mxu0 %v4134_v48  ;;  %v3318_v48 = vrot.slane %v3309_v43, %v3317_v36 }
 0x213   : > { %3089 = vmatpush1.bf16.msra.mxu1 %v4129_v49  ;;  %3253 = vmatpush1.bf16.msra.mxu0 %v4132_v11 }
 0x214   : > { %3090 = vmatprep.subr.bf16.mxu1 %v4137_v50  ;;  %3254 = vmatprep.subr.bf16.mxu0 %v4140_v51  ;;  %v3328_v50 = vrot.slane %v3323_v3, %v3313_v42 }
 0x217   : > { %3091 = vmatpush1.bf16.msra.mxu1 %v4135_v52  ;;  %3255 = vmatpush1.bf16.msra.mxu0 %v4138_v53  ;;  %v3332_v52 = vrot.slane %v3323_v3, %v3317_v36 }
 0x21a   : > { %3093 = vmatmul.mubr.bf16.vlgmr.msra.gmra.mrb[0].mxu1 %v1391_v54  ;;  %3257 = vmatmul.mubr.bf16.vlgmr.msra.gmra.mrb[0].mxu0 %v1399_v55 }
 0x2ed   : > { %v3094_v56 = vpop.f32.mrb[0].mxu1  ;;  %v3258_v20 = vpop.f32.mrb[0].mxu0 }
 0x2ee   : > { %v3704_v39 = vadd.f32 %v3258_v20, %v3094_v56  ;;  %v3096_v57 = vpop.f32.mrb[1].mxu1  ;;  %v3260_v58 = vpop.f32.mrb[1].mxu0 }
 0x2ef   : > { %v3705_v59 = vadd.f32 %v3260_v58, %v3096_v57  ;;  %v3098_v60 = vpop.f32.mrb[2].mxu1  ;;  %v3262_v61 = vpop.f32.mrb[2].mxu0 }
 0x2f0   : > { %v3266_v62 = vsel %vm3265_vm0, %v3704_v39, 0.0  ;;  %v3099_v63 = vpop.f32.mrb[3].mxu1  ;;  %v3263_v44 = vpop.f32.mrb[3].mxu0 }
 0x2f1   : > { %v3267_v0 = vrot.slane %v3266_v62, 4  ;;  %v3273_v45 = vsel %vm3265_vm0, %v3705_v59, 0.0 }
 0x2f2   : > { %v3274_v1 = vrot.slane %v3273_v45, 4 }
 0x2f3   : > { %v3268_v2 = vadd.f32 %v3267_v0, %v3266_v62 }
 0x2f4   : > { %v3275_v6 = vadd.f32 %v3274_v1, %v3273_v45 }
 0x2f5   : > { %v3269_v7 = vrot.slane %v3268_v2, 2 }
 0x2f6   : > { %v3276_v8 = vrot.slane %v3275_v6, 2 }
 0x2f7   : > { %v3270_v9 = vadd.f32 %v3269_v7, %v3268_v2 }
 0x2f8   : > { %v3277_v10 = vadd.f32 %v3276_v8, %v3275_v6 }
 0x2f9   : > { %v3271_v12 = vrot.slane %v3270_v9, 1 }
 0x2fa   : > { %v3278_v13 = vrot.slane %v3277_v10, 1 }
 0x2fb   : > { %v3272_v14 = vadd.f32 %v3271_v12, %v3270_v9 }
 0x2fc   : > { %v3279_v17 = vadd.f32 %v3278_v13, %v3277_v10 }
 0x2fd   : > { %v3281_v18 = vmul.f32 0.5, %v3272_v14 }
 0x2fe   : > { %v3282_v19 = vmul.f32 0.5, %v3279_v17 }
 0x2ff   : > { %v3283_v21 = vsub.f32 %v3704_v39, %v3281_v18 }
 0x300   : > { %v3284_v5 = vsub.f32 %v3705_v59, %v3282_v19 }
 0x301   : > { %v3285_v22 = vmul.f32 %v3283_v21, %v3283_v21 }
 0x302   : > { %v3286_v23 = vmul.f32 %v3284_v5, %v3284_v5 }
 0x303   : > { %v3287_v24 = vsel %vm3265_vm0, %v3285_v22, 0.0 }
 0x304   : > { %v3288_v25 = vrot.slane %v3287_v24, 4  ;;  %v3294_v26 = vsel %vm3265_vm0, %v3286_v23, 0.0 }
 0x305   : > { %v3295_v27 = vrot.slane %v3294_v26, 4 }
 0x306   : > { %v3289_v28 = vadd.f32 %v3288_v25, %v3287_v24 }
 0x307   : > { %v3296_v29 = vadd.f32 %v3295_v27, %v3294_v26 }
 0x308   : > { %v3290_v30 = vrot.slane %v3289_v28, 2 }
 0x309   : > { %v3297_v31 = vrot.slane %v3296_v29, 2 }
 0x30a   : > { %v3291_v32 = vadd.f32 %v3290_v30, %v3289_v28 }
 0x30b   : > { %v3298_v33 = vadd.f32 %v3297_v31, %v3296_v29 }
 0x30c   : > { %v3292_v34 = vrot.slane %v3291_v32, 1 }
 0x30d   : > { %v3299_v15 = vrot.slane %v3298_v33, 1 }
 0x30e   : > { %v3293_v16 = vadd.f32 %v3292_v34, %v3291_v32 }
 0x30f   : > { %v3300_v35 = vadd.f32 %v3299_v15, %v3298_v33 }
 0x310   : > { %v3301_v37 = vmul.f32 0.5, %v3293_v16 }
 0x311   : > { %v3302_v38 = vmul.f32 0.5, %v3300_v35 }
 0x312   : > { %v3303_v40 = vadd.f32 1e-05, %v3301_v37 }
 0x313   : > { %v3304_v41 = vadd.f32 1e-05, %v3302_v38 }
 0x314   : > { %4143 = vrsqrt.f32 %v3303_v40 }
 0x315   : > { %4145 = vrsqrt.f32 %v3304_v41 }
 0x31e   : > { %v4144_v47 = vpop.eup %4143 }
 0x31f   : > { %v4146_v49 = vpop.eup %4145  ;;  %v3307_v11 = vmul.f32 %v4144_v47, %v3283_v21 }
 0x320   : > { %v3308_v51 = vmul.f32 %v4146_v49, %v3284_v5 }
 0x321   : > { %v3321_v53 = vmul.f32 %v3314_v46, %v3307_v11 }
 0x322   : > { %v3322_v54 = vmul.f32 %v3318_v48, %v3308_v51 }
 0x323   : > { %v3335_v55 = vadd.f32 %v3328_v50, %v3321_v53 }
 0x324   : > { %v3336_v56 = vadd.f32 %v3332_v52, %v3322_v54 }
 0x325   : > { %v3337_v20 = vmax.f32 %v3335_v55, 0.0 }
 0x326   : > { %v3338_v39 = vmax.f32 %v3336_v56, 0.0 }
 0x328   : > { %v3341_v4 = vcombine.low %v3337_v20, %v3338_v39 }
 0x32a   : > { %3700 = vst.sshfl [vmem:[%s1291_s28] sm:$0x33 pattern:$0x76325410] %v3341_v4 }
 0x32b PF: > { %p11_p9 = scmp.ge.s32.totalorder %s4214_s19, 6   ;;  %s5133_s15 = smov %s4165_s16 }
 0x32c   : > { %s5134_s16 = smov %s4223_s22  ;;  %s5135_s17 = smov %s4214_s19 }
 0x32d   :  { %13 = sbr.rel (!%p11_p9) target bundleno = 2 (0x2), region = 115 }

// kernel: g_encode_forward.6
= control target key start
LH: loop header
LB: loop body
LE: loop exit
PB: predicated region body
PF: predicated region fallthrough
CT: control target
= control target key end

     0   :  { %s9787_s15 = smov 0   ;;  %s9789_s16 = smov 0   ;;  %s11483_s0 = inlined_call_operand.vmem [shape: f32[8,4096], index: 0, kind: input, shape index: {}]   ;;  %s11484_s1 = inlined_call_operand.vmem [shape: bf16[4096,512], index: 1, kind: input, shape index: {}]   ;;  %s11485_s2 = inlined_call_operand.vmem [shape: f32[1,512], index: 2, kind: input, shape index: {}]   ;;  %s11486_s3 = inlined_call_operand.vmem [shape: f32[1,512], index: 3, kind: input, shape index: {}]   ;;  %s11487_s4 = inlined_call_operand.vmem [shape: f32[8,512], index: 4, kind: output, shape index: {}]  }
   0x1   :  { %s9791_s17 = smov 0  }
   0x2 LB: > { %s8356_s18 = sadd.s32 4294967295, %s9760_s17   ;;  %s9804_s19 = sadd.s32 1, %s9760_s17   ;;  %s9760_s17 = sphi %s9791_s17, %s11490_s17   ;;  %s9756_s16 = sphi %s9789_s16, %s11489_s16   ;;  %s9752_s15 = sphi %s9787_s15, %s11488_s15  }
   0x3   : > { %s39_s20 = ssub.s32 %s9760_s17, %s9804_s19  ;;  %s42_s21 = sadd.s32 1, %s9756_s16 }
   0x4   : > { %p40_p0 = scmp.eq.s32.totalorder %s39_s20, 0  ;;  %p49_p1 = scmp.ne.s32.totalorder %s9756_s16, %s9752_s15 }
   0x5   : > { %p50_p2 = scmp.eq.s32.totalorder %s9760_s17, 0  ;;  %p8359_p4 = scmp.ge.s32.totalorder %s9760_s17, 2 }
   0x6   : > { %s9813_s22 = scalar_select %p40_p0, %s9756_s16, %s42_s21  }
   0x7   : > { %p51_p3 = por %p50_p2, %p49_p1  ;;  %156 = sbr.rel (%p8359_p4) target bundleno = 274 (0x112), region = 20 }
   0xe   : > { %159 = sbr.rel (!%p51_p3) target bundleno = 274 (0x112), region = 24  ;;  %s161_s23 = sand.u32 (%p51_p3), 1, %s9756_s16  }
   0xf   : > { %s8883_s24 = sshll.u32 (%p51_p3), %s9760_s17, 3  ;;  %s8360_s25 = sshll.u32 (%p51_p3), %s161_s23, 12 }
  0x10   : > { %s9821_s28 = scalar_lea.vmem (%p51_p3), %s11484_s1, %s8883_s24  ;;  %s9826_s29 = scalar_lea.vmem (%p51_p3), [#allocation2], %s8360_s25 }
  0x11   : > { %v1219_v0 = vld [vmem:[%s9821_s28] sm:$0xff] (%p51_p3)  ;;  %v1221_v1 = vld [vmem:[%s9821_s28 + $0x10] sm:$0xff] (%p51_p3) }
  0x12   : > { %v1223_v2 = vld [vmem:[%s9821_s28 + $0x20] sm:$0xff] (%p51_p3)  ;;  %1220 = vst [vmem:[%s9826_s29] sm:$0xff] (%p51_p3), %v1219_v0  ;;  %1222 = vst [vmem:[%s9826_s29 + $0x8] sm:$0xff] (%p51_p3), %v1221_v1  ;;  %v1225_v3 = vld [vmem:[%s9821_s28 + $0x30] sm:$0xff] (%p51_p3) }
  0x13   : > { %1224 = vst [vmem:[%s9826_s29 + $0x10] sm:$0xff] (%p51_p3), %v1223_v2  ;;  %v1227_v4 = vld [vmem:[%s9821_s28 + $0x40] sm:$0xff] (%p51_p3)  ;;  %v1229_v5 = vld [vmem:[%s9821_s28 + $0x50] sm:$0xff] (%p51_p3)  ;;  %1226 = vst [vmem:[%s9826_s29 + $0x18] sm:$0xff] (%p51_p3), %v1225_v3 }
  0x14   : > { %1228 = vst [vmem:[%s9826_s29 + $0x20] sm:$0xff] (%p51_p3), %v1227_v4  ;;  %1230 = vst [vmem:[%s9826_s29 + $0x28] sm:$0xff] (%p51_p3), %v1229_v5  ;;  %v1231_v6 = vld [vmem:[%s9821_s28 + $0x60] sm:$0xff] (%p51_p3)  ;;  %v1233_v7 = vld [vmem:[%s9821_s28 + $0x70] sm:$0xff] (%p51_p3) }
  0x15   : > { %v1235_v8 = vld [vmem:[%s9821_s28 + $0x80] sm:$0xff]  ;;  %1232 = vst [vmem:[%s9826_s29 + $0x30] sm:$0xff] %v1231_v6  ;;  %1234 = vst [vmem:[%s9826_s29 + $0x38] sm:$0xff] %v1233_v7  ;;  %v1237_v9 = vld [vmem:[%s9821_s28 + $0x90] sm:$0xff] }
  0x16   : > { %1236 = vst [vmem:[%s9826_s29 + $0x40] sm:$0xff] %v1235_v8  ;;  %v1239_v10 = vld [vmem:[%s9821_s28 + $0xa0] sm:$0xff]  ;;  %v1241_v11 = vld [vmem:[%s9821_s28 + $0xb0] sm:$0xff]  ;;  %1238 = vst [vmem:[%s9826_s29 + $0x48] sm:$0xff] %v1237_v9 }
  0x17   : > { %1240 = vst [vmem:[%s9826_s29 + $0x50] sm:$0xff] %v1239_v10  ;;  %1242 = vst [vmem:[%s9826_s29 + $0x58] sm:$0xff] %v1241_v11  ;;  %v1243_v12 = vld [vmem:[%s9821_s28 + $0xc0] sm:$0xff]  ;;  %v1245_v13 = vld [vmem:[%s9821_s28 + $0xd0] sm:$0xff] }
  0x18   : > { %v1247_v14 = vld [vmem:[%s9821_s28 + $0xe0] sm:$0xff]  ;;  %1244 = vst [vmem:[%s9826_s29 + $0x60] sm:$0xff] %v1243_v12  ;;  %1246 = vst [vmem:[%s9826_s29 + $0x68] sm:$0xff] %v1245_v13  ;;  %v1249_v15 = vld [vmem:[%s9821_s28 + $0xf0] sm:$0xff] }
  0x19   : > { %1248 = vst [vmem:[%s9826_s29 + $0x70] sm:$0xff] %v1247_v14  ;;  %v1251_v16 = vld [vmem:[%s9821_s28 + $0x100] sm:$0xff]  ;;  %v1253_v17 = vld [vmem:[%s9821_s28 + $0x110] sm:$0xff]  ;;  %1250 = vst [vmem:[%s9826_s29 + $0x78] sm:$0xff] %v1249_v15 }
  0x1a   : > { %1252 = vst [vmem:[%s9826_s29 + $0x80] sm:$0xff] %v1251_v16  ;;  %1254 = vst [vmem:[%s9826_s29 + $0x88] sm:$0xff] %v1253_v17  ;;  %v1255_v18 = vld [vmem:[%s9821_s28 + $0x120] sm:$0xff]  ;;  %v1257_v19 = vld [vmem:[%s9821_s28 + $0x130] sm:$0xff] }
  0x1b   : > { %v1259_v20 = vld [vmem:[%s9821_s28 + $0x140] sm:$0xff]  ;;  %1256 = vst [vmem:[%s9826_s29 + $0x90] sm:$0xff] %v1255_v18  ;;  %1258 = vst [vmem:[%s9826_s29 + $0x98] sm:$0xff] %v1257_v19  ;;  %v1261_v21 = vld [vmem:[%s9821_s28 + $0x150] sm:$0xff] }
  0x1c   : > { %1260 = vst [vmem:[%s9826_s29 + $0xa0] sm:$0xff] %v1259_v20  ;;  %v1263_v22 = vld [vmem:[%s9821_s28 + $0x160] sm:$0xff]  ;;  %v1265_v23 = vld [vmem:[%s9821_s28 + $0x170] sm:$0xff]  ;;  %1262 = vst [vmem:[%s9826_s29 + $0xa8] sm:$0xff] %v1261_v21 }
  0x1d   : > { %1264 = vst [vmem:[%s9826_s29 + $0xb0] sm:$0xff] %v1263_v22  ;;  %1266 = vst [vmem:[%s9826_s29 + $0xb8] sm:$0xff] %v1265_v23  ;;  %v1267_v24 = vld [vmem:[%s9821_s28 + $0x180] sm:$0xff]  ;;  %v1269_v25 = vld [vmem:[%s9821_s28 + $0x190] sm:$0xff] }
  0x1e   : > { %v1271_v26 = vld [vmem:[%s9821_s28 + $0x1a0] sm:$0xff]  ;;  %1268 = vst [vmem:[%s9826_s29 + $0xc0] sm:$0xff] %v1267_v24  ;;  %1270 = vst [vmem:[%s9826_s29 + $0xc8] sm:$0xff] %v1269_v25  ;;  %v1273_v27 = vld [vmem:[%s9821_s28 + $0x1b0] sm:$0xff] }
  0x1f   : > { %1272 = vst [vmem:[%s9826_s29 + $0xd0] sm:$0xff] %v1271_v26  ;;  %v1275_v28 = vld [vmem:[%s9821_s28 + $0x1c0] sm:$0xff]  ;;  %v1277_v29 = vld [vmem:[%s9821_s28 + $0x1d0] sm:$0xff]  ;;  %1274 = vst [vmem:[%s9826_s29 + $0xd8] sm:$0xff] %v1273_v27 }
  0x20   : > { %1276 = vst [vmem:[%s9826_s29 + $0xe0] sm:$0xff] %v1275_v28  ;;  %1278 = vst [vmem:[%s9826_s29 + $0xe8] sm:$0xff] %v1277_v29  ;;  %v1279_v30 = vld [vmem:[%s9821_s28 + $0x1e0] sm:$0xff]  ;;  %v1281_v31 = vld [vmem:[%s9821_s28 + $0x1f0] sm:$0xff] }
  0x21   : > { %v1283_v32 = vld [vmem:[%s9821_s28 + $0x200] sm:$0xff]  ;;  %1280 = vst [vmem:[%s9826_s29 + $0xf0] sm:$0xff] %v1279_v30  ;;  %1282 = vst [vmem:[%s9826_s29 + $0xf8] sm:$0xff] %v1281_v31  ;;  %v1285_v33 = vld [vmem:[%s9821_s28 + $0x210] sm:$0xff] }
  0x22   : > { %1284 = vst [vmem:[%s9826_s29 + $0x100] sm:$0xff] %v1283_v32  ;;  %v1287_v34 = vld [vmem:[%s9821_s28 + $0x220] sm:$0xff]  ;;  %v1289_v35 = vld [vmem:[%s9821_s28 + $0x230] sm:$0xff]  ;;  %1286 = vst [vmem:[%s9826_s29 + $0x108] sm:$0xff] %v1285_v33 }
  0x23   : > { %1288 = vst [vmem:[%s9826_s29 + $0x110] sm:$0xff] %v1287_v34  ;;  %1290 = vst [vmem:[%s9826_s29 + $0x118] sm:$0xff] %v1289_v35  ;;  %v1291_v36 = vld [vmem:[%s9821_s28 + $0x240] sm:$0xff]  ;;  %v1293_v37 = vld [vmem:[%s9821_s28 + $0x250] sm:$0xff] }
  0x24   : > { %v1295_v38 = vld [vmem:[%s9821_s28 + $0x260] sm:$0xff]  ;;  %1292 = vst [vmem:[%s9826_s29 + $0x120] sm:$0xff] %v1291_v36  ;;  %1294 = vst [vmem:[%s9826_s29 + $0x128] sm:$0xff] %v1293_v37  ;;  %v1297_v39 = vld [vmem:[%s9821_s28 + $0x270] sm:$0xff] }
  0x25   : > { %1296 = vst [vmem:[%s9826_s29 + $0x130] sm:$0xff] %v1295_v38  ;;  %v1299_v40 = vld [vmem:[%s9821_s28 + $0x280] sm:$0xff]  ;;  %v1301_v41 = vld [vmem:[%s9821_s28 + $0x290] sm:$0xff]  ;;  %1298 = vst [vmem:[%s9826_s29 + $0x138] sm:$0xff] %v1297_v39 }
  0x26   : > { %1300 = vst [vmem:[%s9826_s29 + $0x140] sm:$0xff] %v1299_v40  ;;  %1302 = vst [vmem:[%s9826_s29 + $0x148] sm:$0xff] %v1301_v41  ;;  %v1303_v42 = vld [vmem:[%s9821_s28 + $0x2a0] sm:$0xff]  ;;  %v1305_v43 = vld [vmem:[%s9821_s28 + $0x2b0] sm:$0xff] }
  0x27   : > { %v1307_v44 = vld [vmem:[%s9821_s28 + $0x2c0] sm:$0xff]  ;;  %1304 = vst [vmem:[%s9826_s29 + $0x150] sm:$0xff] %v1303_v42  ;;  %1306 = vst [vmem:[%s9826_s29 + $0x158] sm:$0xff] %v1305_v43  ;;  %v1309_v45 = vld [vmem:[%s9821_s28 + $0x2d0] sm:$0xff] }
  0x28   : > { %1308 = vst [vmem:[%s9826_s29 + $0x160] sm:$0xff] %v1307_v44  ;;  %v1311_v46 = vld [vmem:[%s9821_s28 + $0x2e0] sm:$0xff]  ;;  %v1313_v47 = vld [vmem:[%s9821_s28 + $0x2f0] sm:$0xff]  ;;  %1310 = vst [vmem:[%s9826_s29 + $0x168] sm:$0xff] %v1309_v45 }
  0x29   : > { %1312 = vst [vmem:[%s9826_s29 + $0x170] sm:$0xff] %v1311_v46  ;;  %1314 = vst [vmem:[%s9826_s29 + $0x178] sm:$0xff] %v1313_v47  ;;  %v1315_v48 = vld [vmem:[%s9821_s28 + $0x300] sm:$0xff]  ;;  %v1317_v49 = vld [vmem:[%s9821_s28 + $0x310] sm:$0xff] }
  0x2a   : > { %v1319_v50 = vld [vmem:[%s9821_s28 + $0x320] sm:$0xff]  ;;  %1316 = vst [vmem:[%s9826_s29 + $0x180] sm:$0xff] %v1315_v48  ;;  %1318 = vst [vmem:[%s9826_s29 + $0x188] sm:$0xff] %v1317_v49  ;;  %v1321_v51 = vld [vmem:[%s9821_s28 + $0x330] sm:$0xff] }
  0x2b   : > { %1320 = vst [vmem:[%s9826_s29 + $0x190] sm:$0xff] %v1319_v50  ;;  %v1323_v52 = vld [vmem:[%s9821_s28 + $0x340] sm:$0xff]  ;;  %v1325_v53 = vld [vmem:[%s9821_s28 + $0x350] sm:$0xff]  ;;  %1322 = vst [vmem:[%s9826_s29 + $0x198] sm:$0xff] %v1321_v51 }
  0x2c   : > { %1324 = vst [vmem:[%s9826_s29 + $0x1a0] sm:$0xff] %v1323_v52  ;;  %1326 = vst [vmem:[%s9826_s29 + $0x1a8] sm:$0xff] %v1325_v53  ;;  %v1327_v54 = vld [vmem:[%s9821_s28 + $0x360] sm:$0xff]  ;;  %v1329_v55 = vld [vmem:[%s9821_s28 + $0x370] sm:$0xff] }
  0x2d   : > { %v1331_v56 = vld [vmem:[%s9821_s28 + $0x380] sm:$0xff]  ;;  %1328 = vst [vmem:[%s9826_s29 + $0x1b0] sm:$0xff] %v1327_v54  ;;  %1330 = vst [vmem:[%s9826_s29 + $0x1b8] sm:$0xff] %v1329_v55  ;;  %v1333_v57 = vld [vmem:[%s9821_s28 + $0x390] sm:$0xff] }
  0x2e   : > { %1332 = vst [vmem:[%s9826_s29 + $0x1c0] sm:$0xff] %v1331_v56  ;;  %v1335_v58 = vld [vmem:[%s9821_s28 + $0x3a0] sm:$0xff]  ;;  %v1337_v59 = vld [vmem:[%s9821_s28 + $0x3b0] sm:$0xff]  ;;  %1334 = vst [vmem:[%s9826_s29 + $0x1c8] sm:$0xff] %v1333_v57 }
  0x2f   : > { %1336 = vst [vmem:[%s9826_s29 + $0x1d0] sm:$0xff] %v1335_v58  ;;  %1338 = vst [vmem:[%s9826_s29 + $0x1d8] sm:$0xff] %v1337_v59  ;;  %v1339_v60 = vld [vmem:[%s9821_s28 + $0x3c0] sm:$0xff]  ;;  %v1341_v61 = vld [vmem:[%s9821_s28 + $0x3d0] sm:$0xff] }
  0x30   : > { %v1343_v62 = vld [vmem:[%s9821_s28 + $0x3e0] sm:$0xff]  ;;  %1340 = vst [vmem:[%s9826_s29 + $0x1e0] sm:$0xff] %v1339_v60  ;;  %1342 = vst [vmem:[%s9826_s29 + $0x1e8] sm:$0xff] %v1341_v61  ;;  %v1345_v63 = vld [vmem:[%s9821_s28 + $0x3f0] sm:$0xff] }
  0x31   : > { %1344 = vst [vmem:[%s9826_s29 + $0x1f0] sm:$0xff] %v1343_v62  ;;  %v1347_v0 = vld [vmem:[%s9821_s28 + $0x400] sm:$0xff]  ;;  %v1349_v1 = vld [vmem:[%s9821_s28 + $0x410] sm:$0xff]  ;;  %1346 = vst [vmem:[%s9826_s29 + $0x1f8] sm:$0xff] %v1345_v63 }
  0x32   : > { %1348 = vst [vmem:[%s9826_s29 + $0x200] sm:$0xff] %v1347_v0  ;;  %1350 = vst [vmem:[%s9826_s29 + $0x208] sm:$0xff] %v1349_v1  ;;  %v1351_v2 = vld [vmem:[%s9821_s28 + $0x420] sm:$0xff]  ;;  %v1353_v3 = vld [vmem:[%s9821_s28 + $0x430] sm:$0xff] }
  0x33   : > { %v1355_v4 = vld [vmem:[%s9821_s28 + $0x440] sm:$0xff]  ;;  %1352 = vst [vmem:[%s9826_s29 + $0x210] sm:$0xff] %v1351_v2  ;;  %1354 = vst [vmem:[%s9826_s29 + $0x218] sm:$0xff] %v1353_v3  ;;  %v1357_v5 = vld [vmem:[%s9821_s28 + $0x450] sm:$0xff] }
  0x34   : > { %1356 = vst [vmem:[%s9826_s29 + $0x220] sm:$0xff] %v1355_v4  ;;  %v1359_v6 = vld [vmem:[%s9821_s28 + $0x460] sm:$0xff]  ;;  %v1361_v7 = vld [vmem:[%s9821_s28 + $0x470] sm:$0xff]  ;;  %1358 = vst [vmem:[%s9826_s29 + $0x228] sm:$0xff] %v1357_v5 }
  0x35   : > { %1360 = vst [vmem:[%s9826_s29 + $0x230] sm:$0xff] %v1359_v6  ;;  %1362 = vst [vmem:[%s9826_s29 + $0x238] sm:$0xff] %v1361_v7  ;;  %v1363_v8 = vld [vmem:[%s9821_s28 + $0x480] sm:$0xff]  ;;  %v1365_v9 = vld [vmem:[%s9821_s28 + $0x490] sm:$0xff] }
  0x36   : > { %v1367_v10 = vld [vmem:[%s9821_s28 + $0x4a0] sm:$0xff]  ;;  %1364 = vst [vmem:[%s9826_s29 + $0x240] sm:$0xff] %v1363_v8  ;;  %1366 = vst [vmem:[%s9826_s29 + $0x248] sm:$0xff] %v1365_v9  ;;  %v1369_v11 = vld [vmem:[%s9821_s28 + $0x4b0] sm:$0xff] }
  0x37   : > { %1368 = vst [vmem:[%s9826_s29 + $0x250] sm:$0xff] %v1367_v10  ;;  %v1371_v12 = vld [vmem:[%s9821_s28 + $0x4c0] sm:$0xff]  ;;  %v1373_v13 = vld [vmem:[%s9821_s28 + $0x4d0] sm:$0xff]  ;;  %1370 = vst [vmem:[%s9826_s29 + $0x258] sm:$0xff] %v1369_v11 }
  0x38   : > { %1372 = vst [vmem:[%s9826_s29 + $0x260] sm:$0xff] %v1371_v12  ;;  %1374 = vst [vmem:[%s9826_s29 + $0x268] sm:$0xff] %v1373_v13  ;;  %v1375_v14 = vld [vmem:[%s9821_s28 + $0x4e0] sm:$0xff]  ;;  %v1377_v15 = vld [vmem:[%s9821_s28 + $0x4f0] sm:$0xff] }
  0x39   : > { %v1379_v16 = vld [vmem:[%s9821_s28 + $0x500] sm:$0xff]  ;;  %1376 = vst [vmem:[%s9826_s29 + $0x270] sm:$0xff] %v1375_v14  ;;  %1378 = vst [vmem:[%s9826_s29 + $0x278] sm:$0xff] %v1377_v15  ;;  %v1381_v17 = vld [vmem:[%s9821_s28 + $0x510] sm:$0xff] }
  0x3a   : > { %1380 = vst [vmem:[%s9826_s29 + $0x280] sm:$0xff] %v1379_v16  ;;  %v1383_v18 = vld [vmem:[%s9821_s28 + $0x520] sm:$0xff]  ;;  %v1385_v19 = vld [vmem:[%s9821_s28 + $0x530] sm:$0xff]  ;;  %1382 = vst [vmem:[%s9826_s29 + $0x288] sm:$0xff] %v1381_v17 }
  0x3b   : > { %1384 = vst [vmem:[%s9826_s29 + $0x290] sm:$0xff] %v1383_v18  ;;  %1386 = vst [vmem:[%s9826_s29 + $0x298] sm:$0xff] %v1385_v19  ;;  %v1387_v20 = vld [vmem:[%s9821_s28 + $0x540] sm:$0xff]  ;;  %v1389_v21 = vld [vmem:[%s9821_s28 + $0x550] sm:$0xff] }
  0x3c   : > { %v1391_v22 = vld [vmem:[%s9821_s28 + $0x560] sm:$0xff]  ;;  %1388 = vst [vmem:[%s9826_s29 + $0x2a0] sm:$0xff] %v1387_v20  ;;  %1390 = vst [vmem:[%s9826_s29 + $0x2a8] sm:$0xff] %v1389_v21  ;;  %v1393_v23 = vld [vmem:[%s9821_s28 + $0x570] sm:$0xff] }
  0x3d   : > { %1392 = vst [vmem:[%s9826_s29 + $0x2b0] sm:$0xff] %v1391_v22  ;;  %v1395_v24 = vld [vmem:[%s9821_s28 + $0x580] sm:$0xff]  ;;  %v1397_v25 = vld [vmem:[%s9821_s28 + $0x590] sm:$0xff]  ;;  %1394 = vst [vmem:[%s9826_s29 + $0x2b8] sm:$0xff] %v1393_v23 }
  0x3e   : > { %1396 = vst [vmem:[%s9826_s29 + $0x2c0] sm:$0xff] %v1395_v24  ;;  %1398 = vst [vmem:[%s9826_s29 + $0x2c8] sm:$0xff] %v1397_v25  ;;  %v1399_v26 = vld [vmem:[%s9821_s28 + $0x5a0] sm:$0xff]  ;;  %v1401_v27 = vld [vmem:[%s9821_s28 + $0x5b0] sm:$0xff] }
  0x3f   : > { %v1403_v28 = vld [vmem:[%s9821_s28 + $0x5c0] sm:$0xff]  ;;  %1400 = vst [vmem:[%s9826_s29 + $0x2d0] sm:$0xff] %v1399_v26  ;;  %1402 = vst [vmem:[%s9826_s29 + $0x2d8] sm:$0xff] %v1401_v27  ;;  %v1405_v29 = vld [vmem:[%s9821_s28 + $0x5d0] sm:$0xff] }
  0x40   : > { %1404 = vst [vmem:[%s9826_s29 + $0x2e0] sm:$0xff] %v1403_v28  ;;  %v1407_v30 = vld [vmem:[%s9821_s28 + $0x5e0] sm:$0xff]  ;;  %v1409_v31 = vld [vmem:[%s9821_s28 + $0x5f0] sm:$0xff]  ;;  %1406 = vst [vmem:[%s9826_s29 + $0x2e8] sm:$0xff] %v1405_v29 }
  0x41   : > { %1408 = vst [vmem:[%s9826_s29 + $0x2f0] sm:$0xff] %v1407_v30  ;;  %1410 = vst [vmem:[%s9826_s29 + $0x2f8] sm:$0xff] %v1409_v31  ;;  %v1411_v32 = vld [vmem:[%s9821_s28 + $0x600] sm:$0xff]  ;;  %v1413_v33 = vld [vmem:[%s9821_s28 + $0x610] sm:$0xff] }
  0x42   : > { %v1415_v34 = vld [vmem:[%s9821_s28 + $0x620] sm:$0xff]  ;;  %1412 = vst [vmem:[%s9826_s29 + $0x300] sm:$0xff] %v1411_v32  ;;  %1414 = vst [vmem:[%s9826_s29 + $0x308] sm:$0xff] %v1413_v33  ;;  %v1417_v35 = vld [vmem:[%s9821_s28 + $0x630] sm:$0xff] }
  0x43   : > { %1416 = vst [vmem:[%s9826_s29 + $0x310] sm:$0xff] %v1415_v34  ;;  %v1419_v36 = vld [vmem:[%s9821_s28 + $0x640] sm:$0xff]  ;;  %v1421_v37 = vld [vmem:[%s9821_s28 + $0x650] sm:$0xff]  ;;  %1418 = vst [vmem:[%s9826_s29 + $0x318] sm:$0xff] %v1417_v35 }
  0x44   : > { %1420 = vst [vmem:[%s9826_s29 + $0x320] sm:$0xff] %v1419_v36  ;;  %1422 = vst [vmem:[%s9826_s29 + $0x328] sm:$0xff] %v1421_v37  ;;  %v1423_v38 = vld [vmem:[%s9821_s28 + $0x660] sm:$0xff]  ;;  %v1425_v39 = vld [vmem:[%s9821_s28 + $0x670] sm:$0xff] }
  0x45   : > { %v1427_v40 = vld [vmem:[%s9821_s28 + $0x680] sm:$0xff]  ;;  %1424 = vst [vmem:[%s9826_s29 + $0x330] sm:$0xff] %v1423_v38  ;;  %1426 = vst [vmem:[%s9826_s29 + $0x338] sm:$0xff] %v1425_v39  ;;  %v1429_v41 = vld [vmem:[%s9821_s28 + $0x690] sm:$0xff] }
  0x46   : > { %1428 = vst [vmem:[%s9826_s29 + $0x340] sm:$0xff] %v1427_v40  ;;  %v1431_v42 = vld [vmem:[%s9821_s28 + $0x6a0] sm:$0xff]  ;;  %v1433_v43 = vld [vmem:[%s9821_s28 + $0x6b0] sm:$0xff]  ;;  %1430 = vst [vmem:[%s9826_s29 + $0x348] sm:$0xff] %v1429_v41 }
  0x47   : > { %1432 = vst [vmem:[%s9826_s29 + $0x350] sm:$0xff] %v1431_v42  ;;  %1434 = vst [vmem:[%s9826_s29 + $0x358] sm:$0xff] %v1433_v43  ;;  %v1435_v44 = vld [vmem:[%s9821_s28 + $0x6c0] sm:$0xff]  ;;  %v1437_v45 = vld [vmem:[%s9821_s28 + $0x6d0] sm:$0xff] }
  0x48   : > { %v1439_v46 = vld [vmem:[%s9821_s28 + $0x6e0] sm:$0xff]  ;;  %1436 = vst [vmem:[%s9826_s29 + $0x360] sm:$0xff] %v1435_v44  ;;  %1438 = vst [vmem:[%s9826_s29 + $0x368] sm:$0xff] %v1437_v45  ;;  %v1441_v47 = vld [vmem:[%s9821_s28 + $0x6f0] sm:$0xff] }
  0x49   : > { %1440 = vst [vmem:[%s9826_s29 + $0x370] sm:$0xff] %v1439_v46  ;;  %v1443_v48 = vld [vmem:[%s9821_s28 + $0x700] sm:$0xff]  ;;  %v1445_v49 = vld [vmem:[%s9821_s28 + $0x710] sm:$0xff]  ;;  %1442 = vst [vmem:[%s9826_s29 + $0x378] sm:$0xff] %v1441_v47 }
  0x4a   : > { %1444 = vst [vmem:[%s9826_s29 + $0x380] sm:$0xff] %v1443_v48  ;;  %1446 = vst [vmem:[%s9826_s29 + $0x388] sm:$0xff] %v1445_v49  ;;  %v1447_v50 = vld [vmem:[%s9821_s28 + $0x720] sm:$0xff]  ;;  %v1449_v51 = vld [vmem:[%s9821_s28 + $0x730] sm:$0xff] }
  0x4b   : > { %v1451_v52 = vld [vmem:[%s9821_s28 + $0x740] sm:$0xff]  ;;  %1448 = vst [vmem:[%s9826_s29 + $0x390] sm:$0xff] %v1447_v50  ;;  %1450 = vst [vmem:[%s9826_s29 + $0x398] sm:$0xff] %v1449_v51  ;;  %v1453_v53 = vld [vmem:[%s9821_s28 + $0x750] sm:$0xff] }
  0x4c   : > { %1452 = vst [vmem:[%s9826_s29 + $0x3a0] sm:$0xff] %v1451_v52  ;;  %v1455_v54 = vld [vmem:[%s9821_s28 + $0x760] sm:$0xff]  ;;  %v1457_v55 = vld [vmem:[%s9821_s28 + $0x770] sm:$0xff]  ;;  %1454 = vst [vmem:[%s9826_s29 + $0x3a8] sm:$0xff] %v1453_v53 }
  0x4d   : > { %1456 = vst [vmem:[%s9826_s29 + $0x3b0] sm:$0xff] %v1455_v54  ;;  %1458 = vst [vmem:[%s9826_s29 + $0x3b8] sm:$0xff] %v1457_v55  ;;  %v1459_v56 = vld [vmem:[%s9821_s28 + $0x780] sm:$0xff]  ;;  %v1461_v57 = vld [vmem:[%s9821_s28 + $0x790] sm:$0xff] }
  0x4e   : > { %v1463_v58 = vld [vmem:[%s9821_s28 + $0x7a0] sm:$0xff]  ;;  %1460 = vst [vmem:[%s9826_s29 + $0x3c0] sm:$0xff] %v1459_v56  ;;  %1462 = vst [vmem:[%s9826_s29 + $0x3c8] sm:$0xff] %v1461_v57  ;;  %v1465_v59 = vld [vmem:[%s9821_s28 + $0x7b0] sm:$0xff] }
  0x4f   : > { %1464 = vst [vmem:[%s9826_s29 + $0x3d0] sm:$0xff] %v1463_v58  ;;  %v1467_v60 = vld [vmem:[%s9821_s28 + $0x7c0] sm:$0xff]  ;;  %v1469_v61 = vld [vmem:[%s9821_s28 + $0x7d0] sm:$0xff]  ;;  %1466 = vst [vmem:[%s9826_s29 + $0x3d8] sm:$0xff] %v1465_v59 }
  0x50   : > { %1468 = vst [vmem:[%s9826_s29 + $0x3e0] sm:$0xff] %v1467_v60  ;;  %1470 = vst [vmem:[%s9826_s29 + $0x3e8] sm:$0xff] %v1469_v61  ;;  %v1471_v62 = vld [vmem:[%s9821_s28 + $0x7e0] sm:$0xff]  ;;  %v1473_v63 = vld [vmem:[%s9821_s28 + $0x7f0] sm:$0xff] }
  0x51   : > { %v1475_v0 = vld [vmem:[%s9821_s28 + $0x800] sm:$0xff]  ;;  %1472 = vst [vmem:[%s9826_s29 + $0x3f0] sm:$0xff] %v1471_v62  ;;  %1474 = vst [vmem:[%s9826_s29 + $0x3f8] sm:$0xff] %v1473_v63  ;;  %v1477_v1 = vld [vmem:[%s9821_s28 + $0x810] sm:$0xff] }
  0x52   : > { %1476 = vst [vmem:[%s9826_s29 + $0x400] sm:$0xff] %v1475_v0  ;;  %v1479_v2 = vld [vmem:[%s9821_s28 + $0x820] sm:$0xff]  ;;  %v1481_v3 = vld [vmem:[%s9821_s28 + $0x830] sm:$0xff]  ;;  %1478 = vst [vmem:[%s9826_s29 + $0x408] sm:$0xff] %v1477_v1 }
  0x53   : > { %1480 = vst [vmem:[%s9826_s29 + $0x410] sm:$0xff] %v1479_v2  ;;  %1482 = vst [vmem:[%s9826_s29 + $0x418] sm:$0xff] %v1481_v3  ;;  %v1483_v4 = vld [vmem:[%s9821_s28 + $0x840] sm:$0xff]  ;;  %v1485_v5 = vld [vmem:[%s9821_s28 + $0x850] sm:$0xff] }
  0x54   : > { %v1487_v6 = vld [vmem:[%s9821_s28 + $0x860] sm:$0xff]  ;;  %1484 = vst [vmem:[%s9826_s29 + $0x420] sm:$0xff] %v1483_v4  ;;  %1486 = vst [vmem:[%s9826_s29 + $0x428] sm:$0xff] %v1485_v5  ;;  %v1489_v7 = vld [vmem:[%s9821_s28 + $0x870] sm:$0xff] }
  0x55   : > { %1488 = vst [vmem:[%s9826_s29 + $0x430] sm:$0xff] %v1487_v6  ;;  %v1491_v8 = vld [vmem:[%s9821_s28 + $0x880] sm:$0xff]  ;;  %v1493_v9 = vld [vmem:[%s9821_s28 + $0x890] sm:$0xff]  ;;  %1490 = vst [vmem:[%s9826_s29 + $0x438] sm:$0xff] %v1489_v7 }
  0x56   : > { %1492 = vst [vmem:[%s9826_s29 + $0x440] sm:$0xff] %v1491_v8  ;;  %1494 = vst [vmem:[%s9826_s29 + $0x448] sm:$0xff] %v1493_v9  ;;  %v1495_v10 = vld [vmem:[%s9821_s28 + $0x8a0] sm:$0xff]  ;;  %v1497_v11 = vld [vmem:[%s9821_s28 + $0x8b0] sm:$0xff] }
  0x57   : > { %v1499_v12 = vld [vmem:[%s9821_s28 + $0x8c0] sm:$0xff]  ;;  %1496 = vst [vmem:[%s9826_s29 + $0x450] sm:$0xff] %v1495_v10  ;;  %1498 = vst [vmem:[%s9826_s29 + $0x458] sm:$0xff] %v1497_v11  ;;  %v1501_v13 = vld [vmem:[%s9821_s28 + $0x8d0] sm:$0xff] }
  0x58   : > { %1500 = vst [vmem:[%s9826_s29 + $0x460] sm:$0xff] %v1499_v12  ;;  %v1503_v14 = vld [vmem:[%s9821_s28 + $0x8e0] sm:$0xff]  ;;  %v1505_v15 = vld [vmem:[%s9821_s28 + $0x8f0] sm:$0xff]  ;;  %1502 = vst [vmem:[%s9826_s29 + $0x468] sm:$0xff] %v1501_v13 }
  0x59   : > { %1504 = vst [vmem:[%s9826_s29 + $0x470] sm:$0xff] %v1503_v14  ;;  %1506 = vst [vmem:[%s9826_s29 + $0x478] sm:$0xff] %v1505_v15  ;;  %v1507_v16 = vld [vmem:[%s9821_s28 + $0x900] sm:$0xff]  ;;  %v1509_v17 = vld [vmem:[%s9821_s28 + $0x910] sm:$0xff] }
  0x5a   : > { %v1511_v18 = vld [vmem:[%s9821_s28 + $0x920] sm:$0xff]  ;;  %1508 = vst [vmem:[%s9826_s29 + $0x480] sm:$0xff] %v1507_v16  ;;  %1510 = vst [vmem:[%s9826_s29 + $0x488] sm:$0xff] %v1509_v17  ;;  %v1513_v19 = vld [vmem:[%s9821_s28 + $0x930] sm:$0xff] }
  0x5b   : > { %1512 = vst [vmem:[%s9826_s29 + $0x490] sm:$0xff] %v1511_v18  ;;  %v1515_v20 = vld [vmem:[%s9821_s28 + $0x940] sm:$0xff]  ;;  %v1517_v21 = vld [vmem:[%s9821_s28 + $0x950] sm:$0xff]  ;;  %1514 = vst [vmem:[%s9826_s29 + $0x498] sm:$0xff] %v1513_v19 }
  0x5c   : > { %1516 = vst [vmem:[%s9826_s29 + $0x4a0] sm:$0xff] %v1515_v20  ;;  %1518 = vst [vmem:[%s9826_s29 + $0x4a8] sm:$0xff] %v1517_v21  ;;  %v1519_v22 = vld [vmem:[%s9821_s28 + $0x960] sm:$0xff]  ;;  %v1521_v23 = vld [vmem:[%s9821_s28 + $0x970] sm:$0xff] }
  0x5d   : > { %v1523_v24 = vld [vmem:[%s9821_s28 + $0x980] sm:$0xff]  ;;  %1520 = vst [vmem:[%s9826_s29 + $0x4b0] sm:$0xff] %v1519_v22  ;;  %1522 = vst [vmem:[%s9826_s29 + $0x4b8] sm:$0xff] %v1521_v23  ;;  %v1525_v25 = vld [vmem:[%s9821_s28 + $0x990] sm:$0xff] }
  0x5e   : > { %1524 = vst [vmem:[%s9826_s29 + $0x4c0] sm:$0xff] %v1523_v24  ;;  %v1527_v26 = vld [vmem:[%s9821_s28 + $0x9a0] sm:$0xff]  ;;  %v1529_v27 = vld [vmem:[%s9821_s28 + $0x9b0] sm:$0xff]  ;;  %1526 = vst [vmem:[%s9826_s29 + $0x4c8] sm:$0xff] %v1525_v25 }
  0x5f   : > { %1528 = vst [vmem:[%s9826_s29 + $0x4d0] sm:$0xff] %v1527_v26  ;;  %1530 = vst [vmem:[%s9826_s29 + $0x4d8] sm:$0xff] %v1529_v27  ;;  %v1531_v28 = vld [vmem:[%s9821_s28 + $0x9c0] sm:$0xff]  ;;  %v1533_v29 = vld [vmem:[%s9821_s28 + $0x9d0] sm:$0xff] }
  0x60   : > { %v1535_v30 = vld [vmem:[%s9821_s28 + $0x9e0] sm:$0xff]  ;;  %1532 = vst [vmem:[%s9826_s29 + $0x4e0] sm:$0xff] %v1531_v28  ;;  %1534 = vst [vmem:[%s9826_s29 + $0x4e8] sm:$0xff] %v1533_v29  ;;  %v1537_v31 = vld [vmem:[%s9821_s28 + $0x9f0] sm:$0xff] }
  0x61   : > { %1536 = vst [vmem:[%s9826_s29 + $0x4f0] sm:$0xff] %v1535_v30  ;;  %v1539_v32 = vld [vmem:[%s9821_s28 + $0xa00] sm:$0xff]  ;;  %v1541_v33 = vld [vmem:[%s9821_s28 + $0xa10] sm:$0xff]  ;;  %1538 = vst [vmem:[%s9826_s29 + $0x4f8] sm:$0xff] %v1537_v31 }
  0x62   : > { %1540 = vst [vmem:[%s9826_s29 + $0x500] sm:$0xff] %v1539_v32  ;;  %1542 = vst [vmem:[%s9826_s29 + $0x508] sm:$0xff] %v1541_v33  ;;  %v1543_v34 = vld [vmem:[%s9821_s28 + $0xa20] sm:$0xff]  ;;  %v1545_v35 = vld [vmem:[%s9821_s28 + $0xa30] sm:$0xff] }
  0x63   : > { %v1547_v36 = vld [vmem:[%s9821_s28 + $0xa40] sm:$0xff]  ;;  %1544 = vst [vmem:[%s9826_s29 + $0x510] sm:$0xff] %v1543_v34  ;;  %1546 = vst [vmem:[%s9826_s29 + $0x518] sm:$0xff] %v1545_v35  ;;  %v1549_v37 = vld [vmem:[%s9821_s28 + $0xa50] sm:$0xff] }
  0x64   : > { %1548 = vst [vmem:[%s9826_s29 + $0x520] sm:$0xff] %v1547_v36  ;;  %v1551_v38 = vld [vmem:[%s9821_s28 + $0xa60] sm:$0xff]  ;;  %v1553_v39 = vld [vmem:[%s9821_s28 + $0xa70] sm:$0xff]  ;;  %1550 = vst [vmem:[%s9826_s29 + $0x528] sm:$0xff] %v1549_v37 }
  0x65   : > { %1552 = vst [vmem:[%s9826_s29 + $0x530] sm:$0xff] %v1551_v38  ;;  %1554 = vst [vmem:[%s9826_s29 + $0x538] sm:$0xff] %v1553_v39  ;;  %v1555_v40 = vld [vmem:[%s9821_s28 + $0xa80] sm:$0xff]  ;;  %v1557_v41 = vld [vmem:[%s9821_s28 + $0xa90] sm:$0xff] }
  0x66   : > { %v1559_v42 = vld [vmem:[%s9821_s28 + $0xaa0] sm:$0xff]  ;;  %1556 = vst [vmem:[%s9826_s29 + $0x540] sm:$0xff] %v1555_v40  ;;  %1558 = vst [vmem:[%s9826_s29 + $0x548] sm:$0xff] %v1557_v41  ;;  %v1561_v43 = vld [vmem:[%s9821_s28 + $0xab0] sm:$0xff] }
  0x67   : > { %1560 = vst [vmem:[%s9826_s29 + $0x550] sm:$0xff] %v1559_v42  ;;  %v1563_v44 = vld [vmem:[%s9821_s28 + $0xac0] sm:$0xff]  ;;  %v1565_v45 = vld [vmem:[%s9821_s28 + $0xad0] sm:$0xff]  ;;  %1562 = vst [vmem:[%s9826_s29 + $0x558] sm:$0xff] %v1561_v43 }
  0x68   : > { %1564 = vst [vmem:[%s9826_s29 + $0x560] sm:$0xff] %v1563_v44  ;;  %1566 = vst [vmem:[%s9826_s29 + $0x568] sm:$0xff] %v1565_v45  ;;  %v1567_v46 = vld [vmem:[%s9821_s28 + $0xae0] sm:$0xff]  ;;  %v1569_v47 = vld [vmem:[%s9821_s28 + $0xaf0] sm:$0xff] }
  0x69   : > { %v1571_v48 = vld [vmem:[%s9821_s28 + $0xb00] sm:$0xff]  ;;  %1568 = vst [vmem:[%s9826_s29 + $0x570] sm:$0xff] %v1567_v46  ;;  %1570 = vst [vmem:[%s9826_s29 + $0x578] sm:$0xff] %v1569_v47  ;;  %v1573_v49 = vld [vmem:[%s9821_s28 + $0xb10] sm:$0xff] }
  0x6a   : > { %1572 = vst [vmem:[%s9826_s29 + $0x580] sm:$0xff] %v1571_v48  ;;  %v1575_v50 = vld [vmem:[%s9821_s28 + $0xb20] sm:$0xff]  ;;  %v1577_v51 = vld [vmem:[%s9821_s28 + $0xb30] sm:$0xff]  ;;  %1574 = vst [vmem:[%s9826_s29 + $0x588] sm:$0xff] %v1573_v49 }
  0x6b   : > { %1576 = vst [vmem:[%s9826_s29 + $0x590] sm:$0xff] %v1575_v50  ;;  %1578 = vst [vmem:[%s9826_s29 + $0x598] sm:$0xff] %v1577_v51  ;;  %v1579_v52 = vld [vmem:[%s9821_s28 + $0xb40] sm:$0xff]  ;;  %v1581_v53 = vld [vmem:[%s9821_s28 + $0xb50] sm:$0xff] }
  0x6c   : > { %v1583_v54 = vld [vmem:[%s9821_s28 + $0xb60] sm:$0xff]  ;;  %1580 = vst [vmem:[%s9826_s29 + $0x5a0] sm:$0xff] %v1579_v52  ;;  %1582 = vst [vmem:[%s9826_s29 + $0x5a8] sm:$0xff] %v1581_v53  ;;  %v1585_v55 = vld [vmem:[%s9821_s28 + $0xb70] sm:$0xff] }
  0x6d   : > { %1584 = vst [vmem:[%s9826_s29 + $0x5b0] sm:$0xff] %v1583_v54  ;;  %v1587_v56 = vld [vmem:[%s9821_s28 + $0xb80] sm:$0xff]  ;;  %v1589_v57 = vld [vmem:[%s9821_s28 + $0xb90] sm:$0xff]  ;;  %1586 = vst [vmem:[%s9826_s29 + $0x5b8] sm:$0xff] %v1585_v55 }
  0x6e   : > { %1588 = vst [vmem:[%s9826_s29 + $0x5c0] sm:$0xff] %v1587_v56  ;;  %1590 = vst [vmem:[%s9826_s29 + $0x5c8] sm:$0xff] %v1589_v57  ;;  %v1591_v58 = vld [vmem:[%s9821_s28 + $0xba0] sm:$0xff]  ;;  %v1593_v59 = vld [vmem:[%s9821_s28 + $0xbb0] sm:$0xff] }
  0x6f   : > { %v1595_v60 = vld [vmem:[%s9821_s28 + $0xbc0] sm:$0xff]  ;;  %1592 = vst [vmem:[%s9826_s29 + $0x5d0] sm:$0xff] %v1591_v58  ;;  %1594 = vst [vmem:[%s9826_s29 + $0x5d8] sm:$0xff] %v1593_v59  ;;  %v1597_v61 = vld [vmem:[%s9821_s28 + $0xbd0] sm:$0xff] }
  0x70   : > { %1596 = vst [vmem:[%s9826_s29 + $0x5e0] sm:$0xff] %v1595_v60  ;;  %v1599_v62 = vld [vmem:[%s9821_s28 + $0xbe0] sm:$0xff]  ;;  %v1601_v63 = vld [vmem:[%s9821_s28 + $0xbf0] sm:$0xff]  ;;  %1598 = vst [vmem:[%s9826_s29 + $0x5e8] sm:$0xff] %v1597_v61 }
  0x71   : > { %1600 = vst [vmem:[%s9826_s29 + $0x5f0] sm:$0xff] %v1599_v62  ;;  %1602 = vst [vmem:[%s9826_s29 + $0x5f8] sm:$0xff] %v1601_v63  ;;  %v1603_v0 = vld [vmem:[%s9821_s28 + $0xc00] sm:$0xff]  ;;  %v1605_v1 = vld [vmem:[%s9821_s28 + $0xc10] sm:$0xff] }
  0x72   : > { %v1607_v2 = vld [vmem:[%s9821_s28 + $0xc20] sm:$0xff]  ;;  %1604 = vst [vmem:[%s9826_s29 + $0x600] sm:$0xff] %v1603_v0  ;;  %1606 = vst [vmem:[%s9826_s29 + $0x608] sm:$0xff] %v1605_v1  ;;  %v1609_v3 = vld [vmem:[%s9821_s28 + $0xc30] sm:$0xff] }
  0x73   : > { %1608 = vst [vmem:[%s9826_s29 + $0x610] sm:$0xff] %v1607_v2  ;;  %v1611_v4 = vld [vmem:[%s9821_s28 + $0xc40] sm:$0xff]  ;;  %v1613_v5 = vld [vmem:[%s9821_s28 + $0xc50] sm:$0xff]  ;;  %1610 = vst [vmem:[%s9826_s29 + $0x618] sm:$0xff] %v1609_v3 }
  0x74   : > { %1612 = vst [vmem:[%s9826_s29 + $0x620] sm:$0xff] %v1611_v4  ;;  %1614 = vst [vmem:[%s9826_s29 + $0x628] sm:$0xff] %v1613_v5  ;;  %v1615_v6 = vld [vmem:[%s9821_s28 + $0xc60] sm:$0xff]  ;;  %v1617_v7 = vld [vmem:[%s9821_s28 + $0xc70] sm:$0xff] }
  0x75   : > { %v1619_v8 = vld [vmem:[%s9821_s28 + $0xc80] sm:$0xff]  ;;  %1616 = vst [vmem:[%s9826_s29 + $0x630] sm:$0xff] %v1615_v6  ;;  %1618 = vst [vmem:[%s9826_s29 + $0x638] sm:$0xff] %v1617_v7  ;;  %v1621_v9 = vld [vmem:[%s9821_s28 + $0xc90] sm:$0xff] }
  0x76   : > { %1620 = vst [vmem:[%s9826_s29 + $0x640] sm:$0xff] %v1619_v8  ;;  %v1623_v10 = vld [vmem:[%s9821_s28 + $0xca0] sm:$0xff]  ;;  %v1625_v11 = vld [vmem:[%s9821_s28 + $0xcb0] sm:$0xff]  ;;  %1622 = vst [vmem:[%s9826_s29 + $0x648] sm:$0xff] %v1621_v9 }
  0x77   : > { %1624 = vst [vmem:[%s9826_s29 + $0x650] sm:$0xff] %v1623_v10  ;;  %1626 = vst [vmem:[%s9826_s29 + $0x658] sm:$0xff] %v1625_v11  ;;  %v1627_v12 = vld [vmem:[%s9821_s28 + $0xcc0] sm:$0xff]  ;;  %v1629_v13 = vld [vmem:[%s9821_s28 + $0xcd0] sm:$0xff] }
  0x78   : > { %v1631_v14 = vld [vmem:[%s9821_s28 + $0xce0] sm:$0xff]  ;;  %1628 = vst [vmem:[%s9826_s29 + $0x660] sm:$0xff] %v1627_v12  ;;  %1630 = vst [vmem:[%s9826_s29 + $0x668] sm:$0xff] %v1629_v13  ;;  %v1633_v15 = vld [vmem:[%s9821_s28 + $0xcf0] sm:$0xff] }
  0x79   : > { %1632 = vst [vmem:[%s9826_s29 + $0x670] sm:$0xff] %v1631_v14  ;;  %v1635_v16 = vld [vmem:[%s9821_s28 + $0xd00] sm:$0xff]  ;;  %v1637_v17 = vld [vmem:[%s9821_s28 + $0xd10] sm:$0xff]  ;;  %1634 = vst [vmem:[%s9826_s29 + $0x678] sm:$0xff] %v1633_v15 }
  0x7a   : > { %1636 = vst [vmem:[%s9826_s29 + $0x680] sm:$0xff] %v1635_v16  ;;  %1638 = vst [vmem:[%s9826_s29 + $0x688] sm:$0xff] %v1637_v17  ;;  %v1639_v18 = vld [vmem:[%s9821_s28 + $0xd20] sm:$0xff]  ;;  %v1641_v19 = vld [vmem:[%s9821_s28 + $0xd30] sm:$0xff] }
  0x7b   : > { %v1643_v20 = vld [vmem:[%s9821_s28 + $0xd40] sm:$0xff]  ;;  %1640 = vst [vmem:[%s9826_s29 + $0x690] sm:$0xff] %v1639_v18  ;;  %1642 = vst [vmem:[%s9826_s29 + $0x698] sm:$0xff] %v1641_v19  ;;  %v1645_v21 = vld [vmem:[%s9821_s28 + $0xd50] sm:$0xff] }
  0x7c   : > { %1644 = vst [vmem:[%s9826_s29 + $0x6a0] sm:$0xff] %v1643_v20  ;;  %v1647_v22 = vld [vmem:[%s9821_s28 + $0xd60] sm:$0xff]  ;;  %v1649_v23 = vld [vmem:[%s9821_s28 + $0xd70] sm:$0xff]  ;;  %1646 = vst [vmem:[%s9826_s29 + $0x6a8] sm:$0xff] %v1645_v21 }
  0x7d   : > { %1648 = vst [vmem:[%s9826_s29 + $0x6b0] sm:$0xff] %v1647_v22  ;;  %1650 = vst [vmem:[%s9826_s29 + $0x6b8] sm:$0xff] %v1649_v23  ;;  %v1651_v24 = vld [vmem:[%s9821_s28 + $0xd80] sm:$0xff]  ;;  %v1653_v25 = vld [vmem:[%s9821_s28 + $0xd90] sm:$0xff] }
  0x7e   : > { %v1655_v26 = vld [vmem:[%s9821_s28 + $0xda0] sm:$0xff]  ;;  %1652 = vst [vmem:[%s9826_s29 + $0x6c0] sm:$0xff] %v1651_v24  ;;  %1654 = vst [vmem:[%s9826_s29 + $0x6c8] sm:$0xff] %v1653_v25  ;;  %v1657_v27 = vld [vmem:[%s9821_s28 + $0xdb0] sm:$0xff] }
  0x7f   : > { %1656 = vst [vmem:[%s9826_s29 + $0x6d0] sm:$0xff] %v1655_v26  ;;  %v1659_v28 = vld [vmem:[%s9821_s28 + $0xdc0] sm:$0xff]  ;;  %v1661_v29 = vld [vmem:[%s9821_s28 + $0xdd0] sm:$0xff]  ;;  %1658 = vst [vmem:[%s9826_s29 + $0x6d8] sm:$0xff] %v1657_v27 }
  0x80   : > { %1660 = vst [vmem:[%s9826_s29 + $0x6e0] sm:$0xff] %v1659_v28  ;;  %1662 = vst [vmem:[%s9826_s29 + $0x6e8] sm:$0xff] %v1661_v29  ;;  %v1663_v30 = vld [vmem:[%s9821_s28 + $0xde0] sm:$0xff]  ;;  %v1665_v31 = vld [vmem:[%s9821_s28 + $0xdf0] sm:$0xff] }
  0x81   : > { %v1667_v32 = vld [vmem:[%s9821_s28 + $0xe00] sm:$0xff]  ;;  %1664 = vst [vmem:[%s9826_s29 + $0x6f0] sm:$0xff] %v1663_v30  ;;  %1666 = vst [vmem:[%s9826_s29 + $0x6f8] sm:$0xff] %v1665_v31  ;;  %v1669_v33 = vld [vmem:[%s9821_s28 + $0xe10] sm:$0xff] }
  0x82   : > { %1668 = vst [vmem:[%s9826_s29 + $0x700] sm:$0xff] %v1667_v32  ;;  %v1671_v34 = vld [vmem:[%s9821_s28 + $0xe20] sm:$0xff]  ;;  %v1673_v35 = vld [vmem:[%s9821_s28 + $0xe30] sm:$0xff]  ;;  %1670 = vst [vmem:[%s9826_s29 + $0x708] sm:$0xff] %v1669_v33 }
  0x83   : > { %1672 = vst [vmem:[%s9826_s29 + $0x710] sm:$0xff] %v1671_v34  ;;  %1674 = vst [vmem:[%s9826_s29 + $0x718] sm:$0xff] %v1673_v35  ;;  %v1675_v36 = vld [vmem:[%s9821_s28 + $0xe40] sm:$0xff]  ;;  %v1677_v37 = vld [vmem:[%s9821_s28 + $0xe50] sm:$0xff] }
  0x84   : > { %v1679_v38 = vld [vmem:[%s9821_s28 + $0xe60] sm:$0xff]  ;;  %1676 = vst [vmem:[%s9826_s29 + $0x720] sm:$0xff] %v1675_v36  ;;  %1678 = vst [vmem:[%s9826_s29 + $0x728] sm:$0xff] %v1677_v37  ;;  %v1681_v39 = vld [vmem:[%s9821_s28 + $0xe70] sm:$0xff] }
  0x85   : > { %1680 = vst [vmem:[%s9826_s29 + $0x730] sm:$0xff] %v1679_v38  ;;  %v1683_v40 = vld [vmem:[%s9821_s28 + $0xe80] sm:$0xff]  ;;  %v1685_v41 = vld [vmem:[%s9821_s28 + $0xe90] sm:$0xff]  ;;  %1682 = vst [vmem:[%s9826_s29 + $0x738] sm:$0xff] %v1681_v39 }
  0x86   : > { %1684 = vst [vmem:[%s9826_s29 + $0x740] sm:$0xff] %v1683_v40  ;;  %1686 = vst [vmem:[%s9826_s29 + $0x748] sm:$0xff] %v1685_v41  ;;  %v1687_v42 = vld [vmem:[%s9821_s28 + $0xea0] sm:$0xff]  ;;  %v1689_v43 = vld [vmem:[%s9821_s28 + $0xeb0] sm:$0xff] }
  0x87   : > { %v1691_v44 = vld [vmem:[%s9821_s28 + $0xec0] sm:$0xff]  ;;  %1688 = vst [vmem:[%s9826_s29 + $0x750] sm:$0xff] %v1687_v42  ;;  %1690 = vst [vmem:[%s9826_s29 + $0x758] sm:$0xff] %v1689_v43  ;;  %v1693_v45 = vld [vmem:[%s9821_s28 + $0xed0] sm:$0xff] }
  0x88   : > { %1692 = vst [vmem:[%s9826_s29 + $0x760] sm:$0xff] %v1691_v44  ;;  %v1695_v46 = vld [vmem:[%s9821_s28 + $0xee0] sm:$0xff]  ;;  %v1697_v47 = vld [vmem:[%s9821_s28 + $0xef0] sm:$0xff]  ;;  %1694 = vst [vmem:[%s9826_s29 + $0x768] sm:$0xff] %v1693_v45 }
  0x89   : > { %1696 = vst [vmem:[%s9826_s29 + $0x770] sm:$0xff] %v1695_v46  ;;  %1698 = vst [vmem:[%s9826_s29 + $0x778] sm:$0xff] %v1697_v47  ;;  %v1699_v48 = vld [vmem:[%s9821_s28 + $0xf00] sm:$0xff]  ;;  %v1701_v49 = vld [vmem:[%s9821_s28 + $0xf10] sm:$0xff] }
  0x8a   : > { %v1703_v50 = vld [vmem:[%s9821_s28 + $0xf20] sm:$0xff]  ;;  %1700 = vst [vmem:[%s9826_s29 + $0x780] sm:$0xff] %v1699_v48  ;;  %1702 = vst [vmem:[%s9826_s29 + $0x788] sm:$0xff] %v1701_v49  ;;  %v1705_v51 = vld [vmem:[%s9821_s28 + $0xf30] sm:$0xff] }
  0x8b   : > { %1704 = vst [vmem:[%s9826_s29 + $0x790] sm:$0xff] %v1703_v50  ;;  %v1707_v52 = vld [vmem:[%s9821_s28 + $0xf40] sm:$0xff]  ;;  %v1709_v53 = vld [vmem:[%s9821_s28 + $0xf50] sm:$0xff]  ;;  %1706 = vst [vmem:[%s9826_s29 + $0x798] sm:$0xff] %v1705_v51 }
  0x8c   : > { %1708 = vst [vmem:[%s9826_s29 + $0x7a0] sm:$0xff] %v1707_v52  ;;  %1710 = vst [vmem:[%s9826_s29 + $0x7a8] sm:$0xff] %v1709_v53  ;;  %v1711_v54 = vld [vmem:[%s9821_s28 + $0xf60] sm:$0xff]  ;;  %v1713_v55 = vld [vmem:[%s9821_s28 + $0xf70] sm:$0xff] }
  0x8d   : > { %v1715_v56 = vld [vmem:[%s9821_s28 + $0xf80] sm:$0xff]  ;;  %1712 = vst [vmem:[%s9826_s29 + $0x7b0] sm:$0xff] %v1711_v54  ;;  %1714 = vst [vmem:[%s9826_s29 + $0x7b8] sm:$0xff] %v1713_v55  ;;  %v1717_v57 = vld [vmem:[%s9821_s28 + $0xf90] sm:$0xff] }
  0x8e   : > { %1716 = vst [vmem:[%s9826_s29 + $0x7c0] sm:$0xff] %v1715_v56  ;;  %v1719_v58 = vld [vmem:[%s9821_s28 + $0xfa0] sm:$0xff]  ;;  %v1721_v59 = vld [vmem:[%s9821_s28 + $0xfb0] sm:$0xff]  ;;  %1718 = vst [vmem:[%s9826_s29 + $0x7c8] sm:$0xff] %v1717_v57 }
  0x8f   : > { %1720 = vst [vmem:[%s9826_s29 + $0x7d0] sm:$0xff] %v1719_v58  ;;  %1722 = vst [vmem:[%s9826_s29 + $0x7d8] sm:$0xff] %v1721_v59  ;;  %v1723_v60 = vld [vmem:[%s9821_s28 + $0xfc0] sm:$0xff]  ;;  %v1725_v61 = vld [vmem:[%s9821_s28 + $0xfd0] sm:$0xff] }
  0x90   : > { %v1727_v62 = vld [vmem:[%s9821_s28 + $0xfe0] sm:$0xff]  ;;  %1724 = vst [vmem:[%s9826_s29 + $0x7e0] sm:$0xff] %v1723_v60  ;;  %1726 = vst [vmem:[%s9826_s29 + $0x7e8] sm:$0xff] %v1725_v61  ;;  %v1729_v63 = vld [vmem:[%s9821_s28 + $0xff0] sm:$0xff] }
  0x91   : > { %1728 = vst [vmem:[%s9826_s29 + $0x7f0] sm:$0xff] %v1727_v62  ;;  %v1731_v0 = vld [vmem:[%s9821_s28 + $0x1000] sm:$0xff]  ;;  %v1733_v1 = vld [vmem:[%s9821_s28 + $0x1010] sm:$0xff]  ;;  %1730 = vst [vmem:[%s9826_s29 + $0x7f8] sm:$0xff] %v1729_v63 }
  0x92   : > { %1732 = vst [vmem:[%s9826_s29 + $0x800] sm:$0xff] %v1731_v0  ;;  %1734 = vst [vmem:[%s9826_s29 + $0x808] sm:$0xff] %v1733_v1  ;;  %v1735_v2 = vld [vmem:[%s9821_s28 + $0x1020] sm:$0xff]  ;;  %v1737_v3 = vld [vmem:[%s9821_s28 + $0x1030] sm:$0xff] }
  0x93   : > { %v1739_v4 = vld [vmem:[%s9821_s28 + $0x1040] sm:$0xff]  ;;  %1736 = vst [vmem:[%s9826_s29 + $0x810] sm:$0xff] %v1735_v2  ;;  %1738 = vst [vmem:[%s9826_s29 + $0x818] sm:$0xff] %v1737_v3  ;;  %v1741_v5 = vld [vmem:[%s9821_s28 + $0x1050] sm:$0xff] }
  0x94   : > { %1740 = vst [vmem:[%s9826_s29 + $0x820] sm:$0xff] %v1739_v4  ;;  %v1743_v6 = vld [vmem:[%s9821_s28 + $0x1060] sm:$0xff]  ;;  %v1745_v7 = vld [vmem:[%s9821_s28 + $0x1070] sm:$0xff]  ;;  %1742 = vst [vmem:[%s9826_s29 + $0x828] sm:$0xff] %v1741_v5 }
  0x95   : > { %1744 = vst [vmem:[%s9826_s29 + $0x830] sm:$0xff] %v1743_v6  ;;  %1746 = vst [vmem:[%s9826_s29 + $0x838] sm:$0xff] %v1745_v7  ;;  %v1747_v8 = vld [vmem:[%s9821_s28 + $0x1080] sm:$0xff]  ;;  %v1749_v9 = vld [vmem:[%s9821_s28 + $0x1090] sm:$0xff] }
  0x96   : > { %v1751_v10 = vld [vmem:[%s9821_s28 + $0x10a0] sm:$0xff]  ;;  %1748 = vst [vmem:[%s9826_s29 + $0x840] sm:$0xff] %v1747_v8  ;;  %1750 = vst [vmem:[%s9826_s29 + $0x848] sm:$0xff] %v1749_v9  ;;  %v1753_v11 = vld [vmem:[%s9821_s28 + $0x10b0] sm:$0xff] }
  0x97   : > { %1752 = vst [vmem:[%s9826_s29 + $0x850] sm:$0xff] %v1751_v10  ;;  %v1755_v12 = vld [vmem:[%s9821_s28 + $0x10c0] sm:$0xff]  ;;  %v1757_v13 = vld [vmem:[%s9821_s28 + $0x10d0] sm:$0xff]  ;;  %1754 = vst [vmem:[%s9826_s29 + $0x858] sm:$0xff] %v1753_v11 }
  0x98   : > { %1756 = vst [vmem:[%s9826_s29 + $0x860] sm:$0xff] %v1755_v12  ;;  %1758 = vst [vmem:[%s9826_s29 + $0x868] sm:$0xff] %v1757_v13  ;;  %v1759_v14 = vld [vmem:[%s9821_s28 + $0x10e0] sm:$0xff]  ;;  %v1761_v15 = vld [vmem:[%s9821_s28 + $0x10f0] sm:$0xff] }
  0x99   : > { %v1763_v16 = vld [vmem:[%s9821_s28 + $0x1100] sm:$0xff]  ;;  %1760 = vst [vmem:[%s9826_s29 + $0x870] sm:$0xff] %v1759_v14  ;;  %1762 = vst [vmem:[%s9826_s29 + $0x878] sm:$0xff] %v1761_v15  ;;  %v1765_v17 = vld [vmem:[%s9821_s28 + $0x1110] sm:$0xff] }
  0x9a   : > { %1764 = vst [vmem:[%s9826_s29 + $0x880] sm:$0xff] %v1763_v16  ;;  %v1767_v18 = vld [vmem:[%s9821_s28 + $0x1120] sm:$0xff]  ;;  %v1769_v19 = vld [vmem:[%s9821_s28 + $0x1130] sm:$0xff]  ;;  %1766 = vst [vmem:[%s9826_s29 + $0x888] sm:$0xff] %v1765_v17 }
  0x9b   : > { %1768 = vst [vmem:[%s9826_s29 + $0x890] sm:$0xff] %v1767_v18  ;;  %1770 = vst [vmem:[%s9826_s29 + $0x898] sm:$0xff] %v1769_v19  ;;  %v1771_v20 = vld [vmem:[%s9821_s28 + $0x1140] sm:$0xff]  ;;  %v1773_v21 = vld [vmem:[%s9821_s28 + $0x1150] sm:$0xff] }
  0x9c   : > { %v1775_v22 = vld [vmem:[%s9821_s28 + $0x1160] sm:$0xff]  ;;  %1772 = vst [vmem:[%s9826_s29 + $0x8a0] sm:$0xff] %v1771_v20  ;;  %1774 = vst [vmem:[%s9826_s29 + $0x8a8] sm:$0xff] %v1773_v21  ;;  %v1777_v23 = vld [vmem:[%s9821_s28 + $0x1170] sm:$0xff] }
  0x9d   : > { %1776 = vst [vmem:[%s9826_s29 + $0x8b0] sm:$0xff] %v1775_v22  ;;  %v1779_v24 = vld [vmem:[%s9821_s28 + $0x1180] sm:$0xff]  ;;  %v1781_v25 = vld [vmem:[%s9821_s28 + $0x1190] sm:$0xff]  ;;  %1778 = vst [vmem:[%s9826_s29 + $0x8b8] sm:$0xff] %v1777_v23 }
  0x9e   : > { %1780 = vst [vmem:[%s9826_s29 + $0x8c0] sm:$0xff] %v1779_v24  ;;  %1782 = vst [vmem:[%s9826_s29 + $0x8c8] sm:$0xff] %v1781_v25  ;;  %v1783_v26 = vld [vmem:[%s9821_s28 + $0x11a0] sm:$0xff]  ;;  %v1785_v27 = vld [vmem:[%s9821_s28 + $0x11b0] sm:$0xff] }
  0x9f   : > { %v1787_v28 = vld [vmem:[%s9821_s28 + $0x11c0] sm:$0xff]  ;;  %1784 = vst [vmem:[%s9826_s29 + $0x8d0] sm:$0xff] %v1783_v26  ;;  %1786 = vst [vmem:[%s9826_s29 + $0x8d8] sm:$0xff] %v1785_v27  ;;  %v1789_v29 = vld [vmem:[%s9821_s28 + $0x11d0] sm:$0xff] }
  0xa0   : > { %1788 = vst [vmem:[%s9826_s29 + $0x8e0] sm:$0xff] %v1787_v28  ;;  %v1791_v30 = vld [vmem:[%s9821_s28 + $0x11e0] sm:$0xff]  ;;  %v1793_v31 = vld [vmem:[%s9821_s28 + $0x11f0] sm:$0xff]  ;;  %1790 = vst [vmem:[%s9826_s29 + $0x8e8] sm:$0xff] %v1789_v29 }
  0xa1   : > { %1792 = vst [vmem:[%s9826_s29 + $0x8f0] sm:$0xff] %v1791_v30  ;;  %1794 = vst [vmem:[%s9826_s29 + $0x8f8] sm:$0xff] %v1793_v31  ;;  %v1795_v32 = vld [vmem:[%s9821_s28 + $0x1200] sm:$0xff]  ;;  %v1797_v33 = vld [vmem:[%s9821_s28 + $0x1210] sm:$0xff] }
  0xa2   : > { %v1799_v34 = vld [vmem:[%s9821_s28 + $0x1220] sm:$0xff]  ;;  %1796 = vst [vmem:[%s9826_s29 + $0x900] sm:$0xff] %v1795_v32  ;;  %1798 = vst [vmem:[%s9826_s29 + $0x908] sm:$0xff] %v1797_v33  ;;  %v1801_v35 = vld [vmem:[%s9821_s28 + $0x1230] sm:$0xff] }
  0xa3   : > { %1800 = vst [vmem:[%s9826_s29 + $0x910] sm:$0xff] %v1799_v34  ;;  %v1803_v36 = vld [vmem:[%s9821_s28 + $0x1240] sm:$0xff]  ;;  %v1805_v37 = vld [vmem:[%s9821_s28 + $0x1250] sm:$0xff]  ;;  %1802 = vst [vmem:[%s9826_s29 + $0x918] sm:$0xff] %v1801_v35 }
  0xa4   : > { %1804 = vst [vmem:[%s9826_s29 + $0x920] sm:$0xff] %v1803_v36  ;;  %1806 = vst [vmem:[%s9826_s29 + $0x928] sm:$0xff] %v1805_v37  ;;  %v1807_v38 = vld [vmem:[%s9821_s28 + $0x1260] sm:$0xff]  ;;  %v1809_v39 = vld [vmem:[%s9821_s28 + $0x1270] sm:$0xff] }
  0xa5   : > { %v1811_v40 = vld [vmem:[%s9821_s28 + $0x1280] sm:$0xff]  ;;  %1808 = vst [vmem:[%s9826_s29 + $0x930] sm:$0xff] %v1807_v38  ;;  %1810 = vst [vmem:[%s9826_s29 + $0x938] sm:$0xff] %v1809_v39  ;;  %v1813_v41 = vld [vmem:[%s9821_s28 + $0x1290] sm:$0xff] }
  0xa6   : > { %1812 = vst [vmem:[%s9826_s29 + $0x940] sm:$0xff] %v1811_v40  ;;  %v1815_v42 = vld [vmem:[%s9821_s28 + $0x12a0] sm:$0xff]  ;;  %v1817_v43 = vld [vmem:[%s9821_s28 + $0x12b0] sm:$0xff]  ;;  %1814 = vst [vmem:[%s9826_s29 + $0x948] sm:$0xff] %v1813_v41 }
  0xa7   : > { %1816 = vst [vmem:[%s9826_s29 + $0x950] sm:$0xff] %v1815_v42  ;;  %1818 = vst [vmem:[%s9826_s29 + $0x958] sm:$0xff] %v1817_v43  ;;  %v1819_v44 = vld [vmem:[%s9821_s28 + $0x12c0] sm:$0xff]  ;;  %v1821_v45 = vld [vmem:[%s9821_s28 + $0x12d0] sm:$0xff] }
  0xa8   : > { %v1823_v46 = vld [vmem:[%s9821_s28 + $0x12e0] sm:$0xff]  ;;  %1820 = vst [vmem:[%s9826_s29 + $0x960] sm:$0xff] %v1819_v44  ;;  %1822 = vst [vmem:[%s9826_s29 + $0x968] sm:$0xff] %v1821_v45  ;;  %v1825_v47 = vld [vmem:[%s9821_s28 + $0x12f0] sm:$0xff] }
  0xa9   : > { %1824 = vst [vmem:[%s9826_s29 + $0x970] sm:$0xff] %v1823_v46  ;;  %v1827_v48 = vld [vmem:[%s9821_s28 + $0x1300] sm:$0xff]  ;;  %v1829_v49 = vld [vmem:[%s9821_s28 + $0x1310] sm:$0xff]  ;;  %1826 = vst [vmem:[%s9826_s29 + $0x978] sm:$0xff] %v1825_v47 }
  0xaa   : > { %1828 = vst [vmem:[%s9826_s29 + $0x980] sm:$0xff] %v1827_v48  ;;  %1830 = vst [vmem:[%s9826_s29 + $0x988] sm:$0xff] %v1829_v49  ;;  %v1831_v50 = vld [vmem:[%s9821_s28 + $0x1320] sm:$0xff]  ;;  %v1833_v51 = vld [vmem:[%s9821_s28 + $0x1330] sm:$0xff] }
  0xab   : > { %v1835_v52 = vld [vmem:[%s9821_s28 + $0x1340] sm:$0xff]  ;;  %1832 = vst [vmem:[%s9826_s29 + $0x990] sm:$0xff] %v1831_v50  ;;  %1834 = vst [vmem:[%s9826_s29 + $0x998] sm:$0xff] %v1833_v51  ;;  %v1837_v53 = vld [vmem:[%s9821_s28 + $0x1350] sm:$0xff] }
  0xac   : > { %1836 = vst [vmem:[%s9826_s29 + $0x9a0] sm:$0xff] %v1835_v52  ;;  %v1839_v54 = vld [vmem:[%s9821_s28 + $0x1360] sm:$0xff]  ;;  %v1841_v55 = vld [vmem:[%s9821_s28 + $0x1370] sm:$0xff]  ;;  %1838 = vst [vmem:[%s9826_s29 + $0x9a8] sm:$0xff] %v1837_v53 }
  0xad   : > { %1840 = vst [vmem:[%s9826_s29 + $0x9b0] sm:$0xff] %v1839_v54  ;;  %1842 = vst [vmem:[%s9826_s29 + $0x9b8] sm:$0xff] %v1841_v55  ;;  %v1843_v56 = vld [vmem:[%s9821_s28 + $0x1380] sm:$0xff]  ;;  %v1845_v57 = vld [vmem:[%s9821_s28 + $0x1390] sm:$0xff] }
  0xae   : > { %v1847_v58 = vld [vmem:[%s9821_s28 + $0x13a0] sm:$0xff]  ;;  %1844 = vst [vmem:[%s9826_s29 + $0x9c0] sm:$0xff] %v1843_v56  ;;  %1846 = vst [vmem:[%s9826_s29 + $0x9c8] sm:$0xff] %v1845_v57  ;;  %v1849_v59 = vld [vmem:[%s9821_s28 + $0x13b0] sm:$0xff] }
  0xaf   : > { %1848 = vst [vmem:[%s9826_s29 + $0x9d0] sm:$0xff] %v1847_v58  ;;  %v1851_v60 = vld [vmem:[%s9821_s28 + $0x13c0] sm:$0xff]  ;;  %v1853_v61 = vld [vmem:[%s9821_s28 + $0x13d0] sm:$0xff]  ;;  %1850 = vst [vmem:[%s9826_s29 + $0x9d8] sm:$0xff] %v1849_v59 }
  0xb0   : > { %1852 = vst [vmem:[%s9826_s29 + $0x9e0] sm:$0xff] %v1851_v60  ;;  %1854 = vst [vmem:[%s9826_s29 + $0x9e8] sm:$0xff] %v1853_v61  ;;  %v1855_v62 = vld [vmem:[%s9821_s28 + $0x13e0] sm:$0xff]  ;;  %v1857_v63 = vld [vmem:[%s9821_s28 + $0x13f0] sm:$0xff] }
  0xb1   : > { %v1859_v0 = vld [vmem:[%s9821_s28 + $0x1400] sm:$0xff]  ;;  %1856 = vst [vmem:[%s9826_s29 + $0x9f0] sm:$0xff] %v1855_v62  ;;  %1858 = vst [vmem:[%s9826_s29 + $0x9f8] sm:$0xff] %v1857_v63  ;;  %v1861_v1 = vld [vmem:[%s9821_s28 + $0x1410] sm:$0xff] }
  0xb2   : > { %1860 = vst [vmem:[%s9826_s29 + $0xa00] sm:$0xff] %v1859_v0  ;;  %v1863_v2 = vld [vmem:[%s9821_s28 + $0x1420] sm:$0xff]  ;;  %v1865_v3 = vld [vmem:[%s9821_s28 + $0x1430] sm:$0xff]  ;;  %1862 = vst [vmem:[%s9826_s29 + $0xa08] sm:$0xff] %v1861_v1 }
  0xb3   : > { %1864 = vst [vmem:[%s9826_s29 + $0xa10] sm:$0xff] %v1863_v2  ;;  %1866 = vst [vmem:[%s9826_s29 + $0xa18] sm:$0xff] %v1865_v3  ;;  %v1867_v4 = vld [vmem:[%s9821_s28 + $0x1440] sm:$0xff]  ;;  %v1869_v5 = vld [vmem:[%s9821_s28 + $0x1450] sm:$0xff] }
  0xb4   : > { %v1871_v6 = vld [vmem:[%s9821_s28 + $0x1460] sm:$0xff]  ;;  %1868 = vst [vmem:[%s9826_s29 + $0xa20] sm:$0xff] %v1867_v4  ;;  %1870 = vst [vmem:[%s9826_s29 + $0xa28] sm:$0xff] %v1869_v5  ;;  %v1873_v7 = vld [vmem:[%s9821_s28 + $0x1470] sm:$0xff] }
  0xb5   : > { %1872 = vst [vmem:[%s9826_s29 + $0xa30] sm:$0xff] %v1871_v6  ;;  %v1875_v8 = vld [vmem:[%s9821_s28 + $0x1480] sm:$0xff]  ;;  %v1877_v9 = vld [vmem:[%s9821_s28 + $0x1490] sm:$0xff]  ;;  %1874 = vst [vmem:[%s9826_s29 + $0xa38] sm:$0xff] %v1873_v7 }
  0xb6   : > { %1876 = vst [vmem:[%s9826_s29 + $0xa40] sm:$0xff] %v1875_v8  ;;  %1878 = vst [vmem:[%s9826_s29 + $0xa48] sm:$0xff] %v1877_v9  ;;  %v1879_v10 = vld [vmem:[%s9821_s28 + $0x14a0] sm:$0xff]  ;;  %v1881_v11 = vld [vmem:[%s9821_s28 + $0x14b0] sm:$0xff] }
  0xb7   : > { %v1883_v12 = vld [vmem:[%s9821_s28 + $0x14c0] sm:$0xff]  ;;  %1880 = vst [vmem:[%s9826_s29 + $0xa50] sm:$0xff] %v1879_v10  ;;  %1882 = vst [vmem:[%s9826_s29 + $0xa58] sm:$0xff] %v1881_v11  ;;  %v1885_v13 = vld [vmem:[%s9821_s28 + $0x14d0] sm:$0xff] }
  0xb8   : > { %1884 = vst [vmem:[%s9826_s29 + $0xa60] sm:$0xff] %v1883_v12  ;;  %v1887_v14 = vld [vmem:[%s9821_s28 + $0x14e0] sm:$0xff]  ;;  %v1889_v15 = vld [vmem:[%s9821_s28 + $0x14f0] sm:$0xff]  ;;  %1886 = vst [vmem:[%s9826_s29 + $0xa68] sm:$0xff] %v1885_v13 }
  0xb9   : > { %1888 = vst [vmem:[%s9826_s29 + $0xa70] sm:$0xff] %v1887_v14  ;;  %1890 = vst [vmem:[%s9826_s29 + $0xa78] sm:$0xff] %v1889_v15  ;;  %v1891_v16 = vld [vmem:[%s9821_s28 + $0x1500] sm:$0xff]  ;;  %v1893_v17 = vld [vmem:[%s9821_s28 + $0x1510] sm:$0xff] }
  0xba   : > { %v1895_v18 = vld [vmem:[%s9821_s28 + $0x1520] sm:$0xff]  ;;  %1892 = vst [vmem:[%s9826_s29 + $0xa80] sm:$0xff] %v1891_v16  ;;  %1894 = vst [vmem:[%s9826_s29 + $0xa88] sm:$0xff] %v1893_v17  ;;  %v1897_v19 = vld [vmem:[%s9821_s28 + $0x1530] sm:$0xff] }
  0xbb   : > { %1896 = vst [vmem:[%s9826_s29 + $0xa90] sm:$0xff] %v1895_v18  ;;  %v1899_v20 = vld [vmem:[%s9821_s28 + $0x1540] sm:$0xff]  ;;  %v1901_v21 = vld [vmem:[%s9821_s28 + $0x1550] sm:$0xff]  ;;  %1898 = vst [vmem:[%s9826_s29 + $0xa98] sm:$0xff] %v1897_v19 }
  0xbc   : > { %1900 = vst [vmem:[%s9826_s29 + $0xaa0] sm:$0xff] %v1899_v20  ;;  %1902 = vst [vmem:[%s9826_s29 + $0xaa8] sm:$0xff] %v1901_v21  ;;  %v1903_v22 = vld [vmem:[%s9821_s28 + $0x1560] sm:$0xff]  ;;  %v1905_v23 = vld [vmem:[%s9821_s28 + $0x1570] sm:$0xff] }
  0xbd   : > { %v1907_v24 = vld [vmem:[%s9821_s28 + $0x1580] sm:$0xff]  ;;  %1904 = vst [vmem:[%s9826_s29 + $0xab0] sm:$0xff] %v1903_v22  ;;  %1906 = vst [vmem:[%s9826_s29 + $0xab8] sm:$0xff] %v1905_v23  ;;  %v1909_v25 = vld [vmem:[%s9821_s28 + $0x1590] sm:$0xff] }
  0xbe   : > { %1908 = vst [vmem:[%s9826_s29 + $0xac0] sm:$0xff] %v1907_v24  ;;  %v1911_v26 = vld [vmem:[%s9821_s28 + $0x15a0] sm:$0xff]  ;;  %v1913_v27 = vld [vmem:[%s9821_s28 + $0x15b0] sm:$0xff]  ;;  %1910 = vst [vmem:[%s9826_s29 + $0xac8] sm:$0xff] %v1909_v25 }
  0xbf   : > { %1912 = vst [vmem:[%s9826_s29 + $0xad0] sm:$0xff] %v1911_v26  ;;  %1914 = vst [vmem:[%s9826_s29 + $0xad8] sm:$0xff] %v1913_v27  ;;  %v1915_v28 = vld [vmem:[%s9821_s28 + $0x15c0] sm:$0xff]  ;;  %v1917_v29 = vld [vmem:[%s9821_s28 + $0x15d0] sm:$0xff] }
  0xc0   : > { %v1919_v30 = vld [vmem:[%s9821_s28 + $0x15e0] sm:$0xff]  ;;  %1916 = vst [vmem:[%s9826_s29 + $0xae0] sm:$0xff] %v1915_v28  ;;  %1918 = vst [vmem:[%s9826_s29 + $0xae8] sm:$0xff] %v1917_v29  ;;  %v1921_v31 = vld [vmem:[%s9821_s28 + $0x15f0] sm:$0xff] }
  0xc1   : > { %1920 = vst [vmem:[%s9826_s29 + $0xaf0] sm:$0xff] %v1919_v30  ;;  %v1923_v32 = vld [vmem:[%s9821_s28 + $0x1600] sm:$0xff]  ;;  %v1925_v33 = vld [vmem:[%s9821_s28 + $0x1610] sm:$0xff]  ;;  %1922 = vst [vmem:[%s9826_s29 + $0xaf8] sm:$0xff] %v1921_v31 }
  0xc2   : > { %1924 = vst [vmem:[%s9826_s29 + $0xb00] sm:$0xff] %v1923_v32  ;;  %1926 = vst [vmem:[%s9826_s29 + $0xb08] sm:$0xff] %v1925_v33  ;;  %v1927_v34 = vld [vmem:[%s9821_s28 + $0x1620] sm:$0xff]  ;;  %v1929_v35 = vld [vmem:[%s9821_s28 + $0x1630] sm:$0xff] }
  0xc3   : > { %v1931_v36 = vld [vmem:[%s9821_s28 + $0x1640] sm:$0xff]  ;;  %1928 = vst [vmem:[%s9826_s29 + $0xb10] sm:$0xff] %v1927_v34  ;;  %1930 = vst [vmem:[%s9826_s29 + $0xb18] sm:$0xff] %v1929_v35  ;;  %v1933_v37 = vld [vmem:[%s9821_s28 + $0x1650] sm:$0xff] }
  0xc4   : > { %1932 = vst [vmem:[%s9826_s29 + $0xb20] sm:$0xff] %v1931_v36  ;;  %v1935_v38 = vld [vmem:[%s9821_s28 + $0x1660] sm:$0xff]  ;;  %v1937_v39 = vld [vmem:[%s9821_s28 + $0x1670] sm:$0xff]  ;;  %1934 = vst [vmem:[%s9826_s29 + $0xb28] sm:$0xff] %v1933_v37 }
  0xc5   : > { %1936 = vst [vmem:[%s9826_s29 + $0xb30] sm:$0xff] %v1935_v38  ;;  %1938 = vst [vmem:[%s9826_s29 + $0xb38] sm:$0xff] %v1937_v39  ;;  %v1939_v40 = vld [vmem:[%s9821_s28 + $0x1680] sm:$0xff]  ;;  %v1941_v41 = vld [vmem:[%s9821_s28 + $0x1690] sm:$0xff] }
  0xc6   : > { %v1943_v42 = vld [vmem:[%s9821_s28 + $0x16a0] sm:$0xff]  ;;  %1940 = vst [vmem:[%s9826_s29 + $0xb40] sm:$0xff] %v1939_v40  ;;  %1942 = vst [vmem:[%s9826_s29 + $0xb48] sm:$0xff] %v1941_v41  ;;  %v1945_v43 = vld [vmem:[%s9821_s28 + $0x16b0] sm:$0xff] }
  0xc7   : > { %1944 = vst [vmem:[%s9826_s29 + $0xb50] sm:$0xff] %v1943_v42  ;;  %v1947_v44 = vld [vmem:[%s9821_s28 + $0x16c0] sm:$0xff]  ;;  %v1949_v45 = vld [vmem:[%s9821_s28 + $0x16d0] sm:$0xff]  ;;  %1946 = vst [vmem:[%s9826_s29 + $0xb58] sm:$0xff] %v1945_v43 }
  0xc8   : > { %1948 = vst [vmem:[%s9826_s29 + $0xb60] sm:$0xff] %v1947_v44  ;;  %1950 = vst [vmem:[%s9826_s29 + $0xb68] sm:$0xff] %v1949_v45  ;;  %v1951_v46 = vld [vmem:[%s9821_s28 + $0x16e0] sm:$0xff]  ;;  %v1953_v47 = vld [vmem:[%s9821_s28 + $0x16f0] sm:$0xff] }
  0xc9   : > { %v1955_v48 = vld [vmem:[%s9821_s28 + $0x1700] sm:$0xff]  ;;  %1952 = vst [vmem:[%s9826_s29 + $0xb70] sm:$0xff] %v1951_v46  ;;  %1954 = vst [vmem:[%s9826_s29 + $0xb78] sm:$0xff] %v1953_v47  ;;  %v1957_v49 = vld [vmem:[%s9821_s28 + $0x1710] sm:$0xff] }
  0xca   : > { %1956 = vst [vmem:[%s9826_s29 + $0xb80] sm:$0xff] %v1955_v48  ;;  %v1959_v50 = vld [vmem:[%s9821_s28 + $0x1720] sm:$0xff]  ;;  %v1961_v51 = vld [vmem:[%s9821_s28 + $0x1730] sm:$0xff]  ;;  %1958 = vst [vmem:[%s9826_s29 + $0xb88] sm:$0xff] %v1957_v49 }
  0xcb   : > { %1960 = vst [vmem:[%s9826_s29 + $0xb90] sm:$0xff] %v1959_v50  ;;  %1962 = vst [vmem:[%s9826_s29 + $0xb98] sm:$0xff] %v1961_v51  ;;  %v1963_v52 = vld [vmem:[%s9821_s28 + $0x1740] sm:$0xff]  ;;  %v1965_v53 = vld [vmem:[%s9821_s28 + $0x1750] sm:$0xff] }
  0xcc   : > { %v1967_v54 = vld [vmem:[%s9821_s28 + $0x1760] sm:$0xff]  ;;  %1964 = vst [vmem:[%s9826_s29 + $0xba0] sm:$0xff] %v1963_v52  ;;  %1966 = vst [vmem:[%s9826_s29 + $0xba8] sm:$0xff] %v1965_v53  ;;  %v1969_v55 = vld [vmem:[%s9821_s28 + $0x1770] sm:$0xff] }
  0xcd   : > { %1968 = vst [vmem:[%s9826_s29 + $0xbb0] sm:$0xff] %v1967_v54  ;;  %v1971_v56 = vld [vmem:[%s9821_s28 + $0x1780] sm:$0xff]  ;;  %v1973_v57 = vld [vmem:[%s9821_s28 + $0x1790] sm:$0xff]  ;;  %1970 = vst [vmem:[%s9826_s29 + $0xbb8] sm:$0xff] %v1969_v55 }
  0xce   : > { %1972 = vst [vmem:[%s9826_s29 + $0xbc0] sm:$0xff] %v1971_v56  ;;  %1974 = vst [vmem:[%s9826_s29 + $0xbc8] sm:$0xff] %v1973_v57  ;;  %v1975_v58 = vld [vmem:[%s9821_s28 + $0x17a0] sm:$0xff]  ;;  %v1977_v59 = vld [vmem:[%s9821_s28 + $0x17b0] sm:$0xff] }
  0xcf   : > { %v1979_v60 = vld [vmem:[%s9821_s28 + $0x17c0] sm:$0xff]  ;;  %1976 = vst [vmem:[%s9826_s29 + $0xbd0] sm:$0xff] %v1975_v58  ;;  %1978 = vst [vmem:[%s9826_s29 + $0xbd8] sm:$0xff] %v1977_v59  ;;  %v1981_v61 = vld [vmem:[%s9821_s28 + $0x17d0] sm:$0xff] }
  0xd0   : > { %1980 = vst [vmem:[%s9826_s29 + $0xbe0] sm:$0xff] %v1979_v60  ;;  %v1983_v62 = vld [vmem:[%s9821_s28 + $0x17e0] sm:$0xff]  ;;  %v1985_v63 = vld [vmem:[%s9821_s28 + $0x17f0] sm:$0xff]  ;;  %1982 = vst [vmem:[%s9826_s29 + $0xbe8] sm:$0xff] %v1981_v61 }
  0xd1   : > { %1984 = vst [vmem:[%s9826_s29 + $0xbf0] sm:$0xff] %v1983_v62  ;;  %1986 = vst [vmem:[%s9826_s29 + $0xbf8] sm:$0xff] %v1985_v63  ;;  %v1987_v0 = vld [vmem:[%s9821_s28 + $0x1800] sm:$0xff]  ;;  %v1989_v1 = vld [vmem:[%s9821_s28 + $0x1810] sm:$0xff] }
  0xd2   : > { %v1991_v2 = vld [vmem:[%s9821_s28 + $0x1820] sm:$0xff]  ;;  %1988 = vst [vmem:[%s9826_s29 + $0xc00] sm:$0xff] %v1987_v0  ;;  %1990 = vst [vmem:[%s9826_s29 + $0xc08] sm:$0xff] %v1989_v1  ;;  %v1993_v3 = vld [vmem:[%s9821_s28 + $0x1830] sm:$0xff] }
  0xd3   : > { %1992 = vst [vmem:[%s9826_s29 + $0xc10] sm:$0xff] %v1991_v2  ;;  %v1995_v4 = vld [vmem:[%s9821_s28 + $0x1840] sm:$0xff]  ;;  %v1997_v5 = vld [vmem:[%s9821_s28 + $0x1850] sm:$0xff]  ;;  %1994 = vst [vmem:[%s9826_s29 + $0xc18] sm:$0xff] %v1993_v3 }
  0xd4   : > { %1996 = vst [vmem:[%s9826_s29 + $0xc20] sm:$0xff] %v1995_v4  ;;  %1998 = vst [vmem:[%s9826_s29 + $0xc28] sm:$0xff] %v1997_v5  ;;  %v1999_v6 = vld [vmem:[%s9821_s28 + $0x1860] sm:$0xff]  ;;  %v2001_v7 = vld [vmem:[%s9821_s28 + $0x1870] sm:$0xff] }
  0xd5   : > { %v2003_v8 = vld [vmem:[%s9821_s28 + $0x1880] sm:$0xff]  ;;  %2000 = vst [vmem:[%s9826_s29 + $0xc30] sm:$0xff] %v1999_v6  ;;  %2002 = vst [vmem:[%s9826_s29 + $0xc38] sm:$0xff] %v2001_v7  ;;  %v2005_v9 = vld [vmem:[%s9821_s28 + $0x1890] sm:$0xff] }
  0xd6   : > { %2004 = vst [vmem:[%s9826_s29 + $0xc40] sm:$0xff] %v2003_v8  ;;  %v2007_v10 = vld [vmem:[%s9821_s28 + $0x18a0] sm:$0xff]  ;;  %v2009_v11 = vld [vmem:[%s9821_s28 + $0x18b0] sm:$0xff]  ;;  %2006 = vst [vmem:[%s9826_s29 + $0xc48] sm:$0xff] %v2005_v9 }
  0xd7   : > { %2008 = vst [vmem:[%s9826_s29 + $0xc50] sm:$0xff] %v2007_v10  ;;  %2010 = vst [vmem:[%s9826_s29 + $0xc58] sm:$0xff] %v2009_v11  ;;  %v2011_v12 = vld [vmem:[%s9821_s28 + $0x18c0] sm:$0xff]  ;;  %v2013_v13 = vld [vmem:[%s9821_s28 + $0x18d0] sm:$0xff] }
  0xd8   : > { %v2015_v14 = vld [vmem:[%s9821_s28 + $0x18e0] sm:$0xff]  ;;  %2012 = vst [vmem:[%s9826_s29 + $0xc60] sm:$0xff] %v2011_v12  ;;  %2014 = vst [vmem:[%s9826_s29 + $0xc68] sm:$0xff] %v2013_v13  ;;  %v2017_v15 = vld [vmem:[%s9821_s28 + $0x18f0] sm:$0xff] }
  0xd9   : > { %2016 = vst [vmem:[%s9826_s29 + $0xc70] sm:$0xff] %v2015_v14  ;;  %v2019_v16 = vld [vmem:[%s9821_s28 + $0x1900] sm:$0xff]  ;;  %v2021_v17 = vld [vmem:[%s9821_s28 + $0x1910] sm:$0xff]  ;;  %2018 = vst [vmem:[%s9826_s29 + $0xc78] sm:$0xff] %v2017_v15 }
  0xda   : > { %2020 = vst [vmem:[%s9826_s29 + $0xc80] sm:$0xff] %v2019_v16  ;;  %2022 = vst [vmem:[%s9826_s29 + $0xc88] sm:$0xff] %v2021_v17  ;;  %v2023_v18 = vld [vmem:[%s9821_s28 + $0x1920] sm:$0xff]  ;;  %v2025_v19 = vld [vmem:[%s9821_s28 + $0x1930] sm:$0xff] }
  0xdb   : > { %v2027_v20 = vld [vmem:[%s9821_s28 + $0x1940] sm:$0xff]  ;;  %2024 = vst [vmem:[%s9826_s29 + $0xc90] sm:$0xff] %v2023_v18  ;;  %2026 = vst [vmem:[%s9826_s29 + $0xc98] sm:$0xff] %v2025_v19  ;;  %v2029_v21 = vld [vmem:[%s9821_s28 + $0x1950] sm:$0xff] }
  0xdc   : > { %2028 = vst [vmem:[%s9826_s29 + $0xca0] sm:$0xff] %v2027_v20  ;;  %v2031_v22 = vld [vmem:[%s9821_s28 + $0x1960] sm:$0xff]  ;;  %v2033_v23 = vld [vmem:[%s9821_s28 + $0x1970] sm:$0xff]  ;;  %2030 = vst [vmem:[%s9826_s29 + $0xca8] sm:$0xff] %v2029_v21 }
  0xdd   : > { %2032 = vst [vmem:[%s9826_s29 + $0xcb0] sm:$0xff] %v2031_v22  ;;  %2034 = vst [vmem:[%s9826_s29 + $0xcb8] sm:$0xff] %v2033_v23  ;;  %v2035_v24 = vld [vmem:[%s9821_s28 + $0x1980] sm:$0xff]  ;;  %v2037_v25 = vld [vmem:[%s9821_s28 + $0x1990] sm:$0xff] }
  0xde   : > { %v2039_v26 = vld [vmem:[%s9821_s28 + $0x19a0] sm:$0xff]  ;;  %2036 = vst [vmem:[%s9826_s29 + $0xcc0] sm:$0xff] %v2035_v24  ;;  %2038 = vst [vmem:[%s9826_s29 + $0xcc8] sm:$0xff] %v2037_v25  ;;  %v2041_v27 = vld [vmem:[%s9821_s28 + $0x19b0] sm:$0xff] }
  0xdf   : > { %2040 = vst [vmem:[%s9826_s29 + $0xcd0] sm:$0xff] %v2039_v26  ;;  %v2043_v28 = vld [vmem:[%s9821_s28 + $0x19c0] sm:$0xff]  ;;  %v2045_v29 = vld [vmem:[%s9821_s28 + $0x19d0] sm:$0xff]  ;;  %2042 = vst [vmem:[%s9826_s29 + $0xcd8] sm:$0xff] %v2041_v27 }
  0xe0   : > { %2044 = vst [vmem:[%s9826_s29 + $0xce0] sm:$0xff] %v2043_v28  ;;  %2046 = vst [vmem:[%s9826_s29 + $0xce8] sm:$0xff] %v2045_v29  ;;  %v2047_v30 = vld [vmem:[%s9821_s28 + $0x19e0] sm:$0xff]  ;;  %v2049_v31 = vld [vmem:[%s9821_s28 + $0x19f0] sm:$0xff] }
  0xe1   : > { %v2051_v32 = vld [vmem:[%s9821_s28 + $0x1a00] sm:$0xff]  ;;  %2048 = vst [vmem:[%s9826_s29 + $0xcf0] sm:$0xff] %v2047_v30  ;;  %2050 = vst [vmem:[%s9826_s29 + $0xcf8] sm:$0xff] %v2049_v31  ;;  %v2053_v33 = vld [vmem:[%s9821_s28 + $0x1a10] sm:$0xff] }
  0xe2   : > { %2052 = vst [vmem:[%s9826_s29 + $0xd00] sm:$0xff] %v2051_v32  ;;  %v2055_v34 = vld [vmem:[%s9821_s28 + $0x1a20] sm:$0xff]  ;;  %v2057_v35 = vld [vmem:[%s9821_s28 + $0x1a30] sm:$0xff]  ;;  %2054 = vst [vmem:[%s9826_s29 + $0xd08] sm:$0xff] %v2053_v33 }
  0xe3   : > { %2056 = vst [vmem:[%s9826_s29 + $0xd10] sm:$0xff] %v2055_v34  ;;  %2058 = vst [vmem:[%s9826_s29 + $0xd18] sm:$0xff] %v2057_v35  ;;  %v2059_v36 = vld [vmem:[%s9821_s28 + $0x1a40] sm:$0xff]  ;;  %v2061_v37 = vld [vmem:[%s9821_s28 + $0x1a50] sm:$0xff] }
  0xe4   : > { %v2063_v38 = vld [vmem:[%s9821_s28 + $0x1a60] sm:$0xff]  ;;  %2060 = vst [vmem:[%s9826_s29 + $0xd20] sm:$0xff] %v2059_v36  ;;  %2062 = vst [vmem:[%s9826_s29 + $0xd28] sm:$0xff] %v2061_v37  ;;  %v2065_v39 = vld [vmem:[%s9821_s28 + $0x1a70] sm:$0xff] }
  0xe5   : > { %2064 = vst [vmem:[%s9826_s29 + $0xd30] sm:$0xff] %v2063_v38  ;;  %v2067_v40 = vld [vmem:[%s9821_s28 + $0x1a80] sm:$0xff]  ;;  %v2069_v41 = vld [vmem:[%s9821_s28 + $0x1a90] sm:$0xff]  ;;  %2066 = vst [vmem:[%s9826_s29 + $0xd38] sm:$0xff] %v2065_v39 }
  0xe6   : > { %2068 = vst [vmem:[%s9826_s29 + $0xd40] sm:$0xff] %v2067_v40  ;;  %2070 = vst [vmem:[%s9826_s29 + $0xd48] sm:$0xff] %v2069_v41  ;;  %v2071_v42 = vld [vmem:[%s9821_s28 + $0x1aa0] sm:$0xff]  ;;  %v2073_v43 = vld [vmem:[%s9821_s28 + $0x1ab0] sm:$0xff] }
  0xe7   : > { %v2075_v44 = vld [vmem:[%s9821_s28 + $0x1ac0] sm:$0xff]  ;;  %2072 = vst [vmem:[%s9826_s29 + $0xd50] sm:$0xff] %v2071_v42  ;;  %2074 = vst [vmem:[%s9826_s29 + $0xd58] sm:$0xff] %v2073_v43  ;;  %v2077_v45 = vld [vmem:[%s9821_s28 + $0x1ad0] sm:$0xff] }
  0xe8   : > { %2076 = vst [vmem:[%s9826_s29 + $0xd60] sm:$0xff] %v2075_v44  ;;  %v2079_v46 = vld [vmem:[%s9821_s28 + $0x1ae0] sm:$0xff]  ;;  %v2081_v47 = vld [vmem:[%s9821_s28 + $0x1af0] sm:$0xff]  ;;  %2078 = vst [vmem:[%s9826_s29 + $0xd68] sm:$0xff] %v2077_v45 }
  0xe9   : > { %2080 = vst [vmem:[%s9826_s29 + $0xd70] sm:$0xff] %v2079_v46  ;;  %2082 = vst [vmem:[%s9826_s29 + $0xd78] sm:$0xff] %v2081_v47  ;;  %v2083_v48 = vld [vmem:[%s9821_s28 + $0x1b00] sm:$0xff]  ;;  %v2085_v49 = vld [vmem:[%s9821_s28 + $0x1b10] sm:$0xff] }
  0xea   : > { %v2087_v50 = vld [vmem:[%s9821_s28 + $0x1b20] sm:$0xff]  ;;  %2084 = vst [vmem:[%s9826_s29 + $0xd80] sm:$0xff] %v2083_v48  ;;  %2086 = vst [vmem:[%s9826_s29 + $0xd88] sm:$0xff] %v2085_v49  ;;  %v2089_v51 = vld [vmem:[%s9821_s28 + $0x1b30] sm:$0xff] }
  0xeb   : > { %2088 = vst [vmem:[%s9826_s29 + $0xd90] sm:$0xff] %v2087_v50  ;;  %v2091_v52 = vld [vmem:[%s9821_s28 + $0x1b40] sm:$0xff]  ;;  %v2093_v53 = vld [vmem:[%s9821_s28 + $0x1b50] sm:$0xff]  ;;  %2090 = vst [vmem:[%s9826_s29 + $0xd98] sm:$0xff] %v2089_v51 }
  0xec   : > { %2092 = vst [vmem:[%s9826_s29 + $0xda0] sm:$0xff] %v2091_v52  ;;  %2094 = vst [vmem:[%s9826_s29 + $0xda8] sm:$0xff] %v2093_v53  ;;  %v2095_v54 = vld [vmem:[%s9821_s28 + $0x1b60] sm:$0xff]  ;;  %v2097_v55 = vld [vmem:[%s9821_s28 + $0x1b70] sm:$0xff] }
  0xed   : > { %v2099_v56 = vld [vmem:[%s9821_s28 + $0x1b80] sm:$0xff]  ;;  %2096 = vst [vmem:[%s9826_s29 + $0xdb0] sm:$0xff] %v2095_v54  ;;  %2098 = vst [vmem:[%s9826_s29 + $0xdb8] sm:$0xff] %v2097_v55  ;;  %v2101_v57 = vld [vmem:[%s9821_s28 + $0x1b90] sm:$0xff] }
  0xee   : > { %2100 = vst [vmem:[%s9826_s29 + $0xdc0] sm:$0xff] %v2099_v56  ;;  %v2103_v58 = vld [vmem:[%s9821_s28 + $0x1ba0] sm:$0xff]  ;;  %v2105_v59 = vld [vmem:[%s9821_s28 + $0x1bb0] sm:$0xff]  ;;  %2102 = vst [vmem:[%s9826_s29 + $0xdc8] sm:$0xff] %v2101_v57 }
  0xef   : > { %2104 = vst [vmem:[%s9826_s29 + $0xdd0] sm:$0xff] %v2103_v58  ;;  %2106 = vst [vmem:[%s9826_s29 + $0xdd8] sm:$0xff] %v2105_v59  ;;  %v2107_v60 = vld [vmem:[%s9821_s28 + $0x1bc0] sm:$0xff]  ;;  %v2109_v61 = vld [vmem:[%s9821_s28 + $0x1bd0] sm:$0xff] }
  0xf0   : > { %v2111_v62 = vld [vmem:[%s9821_s28 + $0x1be0] sm:$0xff]  ;;  %2108 = vst [vmem:[%s9826_s29 + $0xde0] sm:$0xff] %v2107_v60  ;;  %2110 = vst [vmem:[%s9826_s29 + $0xde8] sm:$0xff] %v2109_v61  ;;  %v2113_v63 = vld [vmem:[%s9821_s28 + $0x1bf0] sm:$0xff] }
  0xf1   : > { %2112 = vst [vmem:[%s9826_s29 + $0xdf0] sm:$0xff] %v2111_v62  ;;  %v2115_v0 = vld [vmem:[%s9821_s28 + $0x1c00] sm:$0xff]  ;;  %v2117_v1 = vld [vmem:[%s9821_s28 + $0x1c10] sm:$0xff]  ;;  %2114 = vst [vmem:[%s9826_s29 + $0xdf8] sm:$0xff] %v2113_v63 }
  0xf2   : > { %2116 = vst [vmem:[%s9826_s29 + $0xe00] sm:$0xff] %v2115_v0  ;;  %2118 = vst [vmem:[%s9826_s29 + $0xe08] sm:$0xff] %v2117_v1  ;;  %v2119_v2 = vld [vmem:[%s9821_s28 + $0x1c20] sm:$0xff]  ;;  %v2121_v3 = vld [vmem:[%s9821_s28 + $0x1c30] sm:$0xff] }
  0xf3   : > { %v2123_v4 = vld [vmem:[%s9821_s28 + $0x1c40] sm:$0xff]  ;;  %2120 = vst [vmem:[%s9826_s29 + $0xe10] sm:$0xff] %v2119_v2  ;;  %2122 = vst [vmem:[%s9826_s29 + $0xe18] sm:$0xff] %v2121_v3  ;;  %v2125_v5 = vld [vmem:[%s9821_s28 + $0x1c50] sm:$0xff] }
  0xf4   : > { %2124 = vst [vmem:[%s9826_s29 + $0xe20] sm:$0xff] %v2123_v4  ;;  %v2127_v6 = vld [vmem:[%s9821_s28 + $0x1c60] sm:$0xff]  ;;  %v2129_v7 = vld [vmem:[%s9821_s28 + $0x1c70] sm:$0xff]  ;;  %2126 = vst [vmem:[%s9826_s29 + $0xe28] sm:$0xff] %v2125_v5 }
  0xf5   : > { %2128 = vst [vmem:[%s9826_s29 + $0xe30] sm:$0xff] %v2127_v6  ;;  %2130 = vst [vmem:[%s9826_s29 + $0xe38] sm:$0xff] %v2129_v7  ;;  %v2131_v8 = vld [vmem:[%s9821_s28 + $0x1c80] sm:$0xff]  ;;  %v2133_v9 = vld [vmem:[%s9821_s28 + $0x1c90] sm:$0xff] }
  0xf6   : > { %v2135_v10 = vld [vmem:[%s9821_s28 + $0x1ca0] sm:$0xff]  ;;  %2132 = vst [vmem:[%s9826_s29 + $0xe40] sm:$0xff] %v2131_v8  ;;  %2134 = vst [vmem:[%s9826_s29 + $0xe48] sm:$0xff] %v2133_v9  ;;  %v2137_v11 = vld [vmem:[%s9821_s28 + $0x1cb0] sm:$0xff] }
  0xf7   : > { %2136 = vst [vmem:[%s9826_s29 + $0xe50] sm:$0xff] %v2135_v10  ;;  %v2139_v12 = vld [vmem:[%s9821_s28 + $0x1cc0] sm:$0xff]  ;;  %v2141_v13 = vld [vmem:[%s9821_s28 + $0x1cd0] sm:$0xff]  ;;  %2138 = vst [vmem:[%s9826_s29 + $0xe58] sm:$0xff] %v2137_v11 }
  0xf8   : > { %2140 = vst [vmem:[%s9826_s29 + $0xe60] sm:$0xff] %v2139_v12  ;;  %2142 = vst [vmem:[%s9826_s29 + $0xe68] sm:$0xff] %v2141_v13  ;;  %v2143_v14 = vld [vmem:[%s9821_s28 + $0x1ce0] sm:$0xff]  ;;  %v2145_v15 = vld [vmem:[%s9821_s28 + $0x1cf0] sm:$0xff] }
  0xf9   : > { %v2147_v16 = vld [vmem:[%s9821_s28 + $0x1d00] sm:$0xff]  ;;  %2144 = vst [vmem:[%s9826_s29 + $0xe70] sm:$0xff] %v2143_v14  ;;  %2146 = vst [vmem:[%s9826_s29 + $0xe78] sm:$0xff] %v2145_v15  ;;  %v2149_v17 = vld [vmem:[%s9821_s28 + $0x1d10] sm:$0xff] }
  0xfa   : > { %2148 = vst [vmem:[%s9826_s29 + $0xe80] sm:$0xff] %v2147_v16  ;;  %v2151_v18 = vld [vmem:[%s9821_s28 + $0x1d20] sm:$0xff]  ;;  %v2153_v19 = vld [vmem:[%s9821_s28 + $0x1d30] sm:$0xff]  ;;  %2150 = vst [vmem:[%s9826_s29 + $0xe88] sm:$0xff] %v2149_v17 }
  0xfb   : > { %2152 = vst [vmem:[%s9826_s29 + $0xe90] sm:$0xff] %v2151_v18  ;;  %2154 = vst [vmem:[%s9826_s29 + $0xe98] sm:$0xff] %v2153_v19  ;;  %v2155_v20 = vld [vmem:[%s9821_s28 + $0x1d40] sm:$0xff]  ;;  %v2157_v21 = vld [vmem:[%s9821_s28 + $0x1d50] sm:$0xff] }
  0xfc   : > { %v2159_v22 = vld [vmem:[%s9821_s28 + $0x1d60] sm:$0xff]  ;;  %2156 = vst [vmem:[%s9826_s29 + $0xea0] sm:$0xff] %v2155_v20  ;;  %2158 = vst [vmem:[%s9826_s29 + $0xea8] sm:$0xff] %v2157_v21  ;;  %v2161_v23 = vld [vmem:[%s9821_s28 + $0x1d70] sm:$0xff] }
  0xfd   : > { %2160 = vst [vmem:[%s9826_s29 + $0xeb0] sm:$0xff] %v2159_v22  ;;  %v2163_v24 = vld [vmem:[%s9821_s28 + $0x1d80] sm:$0xff]  ;;  %v2165_v25 = vld [vmem:[%s9821_s28 + $0x1d90] sm:$0xff]  ;;  %2162 = vst [vmem:[%s9826_s29 + $0xeb8] sm:$0xff] %v2161_v23 }
  0xfe   : > { %2164 = vst [vmem:[%s9826_s29 + $0xec0] sm:$0xff] %v2163_v24  ;;  %2166 = vst [vmem:[%s9826_s29 + $0xec8] sm:$0xff] %v2165_v25  ;;  %v2167_v26 = vld [vmem:[%s9821_s28 + $0x1da0] sm:$0xff]  ;;  %v2169_v27 = vld [vmem:[%s9821_s28 + $0x1db0] sm:$0xff] }
  0xff   : > { %v2171_v28 = vld [vmem:[%s9821_s28 + $0x1dc0] sm:$0xff]  ;;  %2168 = vst [vmem:[%s9826_s29 + $0xed0] sm:$0xff] %v2167_v26  ;;  %2170 = vst [vmem:[%s9826_s29 + $0xed8] sm:$0xff] %v2169_v27  ;;  %v2173_v29 = vld [vmem:[%s9821_s28 + $0x1dd0] sm:$0xff] }
 0x100   : > { %2172 = vst [vmem:[%s9826_s29 + $0xee0] sm:$0xff] %v2171_v28  ;;  %v2175_v30 = vld [vmem:[%s9821_s28 + $0x1de0] sm:$0xff]  ;;  %v2177_v31 = vld [vmem:[%s9821_s28 + $0x1df0] sm:$0xff]  ;;  %2174 = vst [vmem:[%s9826_s29 + $0xee8] sm:$0xff] %v2173_v29 }
 0x101   : > { %2176 = vst [vmem:[%s9826_s29 + $0xef0] sm:$0xff] %v2175_v30  ;;  %2178 = vst [vmem:[%s9826_s29 + $0xef8] sm:$0xff] %v2177_v31  ;;  %v2179_v32 = vld [vmem:[%s9821_s28 + $0x1e00] sm:$0xff]  ;;  %v2181_v33 = vld [vmem:[%s9821_s28 + $0x1e10] sm:$0xff] }
 0x102   : > { %v2183_v34 = vld [vmem:[%s9821_s28 + $0x1e20] sm:$0xff]  ;;  %2180 = vst [vmem:[%s9826_s29 + $0xf00] sm:$0xff] %v2179_v32  ;;  %2182 = vst [vmem:[%s9826_s29 + $0xf08] sm:$0xff] %v2181_v33  ;;  %v2185_v35 = vld [vmem:[%s9821_s28 + $0x1e30] sm:$0xff] }
 0x103   : > { %2184 = vst [vmem:[%s9826_s29 + $0xf10] sm:$0xff] %v2183_v34  ;;  %v2187_v36 = vld [vmem:[%s9821_s28 + $0x1e40] sm:$0xff]  ;;  %v2189_v37 = vld [vmem:[%s9821_s28 + $0x1e50] sm:$0xff]  ;;  %2186 = vst [vmem:[%s9826_s29 + $0xf18] sm:$0xff] %v2185_v35 }
 0x104   : > { %2188 = vst [vmem:[%s9826_s29 + $0xf20] sm:$0xff] %v2187_v36  ;;  %2190 = vst [vmem:[%s9826_s29 + $0xf28] sm:$0xff] %v2189_v37  ;;  %v2191_v38 = vld [vmem:[%s9821_s28 + $0x1e60] sm:$0xff]  ;;  %v2193_v39 = vld [vmem:[%s9821_s28 + $0x1e70] sm:$0xff] }
 0x105   : > { %v2195_v40 = vld [vmem:[%s9821_s28 + $0x1e80] sm:$0xff]  ;;  %2192 = vst [vmem:[%s9826_s29 + $0xf30] sm:$0xff] %v2191_v38  ;;  %2194 = vst [vmem:[%s9826_s29 + $0xf38] sm:$0xff] %v2193_v39  ;;  %v2197_v41 = vld [vmem:[%s9821_s28 + $0x1e90] sm:$0xff] }
 0x106   : > { %2196 = vst [vmem:[%s9826_s29 + $0xf40] sm:$0xff] %v2195_v40  ;;  %v2199_v42 = vld [vmem:[%s9821_s28 + $0x1ea0] sm:$0xff]  ;;  %v2201_v43 = vld [vmem:[%s9821_s28 + $0x1eb0] sm:$0xff]  ;;  %2198 = vst [vmem:[%s9826_s29 + $0xf48] sm:$0xff] %v2197_v41 }
 0x107   : > { %2200 = vst [vmem:[%s9826_s29 + $0xf50] sm:$0xff] %v2199_v42  ;;  %2202 = vst [vmem:[%s9826_s29 + $0xf58] sm:$0xff] %v2201_v43  ;;  %v2203_v44 = vld [vmem:[%s9821_s28 + $0x1ec0] sm:$0xff]  ;;  %v2205_v45 = vld [vmem:[%s9821_s28 + $0x1ed0] sm:$0xff] }
 0x108   : > { %v2207_v46 = vld [vmem:[%s9821_s28 + $0x1ee0] sm:$0xff]  ;;  %2204 = vst [vmem:[%s9826_s29 + $0xf60] sm:$0xff] %v2203_v44  ;;  %2206 = vst [vmem:[%s9826_s29 + $0xf68] sm:$0xff] %v2205_v45  ;;  %v2209_v47 = vld [vmem:[%s9821_s28 + $0x1ef0] sm:$0xff] }
 0x109   : > { %2208 = vst [vmem:[%s9826_s29 + $0xf70] sm:$0xff] %v2207_v46  ;;  %v2211_v48 = vld [vmem:[%s9821_s28 + $0x1f00] sm:$0xff]  ;;  %v2213_v49 = vld [vmem:[%s9821_s28 + $0x1f10] sm:$0xff]  ;;  %2210 = vst [vmem:[%s9826_s29 + $0xf78] sm:$0xff] %v2209_v47 }
 0x10a   : > { %2212 = vst [vmem:[%s9826_s29 + $0xf80] sm:$0xff] %v2211_v48  ;;  %2214 = vst [vmem:[%s9826_s29 + $0xf88] sm:$0xff] %v2213_v49  ;;  %v2215_v50 = vld [vmem:[%s9821_s28 + $0x1f20] sm:$0xff]  ;;  %v2217_v51 = vld [vmem:[%s9821_s28 + $0x1f30] sm:$0xff] }
 0x10b   : > { %v2219_v52 = vld [vmem:[%s9821_s28 + $0x1f40] sm:$0xff]  ;;  %2216 = vst [vmem:[%s9826_s29 + $0xf90] sm:$0xff] %v2215_v50  ;;  %2218 = vst [vmem:[%s9826_s29 + $0xf98] sm:$0xff] %v2217_v51  ;;  %v2221_v53 = vld [vmem:[%s9821_s28 + $0x1f50] sm:$0xff] }
 0x10c   : > { %2220 = vst [vmem:[%s9826_s29 + $0xfa0] sm:$0xff] %v2219_v52  ;;  %v2223_v54 = vld [vmem:[%s9821_s28 + $0x1f60] sm:$0xff]  ;;  %v2225_v55 = vld [vmem:[%s9821_s28 + $0x1f70] sm:$0xff]  ;;  %2222 = vst [vmem:[%s9826_s29 + $0xfa8] sm:$0xff] %v2221_v53 }
 0x10d   : > { %2224 = vst [vmem:[%s9826_s29 + $0xfb0] sm:$0xff] %v2223_v54  ;;  %2226 = vst [vmem:[%s9826_s29 + $0xfb8] sm:$0xff] %v2225_v55  ;;  %v2227_v56 = vld [vmem:[%s9821_s28 + $0x1f80] sm:$0xff]  ;;  %v2229_v57 = vld [vmem:[%s9821_s28 + $0x1f90] sm:$0xff] }
 0x10e   : > { %v2231_v58 = vld [vmem:[%s9821_s28 + $0x1fa0] sm:$0xff]  ;;  %2228 = vst [vmem:[%s9826_s29 + $0xfc0] sm:$0xff] %v2227_v56  ;;  %2230 = vst [vmem:[%s9826_s29 + $0xfc8] sm:$0xff] %v2229_v57  ;;  %v2233_v59 = vld [vmem:[%s9821_s28 + $0x1fb0] sm:$0xff] }
 0x10f   : > { %2232 = vst [vmem:[%s9826_s29 + $0xfd0] sm:$0xff] %v2231_v58  ;;  %v2235_v60 = vld [vmem:[%s9821_s28 + $0x1fc0] sm:$0xff]  ;;  %v2237_v61 = vld [vmem:[%s9821_s28 + $0x1fd0] sm:$0xff]  ;;  %2234 = vst [vmem:[%s9826_s29 + $0xfd8] sm:$0xff] %v2233_v59 }
 0x110   : > { %2236 = vst [vmem:[%s9826_s29 + $0xfe0] sm:$0xff] %v2235_v60  ;;  %2238 = vst [vmem:[%s9826_s29 + $0xfe8] sm:$0xff] %v2237_v61  ;;  %v2239_v62 = vld [vmem:[%s9821_s28 + $0x1fe0] sm:$0xff]  ;;  %v2241_v63 = vld [vmem:[%s9821_s28 + $0x1ff0] sm:$0xff] }
 0x111   : > { %2240 = vst [vmem:[%s9826_s29 + $0xff0] sm:$0xff] %v2239_v62  ;;  %2242 = vst [vmem:[%s9826_s29 + $0xff8] sm:$0xff] %v2241_v63 }
 0x112 PF: > { %p8363_p5 = scmp.ge.s32.totalorder %s9760_s17, 1  ;;  %p4347_p6 = scmp.lt.s32.totalorder %s9760_s17, 3 }
 0x114   : > { %p4348_p7 = pnand %p8363_p5, %p4347_p6 }
 0x115   : > { %s4354_s30 = sand.u32 (!%p4348_p7), 1, %s9752_s15   ;;  %v4405_v0 = vld [vmem:[%s11483_s0 + $0x8] sm:$0xff] (!%p4348_p7) }
 0x116   : > { %4351 = sbr.rel (%p4348_p7) target bundleno = 1063 (0x427), region = 84  ;;  %v4421_v1 = vld [vmem:[%s11483_s0 + $0x88] sm:$0xff] (!%p4348_p7)  ;;  %s8364_s9 = sshll.u32 (!%p4348_p7), %s4354_s30, 12  ;;  %v4437_v2 = vpack.c.bf16 (!%p4348_p7), %v4405_v0, %v4405_v0 }
 0x117   : > { %v4453_v3 = vpack.c.bf16 (!%p4348_p7), %v4421_v1, %v4421_v1  ;;  %s10858_s10 = scalar_lea.vmem (!%p4348_p7), [#allocation2], %s8364_s9 }
 0x118   : > { %v8966_v4 = vld [vmem:[%s10858_s10 + $0x4] ss:$8 sps:$4 sm:$0xff] (!%p4348_p7)   ;;  %7572 = vmatprep.mubr.bf16.mxu1 (!%p4348_p7), %v4437_v2  ;;  %v8970_v6 = vld [vmem:[%s10858_s10] ss:$8 sps:$4 sm:$0xff] (!%p4348_p7)   ;;  %v8972_v8 = vld [vmem:[%s10858_s10 + $0x14] ss:$8 sps:$4 sm:$0xff] (!%p4348_p7)  }
 0x119   : > { %7900 = vmatprep.mubr.bf16.mxu0 (!%p4348_p7), %v4453_v3  ;;  %v8968_v5 = vld [vmem:[%s10858_s10 + $0x804] ss:$8 sps:$4 sm:$0xff] (!%p4348_p7)   ;;  %7540 = vmatprep.subr.bf16.mxu1 (!%p4348_p7), %v8966_v4  ;;  %v8971_v7 = vld [vmem:[%s10858_s10 + $0x800] ss:$8 sps:$4 sm:$0xff] (!%p4348_p7)   ;;  %v8974_v9 = vld [vmem:[%s10858_s10 + $0x814] ss:$8 sps:$4 sm:$0xff] (!%p4348_p7)  }
 0x11a   : > { %7868 = vmatprep.subr.bf16.mxu0 (!%p4348_p7), %v8968_v5  ;;  %7541 = vmatpush1.bf16.msra.mxu1 (!%p4348_p7), %v8970_v6  ;;  %v8976_v10 = vld [vmem:[%s10858_s10 + $0x10] ss:$8 sps:$4 sm:$0xff] (!%p4348_p7)   ;;  %v8978_v12 = vld [vmem:[%s10858_s10 + $0x24] ss:$8 sps:$4 sm:$0xff] (!%p4348_p7)   ;;  %v8982_v14 = vld [vmem:[%s10858_s10 + $0x20] ss:$8 sps:$4 sm:$0xff] (!%p4348_p7)  }
 0x11b   : > { %7869 = vmatpush1.bf16.msra.mxu0 (!%p4348_p7), %v8971_v7  ;;  %7542 = vmatprep.subr.bf16.mxu1 (!%p4348_p7), %v8972_v8  ;;  %v8977_v11 = vld [vmem:[%s10858_s10 + $0x810] ss:$8 sps:$4 sm:$0xff] (!%p4348_p7)   ;;  %v8980_v13 = vld [vmem:[%s10858_s10 + $0x824] ss:$8 sps:$4 sm:$0xff] (!%p4348_p7)   ;;  %v8983_v15 = vld [vmem:[%s10858_s10 + $0x820] ss:$8 sps:$4 sm:$0xff] (!%p4348_p7)  }
 0x11c   : > { %7870 = vmatprep.subr.bf16.mxu0 (!%p4348_p7), %v8974_v9  ;;  %v8984_v16 = vld [vmem:[%s10858_s10 + $0x34] ss:$8 sps:$4 sm:$0xff] (!%p4348_p7)   ;;  %v8988_v18 = vld [vmem:[%s10858_s10 + $0x30] ss:$8 sps:$4 sm:$0xff] (!%p4348_p7)   ;;  %v8990_v20 = vld [vmem:[%s10858_s10 + $0x44] ss:$8 sps:$4 sm:$0xff] (!%p4348_p7)  }
 0x11d   : > { %v8986_v17 = vld [vmem:[%s10858_s10 + $0x834] ss:$8 sps:$4 sm:$0xff]   ;;  %v8989_v19 = vld [vmem:[%s10858_s10 + $0x830] ss:$8 sps:$4 sm:$0xff]   ;;  %v8992_v21 = vld [vmem:[%s10858_s10 + $0x844] ss:$8 sps:$4 sm:$0xff]  }
 0x11e   : > { %7543 = vmatpush1.bf16.msra.mxu1 %v8976_v10  ;;  %v8994_v22 = vld [vmem:[%s10858_s10 + $0x40] ss:$8 sps:$4 sm:$0xff]   ;;  %v8996_v24 = vld [vmem:[%s10858_s10 + $0x54] ss:$8 sps:$4 sm:$0xff]   ;;  %v9000_v26 = vld [vmem:[%s10858_s10 + $0x50] ss:$8 sps:$4 sm:$0xff]  }
 0x11f   : > { %7871 = vmatpush1.bf16.msra.mxu0 %v8977_v11  ;;  %7544 = vmatprep.subr.bf16.mxu1 %v8978_v12  ;;  %v8995_v23 = vld [vmem:[%s10858_s10 + $0x840] ss:$8 sps:$4 sm:$0xff]   ;;  %v8998_v25 = vld [vmem:[%s10858_s10 + $0x854] ss:$8 sps:$4 sm:$0xff]   ;;  %v9001_v27 = vld [vmem:[%s10858_s10 + $0x850] ss:$8 sps:$4 sm:$0xff]  }
 0x120   : > { %7872 = vmatprep.subr.bf16.mxu0 %v8980_v13  ;;  %v9002_v28 = vld [vmem:[%s10858_s10 + $0x64] ss:$8 sps:$4 sm:$0xff]   ;;  %v9006_v30 = vld [vmem:[%s10858_s10 + $0x60] ss:$8 sps:$4 sm:$0xff]   ;;  %v9008_v32 = vld [vmem:[%s10858_s10 + $0x74] ss:$8 sps:$4 sm:$0xff]  }
 0x121   : > { %v9004_v29 = vld [vmem:[%s10858_s10 + $0x864] ss:$8 sps:$4 sm:$0xff]   ;;  %v9007_v31 = vld [vmem:[%s10858_s10 + $0x860] ss:$8 sps:$4 sm:$0xff]   ;;  %v9010_v33 = vld [vmem:[%s10858_s10 + $0x874] ss:$8 sps:$4 sm:$0xff]  }
 0x122   : > { %7545 = vmatpush1.bf16.msra.mxu1 %v8982_v14  ;;  %v9012_v34 = vld [vmem:[%s10858_s10 + $0x70] ss:$8 sps:$4 sm:$0xff]   ;;  %v9014_v36 = vld [vmem:[%s10858_s10 + $0x84] ss:$8 sps:$4 sm:$0xff]   ;;  %v9018_v38 = vld [vmem:[%s10858_s10 + $0x80] ss:$8 sps:$4 sm:$0xff]  }
 0x123   : > { %7873 = vmatpush1.bf16.msra.mxu0 %v8983_v15  ;;  %7546 = vmatprep.subr.bf16.mxu1 %v8984_v16  ;;  %v9013_v35 = vld [vmem:[%s10858_s10 + $0x870] ss:$8 sps:$4 sm:$0xff]   ;;  %v9016_v37 = vld [vmem:[%s10858_s10 + $0x884] ss:$8 sps:$4 sm:$0xff]   ;;  %v9019_v39 = vld [vmem:[%s10858_s10 + $0x880] ss:$8 sps:$4 sm:$0xff]  }
 0x124   : > { %7874 = vmatprep.subr.bf16.mxu0 %v8986_v17  ;;  %v9020_v40 = vld [vmem:[%s10858_s10 + $0x94] ss:$8 sps:$4 sm:$0xff]   ;;  %v9024_v42 = vld [vmem:[%s10858_s10 + $0x90] ss:$8 sps:$4 sm:$0xff]   ;;  %v9026_v44 = vld [vmem:[%s10858_s10 + $0xa4] ss:$8 sps:$4 sm:$0xff]  }
 0x125   : > { %v9022_v41 = vld [vmem:[%s10858_s10 + $0x894] ss:$8 sps:$4 sm:$0xff]   ;;  %v9025_v43 = vld [vmem:[%s10858_s10 + $0x890] ss:$8 sps:$4 sm:$0xff]   ;;  %v9028_v45 = vld [vmem:[%s10858_s10 + $0x8a4] ss:$8 sps:$4 sm:$0xff]  }
 0x126   : > { %7547 = vmatpush1.bf16.msra.mxu1 %v8988_v18  ;;  %v9030_v46 = vld [vmem:[%s10858_s10 + $0xa0] ss:$8 sps:$4 sm:$0xff]   ;;  %v9032_v48 = vld [vmem:[%s10858_s10 + $0xb4] ss:$8 sps:$4 sm:$0xff]   ;;  %v9036_v50 = vld [vmem:[%s10858_s10 + $0xb0] ss:$8 sps:$4 sm:$0xff]  }
 0x127   : > { %7875 = vmatpush1.bf16.msra.mxu0 %v8989_v19  ;;  %7548 = vmatprep.subr.bf16.mxu1 %v8990_v20  ;;  %v9031_v47 = vld [vmem:[%s10858_s10 + $0x8a0] ss:$8 sps:$4 sm:$0xff]   ;;  %v9034_v49 = vld [vmem:[%s10858_s10 + $0x8b4] ss:$8 sps:$4 sm:$0xff]   ;;  %v9037_v51 = vld [vmem:[%s10858_s10 + $0x8b0] ss:$8 sps:$4 sm:$0xff]  }
 0x128   : > { %7876 = vmatprep.subr.bf16.mxu0 %v8992_v21  ;;  %v9038_v52 = vld [vmem:[%s10858_s10 + $0xc4] ss:$8 sps:$4 sm:$0xff]   ;;  %v9042_v54 = vld [vmem:[%s10858_s10 + $0xc0] ss:$8 sps:$4 sm:$0xff]   ;;  %v9044_v56 = vld [vmem:[%s10858_s10 + $0xd4] ss:$8 sps:$4 sm:$0xff]  }
 0x129   : > { %v9040_v53 = vld [vmem:[%s10858_s10 + $0x8c4] ss:$8 sps:$4 sm:$0xff]   ;;  %v9043_v55 = vld [vmem:[%s10858_s10 + $0x8c0] ss:$8 sps:$4 sm:$0xff]   ;;  %v9046_v57 = vld [vmem:[%s10858_s10 + $0x8d4] ss:$8 sps:$4 sm:$0xff]  }
 0x12a   : > { %7549 = vmatpush1.bf16.msra.mxu1 %v8994_v22  ;;  %v9048_v58 = vld [vmem:[%s10858_s10 + $0xd0] ss:$8 sps:$4 sm:$0xff]   ;;  %v9050_v60 = vld [vmem:[%s10858_s10 + $0xe4] ss:$8 sps:$4 sm:$0xff]   ;;  %v9054_v62 = vld [vmem:[%s10858_s10 + $0xe0] ss:$8 sps:$4 sm:$0xff]  }
 0x12b   : > { %7877 = vmatpush1.bf16.msra.mxu0 %v8995_v23  ;;  %7550 = vmatprep.subr.bf16.mxu1 %v8996_v24  ;;  %v9049_v59 = vld [vmem:[%s10858_s10 + $0x8d0] ss:$8 sps:$4 sm:$0xff]   ;;  %v9052_v61 = vld [vmem:[%s10858_s10 + $0x8e4] ss:$8 sps:$4 sm:$0xff]   ;;  %v9055_v63 = vld [vmem:[%s10858_s10 + $0x8e0] ss:$8 sps:$4 sm:$0xff]  }
 0x12c   : > { %7878 = vmatprep.subr.bf16.mxu0 %v8998_v25  ;;  %v9056_v0 = vld [vmem:[%s10858_s10 + $0xf4] ss:$8 sps:$4 sm:$0xff]   ;;  %v4404_v2 = vld [vmem:[%s11483_s0] sm:$0xff]  ;;  %v9060_v4 = vld [vmem:[%s10858_s10 + $0xf0] ss:$8 sps:$4 sm:$0xff]  }
 0x12d   : > { %v9058_v1 = vld [vmem:[%s10858_s10 + $0x8f4] ss:$8 sps:$4 sm:$0xff]   ;;  %v4420_v3 = vld [vmem:[%s11483_s0 + $0x80] sm:$0xff]  ;;  %v9061_v5 = vld [vmem:[%s10858_s10 + $0x8f0] ss:$8 sps:$4 sm:$0xff]   ;;  %v4436_v10 = vpack.c.bf16 %v4404_v2, %v4404_v2 }
 0x12e   : > { %7551 = vmatpush1.bf16.msra.mxu1 %v9000_v26  ;;  %v9064_v6 = vld [vmem:[%s10858_s10 + $0x104] ss:$8 sps:$4 sm:$0xff]   ;;  %v9062_v8 = vld [vmem:[%s10858_s10 + $0x100] ss:$8 sps:$4 sm:$0xff]   ;;  %v4452_v11 = vpack.c.bf16 %v4420_v3, %v4420_v3  ;;  %v9070_v12 = vld [vmem:[%s10858_s10 + $0x114] ss:$8 sps:$4 sm:$0xff]  }
 0x12f   : > { %7879 = vmatpush1.bf16.msra.mxu0 %v9001_v27  ;;  %7552 = vmatprep.subr.bf16.mxu1 %v9002_v28  ;;  %v9067_v7 = vld [vmem:[%s10858_s10 + $0x904] ss:$8 sps:$4 sm:$0xff]   ;;  %v9065_v9 = vld [vmem:[%s10858_s10 + $0x900] ss:$8 sps:$4 sm:$0xff]   ;;  %v9073_v13 = vld [vmem:[%s10858_s10 + $0x914] ss:$8 sps:$4 sm:$0xff]  }
 0x130   : > { %7880 = vmatprep.subr.bf16.mxu0 %v9004_v29  ;;  %v9068_v14 = vld [vmem:[%s10858_s10 + $0x110] ss:$8 sps:$4 sm:$0xff]   ;;  %v9076_v16 = vld [vmem:[%s10858_s10 + $0x124] ss:$8 sps:$4 sm:$0xff]   ;;  %v9074_v18 = vld [vmem:[%s10858_s10 + $0x120] ss:$8 sps:$4 sm:$0xff]  }
 0x131   : > { %v9071_v15 = vld [vmem:[%s10858_s10 + $0x910] ss:$8 sps:$4 sm:$0xff]   ;;  %v9079_v17 = vld [vmem:[%s10858_s10 + $0x924] ss:$8 sps:$4 sm:$0xff]   ;;  %v9077_v19 = vld [vmem:[%s10858_s10 + $0x920] ss:$8 sps:$4 sm:$0xff]  }
 0x132   : > { %7553 = vmatpush1.bf16.msra.mxu1 %v9006_v30  ;;  %v9082_v20 = vld [vmem:[%s10858_s10 + $0x134] ss:$8 sps:$4 sm:$0xff]   ;;  %v9080_v22 = vld [vmem:[%s10858_s10 + $0x130] ss:$8 sps:$4 sm:$0xff]   ;;  %v9088_v24 = vld [vmem:[%s10858_s10 + $0x144] ss:$8 sps:$4 sm:$0xff]  }
 0x133   : > { %7881 = vmatpush1.bf16.msra.mxu0 %v9007_v31  ;;  %7554 = vmatprep.subr.bf16.mxu1 %v9008_v32  ;;  %v9085_v21 = vld [vmem:[%s10858_s10 + $0x934] ss:$8 sps:$4 sm:$0xff]   ;;  %v9083_v23 = vld [vmem:[%s10858_s10 + $0x930] ss:$8 sps:$4 sm:$0xff]   ;;  %v9091_v25 = vld [vmem:[%s10858_s10 + $0x944] ss:$8 sps:$4 sm:$0xff]  }
 0x134   : > { %7882 = vmatprep.subr.bf16.mxu0 %v9010_v33  ;;  %v9086_v26 = vld [vmem:[%s10858_s10 + $0x140] ss:$8 sps:$4 sm:$0xff]   ;;  %v9094_v28 = vld [vmem:[%s10858_s10 + $0x154] ss:$8 sps:$4 sm:$0xff]   ;;  %v9092_v30 = vld [vmem:[%s10858_s10 + $0x150] ss:$8 sps:$4 sm:$0xff]  }
 0x135   : > { %v9089_v27 = vld [vmem:[%s10858_s10 + $0x940] ss:$8 sps:$4 sm:$0xff]   ;;  %v9097_v29 = vld [vmem:[%s10858_s10 + $0x954] ss:$8 sps:$4 sm:$0xff]   ;;  %v9095_v31 = vld [vmem:[%s10858_s10 + $0x950] ss:$8 sps:$4 sm:$0xff]  }
 0x136   : > { %7555 = vmatpush1.bf16.msra.mxu1 %v9012_v34  ;;  %v9100_v32 = vld [vmem:[%s10858_s10 + $0x164] ss:$8 sps:$4 sm:$0xff]   ;;  %v4407_v34 = vld [vmem:[%s11483_s0 + $0x18] sm:$0xff] }
 0x137   : > { %7883 = vmatpush1.bf16.msra.mxu0 %v9013_v35  ;;  %7556 = vmatprep.subr.bf16.mxu1 %v9014_v36  ;;  %v9103_v33 = vld [vmem:[%s10858_s10 + $0x964] ss:$8 sps:$4 sm:$0xff]   ;;  %v4439_v35 = vpack.c.bf16 %v4407_v34, %v4407_v34  ;;  %v4423_v36 = vld [vmem:[%s11483_s0 + $0x98] sm:$0xff] }
 0x138   : > { %7884 = vmatprep.subr.bf16.mxu0 %v9016_v37  ;;  %v9098_v37 = vld [vmem:[%s10858_s10 + $0x160] ss:$8 sps:$4 sm:$0xff]   ;;  %v9140_v2 = vld [vmem:[%s10858_s10 + $0x1d0] ss:$8 sps:$4 sm:$0xff]  }
 0x139   : > { %v9143_v3 = vld [vmem:[%s10858_s10 + $0x9d0] ss:$8 sps:$4 sm:$0xff]  }
 0x13a   : > { %7557 = vmatpush1.bf16.msra.mxu1 %v9018_v38  ;;  %v9101_v38 = vld [vmem:[%s10858_s10 + $0x960] ss:$8 sps:$4 sm:$0xff]   ;;  %v9176_v34 = vld [vmem:[%s10858_s10 + $0x230] ss:$8 sps:$4 sm:$0xff]  }
 0x13b   : > { %7885 = vmatpush1.bf16.msra.mxu0 %v9019_v39  ;;  %7558 = vmatprep.subr.bf16.mxu1 %v9020_v40  ;;  %v9106_v39 = vld [vmem:[%s10858_s10 + $0x174] ss:$8 sps:$4 sm:$0xff]   ;;  %v4455_v40 = vpack.c.bf16 %v4423_v36, %v4423_v36  ;;  %v9184_v36 = vld [vmem:[%s10858_s10 + $0x244] ss:$8 sps:$4 sm:$0xff]  }
 0x13c   : > { %7886 = vmatprep.subr.bf16.mxu0 %v9022_v41  ;;  %v9109_v41 = vld [vmem:[%s10858_s10 + $0x974] ss:$8 sps:$4 sm:$0xff]  }
 0x13e   : > { %7559 = vmatpush1.bf16.msra.mxu1 %v9024_v42  ;;  %v9104_v42 = vld [vmem:[%s10858_s10 + $0x170] ss:$8 sps:$4 sm:$0xff]  }
 0x13f   : > { %7887 = vmatpush1.bf16.msra.mxu0 %v9025_v43  ;;  %7560 = vmatprep.subr.bf16.mxu1 %v9026_v44  ;;  %v9107_v43 = vld [vmem:[%s10858_s10 + $0x970] ss:$8 sps:$4 sm:$0xff]   ;;  %v9112_v44 = vld [vmem:[%s10858_s10 + $0x184] ss:$8 sps:$4 sm:$0xff]  }
 0x140   : > { %7888 = vmatprep.subr.bf16.mxu0 %v9028_v45  ;;  %v9115_v45 = vld [vmem:[%s10858_s10 + $0x984] ss:$8 sps:$4 sm:$0xff]  }
 0x142   : > { %7561 = vmatpush1.bf16.msra.mxu1 %v9030_v46  ;;  %v9110_v46 = vld [vmem:[%s10858_s10 + $0x180] ss:$8 sps:$4 sm:$0xff]  }
 0x143   : > { %7889 = vmatpush1.bf16.msra.mxu0 %v9031_v47  ;;  %7562 = vmatprep.subr.bf16.mxu1 %v9032_v48  ;;  %v9113_v47 = vld [vmem:[%s10858_s10 + $0x980] ss:$8 sps:$4 sm:$0xff]   ;;  %v9118_v48 = vld [vmem:[%s10858_s10 + $0x194] ss:$8 sps:$4 sm:$0xff]  }
 0x144   : > { %7890 = vmatprep.subr.bf16.mxu0 %v9034_v49  ;;  %v9121_v49 = vld [vmem:[%s10858_s10 + $0x994] ss:$8 sps:$4 sm:$0xff]  }
 0x146   : > { %7563 = vmatpush1.bf16.msra.mxu1 %v9036_v50  ;;  %v9116_v50 = vld [vmem:[%s10858_s10 + $0x190] ss:$8 sps:$4 sm:$0xff]  }
 0x147   : > { %7891 = vmatpush1.bf16.msra.mxu0 %v9037_v51  ;;  %7564 = vmatprep.subr.bf16.mxu1 %v9038_v52  ;;  %v9119_v51 = vld [vmem:[%s10858_s10 + $0x990] ss:$8 sps:$4 sm:$0xff]   ;;  %v9124_v52 = vld [vmem:[%s10858_s10 + $0x1a4] ss:$8 sps:$4 sm:$0xff]  }
 0x148   : > { %7892 = vmatprep.subr.bf16.mxu0 %v9040_v53  ;;  %v9127_v53 = vld [vmem:[%s10858_s10 + $0x9a4] ss:$8 sps:$4 sm:$0xff]  }
 0x14a   : > { %7565 = vmatpush1.bf16.msra.mxu1 %v9042_v54  ;;  %v9122_v54 = vld [vmem:[%s10858_s10 + $0x1a0] ss:$8 sps:$4 sm:$0xff]  }
 0x14b   : > { %7893 = vmatpush1.bf16.msra.mxu0 %v9043_v55  ;;  %7566 = vmatprep.subr.bf16.mxu1 %v9044_v56  ;;  %v9125_v55 = vld [vmem:[%s10858_s10 + $0x9a0] ss:$8 sps:$4 sm:$0xff]   ;;  %v9130_v56 = vld [vmem:[%s10858_s10 + $0x1b4] ss:$8 sps:$4 sm:$0xff]  }
 0x14c   : > { %7894 = vmatprep.subr.bf16.mxu0 %v9046_v57  ;;  %v9133_v57 = vld [vmem:[%s10858_s10 + $0x9b4] ss:$8 sps:$4 sm:$0xff]  }
 0x14e   : > { %7567 = vmatpush1.bf16.msra.mxu1 %v9048_v58  ;;  %v9128_v58 = vld [vmem:[%s10858_s10 + $0x1b0] ss:$8 sps:$4 sm:$0xff]  }
 0x14f   : > { %7895 = vmatpush1.bf16.msra.mxu0 %v9049_v59  ;;  %7568 = vmatprep.subr.bf16.mxu1 %v9050_v60  ;;  %v9131_v59 = vld [vmem:[%s10858_s10 + $0x9b0] ss:$8 sps:$4 sm:$0xff]   ;;  %v9136_v60 = vld [vmem:[%s10858_s10 + $0x1c4] ss:$8 sps:$4 sm:$0xff]  }
 0x150   : > { %7896 = vmatprep.subr.bf16.mxu0 %v9052_v61  ;;  %v9139_v61 = vld [vmem:[%s10858_s10 + $0x9c4] ss:$8 sps:$4 sm:$0xff]  }
 0x152   : > { %7569 = vmatpush1.bf16.msra.mxu1 %v9054_v62  ;;  %v9134_v62 = vld [vmem:[%s10858_s10 + $0x1c0] ss:$8 sps:$4 sm:$0xff]  }
 0x153   : > { %7897 = vmatpush1.bf16.msra.mxu0 %v9055_v63  ;;  %7570 = vmatprep.subr.bf16.mxu1 %v9056_v0  ;;  %v9137_v63 = vld [vmem:[%s10858_s10 + $0x9c0] ss:$8 sps:$4 sm:$0xff]   ;;  %v9142_v0 = vld [vmem:[%s10858_s10 + $0x1d4] ss:$8 sps:$4 sm:$0xff]  }
 0x154   : > { %7898 = vmatprep.subr.bf16.mxu0 %v9058_v1  ;;  %v9145_v1 = vld [vmem:[%s10858_s10 + $0x9d4] ss:$8 sps:$4 sm:$0xff]  }
 0x156   : > { %7571 = vmatpush1.bf16.msra.mxu1 %v9060_v4  ;;  %v9148_v4 = vld [vmem:[%s10858_s10 + $0x1e4] ss:$8 sps:$4 sm:$0xff]  }
 0x157   : > { %7899 = vmatpush1.bf16.msra.mxu0 %v9061_v5  ;;  %7581 = vmatprep.subr.bf16.mxu1 %v9064_v6  ;;  %v9151_v5 = vld [vmem:[%s10858_s10 + $0x9e4] ss:$8 sps:$4 sm:$0xff]   ;;  %v9146_v6 = vld [vmem:[%s10858_s10 + $0x1e0] ss:$8 sps:$4 sm:$0xff]  }
 0x158   : > { %7909 = vmatprep.subr.bf16.mxu0 %v9067_v7  ;;  %v9149_v7 = vld [vmem:[%s10858_s10 + $0x9e0] ss:$8 sps:$4 sm:$0xff]  }
 0x159   : > { %7573 = vmatmul.mubr.bf16.vlgmr.msra.gmra.mrb[0].mxu1 %v4436_v10  ;;  %v9152_v10 = vld [vmem:[%s10858_s10 + $0x1f0] ss:$8 sps:$4 sm:$0xff]  }
 0x15a   : > { %7901 = vmatmul.mubr.bf16.vlgmr.msra.gmra.mrb[0].mxu0 %v4452_v11  ;;  %7582 = vmatpush1.bf16.msra.mxu1 %v9062_v8  ;;  %v9154_v8 = vld [vmem:[%s10858_s10 + $0x1f4] ss:$8 sps:$4 sm:$0xff]   ;;  %v9155_v11 = vld [vmem:[%s10858_s10 + $0x9f0] ss:$8 sps:$4 sm:$0xff]  }
 0x15b   : > { %7910 = vmatpush1.bf16.msra.mxu0 %v9065_v9  ;;  %7583 = vmatprep.subr.bf16.mxu1 %v9070_v12  ;;  %v9157_v9 = vld [vmem:[%s10858_s10 + $0x9f4] ss:$8 sps:$4 sm:$0xff]   ;;  %v9160_v12 = vld [vmem:[%s10858_s10 + $0x204] ss:$8 sps:$4 sm:$0xff]  }
 0x15c   : > { %7911 = vmatprep.subr.bf16.mxu0 %v9073_v13  ;;  %7613 = vmatprep.mubr.bf16.mxu1 %v4439_v35  ;;  %v4406_v13 = vld [vmem:[%s11483_s0 + $0x10] sm:$0xff] }
 0x15d   : > { %7941 = vmatprep.mubr.bf16.mxu0 %v4455_v40  ;;  %v9179_v35 = vld [vmem:[%s10858_s10 + $0xa30] ss:$8 sps:$4 sm:$0xff]   ;;  %v9190_v40 = vld [vmem:[%s10858_s10 + $0x254] ss:$8 sps:$4 sm:$0xff]  }
 0x15e   : > { %7584 = vmatpush1.bf16.msra.mxu1 %v9068_v14  ;;  %v4422_v14 = vld [vmem:[%s11483_s0 + $0x90] sm:$0xff] }
 0x15f   : > { %7912 = vmatpush1.bf16.msra.mxu0 %v9071_v15  ;;  %7585 = vmatprep.subr.bf16.mxu1 %v9076_v16  ;;  %v9163_v15 = vld [vmem:[%s10858_s10 + $0xa04] ss:$8 sps:$4 sm:$0xff]   ;;  %v9158_v16 = vld [vmem:[%s10858_s10 + $0x200] ss:$8 sps:$4 sm:$0xff]  }
 0x160   : > { %7913 = vmatprep.subr.bf16.mxu0 %v9079_v17  ;;  %v9161_v17 = vld [vmem:[%s10858_s10 + $0xa00] ss:$8 sps:$4 sm:$0xff]  }
 0x162   : > { %7586 = vmatpush1.bf16.msra.mxu1 %v9074_v18  ;;  %v4438_v18 = vpack.c.bf16 %v4406_v13, %v4406_v13  ;;  %v9247_v13 = vld [vmem:[%s10858_s10 + $0xae4] ss:$8 sps:$4 sm:$0xff]  }
 0x163   : > { %7914 = vmatpush1.bf16.msra.mxu0 %v9077_v19  ;;  %7587 = vmatprep.subr.bf16.mxu1 %v9082_v20  ;;  %v4454_v19 = vpack.c.bf16 %v4422_v14, %v4422_v14  ;;  %v9166_v20 = vld [vmem:[%s10858_s10 + $0x214] ss:$8 sps:$4 sm:$0xff]   ;;  %v9242_v14 = vld [vmem:[%s10858_s10 + $0x2e0] ss:$8 sps:$4 sm:$0xff]  }
 0x164   : > { %7915 = vmatprep.subr.bf16.mxu0 %v9085_v21  ;;  %v9169_v21 = vld [vmem:[%s10858_s10 + $0xa14] ss:$8 sps:$4 sm:$0xff]  }
 0x166   : > { %7588 = vmatpush1.bf16.msra.mxu1 %v9080_v22  ;;  %v4409_v22 = vld [vmem:[%s11483_s0 + $0x28] sm:$0xff] }
 0x167   : > { %7916 = vmatpush1.bf16.msra.mxu0 %v9083_v23  ;;  %7589 = vmatprep.subr.bf16.mxu1 %v9088_v24  ;;  %v4441_v23 = vpack.c.bf16 %v4409_v22, %v4409_v22  ;;  %v4425_v24 = vld [vmem:[%s11483_s0 + $0xa8] sm:$0xff]  ;;  %v4424_v22 = vld [vmem:[%s11483_s0 + $0xa0] sm:$0xff] }
 0x168   : > { %7917 = vmatprep.subr.bf16.mxu0 %v9091_v25  ;;  %v9164_v25 = vld [vmem:[%s10858_s10 + $0x210] ss:$8 sps:$4 sm:$0xff]  }
 0x16a   : > { %7590 = vmatpush1.bf16.msra.mxu1 %v9086_v26  ;;  %v9167_v26 = vld [vmem:[%s10858_s10 + $0xa10] ss:$8 sps:$4 sm:$0xff]  }
 0x16b   : > { %7918 = vmatpush1.bf16.msra.mxu0 %v9089_v27  ;;  %7591 = vmatprep.subr.bf16.mxu1 %v9094_v28  ;;  %v9172_v27 = vld [vmem:[%s10858_s10 + $0x224] ss:$8 sps:$4 sm:$0xff]   ;;  %v4457_v28 = vpack.c.bf16 %v4425_v24, %v4425_v24  ;;  %v9254_v24 = vld [vmem:[%s10858_s10 + $0x300] ss:$8 sps:$4 sm:$0xff]  }
 0x16c   : > { %7919 = vmatprep.subr.bf16.mxu0 %v9097_v29  ;;  %v9175_v29 = vld [vmem:[%s10858_s10 + $0xa24] ss:$8 sps:$4 sm:$0xff]  }
 0x16e   : > { %7592 = vmatpush1.bf16.msra.mxu1 %v9092_v30  ;;  %v9170_v30 = vld [vmem:[%s10858_s10 + $0x220] ss:$8 sps:$4 sm:$0xff]  }
 0x16f   : > { %7920 = vmatpush1.bf16.msra.mxu0 %v9095_v31  ;;  %7593 = vmatprep.subr.bf16.mxu1 %v9100_v32  ;;  %v9173_v31 = vld [vmem:[%s10858_s10 + $0xa20] ss:$8 sps:$4 sm:$0xff]   ;;  %v9178_v32 = vld [vmem:[%s10858_s10 + $0x234] ss:$8 sps:$4 sm:$0xff]  }
 0x170   : > { %7921 = vmatprep.subr.bf16.mxu0 %v9103_v33  ;;  %v9181_v33 = vld [vmem:[%s10858_s10 + $0xa34] ss:$8 sps:$4 sm:$0xff]  }
 0x172   : > { %7594 = vmatpush1.bf16.msra.mxu1 %v9098_v37  ;;  %v9187_v37 = vld [vmem:[%s10858_s10 + $0xa44] ss:$8 sps:$4 sm:$0xff]  }
 0x173   : > { %7922 = vmatpush1.bf16.msra.mxu0 %v9101_v38  ;;  %7595 = vmatprep.subr.bf16.mxu1 %v9106_v39  ;;  %v9182_v38 = vld [vmem:[%s10858_s10 + $0x240] ss:$8 sps:$4 sm:$0xff]  }
 0x174   : > { %7923 = vmatprep.subr.bf16.mxu0 %v9109_v41  ;;  %v9185_v39 = vld [vmem:[%s10858_s10 + $0xa40] ss:$8 sps:$4 sm:$0xff]   ;;  %v9193_v41 = vld [vmem:[%s10858_s10 + $0xa54] ss:$8 sps:$4 sm:$0xff]  }
 0x176   : > { %7596 = vmatpush1.bf16.msra.mxu1 %v9104_v42  ;;  %v9188_v42 = vld [vmem:[%s10858_s10 + $0x250] ss:$8 sps:$4 sm:$0xff]  }
 0x177   : > { %7924 = vmatpush1.bf16.msra.mxu0 %v9107_v43  ;;  %7597 = vmatprep.subr.bf16.mxu1 %v9112_v44  ;;  %v9191_v43 = vld [vmem:[%s10858_s10 + $0xa50] ss:$8 sps:$4 sm:$0xff]   ;;  %v9196_v44 = vld [vmem:[%s10858_s10 + $0x264] ss:$8 sps:$4 sm:$0xff]  }
 0x178   : > { %7925 = vmatprep.subr.bf16.mxu0 %v9115_v45  ;;  %v9199_v45 = vld [vmem:[%s10858_s10 + $0xa64] ss:$8 sps:$4 sm:$0xff]  }
 0x17a   : > { %7598 = vmatpush1.bf16.msra.mxu1 %v9110_v46  ;;  %v9194_v46 = vld [vmem:[%s10858_s10 + $0x260] ss:$8 sps:$4 sm:$0xff]  }
 0x17b   : > { %7926 = vmatpush1.bf16.msra.mxu0 %v9113_v47  ;;  %7599 = vmatprep.subr.bf16.mxu1 %v9118_v48  ;;  %v9197_v47 = vld [vmem:[%s10858_s10 + $0xa60] ss:$8 sps:$4 sm:$0xff]   ;;  %v9202_v48 = vld [vmem:[%s10858_s10 + $0x274] ss:$8 sps:$4 sm:$0xff]  }
 0x17c   : > { %7927 = vmatprep.subr.bf16.mxu0 %v9121_v49  ;;  %v9205_v49 = vld [vmem:[%s10858_s10 + $0xa74] ss:$8 sps:$4 sm:$0xff]  }
 0x17e   : > { %7600 = vmatpush1.bf16.msra.mxu1 %v9116_v50  ;;  %v9200_v50 = vld [vmem:[%s10858_s10 + $0x270] ss:$8 sps:$4 sm:$0xff]  }
 0x17f   : > { %7928 = vmatpush1.bf16.msra.mxu0 %v9119_v51  ;;  %7601 = vmatprep.subr.bf16.mxu1 %v9124_v52  ;;  %v9203_v51 = vld [vmem:[%s10858_s10 + $0xa70] ss:$8 sps:$4 sm:$0xff]   ;;  %v9208_v52 = vld [vmem:[%s10858_s10 + $0x284] ss:$8 sps:$4 sm:$0xff]  }
 0x180   : > { %7929 = vmatprep.subr.bf16.mxu0 %v9127_v53  ;;  %v9211_v53 = vld [vmem:[%s10858_s10 + $0xa84] ss:$8 sps:$4 sm:$0xff]  }
 0x182   : > { %7602 = vmatpush1.bf16.msra.mxu1 %v9122_v54  ;;  %v9206_v54 = vld [vmem:[%s10858_s10 + $0x280] ss:$8 sps:$4 sm:$0xff]  }
 0x183   : > { %7930 = vmatpush1.bf16.msra.mxu0 %v9125_v55  ;;  %7603 = vmatprep.subr.bf16.mxu1 %v9130_v56  ;;  %v9209_v55 = vld [vmem:[%s10858_s10 + $0xa80] ss:$8 sps:$4 sm:$0xff]   ;;  %v9214_v56 = vld [vmem:[%s10858_s10 + $0x294] ss:$8 sps:$4 sm:$0xff]  }
 0x184   : > { %7931 = vmatprep.subr.bf16.mxu0 %v9133_v57  ;;  %v9217_v57 = vld [vmem:[%s10858_s10 + $0xa94] ss:$8 sps:$4 sm:$0xff]  }
 0x186   : > { %7604 = vmatpush1.bf16.msra.mxu1 %v9128_v58  ;;  %v9212_v58 = vld [vmem:[%s10858_s10 + $0x290] ss:$8 sps:$4 sm:$0xff]  }
 0x187   : > { %7932 = vmatpush1.bf16.msra.mxu0 %v9131_v59  ;;  %7605 = vmatprep.subr.bf16.mxu1 %v9136_v60  ;;  %v9215_v59 = vld [vmem:[%s10858_s10 + $0xa90] ss:$8 sps:$4 sm:$0xff]   ;;  %v9220_v60 = vld [vmem:[%s10858_s10 + $0x2a4] ss:$8 sps:$4 sm:$0xff]  }
 0x188   : > { %7933 = vmatprep.subr.bf16.mxu0 %v9139_v61  ;;  %v9223_v61 = vld [vmem:[%s10858_s10 + $0xaa4] ss:$8 sps:$4 sm:$0xff]  }
 0x18a   : > { %7606 = vmatpush1.bf16.msra.mxu1 %v9134_v62  ;;  %v9218_v62 = vld [vmem:[%s10858_s10 + $0x2a0] ss:$8 sps:$4 sm:$0xff]  }
 0x18b   : > { %7934 = vmatpush1.bf16.msra.mxu0 %v9137_v63  ;;  %7607 = vmatprep.subr.bf16.mxu1 %v9142_v0  ;;  %v9221_v63 = vld [vmem:[%s10858_s10 + $0xaa0] ss:$8 sps:$4 sm:$0xff]   ;;  %v9226_v0 = vld [vmem:[%s10858_s10 + $0x2b4] ss:$8 sps:$4 sm:$0xff]  }
 0x18c   : > { %7935 = vmatprep.subr.bf16.mxu0 %v9145_v1  ;;  %v9229_v1 = vld [vmem:[%s10858_s10 + $0xab4] ss:$8 sps:$4 sm:$0xff]  }
 0x18e   : > { %7608 = vmatpush1.bf16.msra.mxu1 %v9140_v2  ;;  %v9224_v2 = vld [vmem:[%s10858_s10 + $0x2b0] ss:$8 sps:$4 sm:$0xff]  }
 0x18f   : > { %7936 = vmatpush1.bf16.msra.mxu0 %v9143_v3  ;;  %7609 = vmatprep.subr.bf16.mxu1 %v9148_v4  ;;  %v9227_v3 = vld [vmem:[%s10858_s10 + $0xab0] ss:$8 sps:$4 sm:$0xff]   ;;  %v9232_v4 = vld [vmem:[%s10858_s10 + $0x2c4] ss:$8 sps:$4 sm:$0xff]  }
 0x190   : > { %7937 = vmatprep.subr.bf16.mxu0 %v9151_v5  ;;  %v9235_v5 = vld [vmem:[%s10858_s10 + $0xac4] ss:$8 sps:$4 sm:$0xff]  }
 0x192   : > { %7610 = vmatpush1.bf16.msra.mxu1 %v9146_v6  ;;  %v9230_v6 = vld [vmem:[%s10858_s10 + $0x2c0] ss:$8 sps:$4 sm:$0xff]  }
 0x193   : > { %7938 = vmatpush1.bf16.msra.mxu0 %v9149_v7  ;;  %7611 = vmatprep.subr.bf16.mxu1 %v9154_v8  ;;  %v9233_v7 = vld [vmem:[%s10858_s10 + $0xac0] ss:$8 sps:$4 sm:$0xff]   ;;  %v9238_v8 = vld [vmem:[%s10858_s10 + $0x2d4] ss:$8 sps:$4 sm:$0xff]  }
 0x194   : > { %7939 = vmatprep.subr.bf16.mxu0 %v9157_v9  ;;  %v9241_v9 = vld [vmem:[%s10858_s10 + $0xad4] ss:$8 sps:$4 sm:$0xff]  }
 0x196   : > { %7612 = vmatpush1.bf16.msra.mxu1 %v9152_v10  ;;  %v9236_v10 = vld [vmem:[%s10858_s10 + $0x2d0] ss:$8 sps:$4 sm:$0xff]  }
 0x197   : > { %7940 = vmatpush1.bf16.msra.mxu0 %v9155_v11  ;;  %7622 = vmatprep.subr.bf16.mxu1 %v9160_v12  ;;  %v9239_v11 = vld [vmem:[%s10858_s10 + $0xad0] ss:$8 sps:$4 sm:$0xff]   ;;  %v9244_v12 = vld [vmem:[%s10858_s10 + $0x2e4] ss:$8 sps:$4 sm:$0xff]  }
 0x198   : > { %7950 = vmatprep.subr.bf16.mxu0 %v9163_v15  ;;  %v9245_v15 = vld [vmem:[%s10858_s10 + $0xae0] ss:$8 sps:$4 sm:$0xff]  }
 0x199   : > { %7614 = vmatmul.mubr.bf16.vlgmr.msra.gmra.mrb[0].mxu1 %v4438_v18  ;;  %v9248_v18 = vld [vmem:[%s10858_s10 + $0x2f0] ss:$8 sps:$4 sm:$0xff]  }
 0x19a   : > { %7942 = vmatmul.mubr.bf16.vlgmr.msra.gmra.mrb[0].mxu0 %v4454_v19  ;;  %7623 = vmatpush1.bf16.msra.mxu1 %v9158_v16  ;;  %v9250_v16 = vld [vmem:[%s10858_s10 + $0x2f4] ss:$8 sps:$4 sm:$0xff]   ;;  %v9251_v19 = vld [vmem:[%s10858_s10 + $0xaf0] ss:$8 sps:$4 sm:$0xff]  }
 0x19b   : > { %7951 = vmatpush1.bf16.msra.mxu0 %v9161_v17  ;;  %7624 = vmatprep.subr.bf16.mxu1 %v9166_v20  ;;  %v9253_v17 = vld [vmem:[%s10858_s10 + $0xaf4] ss:$8 sps:$4 sm:$0xff]   ;;  %v9256_v20 = vld [vmem:[%s10858_s10 + $0x304] ss:$8 sps:$4 sm:$0xff]  }
 0x19c   : > { %7952 = vmatprep.subr.bf16.mxu0 %v9169_v21  ;;  %7654 = vmatprep.mubr.bf16.mxu1 %v4441_v23  ;;  %v4408_v21 = vld [vmem:[%s11483_s0 + $0x20] sm:$0xff] }
 0x19d   : > { %7982 = vmatprep.mubr.bf16.mxu0 %v4457_v28  ;;  %v9259_v23 = vld [vmem:[%s10858_s10 + $0xb04] ss:$8 sps:$4 sm:$0xff]   ;;  %v4411_v28 = vld [vmem:[%s11483_s0 + $0x38] sm:$0xff] }
 0x19e   : > { %7625 = vmatpush1.bf16.msra.mxu1 %v9164_v25  ;;  %v9257_v25 = vld [vmem:[%s10858_s10 + $0xb00] ss:$8 sps:$4 sm:$0xff]  }
 0x19f   : > { %7953 = vmatpush1.bf16.msra.mxu0 %v9167_v26  ;;  %7626 = vmatprep.subr.bf16.mxu1 %v9172_v27  ;;  %v4440_v26 = vpack.c.bf16 %v4408_v21, %v4408_v21  ;;  %v4456_v27 = vpack.c.bf16 %v4424_v22, %v4424_v22  ;;  %v9343_v21 = vld [vmem:[%s10858_s10 + $0xbe4] ss:$8 sps:$4 sm:$0xff]   ;;  %v9338_v22 = vld [vmem:[%s10858_s10 + $0x3e0] ss:$8 sps:$4 sm:$0xff]  }
 0x1a0   : > { %7954 = vmatprep.subr.bf16.mxu0 %v9175_v29  ;;  %v4427_v29 = vld [vmem:[%s11483_s0 + $0xb8] sm:$0xff] }
 0x1a2   : > { %7627 = vmatpush1.bf16.msra.mxu1 %v9170_v30  ;;  %v9262_v30 = vld [vmem:[%s10858_s10 + $0x314] ss:$8 sps:$4 sm:$0xff]  }
 0x1a3   : > { %7955 = vmatpush1.bf16.msra.mxu0 %v9173_v31  ;;  %7628 = vmatprep.subr.bf16.mxu1 %v9178_v32  ;;  %v9265_v31 = vld [vmem:[%s10858_s10 + $0xb14] ss:$8 sps:$4 sm:$0xff]   ;;  %v4443_v32 = vpack.c.bf16 %v4411_v28, %v4411_v28  ;;  %v9352_v28 = vld [vmem:[%s10858_s10 + $0x404] ss:$8 sps:$4 sm:$0xff]  }
 0x1a4   : > { %7956 = vmatprep.subr.bf16.mxu0 %v9181_v33  ;;  %v4459_v33 = vpack.c.bf16 %v4427_v29, %v4427_v29  ;;  %v4410_v29 = vld [vmem:[%s11483_s0 + $0x30] sm:$0xff] }
 0x1a6   : > { %7629 = vmatpush1.bf16.msra.mxu1 %v9176_v34  ;;  %v9260_v34 = vld [vmem:[%s10858_s10 + $0x310] ss:$8 sps:$4 sm:$0xff]  }
 0x1a7   : > { %7957 = vmatpush1.bf16.msra.mxu0 %v9179_v35  ;;  %7630 = vmatprep.subr.bf16.mxu1 %v9184_v36  ;;  %v9263_v35 = vld [vmem:[%s10858_s10 + $0xb10] ss:$8 sps:$4 sm:$0xff]   ;;  %v9268_v36 = vld [vmem:[%s10858_s10 + $0x324] ss:$8 sps:$4 sm:$0xff]  }
 0x1a8   : > { %7958 = vmatprep.subr.bf16.mxu0 %v9187_v37  ;;  %v9271_v37 = vld [vmem:[%s10858_s10 + $0xb24] ss:$8 sps:$4 sm:$0xff]  }
 0x1aa   : > { %7631 = vmatpush1.bf16.msra.mxu1 %v9182_v38  ;;  %v9266_v38 = vld [vmem:[%s10858_s10 + $0x320] ss:$8 sps:$4 sm:$0xff]  }
 0x1ab   : > { %7959 = vmatpush1.bf16.msra.mxu0 %v9185_v39  ;;  %7632 = vmatprep.subr.bf16.mxu1 %v9190_v40  ;;  %v9269_v39 = vld [vmem:[%s10858_s10 + $0xb20] ss:$8 sps:$4 sm:$0xff]   ;;  %v9274_v40 = vld [vmem:[%s10858_s10 + $0x334] ss:$8 sps:$4 sm:$0xff]  }
 0x1ac   : > { %7960 = vmatprep.subr.bf16.mxu0 %v9193_v41  ;;  %v9277_v41 = vld [vmem:[%s10858_s10 + $0xb34] ss:$8 sps:$4 sm:$0xff]  }
 0x1ae   : > { %7633 = vmatpush1.bf16.msra.mxu1 %v9188_v42  ;;  %v9272_v42 = vld [vmem:[%s10858_s10 + $0x330] ss:$8 sps:$4 sm:$0xff]  }
 0x1af   : > { %7961 = vmatpush1.bf16.msra.mxu0 %v9191_v43  ;;  %7634 = vmatprep.subr.bf16.mxu1 %v9196_v44  ;;  %v9275_v43 = vld [vmem:[%s10858_s10 + $0xb30] ss:$8 sps:$4 sm:$0xff]   ;;  %v9280_v44 = vld [vmem:[%s10858_s10 + $0x344] ss:$8 sps:$4 sm:$0xff]  }
 0x1b0   : > { %7962 = vmatprep.subr.bf16.mxu0 %v9199_v45  ;;  %v9283_v45 = vld [vmem:[%s10858_s10 + $0xb44] ss:$8 sps:$4 sm:$0xff]  }
 0x1b2   : > { %7635 = vmatpush1.bf16.msra.mxu1 %v9194_v46  ;;  %v9278_v46 = vld [vmem:[%s10858_s10 + $0x340] ss:$8 sps:$4 sm:$0xff]  }
 0x1b3   : > { %7963 = vmatpush1.bf16.msra.mxu0 %v9197_v47  ;;  %7636 = vmatprep.subr.bf16.mxu1 %v9202_v48  ;;  %v9281_v47 = vld [vmem:[%s10858_s10 + $0xb40] ss:$8 sps:$4 sm:$0xff]   ;;  %v9286_v48 = vld [vmem:[%s10858_s10 + $0x354] ss:$8 sps:$4 sm:$0xff]  }
 0x1b4   : > { %7964 = vmatprep.subr.bf16.mxu0 %v9205_v49  ;;  %v9289_v49 = vld [vmem:[%s10858_s10 + $0xb54] ss:$8 sps:$4 sm:$0xff]  }
 0x1b6   : > { %7637 = vmatpush1.bf16.msra.mxu1 %v9200_v50  ;;  %v9284_v50 = vld [vmem:[%s10858_s10 + $0x350] ss:$8 sps:$4 sm:$0xff]  }
 0x1b7   : > { %7965 = vmatpush1.bf16.msra.mxu0 %v9203_v51  ;;  %7638 = vmatprep.subr.bf16.mxu1 %v9208_v52  ;;  %v9287_v51 = vld [vmem:[%s10858_s10 + $0xb50] ss:$8 sps:$4 sm:$0xff]   ;;  %v9292_v52 = vld [vmem:[%s10858_s10 + $0x364] ss:$8 sps:$4 sm:$0xff]  }
 0x1b8   : > { %7966 = vmatprep.subr.bf16.mxu0 %v9211_v53  ;;  %v9295_v53 = vld [vmem:[%s10858_s10 + $0xb64] ss:$8 sps:$4 sm:$0xff]  }
 0x1ba   : > { %7639 = vmatpush1.bf16.msra.mxu1 %v9206_v54  ;;  %v9290_v54 = vld [vmem:[%s10858_s10 + $0x360] ss:$8 sps:$4 sm:$0xff]  }
 0x1bb   : > { %7967 = vmatpush1.bf16.msra.mxu0 %v9209_v55  ;;  %7640 = vmatprep.subr.bf16.mxu1 %v9214_v56  ;;  %v9293_v55 = vld [vmem:[%s10858_s10 + $0xb60] ss:$8 sps:$4 sm:$0xff]   ;;  %v9298_v56 = vld [vmem:[%s10858_s10 + $0x374] ss:$8 sps:$4 sm:$0xff]  }
 0x1bc   : > { %7968 = vmatprep.subr.bf16.mxu0 %v9217_v57  ;;  %v9301_v57 = vld [vmem:[%s10858_s10 + $0xb74] ss:$8 sps:$4 sm:$0xff]  }
 0x1be   : > { %7641 = vmatpush1.bf16.msra.mxu1 %v9212_v58  ;;  %v9296_v58 = vld [vmem:[%s10858_s10 + $0x370] ss:$8 sps:$4 sm:$0xff]  }
 0x1bf   : > { %7969 = vmatpush1.bf16.msra.mxu0 %v9215_v59  ;;  %7642 = vmatprep.subr.bf16.mxu1 %v9220_v60  ;;  %v9299_v59 = vld [vmem:[%s10858_s10 + $0xb70] ss:$8 sps:$4 sm:$0xff]   ;;  %v9304_v60 = vld [vmem:[%s10858_s10 + $0x384] ss:$8 sps:$4 sm:$0xff]  }
 0x1c0   : > { %7970 = vmatprep.subr.bf16.mxu0 %v9223_v61  ;;  %v9307_v61 = vld [vmem:[%s10858_s10 + $0xb84] ss:$8 sps:$4 sm:$0xff]  }
 0x1c2   : > { %7643 = vmatpush1.bf16.msra.mxu1 %v9218_v62  ;;  %v9302_v62 = vld [vmem:[%s10858_s10 + $0x380] ss:$8 sps:$4 sm:$0xff]  }
 0x1c3   : > { %7971 = vmatpush1.bf16.msra.mxu0 %v9221_v63  ;;  %7644 = vmatprep.subr.bf16.mxu1 %v9226_v0  ;;  %v9305_v63 = vld [vmem:[%s10858_s10 + $0xb80] ss:$8 sps:$4 sm:$0xff]   ;;  %v9310_v0 = vld [vmem:[%s10858_s10 + $0x394] ss:$8 sps:$4 sm:$0xff]  }
 0x1c4   : > { %7972 = vmatprep.subr.bf16.mxu0 %v9229_v1  ;;  %v9313_v1 = vld [vmem:[%s10858_s10 + $0xb94] ss:$8 sps:$4 sm:$0xff]  }
 0x1c6   : > { %7645 = vmatpush1.bf16.msra.mxu1 %v9224_v2  ;;  %v9308_v2 = vld [vmem:[%s10858_s10 + $0x390] ss:$8 sps:$4 sm:$0xff]  }
 0x1c7   : > { %7973 = vmatpush1.bf16.msra.mxu0 %v9227_v3  ;;  %7646 = vmatprep.subr.bf16.mxu1 %v9232_v4  ;;  %v9311_v3 = vld [vmem:[%s10858_s10 + $0xb90] ss:$8 sps:$4 sm:$0xff]   ;;  %v9316_v4 = vld [vmem:[%s10858_s10 + $0x3a4] ss:$8 sps:$4 sm:$0xff]  }
 0x1c8   : > { %7974 = vmatprep.subr.bf16.mxu0 %v9235_v5  ;;  %v9319_v5 = vld [vmem:[%s10858_s10 + $0xba4] ss:$8 sps:$4 sm:$0xff]  }
 0x1ca   : > { %7647 = vmatpush1.bf16.msra.mxu1 %v9230_v6  ;;  %v9314_v6 = vld [vmem:[%s10858_s10 + $0x3a0] ss:$8 sps:$4 sm:$0xff]  }
 0x1cb   : > { %7975 = vmatpush1.bf16.msra.mxu0 %v9233_v7  ;;  %7648 = vmatprep.subr.bf16.mxu1 %v9238_v8  ;;  %v9317_v7 = vld [vmem:[%s10858_s10 + $0xba0] ss:$8 sps:$4 sm:$0xff]   ;;  %v9322_v8 = vld [vmem:[%s10858_s10 + $0x3b4] ss:$8 sps:$4 sm:$0xff]  }
 0x1cc   : > { %7976 = vmatprep.subr.bf16.mxu0 %v9241_v9  ;;  %v9325_v9 = vld [vmem:[%s10858_s10 + $0xbb4] ss:$8 sps:$4 sm:$0xff]  }
 0x1ce   : > { %7649 = vmatpush1.bf16.msra.mxu1 %v9236_v10  ;;  %v9320_v10 = vld [vmem:[%s10858_s10 + $0x3b0] ss:$8 sps:$4 sm:$0xff]  }
 0x1cf   : > { %7977 = vmatpush1.bf16.msra.mxu0 %v9239_v11  ;;  %7650 = vmatprep.subr.bf16.mxu1 %v9244_v12  ;;  %v9323_v11 = vld [vmem:[%s10858_s10 + $0xbb0] ss:$8 sps:$4 sm:$0xff]   ;;  %v9328_v12 = vld [vmem:[%s10858_s10 + $0x3c4] ss:$8 sps:$4 sm:$0xff]  }
 0x1d0   : > { %7978 = vmatprep.subr.bf16.mxu0 %v9247_v13  ;;  %v9331_v13 = vld [vmem:[%s10858_s10 + $0xbc4] ss:$8 sps:$4 sm:$0xff]  }
 0x1d2   : > { %7651 = vmatpush1.bf16.msra.mxu1 %v9242_v14  ;;  %v9326_v14 = vld [vmem:[%s10858_s10 + $0x3c0] ss:$8 sps:$4 sm:$0xff]  }
 0x1d3   : > { %7979 = vmatpush1.bf16.msra.mxu0 %v9245_v15  ;;  %7652 = vmatprep.subr.bf16.mxu1 %v9250_v16  ;;  %v9329_v15 = vld [vmem:[%s10858_s10 + $0xbc0] ss:$8 sps:$4 sm:$0xff]   ;;  %v9334_v16 = vld [vmem:[%s10858_s10 + $0x3d4] ss:$8 sps:$4 sm:$0xff]  }
 0x1d4   : > { %7980 = vmatprep.subr.bf16.mxu0 %v9253_v17  ;;  %v9337_v17 = vld [vmem:[%s10858_s10 + $0xbd4] ss:$8 sps:$4 sm:$0xff]  }
 0x1d6   : > { %7653 = vmatpush1.bf16.msra.mxu1 %v9248_v18  ;;  %v9332_v18 = vld [vmem:[%s10858_s10 + $0x3d0] ss:$8 sps:$4 sm:$0xff]  }
 0x1d7   : > { %7981 = vmatpush1.bf16.msra.mxu0 %v9251_v19  ;;  %7663 = vmatprep.subr.bf16.mxu1 %v9256_v20  ;;  %v9335_v19 = vld [vmem:[%s10858_s10 + $0xbd0] ss:$8 sps:$4 sm:$0xff]   ;;  %v9340_v20 = vld [vmem:[%s10858_s10 + $0x3e4] ss:$8 sps:$4 sm:$0xff]  }
 0x1d8   : > { %7991 = vmatprep.subr.bf16.mxu0 %v9259_v23  ;;  %v9341_v23 = vld [vmem:[%s10858_s10 + $0xbe0] ss:$8 sps:$4 sm:$0xff]  }
 0x1d9   : > { %7655 = vmatmul.mubr.bf16.vlgmr.msra.gmra.mrb[0].mxu1 %v4440_v26  ;;  %v9344_v26 = vld [vmem:[%s10858_s10 + $0x3f0] ss:$8 sps:$4 sm:$0xff]  }
 0x1da   : > { %7983 = vmatmul.mubr.bf16.vlgmr.msra.gmra.mrb[0].mxu0 %v4456_v27  ;;  %7664 = vmatpush1.bf16.msra.mxu1 %v9254_v24  ;;  %v9346_v24 = vld [vmem:[%s10858_s10 + $0x3f4] ss:$8 sps:$4 sm:$0xff]   ;;  %v9347_v27 = vld [vmem:[%s10858_s10 + $0xbf0] ss:$8 sps:$4 sm:$0xff]  }
 0x1db   : > { %7992 = vmatpush1.bf16.msra.mxu0 %v9257_v25  ;;  %7665 = vmatprep.subr.bf16.mxu1 %v9262_v30  ;;  %v9349_v25 = vld [vmem:[%s10858_s10 + $0xbf4] ss:$8 sps:$4 sm:$0xff]  }
 0x1dc   : > { %7993 = vmatprep.subr.bf16.mxu0 %v9265_v31  ;;  %7695 = vmatprep.mubr.bf16.mxu1 %v4443_v32  ;;  %v4426_v30 = vld [vmem:[%s11483_s0 + $0xb0] sm:$0xff]  ;;  %v9355_v31 = vld [vmem:[%s10858_s10 + $0xc04] ss:$8 sps:$4 sm:$0xff]   ;;  %v9350_v32 = vld [vmem:[%s10858_s10 + $0x400] ss:$8 sps:$4 sm:$0xff]  }
 0x1dd   : > { %8023 = vmatprep.mubr.bf16.mxu0 %v4459_v33  ;;  %v9353_v33 = vld [vmem:[%s10858_s10 + $0xc00] ss:$8 sps:$4 sm:$0xff]  }
 0x1de   : > { %7666 = vmatpush1.bf16.msra.mxu1 %v9260_v34  ;;  %v4442_v34 = vpack.c.bf16 %v4410_v29, %v4410_v29  ;;  %v9439_v29 = vld [vmem:[%s10858_s10 + $0xce4] ss:$8 sps:$4 sm:$0xff]  }
 0x1df   : > { %7994 = vmatpush1.bf16.msra.mxu0 %v9263_v35  ;;  %7667 = vmatprep.subr.bf16.mxu1 %v9268_v36  ;;  %v4458_v35 = vpack.c.bf16 %v4426_v30, %v4426_v30  ;;  %v4413_v36 = vld [vmem:[%s11483_s0 + $0x48] sm:$0xff] }
 0x1e0   : > { %7995 = vmatprep.subr.bf16.mxu0 %v9271_v37  ;;  %v4429_v37 = vld [vmem:[%s11483_s0 + $0xc8] sm:$0xff] }
 0x1e1   : > { %v9434_v30 = vld [vmem:[%s10858_s10 + $0x4e0] ss:$8 sps:$4 sm:$0xff]  }
 0x1e2   : > { %7668 = vmatpush1.bf16.msra.mxu1 %v9266_v38  ;;  %v9358_v38 = vld [vmem:[%s10858_s10 + $0x414] ss:$8 sps:$4 sm:$0xff]  }
 0x1e3   : > { %7996 = vmatpush1.bf16.msra.mxu0 %v9269_v39  ;;  %7669 = vmatprep.subr.bf16.mxu1 %v9274_v40  ;;  %v9361_v39 = vld [vmem:[%s10858_s10 + $0xc14] ss:$8 sps:$4 sm:$0xff]   ;;  %v4445_v40 = vpack.c.bf16 %v4413_v36, %v4413_v36  ;;  %v9448_v36 = vld [vmem:[%s10858_s10 + $0x504] ss:$8 sps:$4 sm:$0xff]  }
 0x1e4   : > { %7997 = vmatprep.subr.bf16.mxu0 %v9277_v41  ;;  %v4461_v41 = vpack.c.bf16 %v4429_v37, %v4429_v37  ;;  %v9451_v37 = vld [vmem:[%s10858_s10 + $0xd04] ss:$8 sps:$4 sm:$0xff]  }
 0x1e6   : > { %7670 = vmatpush1.bf16.msra.mxu1 %v9272_v42  ;;  %v9356_v42 = vld [vmem:[%s10858_s10 + $0x410] ss:$8 sps:$4 sm:$0xff]  }
 0x1e7   : > { %7998 = vmatpush1.bf16.msra.mxu0 %v9275_v43  ;;  %7671 = vmatprep.subr.bf16.mxu1 %v9280_v44  ;;  %v9359_v43 = vld [vmem:[%s10858_s10 + $0xc10] ss:$8 sps:$4 sm:$0xff]   ;;  %v9364_v44 = vld [vmem:[%s10858_s10 + $0x424] ss:$8 sps:$4 sm:$0xff]  }
 0x1e8   : > { %7999 = vmatprep.subr.bf16.mxu0 %v9283_v45  ;;  %v9367_v45 = vld [vmem:[%s10858_s10 + $0xc24] ss:$8 sps:$4 sm:$0xff]  }
 0x1ea   : > { %7672 = vmatpush1.bf16.msra.mxu1 %v9278_v46  ;;  %v9362_v46 = vld [vmem:[%s10858_s10 + $0x420] ss:$8 sps:$4 sm:$0xff]  }
 0x1eb   : > { %8000 = vmatpush1.bf16.msra.mxu0 %v9281_v47  ;;  %7673 = vmatprep.subr.bf16.mxu1 %v9286_v48  ;;  %v9365_v47 = vld [vmem:[%s10858_s10 + $0xc20] ss:$8 sps:$4 sm:$0xff]   ;;  %v9370_v48 = vld [vmem:[%s10858_s10 + $0x434] ss:$8 sps:$4 sm:$0xff]  }
 0x1ec   : > { %8001 = vmatprep.subr.bf16.mxu0 %v9289_v49  ;;  %v9373_v49 = vld [vmem:[%s10858_s10 + $0xc34] ss:$8 sps:$4 sm:$0xff]  }
 0x1ee   : > { %7674 = vmatpush1.bf16.msra.mxu1 %v9284_v50  ;;  %v9368_v50 = vld [vmem:[%s10858_s10 + $0x430] ss:$8 sps:$4 sm:$0xff]  }
 0x1ef   : > { %8002 = vmatpush1.bf16.msra.mxu0 %v9287_v51  ;;  %7675 = vmatprep.subr.bf16.mxu1 %v9292_v52  ;;  %v9371_v51 = vld [vmem:[%s10858_s10 + $0xc30] ss:$8 sps:$4 sm:$0xff]   ;;  %v9376_v52 = vld [vmem:[%s10858_s10 + $0x444] ss:$8 sps:$4 sm:$0xff]  }
 0x1f0   : > { %8003 = vmatprep.subr.bf16.mxu0 %v9295_v53  ;;  %v9379_v53 = vld [vmem:[%s10858_s10 + $0xc44] ss:$8 sps:$4 sm:$0xff]  }
 0x1f2   : > { %7676 = vmatpush1.bf16.msra.mxu1 %v9290_v54  ;;  %v9374_v54 = vld [vmem:[%s10858_s10 + $0x440] ss:$8 sps:$4 sm:$0xff]  }
 0x1f3   : > { %8004 = vmatpush1.bf16.msra.mxu0 %v9293_v55  ;;  %7677 = vmatprep.subr.bf16.mxu1 %v9298_v56  ;;  %v9377_v55 = vld [vmem:[%s10858_s10 + $0xc40] ss:$8 sps:$4 sm:$0xff]   ;;  %v9382_v56 = vld [vmem:[%s10858_s10 + $0x454] ss:$8 sps:$4 sm:$0xff]  }
 0x1f4   : > { %8005 = vmatprep.subr.bf16.mxu0 %v9301_v57  ;;  %v9385_v57 = vld [vmem:[%s10858_s10 + $0xc54] ss:$8 sps:$4 sm:$0xff]  }
 0x1f6   : > { %7678 = vmatpush1.bf16.msra.mxu1 %v9296_v58  ;;  %v9380_v58 = vld [vmem:[%s10858_s10 + $0x450] ss:$8 sps:$4 sm:$0xff]  }
 0x1f7   : > { %8006 = vmatpush1.bf16.msra.mxu0 %v9299_v59  ;;  %7679 = vmatprep.subr.bf16.mxu1 %v9304_v60  ;;  %v9383_v59 = vld [vmem:[%s10858_s10 + $0xc50] ss:$8 sps:$4 sm:$0xff]   ;;  %v9388_v60 = vld [vmem:[%s10858_s10 + $0x464] ss:$8 sps:$4 sm:$0xff]  }
 0x1f8   : > { %8007 = vmatprep.subr.bf16.mxu0 %v9307_v61  ;;  %v9391_v61 = vld [vmem:[%s10858_s10 + $0xc64] ss:$8 sps:$4 sm:$0xff]  }
 0x1fa   : > { %7680 = vmatpush1.bf16.msra.mxu1 %v9302_v62  ;;  %v9386_v62 = vld [vmem:[%s10858_s10 + $0x460] ss:$8 sps:$4 sm:$0xff]  }
 0x1fb   : > { %8008 = vmatpush1.bf16.msra.mxu0 %v9305_v63  ;;  %7681 = vmatprep.subr.bf16.mxu1 %v9310_v0  ;;  %v9389_v63 = vld [vmem:[%s10858_s10 + $0xc60] ss:$8 sps:$4 sm:$0xff]   ;;  %v9394_v0 = vld [vmem:[%s10858_s10 + $0x474] ss:$8 sps:$4 sm:$0xff]  }
 0x1fc   : > { %8009 = vmatprep.subr.bf16.mxu0 %v9313_v1  ;;  %v9397_v1 = vld [vmem:[%s10858_s10 + $0xc74] ss:$8 sps:$4 sm:$0xff]  }
 0x1fe   : > { %7682 = vmatpush1.bf16.msra.mxu1 %v9308_v2  ;;  %v9392_v2 = vld [vmem:[%s10858_s10 + $0x470] ss:$8 sps:$4 sm:$0xff]  }
 0x1ff   : > { %8010 = vmatpush1.bf16.msra.mxu0 %v9311_v3  ;;  %7683 = vmatprep.subr.bf16.mxu1 %v9316_v4  ;;  %v9395_v3 = vld [vmem:[%s10858_s10 + $0xc70] ss:$8 sps:$4 sm:$0xff]   ;;  %v9400_v4 = vld [vmem:[%s10858_s10 + $0x484] ss:$8 sps:$4 sm:$0xff]  }
 0x200   : > { %8011 = vmatprep.subr.bf16.mxu0 %v9319_v5  ;;  %v9403_v5 = vld [vmem:[%s10858_s10 + $0xc84] ss:$8 sps:$4 sm:$0xff]  }
 0x202   : > { %7684 = vmatpush1.bf16.msra.mxu1 %v9314_v6  ;;  %v9398_v6 = vld [vmem:[%s10858_s10 + $0x480] ss:$8 sps:$4 sm:$0xff]  }
 0x203   : > { %8012 = vmatpush1.bf16.msra.mxu0 %v9317_v7  ;;  %7685 = vmatprep.subr.bf16.mxu1 %v9322_v8  ;;  %v9401_v7 = vld [vmem:[%s10858_s10 + $0xc80] ss:$8 sps:$4 sm:$0xff]   ;;  %v9406_v8 = vld [vmem:[%s10858_s10 + $0x494] ss:$8 sps:$4 sm:$0xff]  }
 0x204   : > { %8013 = vmatprep.subr.bf16.mxu0 %v9325_v9  ;;  %v9409_v9 = vld [vmem:[%s10858_s10 + $0xc94] ss:$8 sps:$4 sm:$0xff]  }
 0x206   : > { %7686 = vmatpush1.bf16.msra.mxu1 %v9320_v10  ;;  %v9404_v10 = vld [vmem:[%s10858_s10 + $0x490] ss:$8 sps:$4 sm:$0xff]  }
 0x207   : > { %8014 = vmatpush1.bf16.msra.mxu0 %v9323_v11  ;;  %7687 = vmatprep.subr.bf16.mxu1 %v9328_v12  ;;  %v9407_v11 = vld [vmem:[%s10858_s10 + $0xc90] ss:$8 sps:$4 sm:$0xff]   ;;  %v9412_v12 = vld [vmem:[%s10858_s10 + $0x4a4] ss:$8 sps:$4 sm:$0xff]  }
 0x208   : > { %8015 = vmatprep.subr.bf16.mxu0 %v9331_v13  ;;  %v9415_v13 = vld [vmem:[%s10858_s10 + $0xca4] ss:$8 sps:$4 sm:$0xff]  }
 0x20a   : > { %7688 = vmatpush1.bf16.msra.mxu1 %v9326_v14  ;;  %v9410_v14 = vld [vmem:[%s10858_s10 + $0x4a0] ss:$8 sps:$4 sm:$0xff]  }
 0x20b   : > { %8016 = vmatpush1.bf16.msra.mxu0 %v9329_v15  ;;  %7689 = vmatprep.subr.bf16.mxu1 %v9334_v16  ;;  %v9413_v15 = vld [vmem:[%s10858_s10 + $0xca0] ss:$8 sps:$4 sm:$0xff]   ;;  %v9418_v16 = vld [vmem:[%s10858_s10 + $0x4b4] ss:$8 sps:$4 sm:$0xff]  }
 0x20c   : > { %8017 = vmatprep.subr.bf16.mxu0 %v9337_v17  ;;  %v9421_v17 = vld [vmem:[%s10858_s10 + $0xcb4] ss:$8 sps:$4 sm:$0xff]  }
 0x20e   : > { %7690 = vmatpush1.bf16.msra.mxu1 %v9332_v18  ;;  %v9416_v18 = vld [vmem:[%s10858_s10 + $0x4b0] ss:$8 sps:$4 sm:$0xff]  }
 0x20f   : > { %8018 = vmatpush1.bf16.msra.mxu0 %v9335_v19  ;;  %7691 = vmatprep.subr.bf16.mxu1 %v9340_v20  ;;  %v9419_v19 = vld [vmem:[%s10858_s10 + $0xcb0] ss:$8 sps:$4 sm:$0xff]   ;;  %v9424_v20 = vld [vmem:[%s10858_s10 + $0x4c4] ss:$8 sps:$4 sm:$0xff]  }
 0x210   : > { %8019 = vmatprep.subr.bf16.mxu0 %v9343_v21  ;;  %v9427_v21 = vld [vmem:[%s10858_s10 + $0xcc4] ss:$8 sps:$4 sm:$0xff]  }
 0x212   : > { %7692 = vmatpush1.bf16.msra.mxu1 %v9338_v22  ;;  %v9422_v22 = vld [vmem:[%s10858_s10 + $0x4c0] ss:$8 sps:$4 sm:$0xff]  }
 0x213   : > { %8020 = vmatpush1.bf16.msra.mxu0 %v9341_v23  ;;  %7693 = vmatprep.subr.bf16.mxu1 %v9346_v24  ;;  %v9425_v23 = vld [vmem:[%s10858_s10 + $0xcc0] ss:$8 sps:$4 sm:$0xff]   ;;  %v9430_v24 = vld [vmem:[%s10858_s10 + $0x4d4] ss:$8 sps:$4 sm:$0xff]  }
 0x214   : > { %8021 = vmatprep.subr.bf16.mxu0 %v9349_v25  ;;  %v9433_v25 = vld [vmem:[%s10858_s10 + $0xcd4] ss:$8 sps:$4 sm:$0xff]  }
 0x216   : > { %7694 = vmatpush1.bf16.msra.mxu1 %v9344_v26  ;;  %v9428_v26 = vld [vmem:[%s10858_s10 + $0x4d0] ss:$8 sps:$4 sm:$0xff]  }
 0x217   : > { %8022 = vmatpush1.bf16.msra.mxu0 %v9347_v27  ;;  %7704 = vmatprep.subr.bf16.mxu1 %v9352_v28  ;;  %v9431_v27 = vld [vmem:[%s10858_s10 + $0xcd0] ss:$8 sps:$4 sm:$0xff]   ;;  %v9436_v28 = vld [vmem:[%s10858_s10 + $0x4e4] ss:$8 sps:$4 sm:$0xff]  }
 0x218   : > { %8032 = vmatprep.subr.bf16.mxu0 %v9355_v31  ;;  %v9437_v31 = vld [vmem:[%s10858_s10 + $0xce0] ss:$8 sps:$4 sm:$0xff]  }
 0x219   : > { %7696 = vmatmul.mubr.bf16.vlgmr.msra.gmra.mrb[0].mxu1 %v4442_v34  ;;  %v9440_v34 = vld [vmem:[%s10858_s10 + $0x4f0] ss:$8 sps:$4 sm:$0xff]  }
 0x21a   : > { %8024 = vmatmul.mubr.bf16.vlgmr.msra.gmra.mrb[0].mxu0 %v4458_v35  ;;  %7705 = vmatpush1.bf16.msra.mxu1 %v9350_v32  ;;  %v9442_v32 = vld [vmem:[%s10858_s10 + $0x4f4] ss:$8 sps:$4 sm:$0xff]   ;;  %v9443_v35 = vld [vmem:[%s10858_s10 + $0xcf0] ss:$8 sps:$4 sm:$0xff]  }
 0x21b   : > { %8033 = vmatpush1.bf16.msra.mxu0 %v9353_v33  ;;  %7706 = vmatprep.subr.bf16.mxu1 %v9358_v38  ;;  %v9445_v33 = vld [vmem:[%s10858_s10 + $0xcf4] ss:$8 sps:$4 sm:$0xff]   ;;  %v4412_v38 = vld [vmem:[%s11483_s0 + $0x40] sm:$0xff] }
 0x21c   : > { %8034 = vmatprep.subr.bf16.mxu0 %v9361_v39  ;;  %7736 = vmatprep.mubr.bf16.mxu1 %v4445_v40  ;;  %v4428_v39 = vld [vmem:[%s11483_s0 + $0xc0] sm:$0xff]  ;;  %v4415_v40 = vld [vmem:[%s11483_s0 + $0x58] sm:$0xff] }
 0x21d   : > { %8064 = vmatprep.mubr.bf16.mxu0 %v4461_v41  ;;  %v4431_v41 = vld [vmem:[%s11483_s0 + $0xd8] sm:$0xff] }
 0x21e   : > { %7707 = vmatpush1.bf16.msra.mxu1 %v9356_v42  ;;  %v4444_v42 = vpack.c.bf16 %v4412_v38, %v4412_v38  ;;  %v9530_v38 = vld [vmem:[%s10858_s10 + $0x5e0] ss:$8 sps:$4 sm:$0xff]  }
 0x21f   : > { %8035 = vmatpush1.bf16.msra.mxu0 %v9359_v43  ;;  %7708 = vmatprep.subr.bf16.mxu1 %v9364_v44  ;;  %v4460_v43 = vpack.c.bf16 %v4428_v39, %v4428_v39  ;;  %v9446_v44 = vld [vmem:[%s10858_s10 + $0x500] ss:$8 sps:$4 sm:$0xff]  }
 0x220   : > { %8036 = vmatprep.subr.bf16.mxu0 %v9367_v45  ;;  %v9449_v45 = vld [vmem:[%s10858_s10 + $0xd00] ss:$8 sps:$4 sm:$0xff]  }
 0x221   : > { %v9533_v39 = vld [vmem:[%s10858_s10 + $0xde0] ss:$8 sps:$4 sm:$0xff]  }
 0x222   : > { %7709 = vmatpush1.bf16.msra.mxu1 %v9362_v46  ;;  %v9454_v46 = vld [vmem:[%s10858_s10 + $0x514] ss:$8 sps:$4 sm:$0xff]  }
 0x223   : > { %8037 = vmatpush1.bf16.msra.mxu0 %v9365_v47  ;;  %7710 = vmatprep.subr.bf16.mxu1 %v9370_v48  ;;  %v9457_v47 = vld [vmem:[%s10858_s10 + $0xd14] ss:$8 sps:$4 sm:$0xff]   ;;  %v4447_v48 = vpack.c.bf16 %v4415_v40, %v4415_v40 }
 0x224   : > { %8038 = vmatprep.subr.bf16.mxu0 %v9373_v49  ;;  %v4463_v49 = vpack.c.bf16 %v4431_v41, %v4431_v41  ;;  %v9538_v40 = vld [vmem:[%s10858_s10 + $0x5f4] ss:$8 sps:$4 sm:$0xff]  }
 0x225   : > { %v9541_v41 = vld [vmem:[%s10858_s10 + $0xdf4] ss:$8 sps:$4 sm:$0xff]  }
 0x226   : > { %7711 = vmatpush1.bf16.msra.mxu1 %v9368_v50  ;;  %v9452_v50 = vld [vmem:[%s10858_s10 + $0x510] ss:$8 sps:$4 sm:$0xff]  }
 0x227   : > { %8039 = vmatpush1.bf16.msra.mxu0 %v9371_v51  ;;  %7712 = vmatprep.subr.bf16.mxu1 %v9376_v52  ;;  %v9455_v51 = vld [vmem:[%s10858_s10 + $0xd10] ss:$8 sps:$4 sm:$0xff]   ;;  %v9460_v52 = vld [vmem:[%s10858_s10 + $0x524] ss:$8 sps:$4 sm:$0xff]  }
 0x228   : > { %8040 = vmatprep.subr.bf16.mxu0 %v9379_v53  ;;  %v9463_v53 = vld [vmem:[%s10858_s10 + $0xd24] ss:$8 sps:$4 sm:$0xff]  }
 0x22a   : > { %7713 = vmatpush1.bf16.msra.mxu1 %v9374_v54  ;;  %v9458_v54 = vld [vmem:[%s10858_s10 + $0x520] ss:$8 sps:$4 sm:$0xff]  }
 0x22b   : > { %8041 = vmatpush1.bf16.msra.mxu0 %v9377_v55  ;;  %7714 = vmatprep.subr.bf16.mxu1 %v9382_v56  ;;  %v9461_v55 = vld [vmem:[%s10858_s10 + $0xd20] ss:$8 sps:$4 sm:$0xff]   ;;  %v9466_v56 = vld [vmem:[%s10858_s10 + $0x534] ss:$8 sps:$4 sm:$0xff]  }
 0x22c   : > { %8042 = vmatprep.subr.bf16.mxu0 %v9385_v57  ;;  %v9469_v57 = vld [vmem:[%s10858_s10 + $0xd34] ss:$8 sps:$4 sm:$0xff]  }
 0x22e   : > { %7715 = vmatpush1.bf16.msra.mxu1 %v9380_v58  ;;  %v9464_v58 = vld [vmem:[%s10858_s10 + $0x530] ss:$8 sps:$4 sm:$0xff]  }
 0x22f   : > { %8043 = vmatpush1.bf16.msra.mxu0 %v9383_v59  ;;  %7716 = vmatprep.subr.bf16.mxu1 %v9388_v60  ;;  %v9467_v59 = vld [vmem:[%s10858_s10 + $0xd30] ss:$8 sps:$4 sm:$0xff]   ;;  %v9472_v60 = vld [vmem:[%s10858_s10 + $0x544] ss:$8 sps:$4 sm:$0xff]  }
 0x230   : > { %8044 = vmatprep.subr.bf16.mxu0 %v9391_v61  ;;  %v9475_v61 = vld [vmem:[%s10858_s10 + $0xd44] ss:$8 sps:$4 sm:$0xff]  }
 0x232   : > { %7717 = vmatpush1.bf16.msra.mxu1 %v9386_v62  ;;  %v9470_v62 = vld [vmem:[%s10858_s10 + $0x540] ss:$8 sps:$4 sm:$0xff]  }
 0x233   : > { %8045 = vmatpush1.bf16.msra.mxu0 %v9389_v63  ;;  %7718 = vmatprep.subr.bf16.mxu1 %v9394_v0  ;;  %v9473_v63 = vld [vmem:[%s10858_s10 + $0xd40] ss:$8 sps:$4 sm:$0xff]   ;;  %v9478_v0 = vld [vmem:[%s10858_s10 + $0x554] ss:$8 sps:$4 sm:$0xff]  }
 0x234   : > { %8046 = vmatprep.subr.bf16.mxu0 %v9397_v1  ;;  %v9481_v1 = vld [vmem:[%s10858_s10 + $0xd54] ss:$8 sps:$4 sm:$0xff]  }
 0x236   : > { %7719 = vmatpush1.bf16.msra.mxu1 %v9392_v2  ;;  %v9476_v2 = vld [vmem:[%s10858_s10 + $0x550] ss:$8 sps:$4 sm:$0xff]  }
 0x237   : > { %8047 = vmatpush1.bf16.msra.mxu0 %v9395_v3  ;;  %7720 = vmatprep.subr.bf16.mxu1 %v9400_v4  ;;  %v9479_v3 = vld [vmem:[%s10858_s10 + $0xd50] ss:$8 sps:$4 sm:$0xff]   ;;  %v9484_v4 = vld [vmem:[%s10858_s10 + $0x564] ss:$8 sps:$4 sm:$0xff]  }
 0x238   : > { %8048 = vmatprep.subr.bf16.mxu0 %v9403_v5  ;;  %v9487_v5 = vld [vmem:[%s10858_s10 + $0xd64] ss:$8 sps:$4 sm:$0xff]  }
 0x23a   : > { %7721 = vmatpush1.bf16.msra.mxu1 %v9398_v6  ;;  %v9482_v6 = vld [vmem:[%s10858_s10 + $0x560] ss:$8 sps:$4 sm:$0xff]  }
 0x23b   : > { %8049 = vmatpush1.bf16.msra.mxu0 %v9401_v7  ;;  %7722 = vmatprep.subr.bf16.mxu1 %v9406_v8  ;;  %v9485_v7 = vld [vmem:[%s10858_s10 + $0xd60] ss:$8 sps:$4 sm:$0xff]   ;;  %v9490_v8 = vld [vmem:[%s10858_s10 + $0x574] ss:$8 sps:$4 sm:$0xff]  }
 0x23c   : > { %8050 = vmatprep.subr.bf16.mxu0 %v9409_v9  ;;  %v9493_v9 = vld [vmem:[%s10858_s10 + $0xd74] ss:$8 sps:$4 sm:$0xff]  }
 0x23e   : > { %7723 = vmatpush1.bf16.msra.mxu1 %v9404_v10  ;;  %v9488_v10 = vld [vmem:[%s10858_s10 + $0x570] ss:$8 sps:$4 sm:$0xff]  }
 0x23f   : > { %8051 = vmatpush1.bf16.msra.mxu0 %v9407_v11  ;;  %7724 = vmatprep.subr.bf16.mxu1 %v9412_v12  ;;  %v9491_v11 = vld [vmem:[%s10858_s10 + $0xd70] ss:$8 sps:$4 sm:$0xff]   ;;  %v9496_v12 = vld [vmem:[%s10858_s10 + $0x584] ss:$8 sps:$4 sm:$0xff]  }
 0x240   : > { %8052 = vmatprep.subr.bf16.mxu0 %v9415_v13  ;;  %v9499_v13 = vld [vmem:[%s10858_s10 + $0xd84] ss:$8 sps:$4 sm:$0xff]  }
 0x242   : > { %7725 = vmatpush1.bf16.msra.mxu1 %v9410_v14  ;;  %v9494_v14 = vld [vmem:[%s10858_s10 + $0x580] ss:$8 sps:$4 sm:$0xff]  }
 0x243   : > { %8053 = vmatpush1.bf16.msra.mxu0 %v9413_v15  ;;  %7726 = vmatprep.subr.bf16.mxu1 %v9418_v16  ;;  %v9497_v15 = vld [vmem:[%s10858_s10 + $0xd80] ss:$8 sps:$4 sm:$0xff]   ;;  %v9502_v16 = vld [vmem:[%s10858_s10 + $0x594] ss:$8 sps:$4 sm:$0xff]  }
 0x244   : > { %8054 = vmatprep.subr.bf16.mxu0 %v9421_v17  ;;  %v9505_v17 = vld [vmem:[%s10858_s10 + $0xd94] ss:$8 sps:$4 sm:$0xff]  }
 0x246   : > { %7727 = vmatpush1.bf16.msra.mxu1 %v9416_v18  ;;  %v9500_v18 = vld [vmem:[%s10858_s10 + $0x590] ss:$8 sps:$4 sm:$0xff]  }
 0x247   : > { %8055 = vmatpush1.bf16.msra.mxu0 %v9419_v19  ;;  %7728 = vmatprep.subr.bf16.mxu1 %v9424_v20  ;;  %v9503_v19 = vld [vmem:[%s10858_s10 + $0xd90] ss:$8 sps:$4 sm:$0xff]   ;;  %v9508_v20 = vld [vmem:[%s10858_s10 + $0x5a4] ss:$8 sps:$4 sm:$0xff]  }
 0x248   : > { %8056 = vmatprep.subr.bf16.mxu0 %v9427_v21  ;;  %v9511_v21 = vld [vmem:[%s10858_s10 + $0xda4] ss:$8 sps:$4 sm:$0xff]  }
 0x24a   : > { %7729 = vmatpush1.bf16.msra.mxu1 %v9422_v22  ;;  %v9506_v22 = vld [vmem:[%s10858_s10 + $0x5a0] ss:$8 sps:$4 sm:$0xff]  }
 0x24b   : > { %8057 = vmatpush1.bf16.msra.mxu0 %v9425_v23  ;;  %7730 = vmatprep.subr.bf16.mxu1 %v9430_v24  ;;  %v9509_v23 = vld [vmem:[%s10858_s10 + $0xda0] ss:$8 sps:$4 sm:$0xff]   ;;  %v9514_v24 = vld [vmem:[%s10858_s10 + $0x5b4] ss:$8 sps:$4 sm:$0xff]  }
 0x24c   : > { %8058 = vmatprep.subr.bf16.mxu0 %v9433_v25  ;;  %v9517_v25 = vld [vmem:[%s10858_s10 + $0xdb4] ss:$8 sps:$4 sm:$0xff]  }
 0x24e   : > { %7731 = vmatpush1.bf16.msra.mxu1 %v9428_v26  ;;  %v9512_v26 = vld [vmem:[%s10858_s10 + $0x5b0] ss:$8 sps:$4 sm:$0xff]  }
 0x24f   : > { %8059 = vmatpush1.bf16.msra.mxu0 %v9431_v27  ;;  %7732 = vmatprep.subr.bf16.mxu1 %v9436_v28  ;;  %v9515_v27 = vld [vmem:[%s10858_s10 + $0xdb0] ss:$8 sps:$4 sm:$0xff]   ;;  %v9520_v28 = vld [vmem:[%s10858_s10 + $0x5c4] ss:$8 sps:$4 sm:$0xff]  }
 0x250   : > { %8060 = vmatprep.subr.bf16.mxu0 %v9439_v29  ;;  %v9523_v29 = vld [vmem:[%s10858_s10 + $0xdc4] ss:$8 sps:$4 sm:$0xff]  }
 0x252   : > { %7733 = vmatpush1.bf16.msra.mxu1 %v9434_v30  ;;  %v9518_v30 = vld [vmem:[%s10858_s10 + $0x5c0] ss:$8 sps:$4 sm:$0xff]  }
 0x253   : > { %8061 = vmatpush1.bf16.msra.mxu0 %v9437_v31  ;;  %7734 = vmatprep.subr.bf16.mxu1 %v9442_v32  ;;  %v9521_v31 = vld [vmem:[%s10858_s10 + $0xdc0] ss:$8 sps:$4 sm:$0xff]   ;;  %v9526_v32 = vld [vmem:[%s10858_s10 + $0x5d4] ss:$8 sps:$4 sm:$0xff]  }
 0x254   : > { %8062 = vmatprep.subr.bf16.mxu0 %v9445_v33  ;;  %v9529_v33 = vld [vmem:[%s10858_s10 + $0xdd4] ss:$8 sps:$4 sm:$0xff]  }
 0x256   : > { %7735 = vmatpush1.bf16.msra.mxu1 %v9440_v34  ;;  %v9524_v34 = vld [vmem:[%s10858_s10 + $0x5d0] ss:$8 sps:$4 sm:$0xff]  }
 0x257   : > { %8063 = vmatpush1.bf16.msra.mxu0 %v9443_v35  ;;  %7745 = vmatprep.subr.bf16.mxu1 %v9448_v36  ;;  %v9527_v35 = vld [vmem:[%s10858_s10 + $0xdd0] ss:$8 sps:$4 sm:$0xff]   ;;  %v9532_v36 = vld [vmem:[%s10858_s10 + $0x5e4] ss:$8 sps:$4 sm:$0xff]  }
 0x258   : > { %8073 = vmatprep.subr.bf16.mxu0 %v9451_v37  ;;  %v9535_v37 = vld [vmem:[%s10858_s10 + $0xde4] ss:$8 sps:$4 sm:$0xff]  }
 0x259   : > { %7737 = vmatmul.mubr.bf16.vlgmr.msra.gmra.mrb[0].mxu1 %v4444_v42  ;;  %v9536_v42 = vld [vmem:[%s10858_s10 + $0x5f0] ss:$8 sps:$4 sm:$0xff]  }
 0x25a   : > { %8065 = vmatmul.mubr.bf16.vlgmr.msra.gmra.mrb[0].mxu0 %v4460_v43  ;;  %7746 = vmatpush1.bf16.msra.mxu1 %v9446_v44  ;;  %v9539_v43 = vld [vmem:[%s10858_s10 + $0xdf0] ss:$8 sps:$4 sm:$0xff]  }
 0x25b   : > { %8074 = vmatpush1.bf16.msra.mxu0 %v9449_v45  ;;  %7747 = vmatprep.subr.bf16.mxu1 %v9454_v46  ;;  %v4414_v44 = vld [vmem:[%s11483_s0 + $0x50] sm:$0xff]  ;;  %v9544_v46 = vld [vmem:[%s10858_s10 + $0x604] ss:$8 sps:$4 sm:$0xff]  }
 0x25c   : > { %8075 = vmatprep.subr.bf16.mxu0 %v9457_v47  ;;  %7777 = vmatprep.mubr.bf16.mxu1 %v4447_v48  ;;  %v4430_v45 = vld [vmem:[%s11483_s0 + $0xd0] sm:$0xff]  ;;  %v9547_v47 = vld [vmem:[%s10858_s10 + $0xe04] ss:$8 sps:$4 sm:$0xff]   ;;  %v4446_v48 = vpack.c.bf16 %v4414_v44, %v4414_v44 }
 0x25d   : > { %8105 = vmatprep.mubr.bf16.mxu0 %v4463_v49  ;;  %v4462_v49 = vpack.c.bf16 %v4430_v45, %v4430_v45  ;;  %v9628_v44 = vld [vmem:[%s10858_s10 + $0x6e4] ss:$8 sps:$4 sm:$0xff]  }
 0x25e   : > { %7748 = vmatpush1.bf16.msra.mxu1 %v9452_v50  ;;  %v4417_v50 = vld [vmem:[%s11483_s0 + $0x68] sm:$0xff] }
 0x25f   : > { %8076 = vmatpush1.bf16.msra.mxu0 %v9455_v51  ;;  %7749 = vmatprep.subr.bf16.mxu1 %v9460_v52  ;;  %v4433_v51 = vld [vmem:[%s11483_s0 + $0xe8] sm:$0xff] }
 0x260   : > { %8077 = vmatprep.subr.bf16.mxu0 %v9463_v53  ;;  %v9542_v52 = vld [vmem:[%s10858_s10 + $0x600] ss:$8 sps:$4 sm:$0xff]   ;;  %v9631_v45 = vld [vmem:[%s10858_s10 + $0xee4] ss:$8 sps:$4 sm:$0xff]  }
 0x261   : > { %v9545_v53 = vld [vmem:[%s10858_s10 + $0xe00] ss:$8 sps:$4 sm:$0xff]  }
 0x262   : > { %7750 = vmatpush1.bf16.msra.mxu1 %v9458_v54  ;;  %v9550_v54 = vld [vmem:[%s10858_s10 + $0x614] ss:$8 sps:$4 sm:$0xff]  }
 0x263   : > { %8078 = vmatpush1.bf16.msra.mxu0 %v9461_v55  ;;  %7751 = vmatprep.subr.bf16.mxu1 %v9466_v56  ;;  %v9553_v55 = vld [vmem:[%s10858_s10 + $0xe14] ss:$8 sps:$4 sm:$0xff]   ;;  %v4449_v56 = vpack.c.bf16 %v4417_v50, %v4417_v50  ;;  %v9632_v50 = vld [vmem:[%s10858_s10 + $0x6f0] ss:$8 sps:$4 sm:$0xff]  }
 0x264   : > { %8079 = vmatprep.subr.bf16.mxu0 %v9469_v57  ;;  %v4465_v57 = vpack.c.bf16 %v4433_v51, %v4433_v51  ;;  %v9635_v51 = vld [vmem:[%s10858_s10 + $0xef0] ss:$8 sps:$4 sm:$0xff]  }
 0x266   : > { %7752 = vmatpush1.bf16.msra.mxu1 %v9464_v58  ;;  %v9548_v58 = vld [vmem:[%s10858_s10 + $0x610] ss:$8 sps:$4 sm:$0xff]  }
 0x267   : > { %8080 = vmatpush1.bf16.msra.mxu0 %v9467_v59  ;;  %7753 = vmatprep.subr.bf16.mxu1 %v9472_v60  ;;  %v9551_v59 = vld [vmem:[%s10858_s10 + $0xe10] ss:$8 sps:$4 sm:$0xff]   ;;  %v9556_v60 = vld [vmem:[%s10858_s10 + $0x624] ss:$8 sps:$4 sm:$0xff]  }
 0x268   : > { %8081 = vmatprep.subr.bf16.mxu0 %v9475_v61  ;;  %v9559_v61 = vld [vmem:[%s10858_s10 + $0xe24] ss:$8 sps:$4 sm:$0xff]  }
 0x26a   : > { %7754 = vmatpush1.bf16.msra.mxu1 %v9470_v62  ;;  %v9554_v62 = vld [vmem:[%s10858_s10 + $0x620] ss:$8 sps:$4 sm:$0xff]  }
 0x26b   : > { %8082 = vmatpush1.bf16.msra.mxu0 %v9473_v63  ;;  %7755 = vmatprep.subr.bf16.mxu1 %v9478_v0  ;;  %v9557_v63 = vld [vmem:[%s10858_s10 + $0xe20] ss:$8 sps:$4 sm:$0xff]   ;;  %v9562_v0 = vld [vmem:[%s10858_s10 + $0x634] ss:$8 sps:$4 sm:$0xff]  }
 0x26c   : > { %8083 = vmatprep.subr.bf16.mxu0 %v9481_v1  ;;  %v9565_v1 = vld [vmem:[%s10858_s10 + $0xe34] ss:$8 sps:$4 sm:$0xff]  }
 0x26e   : > { %7756 = vmatpush1.bf16.msra.mxu1 %v9476_v2  ;;  %v9560_v2 = vld [vmem:[%s10858_s10 + $0x630] ss:$8 sps:$4 sm:$0xff]  }
 0x26f   : > { %8084 = vmatpush1.bf16.msra.mxu0 %v9479_v3  ;;  %7757 = vmatprep.subr.bf16.mxu1 %v9484_v4  ;;  %v9563_v3 = vld [vmem:[%s10858_s10 + $0xe30] ss:$8 sps:$4 sm:$0xff]   ;;  %v9568_v4 = vld [vmem:[%s10858_s10 + $0x644] ss:$8 sps:$4 sm:$0xff]  }
 0x270   : > { %8085 = vmatprep.subr.bf16.mxu0 %v9487_v5  ;;  %v9571_v5 = vld [vmem:[%s10858_s10 + $0xe44] ss:$8 sps:$4 sm:$0xff]  }
 0x272   : > { %7758 = vmatpush1.bf16.msra.mxu1 %v9482_v6  ;;  %v9566_v6 = vld [vmem:[%s10858_s10 + $0x640] ss:$8 sps:$4 sm:$0xff]  }
 0x273   : > { %8086 = vmatpush1.bf16.msra.mxu0 %v9485_v7  ;;  %7759 = vmatprep.subr.bf16.mxu1 %v9490_v8  ;;  %v9569_v7 = vld [vmem:[%s10858_s10 + $0xe40] ss:$8 sps:$4 sm:$0xff]   ;;  %v9574_v8 = vld [vmem:[%s10858_s10 + $0x654] ss:$8 sps:$4 sm:$0xff]  }
 0x274   : > { %8087 = vmatprep.subr.bf16.mxu0 %v9493_v9  ;;  %v9577_v9 = vld [vmem:[%s10858_s10 + $0xe54] ss:$8 sps:$4 sm:$0xff]  }
 0x276   : > { %7760 = vmatpush1.bf16.msra.mxu1 %v9488_v10  ;;  %v9572_v10 = vld [vmem:[%s10858_s10 + $0x650] ss:$8 sps:$4 sm:$0xff]  }
 0x277   : > { %8088 = vmatpush1.bf16.msra.mxu0 %v9491_v11  ;;  %7761 = vmatprep.subr.bf16.mxu1 %v9496_v12  ;;  %v9575_v11 = vld [vmem:[%s10858_s10 + $0xe50] ss:$8 sps:$4 sm:$0xff]   ;;  %v9580_v12 = vld [vmem:[%s10858_s10 + $0x664] ss:$8 sps:$4 sm:$0xff]  }
 0x278   : > { %8089 = vmatprep.subr.bf16.mxu0 %v9499_v13  ;;  %v9583_v13 = vld [vmem:[%s10858_s10 + $0xe64] ss:$8 sps:$4 sm:$0xff]  }
 0x27a   : > { %7762 = vmatpush1.bf16.msra.mxu1 %v9494_v14  ;;  %v9578_v14 = vld [vmem:[%s10858_s10 + $0x660] ss:$8 sps:$4 sm:$0xff]  }
 0x27b   : > { %8090 = vmatpush1.bf16.msra.mxu0 %v9497_v15  ;;  %7763 = vmatprep.subr.bf16.mxu1 %v9502_v16  ;;  %v9581_v15 = vld [vmem:[%s10858_s10 + $0xe60] ss:$8 sps:$4 sm:$0xff]   ;;  %v9586_v16 = vld [vmem:[%s10858_s10 + $0x674] ss:$8 sps:$4 sm:$0xff]  }
 0x27c   : > { %8091 = vmatprep.subr.bf16.mxu0 %v9505_v17  ;;  %v9589_v17 = vld [vmem:[%s10858_s10 + $0xe74] ss:$8 sps:$4 sm:$0xff]  }
 0x27e   : > { %7764 = vmatpush1.bf16.msra.mxu1 %v9500_v18  ;;  %v9584_v18 = vld [vmem:[%s10858_s10 + $0x670] ss:$8 sps:$4 sm:$0xff]  }
 0x27f   : > { %8092 = vmatpush1.bf16.msra.mxu0 %v9503_v19  ;;  %7765 = vmatprep.subr.bf16.mxu1 %v9508_v20  ;;  %v9587_v19 = vld [vmem:[%s10858_s10 + $0xe70] ss:$8 sps:$4 sm:$0xff]   ;;  %v9592_v20 = vld [vmem:[%s10858_s10 + $0x684] ss:$8 sps:$4 sm:$0xff]  }
 0x280   : > { %8093 = vmatprep.subr.bf16.mxu0 %v9511_v21  ;;  %v9595_v21 = vld [vmem:[%s10858_s10 + $0xe84] ss:$8 sps:$4 sm:$0xff]  }
 0x282   : > { %7766 = vmatpush1.bf16.msra.mxu1 %v9506_v22  ;;  %v9590_v22 = vld [vmem:[%s10858_s10 + $0x680] ss:$8 sps:$4 sm:$0xff]  }
 0x283   : > { %8094 = vmatpush1.bf16.msra.mxu0 %v9509_v23  ;;  %7767 = vmatprep.subr.bf16.mxu1 %v9514_v24  ;;  %v9593_v23 = vld [vmem:[%s10858_s10 + $0xe80] ss:$8 sps:$4 sm:$0xff]   ;;  %v9598_v24 = vld [vmem:[%s10858_s10 + $0x694] ss:$8 sps:$4 sm:$0xff]  }
 0x284   : > { %8095 = vmatprep.subr.bf16.mxu0 %v9517_v25  ;;  %v9601_v25 = vld [vmem:[%s10858_s10 + $0xe94] ss:$8 sps:$4 sm:$0xff]  }
 0x286   : > { %7768 = vmatpush1.bf16.msra.mxu1 %v9512_v26  ;;  %v9596_v26 = vld [vmem:[%s10858_s10 + $0x690] ss:$8 sps:$4 sm:$0xff]  }
 0x287   : > { %8096 = vmatpush1.bf16.msra.mxu0 %v9515_v27  ;;  %7769 = vmatprep.subr.bf16.mxu1 %v9520_v28  ;;  %v9599_v27 = vld [vmem:[%s10858_s10 + $0xe90] ss:$8 sps:$4 sm:$0xff]   ;;  %v9604_v28 = vld [vmem:[%s10858_s10 + $0x6a4] ss:$8 sps:$4 sm:$0xff]  }
 0x288   : > { %8097 = vmatprep.subr.bf16.mxu0 %v9523_v29  ;;  %v9607_v29 = vld [vmem:[%s10858_s10 + $0xea4] ss:$8 sps:$4 sm:$0xff]  }
 0x28a   : > { %7770 = vmatpush1.bf16.msra.mxu1 %v9518_v30  ;;  %v9602_v30 = vld [vmem:[%s10858_s10 + $0x6a0] ss:$8 sps:$4 sm:$0xff]  }
 0x28b   : > { %8098 = vmatpush1.bf16.msra.mxu0 %v9521_v31  ;;  %7771 = vmatprep.subr.bf16.mxu1 %v9526_v32  ;;  %v9605_v31 = vld [vmem:[%s10858_s10 + $0xea0] ss:$8 sps:$4 sm:$0xff]   ;;  %v9610_v32 = vld [vmem:[%s10858_s10 + $0x6b4] ss:$8 sps:$4 sm:$0xff]  }
 0x28c   : > { %8099 = vmatprep.subr.bf16.mxu0 %v9529_v33  ;;  %v9613_v33 = vld [vmem:[%s10858_s10 + $0xeb4] ss:$8 sps:$4 sm:$0xff]  }
 0x28e   : > { %7772 = vmatpush1.bf16.msra.mxu1 %v9524_v34  ;;  %v9608_v34 = vld [vmem:[%s10858_s10 + $0x6b0] ss:$8 sps:$4 sm:$0xff]  }
 0x28f   : > { %8100 = vmatpush1.bf16.msra.mxu0 %v9527_v35  ;;  %7773 = vmatprep.subr.bf16.mxu1 %v9532_v36  ;;  %v9611_v35 = vld [vmem:[%s10858_s10 + $0xeb0] ss:$8 sps:$4 sm:$0xff]   ;;  %v9616_v36 = vld [vmem:[%s10858_s10 + $0x6c4] ss:$8 sps:$4 sm:$0xff]  }
 0x290   : > { %8101 = vmatprep.subr.bf16.mxu0 %v9535_v37  ;;  %v9619_v37 = vld [vmem:[%s10858_s10 + $0xec4] ss:$8 sps:$4 sm:$0xff]  }
 0x292   : > { %7774 = vmatpush1.bf16.msra.mxu1 %v9530_v38  ;;  %v9614_v38 = vld [vmem:[%s10858_s10 + $0x6c0] ss:$8 sps:$4 sm:$0xff]  }
 0x293   : > { %8102 = vmatpush1.bf16.msra.mxu0 %v9533_v39  ;;  %7775 = vmatprep.subr.bf16.mxu1 %v9538_v40  ;;  %v9617_v39 = vld [vmem:[%s10858_s10 + $0xec0] ss:$8 sps:$4 sm:$0xff]   ;;  %v9622_v40 = vld [vmem:[%s10858_s10 + $0x6d4] ss:$8 sps:$4 sm:$0xff]  }
 0x294   : > { %8103 = vmatprep.subr.bf16.mxu0 %v9541_v41  ;;  %v9625_v41 = vld [vmem:[%s10858_s10 + $0xed4] ss:$8 sps:$4 sm:$0xff]  }
 0x296   : > { %7776 = vmatpush1.bf16.msra.mxu1 %v9536_v42  ;;  %v9620_v42 = vld [vmem:[%s10858_s10 + $0x6d0] ss:$8 sps:$4 sm:$0xff]  }
 0x297   : > { %8104 = vmatpush1.bf16.msra.mxu0 %v9539_v43  ;;  %7786 = vmatprep.subr.bf16.mxu1 %v9544_v46  ;;  %v9623_v43 = vld [vmem:[%s10858_s10 + $0xed0] ss:$8 sps:$4 sm:$0xff]   ;;  %v9626_v46 = vld [vmem:[%s10858_s10 + $0x6e0] ss:$8 sps:$4 sm:$0xff]  }
 0x298   : > { %8114 = vmatprep.subr.bf16.mxu0 %v9547_v47  ;;  %v9629_v47 = vld [vmem:[%s10858_s10 + $0xee0] ss:$8 sps:$4 sm:$0xff]  }
 0x299   : > { %7778 = vmatmul.mubr.bf16.vlgmr.msra.gmra.mrb[0].mxu1 %v4446_v48  ;;  %v9634_v48 = vld [vmem:[%s10858_s10 + $0x6f4] ss:$8 sps:$4 sm:$0xff]  }
 0x29a   : > { %8106 = vmatmul.mubr.bf16.vlgmr.msra.gmra.mrb[0].mxu0 %v4462_v49  ;;  %7787 = vmatpush1.bf16.msra.mxu1 %v9542_v52  ;;  %v9637_v49 = vld [vmem:[%s10858_s10 + $0xef4] ss:$8 sps:$4 sm:$0xff]   ;;  %v4416_v52 = vld [vmem:[%s11483_s0 + $0x60] sm:$0xff] }
 0x29b   : > { %8115 = vmatpush1.bf16.msra.mxu0 %v9545_v53  ;;  %7788 = vmatprep.subr.bf16.mxu1 %v9550_v54  ;;  %v4432_v53 = vld [vmem:[%s11483_s0 + $0xe0] sm:$0xff] }
 0x29c   : > { %8116 = vmatprep.subr.bf16.mxu0 %v9553_v55  ;;  %7818 = vmatprep.mubr.bf16.mxu1 %v4449_v56  ;;  %v9640_v54 = vld [vmem:[%s10858_s10 + $0x704] ss:$8 sps:$4 sm:$0xff]   ;;  %v4448_v56 = vpack.c.bf16 %v4416_v52, %v4416_v52 }
 0x29d   : > { %8146 = vmatprep.mubr.bf16.mxu0 %v4465_v57  ;;  %v9643_v55 = vld [vmem:[%s10858_s10 + $0xf04] ss:$8 sps:$4 sm:$0xff]   ;;  %v4464_v57 = vpack.c.bf16 %v4432_v53, %v4432_v53 }
 0x29e   : > { %7789 = vmatpush1.bf16.msra.mxu1 %v9548_v58  ;;  %v4419_v58 = vld [vmem:[%s11483_s0 + $0x78] sm:$0xff]  ;;  %v9724_v52 = vld [vmem:[%s10858_s10 + $0x7e4] ss:$8 sps:$4 sm:$0xff]  }
 0x29f   : > { %8117 = vmatpush1.bf16.msra.mxu0 %v9551_v59  ;;  %7790 = vmatprep.subr.bf16.mxu1 %v9556_v60  ;;  %v4435_v59 = vld [vmem:[%s11483_s0 + $0xf8] sm:$0xff]  ;;  %v9638_v60 = vld [vmem:[%s10858_s10 + $0x700] ss:$8 sps:$4 sm:$0xff]   ;;  %v9727_v53 = vld [vmem:[%s10858_s10 + $0xfe4] ss:$8 sps:$4 sm:$0xff]  }
 0x2a0   : > { %8118 = vmatprep.subr.bf16.mxu0 %v9559_v61  ;;  %v9641_v61 = vld [vmem:[%s10858_s10 + $0xf00] ss:$8 sps:$4 sm:$0xff]  }
 0x2a2   : > { %7791 = vmatpush1.bf16.msra.mxu1 %v9554_v62  ;;  %v9646_v62 = vld [vmem:[%s10858_s10 + $0x714] ss:$8 sps:$4 sm:$0xff]  }
 0x2a3   : > { %8119 = vmatpush1.bf16.msra.mxu0 %v9557_v63  ;;  %7792 = vmatprep.subr.bf16.mxu1 %v9562_v0  ;;  %v9649_v63 = vld [vmem:[%s10858_s10 + $0xf14] ss:$8 sps:$4 sm:$0xff]   ;;  %v4451_v0 = vpack.c.bf16 %v4419_v58, %v4419_v58  ;;  %v9728_v58 = vld [vmem:[%s10858_s10 + $0x7f0] ss:$8 sps:$4 sm:$0xff]  }
 0x2a4   : > { %8120 = vmatprep.subr.bf16.mxu0 %v9565_v1  ;;  %v4467_v1 = vpack.c.bf16 %v4435_v59, %v4435_v59  ;;  %v9731_v59 = vld [vmem:[%s10858_s10 + $0xff0] ss:$8 sps:$4 sm:$0xff]  }
 0x2a6   : > { %7793 = vmatpush1.bf16.msra.mxu1 %v9560_v2  ;;  %v9644_v2 = vld [vmem:[%s10858_s10 + $0x710] ss:$8 sps:$4 sm:$0xff]  }
 0x2a7   : > { %8121 = vmatpush1.bf16.msra.mxu0 %v9563_v3  ;;  %7794 = vmatprep.subr.bf16.mxu1 %v9568_v4  ;;  %v9647_v3 = vld [vmem:[%s10858_s10 + $0xf10] ss:$8 sps:$4 sm:$0xff]   ;;  %v9652_v4 = vld [vmem:[%s10858_s10 + $0x724] ss:$8 sps:$4 sm:$0xff]  }
 0x2a8   : > { %8122 = vmatprep.subr.bf16.mxu0 %v9571_v5  ;;  %v9655_v5 = vld [vmem:[%s10858_s10 + $0xf24] ss:$8 sps:$4 sm:$0xff]  }
 0x2aa   : > { %7795 = vmatpush1.bf16.msra.mxu1 %v9566_v6  ;;  %v9650_v6 = vld [vmem:[%s10858_s10 + $0x720] ss:$8 sps:$4 sm:$0xff]  }
 0x2ab   : > { %8123 = vmatpush1.bf16.msra.mxu0 %v9569_v7  ;;  %7796 = vmatprep.subr.bf16.mxu1 %v9574_v8  ;;  %v9653_v7 = vld [vmem:[%s10858_s10 + $0xf20] ss:$8 sps:$4 sm:$0xff]   ;;  %v9658_v8 = vld [vmem:[%s10858_s10 + $0x734] ss:$8 sps:$4 sm:$0xff]  }
 0x2ac   : > { %8124 = vmatprep.subr.bf16.mxu0 %v9577_v9  ;;  %v9661_v9 = vld [vmem:[%s10858_s10 + $0xf34] ss:$8 sps:$4 sm:$0xff]  }
 0x2ae   : > { %7797 = vmatpush1.bf16.msra.mxu1 %v9572_v10  ;;  %v9656_v10 = vld [vmem:[%s10858_s10 + $0x730] ss:$8 sps:$4 sm:$0xff]  }
 0x2af   : > { %8125 = vmatpush1.bf16.msra.mxu0 %v9575_v11  ;;  %7798 = vmatprep.subr.bf16.mxu1 %v9580_v12  ;;  %v9659_v11 = vld [vmem:[%s10858_s10 + $0xf30] ss:$8 sps:$4 sm:$0xff]   ;;  %v9664_v12 = vld [vmem:[%s10858_s10 + $0x744] ss:$8 sps:$4 sm:$0xff]  }
 0x2b0   : > { %8126 = vmatprep.subr.bf16.mxu0 %v9583_v13  ;;  %v9667_v13 = vld [vmem:[%s10858_s10 + $0xf44] ss:$8 sps:$4 sm:$0xff]  }
 0x2b2   : > { %7799 = vmatpush1.bf16.msra.mxu1 %v9578_v14  ;;  %v9662_v14 = vld [vmem:[%s10858_s10 + $0x740] ss:$8 sps:$4 sm:$0xff]  }
 0x2b3   : > { %8127 = vmatpush1.bf16.msra.mxu0 %v9581_v15  ;;  %7800 = vmatprep.subr.bf16.mxu1 %v9586_v16  ;;  %v9665_v15 = vld [vmem:[%s10858_s10 + $0xf40] ss:$8 sps:$4 sm:$0xff]   ;;  %v9670_v16 = vld [vmem:[%s10858_s10 + $0x754] ss:$8 sps:$4 sm:$0xff]  }
 0x2b4   : > { %8128 = vmatprep.subr.bf16.mxu0 %v9589_v17  ;;  %v9673_v17 = vld [vmem:[%s10858_s10 + $0xf54] ss:$8 sps:$4 sm:$0xff]  }
 0x2b6   : > { %7801 = vmatpush1.bf16.msra.mxu1 %v9584_v18  ;;  %v9668_v18 = vld [vmem:[%s10858_s10 + $0x750] ss:$8 sps:$4 sm:$0xff]  }
 0x2b7   : > { %8129 = vmatpush1.bf16.msra.mxu0 %v9587_v19  ;;  %7802 = vmatprep.subr.bf16.mxu1 %v9592_v20  ;;  %v9671_v19 = vld [vmem:[%s10858_s10 + $0xf50] ss:$8 sps:$4 sm:$0xff]   ;;  %v9676_v20 = vld [vmem:[%s10858_s10 + $0x764] ss:$8 sps:$4 sm:$0xff]  }
 0x2b8   : > { %8130 = vmatprep.subr.bf16.mxu0 %v9595_v21  ;;  %v9679_v21 = vld [vmem:[%s10858_s10 + $0xf64] ss:$8 sps:$4 sm:$0xff]  }
 0x2ba   : > { %7803 = vmatpush1.bf16.msra.mxu1 %v9590_v22  ;;  %v9674_v22 = vld [vmem:[%s10858_s10 + $0x760] ss:$8 sps:$4 sm:$0xff]  }
 0x2bb   : > { %8131 = vmatpush1.bf16.msra.mxu0 %v9593_v23  ;;  %7804 = vmatprep.subr.bf16.mxu1 %v9598_v24  ;;  %v9677_v23 = vld [vmem:[%s10858_s10 + $0xf60] ss:$8 sps:$4 sm:$0xff]   ;;  %v9682_v24 = vld [vmem:[%s10858_s10 + $0x774] ss:$8 sps:$4 sm:$0xff]  }
 0x2bc   : > { %8132 = vmatprep.subr.bf16.mxu0 %v9601_v25  ;;  %v9685_v25 = vld [vmem:[%s10858_s10 + $0xf74] ss:$8 sps:$4 sm:$0xff]  }
 0x2be   : > { %7805 = vmatpush1.bf16.msra.mxu1 %v9596_v26  ;;  %v9680_v26 = vld [vmem:[%s10858_s10 + $0x770] ss:$8 sps:$4 sm:$0xff]  }
 0x2bf   : > { %8133 = vmatpush1.bf16.msra.mxu0 %v9599_v27  ;;  %7806 = vmatprep.subr.bf16.mxu1 %v9604_v28  ;;  %v9683_v27 = vld [vmem:[%s10858_s10 + $0xf70] ss:$8 sps:$4 sm:$0xff]   ;;  %v9688_v28 = vld [vmem:[%s10858_s10 + $0x784] ss:$8 sps:$4 sm:$0xff]  }
 0x2c0   : > { %8134 = vmatprep.subr.bf16.mxu0 %v9607_v29  ;;  %v9691_v29 = vld [vmem:[%s10858_s10 + $0xf84] ss:$8 sps:$4 sm:$0xff]  }
 0x2c2   : > { %7807 = vmatpush1.bf16.msra.mxu1 %v9602_v30  ;;  %v9686_v30 = vld [vmem:[%s10858_s10 + $0x780] ss:$8 sps:$4 sm:$0xff]  }
 0x2c3   : > { %8135 = vmatpush1.bf16.msra.mxu0 %v9605_v31  ;;  %7808 = vmatprep.subr.bf16.mxu1 %v9610_v32  ;;  %v9689_v31 = vld [vmem:[%s10858_s10 + $0xf80] ss:$8 sps:$4 sm:$0xff]   ;;  %v9694_v32 = vld [vmem:[%s10858_s10 + $0x794] ss:$8 sps:$4 sm:$0xff]  }
 0x2c4   : > { %8136 = vmatprep.subr.bf16.mxu0 %v9613_v33  ;;  %v9697_v33 = vld [vmem:[%s10858_s10 + $0xf94] ss:$8 sps:$4 sm:$0xff]  }
 0x2c6   : > { %7809 = vmatpush1.bf16.msra.mxu1 %v9608_v34  ;;  %v9692_v34 = vld [vmem:[%s10858_s10 + $0x790] ss:$8 sps:$4 sm:$0xff]  }
 0x2c7   : > { %8137 = vmatpush1.bf16.msra.mxu0 %v9611_v35  ;;  %7810 = vmatprep.subr.bf16.mxu1 %v9616_v36  ;;  %v9695_v35 = vld [vmem:[%s10858_s10 + $0xf90] ss:$8 sps:$4 sm:$0xff]   ;;  %v9700_v36 = vld [vmem:[%s10858_s10 + $0x7a4] ss:$8 sps:$4 sm:$0xff]  }
 0x2c8   : > { %8138 = vmatprep.subr.bf16.mxu0 %v9619_v37  ;;  %v9703_v37 = vld [vmem:[%s10858_s10 + $0xfa4] ss:$8 sps:$4 sm:$0xff]  }
 0x2ca   : > { %7811 = vmatpush1.bf16.msra.mxu1 %v9614_v38  ;;  %v9698_v38 = vld [vmem:[%s10858_s10 + $0x7a0] ss:$8 sps:$4 sm:$0xff]  }
 0x2cb   : > { %8139 = vmatpush1.bf16.msra.mxu0 %v9617_v39  ;;  %7812 = vmatprep.subr.bf16.mxu1 %v9622_v40  ;;  %v9701_v39 = vld [vmem:[%s10858_s10 + $0xfa0] ss:$8 sps:$4 sm:$0xff]   ;;  %v9706_v40 = vld [vmem:[%s10858_s10 + $0x7b4] ss:$8 sps:$4 sm:$0xff]  }
 0x2cc   : > { %8140 = vmatprep.subr.bf16.mxu0 %v9625_v41  ;;  %v9709_v41 = vld [vmem:[%s10858_s10 + $0xfb4] ss:$8 sps:$4 sm:$0xff]  }
 0x2ce   : > { %7813 = vmatpush1.bf16.msra.mxu1 %v9620_v42  ;;  %v9704_v42 = vld [vmem:[%s10858_s10 + $0x7b0] ss:$8 sps:$4 sm:$0xff]  }
 0x2cf   : > { %8141 = vmatpush1.bf16.msra.mxu0 %v9623_v43  ;;  %7814 = vmatprep.subr.bf16.mxu1 %v9628_v44  ;;  %v9707_v43 = vld [vmem:[%s10858_s10 + $0xfb0] ss:$8 sps:$4 sm:$0xff]   ;;  %v9712_v44 = vld [vmem:[%s10858_s10 + $0x7c4] ss:$8 sps:$4 sm:$0xff]  }
 0x2d0   : > { %8142 = vmatprep.subr.bf16.mxu0 %v9631_v45  ;;  %v9715_v45 = vld [vmem:[%s10858_s10 + $0xfc4] ss:$8 sps:$4 sm:$0xff]  }
 0x2d2   : > { %7815 = vmatpush1.bf16.msra.mxu1 %v9626_v46  ;;  %v9710_v46 = vld [vmem:[%s10858_s10 + $0x7c0] ss:$8 sps:$4 sm:$0xff]  }
 0x2d3   : > { %8143 = vmatpush1.bf16.msra.mxu0 %v9629_v47  ;;  %7816 = vmatprep.subr.bf16.mxu1 %v9634_v48  ;;  %v9713_v47 = vld [vmem:[%s10858_s10 + $0xfc0] ss:$8 sps:$4 sm:$0xff]   ;;  %v9718_v48 = vld [vmem:[%s10858_s10 + $0x7d4] ss:$8 sps:$4 sm:$0xff]  }
 0x2d4   : > { %8144 = vmatprep.subr.bf16.mxu0 %v9637_v49  ;;  %v9721_v49 = vld [vmem:[%s10858_s10 + $0xfd4] ss:$8 sps:$4 sm:$0xff]  }
 0x2d6   : > { %7817 = vmatpush1.bf16.msra.mxu1 %v9632_v50  ;;  %v9716_v50 = vld [vmem:[%s10858_s10 + $0x7d0] ss:$8 sps:$4 sm:$0xff]  }
 0x2d7   : > { %8145 = vmatpush1.bf16.msra.mxu0 %v9635_v51  ;;  %7827 = vmatprep.subr.bf16.mxu1 %v9640_v54  ;;  %v9719_v51 = vld [vmem:[%s10858_s10 + $0xfd0] ss:$8 sps:$4 sm:$0xff]   ;;  %v9722_v54 = vld [vmem:[%s10858_s10 + $0x7e0] ss:$8 sps:$4 sm:$0xff]  }
 0x2d8   : > { %8155 = vmatprep.subr.bf16.mxu0 %v9643_v55  ;;  %v9725_v55 = vld [vmem:[%s10858_s10 + $0xfe0] ss:$8 sps:$4 sm:$0xff]  }
 0x2d9   : > { %7819 = vmatmul.mubr.bf16.vlgmr.msra.gmra.mrb[0].mxu1 %v4448_v56  ;;  %v9730_v56 = vld [vmem:[%s10858_s10 + $0x7f4] ss:$8 sps:$4 sm:$0xff]  }
 0x2da   : > { %8147 = vmatmul.mubr.bf16.vlgmr.msra.gmra.mrb[0].mxu0 %v4464_v57  ;;  %7828 = vmatpush1.bf16.msra.mxu1 %v9638_v60  ;;  %v9733_v57 = vld [vmem:[%s10858_s10 + $0xff4] ss:$8 sps:$4 sm:$0xff]   ;;  %s8365_s10 = sshll.u32 %s8356_s18, 1 }
 0x2db   : > { %8156 = vmatpush1.bf16.msra.mxu0 %v9641_v61  ;;  %7829 = vmatprep.subr.bf16.mxu1 %v9646_v62  ;;  %v4418_v60 = vld [vmem:[%s11483_s0 + $0x70] sm:$0xff]  ;;  %p4389_p8 = scmp.lt.s32.totalorder %s8365_s10, 3 }
 0x2dc   : > { %8157 = vmatprep.subr.bf16.mxu0 %v9649_v63  ;;  %7859 = vmatprep.mubr.bf16.mxu1 %v4451_v0  ;;  %v4434_v61 = vld [vmem:[%s11483_s0 + $0xf0] sm:$0xff]  ;;  %v4450_v62 = vpack.c.bf16 %v4418_v60, %v4418_v60 }
 0x2dd   : > { %8187 = vmatprep.mubr.bf16.mxu0 %v4467_v1  ;;  %v4466_v63 = vpack.c.bf16 %v4434_v61, %v4434_v61  ;;  %s11492_s10 = smov (!%p4389_p8, %s8365_s10), 3 }
 0x2de   : > { %7830 = vmatpush1.bf16.msra.mxu1 %v9644_v2  ;;  %s4391_s13 = scalar_lea.vmem %s11485_s2, %s11492_s10  ;;  %s4396_s14 = scalar_lea.vmem %s11486_s3, %s11492_s10 }
 0x2df   : > { %8158 = vmatpush1.bf16.msra.mxu0 %v9647_v3  ;;  %7831 = vmatprep.subr.bf16.mxu1 %v9652_v4  ;;  %s8368_s15 = sshll.u32 %s11492_s10, 3 }
 0x2e0   : > { %8159 = vmatprep.subr.bf16.mxu0 %v9655_v5  ;;  %s4402_s23 = scalar_lea.vmem %s11487_s4, %s8368_s15 }
 0x2e2   : > { %7832 = vmatpush1.bf16.msra.mxu1 %v9650_v6 }
 0x2e3   : > { %8160 = vmatpush1.bf16.msra.mxu0 %v9653_v7  ;;  %7833 = vmatprep.subr.bf16.mxu1 %v9658_v8 }
 0x2e4   : > { %8161 = vmatprep.subr.bf16.mxu0 %v9661_v9 }
 0x2e6   : > { %7834 = vmatpush1.bf16.msra.mxu1 %v9656_v10 }
 0x2e7   : > { %8162 = vmatpush1.bf16.msra.mxu0 %v9659_v11  ;;  %7835 = vmatprep.subr.bf16.mxu1 %v9664_v12 }
 0x2e8   : > { %8163 = vmatprep.subr.bf16.mxu0 %v9667_v13 }
 0x2ea   : > { %7836 = vmatpush1.bf16.msra.mxu1 %v9662_v14 }
 0x2eb   : > { %8164 = vmatpush1.bf16.msra.mxu0 %v9665_v15  ;;  %7837 = vmatprep.subr.bf16.mxu1 %v9670_v16 }
 0x2ec   : > { %8165 = vmatprep.subr.bf16.mxu0 %v9673_v17 }
 0x2ee   : > { %7838 = vmatpush1.bf16.msra.mxu1 %v9668_v18 }
 0x2ef   : > { %8166 = vmatpush1.bf16.msra.mxu0 %v9671_v19  ;;  %7839 = vmatprep.subr.bf16.mxu1 %v9676_v20 }
 0x2f0   : > { %8167 = vmatprep.subr.bf16.mxu0 %v9679_v21 }
 0x2f2   : > { %7840 = vmatpush1.bf16.msra.mxu1 %v9674_v22 }
 0x2f3   : > { %8168 = vmatpush1.bf16.msra.mxu0 %v9677_v23  ;;  %7841 = vmatprep.subr.bf16.mxu1 %v9682_v24 }
 0x2f4   : > { %8169 = vmatprep.subr.bf16.mxu0 %v9685_v25 }
 0x2f6   : > { %7842 = vmatpush1.bf16.msra.mxu1 %v9680_v26 }
 0x2f7   : > { %8170 = vmatpush1.bf16.msra.mxu0 %v9683_v27  ;;  %7843 = vmatprep.subr.bf16.mxu1 %v9688_v28 }
 0x2f8   : > { %8171 = vmatprep.subr.bf16.mxu0 %v9691_v29 }
 0x2fa   : > { %7844 = vmatpush1.bf16.msra.mxu1 %v9686_v30 }
 0x2fb   : > { %8172 = vmatpush1.bf16.msra.mxu0 %v9689_v31  ;;  %7845 = vmatprep.subr.bf16.mxu1 %v9694_v32 }
 0x2fc   : > { %8173 = vmatprep.subr.bf16.mxu0 %v9697_v33 }
 0x2fe   : > { %7846 = vmatpush1.bf16.msra.mxu1 %v9692_v34 }
 0x2ff   : > { %8174 = vmatpush1.bf16.msra.mxu0 %v9695_v35  ;;  %7847 = vmatprep.subr.bf16.mxu1 %v9700_v36 }
 0x300   : > { %8175 = vmatprep.subr.bf16.mxu0 %v9703_v37 }
 0x302   : > { %7848 = vmatpush1.bf16.msra.mxu1 %v9698_v38 }
 0x303   : > { %8176 = vmatpush1.bf16.msra.mxu0 %v9701_v39  ;;  %7849 = vmatprep.subr.bf16.mxu1 %v9706_v40 }
 0x304   : > { %8177 = vmatprep.subr.bf16.mxu0 %v9709_v41  ;;  %v8237_v41 = vlaneseq }
 0x306   : > { %7850 = vmatpush1.bf16.msra.mxu1 %v9704_v42 }
 0x307   : > { %8178 = vmatpush1.bf16.msra.mxu0 %v9707_v43  ;;  %7851 = vmatprep.subr.bf16.mxu1 %v9712_v44 }
 0x308   : > { %8179 = vmatprep.subr.bf16.mxu0 %v9715_v45  ;;  %v8238_v45 = vshrl.u32 %v8237_v41, 7 }
 0x30a   : > { %7852 = vmatpush1.bf16.msra.mxu1 %v9710_v46  ;;  %v8239_v46 = vsub.s32 0, %v8238_v45 }
 0x30b   : > { %8180 = vmatpush1.bf16.msra.mxu0 %v9713_v47  ;;  %7853 = vmatprep.subr.bf16.mxu1 %v9718_v48  ;;  %v8235_v47 = vld [vmem:[%s4391_s13] sm:$0x3]  ;;  %v8243_v48 = vsub.s32 1, %v8238_v45 }
 0x30c   : > { %8181 = vmatprep.subr.bf16.mxu0 %v9721_v49  ;;  %v8249_v49 = vld [vmem:[%s4396_s14] sm:$0x3] }
 0x30e   : > { %7854 = vmatpush1.bf16.msra.mxu1 %v9716_v50  ;;  %v8240_v50 = vrot.slane %v8235_v47, %v8239_v46 }
 0x30f   : > { %8182 = vmatpush1.bf16.msra.mxu0 %v9719_v51  ;;  %7855 = vmatprep.subr.bf16.mxu1 %v9724_v52  ;;  %v8244_v52 = vrot.slane %v8235_v47, %v8243_v48 }
 0x310   : > { %8183 = vmatprep.subr.bf16.mxu0 %v9727_v53 }
 0x312   : > { %7856 = vmatpush1.bf16.msra.mxu1 %v9722_v54 }
 0x313   : > { %8184 = vmatpush1.bf16.msra.mxu0 %v9725_v55  ;;  %7857 = vmatprep.subr.bf16.mxu1 %v9730_v56  ;;  %v8254_v55 = vrot.slane %v8249_v49, %v8239_v46 }
 0x314   : > { %8185 = vmatprep.subr.bf16.mxu0 %v9733_v57  ;;  %v8258_v57 = vrot.slane %v8249_v49, %v8243_v48 }
 0x316   : > { %7858 = vmatpush1.bf16.msra.mxu1 %v9728_v58 }
 0x317   : > { %8186 = vmatpush1.bf16.msra.mxu0 %v9731_v59 }
 0x319   : > { %7860 = vmatmul.mubr.bf16.vlgmr.msra.gmra.mrb[0].mxu1 %v4450_v62 }
 0x31a   : > { %8188 = vmatmul.mubr.bf16.vlgmr.msra.gmra.mrb[0].mxu0 %v4466_v63 }
 0x3ec   : > { %v7861_v0 = vpop.f32.mrb[0].mxu1 }
 0x3ed   : > { %v8189_v1 = vpop.f32.mrb[0].mxu0  ;;  %v7863_v3 = vpop.f32.mrb[1].mxu1 }
 0x3ee   : > { %v8884_v2 = vadd.f32 %v8189_v1, %v7861_v0  ;;  %v8191_v4 = vpop.f32.mrb[1].mxu0  ;;  %v7865_v6 = vpop.f32.mrb[2].mxu1 }
 0x3ef   : > { %v8885_v5 = vadd.f32 %v8191_v4, %v7863_v3  ;;  %v8193_v7 = vpop.f32.mrb[2].mxu0  ;;  %v7866_v9 = vpop.f32.mrb[3].mxu1 }
 0x3f0   : > { %v8196_v8 = vrot.slane %v8884_v2, 4  ;;  %v8194_v10 = vpop.f32.mrb[3].mxu0 }
 0x3f1   : > { %v8202_v11 = vrot.slane %v8885_v5, 4 }
 0x3f2   : > { %v8197_v12 = vadd.f32 %v8884_v2, %v8196_v8 }
 0x3f3   : > { %v8203_v13 = vadd.f32 %v8885_v5, %v8202_v11 }
 0x3f4   : > { %v8198_v14 = vrot.slane %v8197_v12, 2 }
 0x3f5   : > { %v8204_v15 = vrot.slane %v8203_v13, 2 }
 0x3f6   : > { %v8199_v16 = vadd.f32 %v8198_v14, %v8197_v12 }
 0x3f7   : > { %v8205_v17 = vadd.f32 %v8204_v15, %v8203_v13 }
 0x3f8   : > { %v8200_v18 = vrot.slane %v8199_v16, 1 }
 0x3f9   : > { %v8206_v19 = vrot.slane %v8205_v17, 1 }
 0x3fa   : > { %v8201_v20 = vadd.f32 %v8200_v18, %v8199_v16 }
 0x3fb   : > { %v8207_v21 = vadd.f32 %v8206_v19, %v8205_v17 }
 0x3fc   : > { %v8209_v22 = vmul.f32 0.125, %v8201_v20 }
 0x3fd   : > { %v8210_v23 = vmul.f32 0.125, %v8207_v21 }
 0x3fe   : > { %v8211_v24 = vsub.f32 %v8884_v2, %v8209_v22 }
 0x3ff   : > { %v8212_v25 = vsub.f32 %v8885_v5, %v8210_v23 }
 0x400   : > { %v8213_v26 = vmul.f32 %v8211_v24, %v8211_v24 }
 0x401   : > { %v8214_v27 = vmul.f32 %v8212_v25, %v8212_v25 }
 0x402   : > { %v8215_v28 = vrot.slane %v8213_v26, 4 }
 0x403   : > { %v8221_v29 = vrot.slane %v8214_v27, 4 }
 0x404   : > { %v8216_v30 = vadd.f32 %v8215_v28, %v8213_v26 }
 0x405   : > { %v8222_v31 = vadd.f32 %v8221_v29, %v8214_v27 }
 0x406   : > { %v8217_v32 = vrot.slane %v8216_v30, 2 }
 0x407   : > { %v8223_v33 = vrot.slane %v8222_v31, 2 }
 0x408   : > { %v8218_v34 = vadd.f32 %v8217_v32, %v8216_v30 }
 0x409   : > { %v8224_v35 = vadd.f32 %v8223_v33, %v8222_v31 }
 0x40a   : > { %v8219_v36 = vrot.slane %v8218_v34, 1 }
 0x40b   : > { %v8225_v37 = vrot.slane %v8224_v35, 1 }
 0x40c   : > { %v8220_v38 = vadd.f32 %v8219_v36, %v8218_v34 }
 0x40d   : > { %v8226_v39 = vadd.f32 %v8225_v37, %v8224_v35 }
 0x40e   : > { %v8227_v40 = vmul.f32 0.125, %v8220_v38 }
 0x40f   : > { %v8228_v42 = vmul.f32 0.125, %v8226_v39 }
 0x410   : > { %v8229_v43 = vadd.f32 1e-05, %v8227_v40 }
 0x411   : > { %v8230_v44 = vadd.f32 1e-05, %v8228_v42 }
 0x412   : > { %9734 = vrsqrt.f32 %v8229_v43 }
 0x413   : > { %9736 = vrsqrt.f32 %v8230_v44 }
 0x41c   : > { %v9735_v51 = vpop.eup %9734 }
 0x41d   : > { %v9737_v53 = vpop.eup %9736  ;;  %v8233_v54 = vmul.f32 %v9735_v51, %v8211_v24 }
 0x41e   : > { %v8234_v56 = vmul.f32 %v9737_v53, %v8212_v25 }
 0x41f   : > { %v8247_v58 = vmul.f32 %v8240_v50, %v8233_v54 }
 0x420   : > { %v8248_v59 = vmul.f32 %v8244_v52, %v8234_v56 }
 0x421   : > { %v8261_v60 = vadd.f32 %v8254_v55, %v8247_v58 }
 0x422   : > { %v8262_v61 = vadd.f32 %v8258_v57, %v8248_v59 }
 0x423   : > { %v8263_v62 = vmax.f32 %v8261_v60, 0.0 }
 0x424   : > { %v8264_v63 = vmax.f32 %v8262_v61, 0.0 }
 0x425   : > { %8265 = vst [vmem:[%s4402_s23] sm:$0xff] %v8263_v62 }
 0x426   : > { %8266 = vst [vmem:[%s4402_s23 + $0x8] sm:$0xff] %v8264_v63 }
 0x427 PF: > { %p11_p9 = scmp.ge.s32.totalorder %s9804_s19, 4   ;;  %s11488_s15 = smov %s9756_s16 }
 0x428   : > { %s11489_s16 = smov %s9813_s22  ;;  %s11490_s17 = smov %s9804_s19 }
 0x429   :  { %13 = sbr.rel (!%p11_p9) target bundleno = 2 (0x2), region = 135 }

</bundles_post_ra>
